<compile_context>
chip_gen: v7x
topology: tpu7x:2x2x1
jax: 0.10.0
libtpu: 0.0.40
codegen_flags: <defaults>
</compile_context>

<pallas_src>
import jax
import jax.numpy as jnp
from jax.experimental import pallas as pl
from jax.experimental.pallas import tpu as pltpu


# ---------------------------------------------------------------------------
# Pallas kernels
# ---------------------------------------------------------------------------
def _conv_pool_kernel(x_ref, w_ref, b_ref, o_ref):
    """Fused im2col-matmul + bias + 2x2 max-pool epilogue.

    x_ref: (TM, K)      bf16 patches, rows ordered (window, tap0..tap3)
    w_ref: (K, N)       bf16
    b_ref: (1, N)       f32
    o_ref: (TM//4, N)   bf16 pooled conv output
    """
    acc = jnp.dot(x_ref[...], w_ref[...], preferred_element_type=jnp.float32)
    tm, n = acc.shape
    # 2x2 max-pool: 4 consecutive rows = one window (sublane-group reduce).
    pooled = jnp.max(acc.reshape(tm // 4, 4, n), axis=1)
    # bias is constant per column, so max(a) + b == max(a + b): add after max.
    pooled = pooled + b_ref[...]
    o_ref[...] = pooled.astype(o_ref.dtype)


def _fc_head_kernel(x_ref, w1_ref, b1_ref, w2_ref, b2_ref, o_ref):
    """Fused fc1 -> fc2 head (reference model has no nonlinearity)."""
    h = jnp.dot(x_ref[...], w1_ref[...], preferred_element_type=jnp.float32)
    h = h + b1_ref[...]
    o = jnp.dot(h.astype(jnp.bfloat16), w2_ref[...],
                preferred_element_type=jnp.float32)
    o_ref[...] = o + b2_ref[...]


# ---------------------------------------------------------------------------
# Wrappers
# ---------------------------------------------------------------------------
def _pick_tile(m, target=1024):
    """Largest tile <= target that divides m (multiples of 64), else m."""
    for cand in (1024, 512, 256, 128, 64):
        if cand <= target and m % cand == 0:
            return cand
    return m


def conv5x5_pool2(x, w, b):
    """Conv2d(k=5, pad=2, stride=1) + MaxPool2d(2) on NHWC bf16 input.

    x: (B, H, W, Cin) bf16, w: (Cout, Cin, 5, 5) fp32 (torch layout), b: (Cout,)
    returns (B, H//2, W//2, Cout) bf16
    """
    B, H, W, Cin = x.shape
    Cout = w.shape[0]
    Ho, Wo = H // 2, W // 2
    K = 25 * Cin
    M = B * H * W  # number of conv-output pixels (= pooled pixels * 4 taps)

    # im2col (XLA glue) with rows grouped so 4 consecutive rows = 1 pool window.
    xp = jnp.pad(x, ((0, 0), (2, 2), (2, 2), (0, 0)))
    taps = [xp[:, dy:dy + H, dx:dx + W, :] for dy in range(5) for dx in range(5)]
    p = jnp.stack(taps, axis=3)                       # (B, H, W, 25, Cin)
    p = p.reshape(B, Ho, 2, Wo, 2, K)                 # (B, Ho, py, Wo, px, K)
    p = p.transpose(0, 1, 3, 2, 4, 5)                 # (B, Ho, Wo, py, px, K)
    patches = p.reshape(M, K)                         # bf16

    w_mat = jnp.transpose(w, (2, 3, 1, 0)).reshape(K, Cout).astype(jnp.bfloat16)
    b_row = b.reshape(1, Cout).astype(jnp.float32)

    TM = _pick_tile(M, target=1024)
    out = pl.pallas_call(
        _conv_pool_kernel,
        out_shape=jax.ShapeDtypeStruct((M // 4, Cout), jnp.bfloat16),
        grid=(M // TM,),
        in_specs=[
            pl.BlockSpec((TM, K), lambda i: (i, 0)),
            pl.BlockSpec((K, Cout), lambda i: (0, 0)),
            pl.BlockSpec((1, Cout), lambda i: (0, 0)),
        ],
        out_specs=pl.BlockSpec((TM // 4, Cout), lambda i: (i, 0)),
        compiler_params=pltpu.CompilerParams(
            dimension_semantics=("parallel",)),
    )(patches, w_mat, b_row)
    return out.reshape(B, Ho, Wo, Cout)


def fc_head(x_flat, w1, b1, w2, b2):
    """x_flat:(B,K1) bf16, w1:(K1,H1) bf16, w2:(H1,N) bf16 -> (B,N) fp32."""
    B, K1 = x_flat.shape
    H1 = w1.shape[1]
    N = w2.shape[1]
    TB = _pick_tile(B, target=512)
    return pl.pallas_call(
        _fc_head_kernel,
        out_shape=jax.ShapeDtypeStruct((B, N), jnp.float32),
        grid=(B // TB,),
        in_specs=[
            pl.BlockSpec((TB, K1), lambda i: (i, 0)),
            pl.BlockSpec((K1, H1), lambda i: (0, 0)),
            pl.BlockSpec((1, H1), lambda i: (0, 0)),
            pl.BlockSpec((H1, N), lambda i: (0, 0)),
            pl.BlockSpec((1, N), lambda i: (0, 0)),
        ],
        out_specs=pl.BlockSpec((TB, N), lambda i: (i, 0)),
        compiler_params=pltpu.CompilerParams(
            dimension_semantics=("parallel",)),
    )(x_flat, w1, b1, w2, b2)


def cifar_net_forward(x_nchw, params):
    """Forward pass equivalent to CIFAR_net. x_nchw: (B, 3, 32, 32) float32."""
    x = jnp.transpose(x_nchw, (0, 2, 3, 1)).astype(jnp.bfloat16)   # NHWC bf16
    x = conv5x5_pool2(x, params["c1_w"], params["c1_b"])   # (B, 16, 16, 32)
    x = conv5x5_pool2(x, params["c2_w"], params["c2_b"])   # (B,  8,  8, 32)
    x = conv5x5_pool2(x, params["c3_w"], params["c3_b"])   # (B,  4,  4, 64)

    B, H, W, C = x.shape
    x_flat = x.reshape(B, H * W * C)                        # NHWC flatten, bf16

    # Fold the torch NCHW-flatten permutation into fc1's weight columns so the
    # activation can stay NHWC (no activation transpose).
    w1 = params["fc1_w"].reshape(64, C, H, W).transpose(2, 3, 1, 0)
    w1 = w1.reshape(H * W * C, 64).astype(jnp.bfloat16)      # (1024, 64)
    b1 = params["fc1_b"].reshape(1, 64).astype(jnp.float32)
    w2 = params["fc2_w"].T.astype(jnp.bfloat16)              # (64, 10)
    b2 = params["fc2_b"].reshape(1, 10).astype(jnp.float32)

    return fc_head(x_flat, w1, b1, w2, b2)                   # (B, 10) fp32


# ---------------------------------------------------------------------------
# Deterministic synthetic parameters (shapes from CIFAR_net.__init__)
# ---------------------------------------------------------------------------
def init_params(key):
    ks = jax.random.split(key, 10)
    scale = 0.05

    def w(k, shape):
        return scale * jax.random.normal(k, shape, dtype=jnp.float32)

    return {
        "c1_w": w(ks[0], (32, 3, 5, 5)),
        "c1_b": w(ks[1], (32,)),
        "c2_w": w(ks[2], (32, 32, 5, 5)),
        "c2_b": w(ks[3], (32,)),
        "c3_w": w(ks[4], (64, 32, 5, 5)),
        "c3_b": w(ks[5], (64,)),
        "fc1_w": w(ks[6], (64, 64 * 4 * 4)),
        "fc1_b": w(ks[7], (64,)),
        "fc2_w": w(ks[8], (10, 64)),
        "fc2_b": w(ks[9], (10,)),
    }


if __name__ == "__main__":
    key = jax.random.PRNGKey(0)
    k_params, k_x = jax.random.split(key)
    params = init_params(k_params)

    # Spatial size must be 32x32 so Flatten yields 64*4*4 = 1024 features.
    x = jax.random.normal(k_x, (2, 3, 32, 32), dtype=jnp.float32)

    out = jax.jit(cifar_net_forward)(x, params)
    out = jax.block_until_ready(out)
    assert out.shape == (2, 10), out.shape
    assert out.dtype == jnp.float32

    print("KERNEL_OK")
</pallas_src>

<mosaic_0001>
module attributes {stable_mosaic.version = 11 : i64} {
  func.func @_conv_pool_kernel(%arg0: i32, %arg1: memref<1024x75xbf16, #tpu.memory_space<vmem>>, %arg2: memref<75x32xbf16, #tpu.memory_space<vmem>>, %arg3: memref<1x32xf32, #tpu.memory_space<vmem>>, %arg4: memref<256x32xbf16, #tpu.memory_space<vmem>>) attributes {dimension_semantics = [#tpu.dimension_semantics<parallel>], iteration_bounds = array<i64: 2>, scalar_prefetch = 0 : i64, scratch_operands = 0 : i64, tpu.core_type = #tpu.core_type<tc>, window_params = [{transform_indices = @transform_0, window_bounds = array<i64: 1024, 75>}, {pipeline_mode = #tpu.pipeline_mode<synchronous>, transform_indices = @transform_1, window_bounds = array<i64: 75, 32>}, {pipeline_mode = #tpu.pipeline_mode<synchronous>, transform_indices = @transform_2, window_bounds = array<i64: 1, 32>}, {transform_indices = @transform_3, window_bounds = array<i64: 256, 32>}]} {
    %c0 = arith.constant 0 : index
    %c0_0 = arith.constant 0 : index
    %0 = vector.load %arg1[%c0, %c0_0] : memref<1024x75xbf16, #tpu.memory_space<vmem>>, vector<1024x75xbf16>
    %c0_1 = arith.constant 0 : index
    %c0_2 = arith.constant 0 : index
    %1 = vector.load %arg2[%c0_1, %c0_2] : memref<75x32xbf16, #tpu.memory_space<vmem>>, vector<75x32xbf16>
    %cst = arith.constant dense<0.000000e+00> : vector<1024x32xf32>
    %2 = tpu.matmul %0, %1, %cst {dimension_numbers = #tpu.dot_dimension_numbers<[1], [0], [0], [1], [0, 0, 1, 1], [], []>} : vector<1024x75xbf16>, vector<75x32xbf16>, vector<1024x32xf32> -> vector<1024x32xf32>
    %3 = vector.shape_cast %2 : vector<1024x32xf32> to vector<256x4x32xf32>
    %cst_3 = arith.constant dense<0xFF800000> : vector<256x32xf32>
    %4 = vector.multi_reduction <maximumf>, %3, %cst_3 [1] : vector<256x4x32xf32> to vector<256x32xf32>
    %c0_4 = arith.constant 0 : index
    %c0_5 = arith.constant 0 : index
    %5 = vector.load %arg3[%c0_4, %c0_5] : memref<1x32xf32, #tpu.memory_space<vmem>>, vector<1x32xf32>
    %6 = vector.broadcast %5 : vector<1x32xf32> to vector<256x32xf32>
    %7 = arith.addf %4, %6 : vector<256x32xf32>
    %8 = arith.truncf %7 : vector<256x32xf32> to vector<256x32xbf16>
    %c0_6 = arith.constant 0 : index
    %c0_7 = arith.constant 0 : index
    %9 = vector.load %arg4[%c0_6, %c0_7] : memref<256x32xbf16, #tpu.memory_space<vmem>>, vector<256x32xbf16>
    tpu.vector_store %arg4[%c0_6, %c0_7], %8 {strides = array<i32>} : memref<256x32xbf16, #tpu.memory_space<vmem>>, vector<256x32xbf16>,
    return
  }
  func.func @transform_0(%arg0: i32) -> (i32, i32) {
    %c0_i32 = arith.constant 0 : i32
    %c0_i32_0 = arith.constant 0 : i32
    return %arg0, %c0_i32 : i32, i32
  }
  func.func @transform_1(%arg0: i32) -> (i32, i32) {
    %c0_i32 = arith.constant 0 : i32
    %c0_i32_0 = arith.constant 0 : i32
    %c0_i32_1 = arith.constant 0 : i32
    return %c0_i32, %c0_i32_0 : i32, i32
  }
  func.func @transform_2(%arg0: i32) -> (i32, i32) {
    %c0_i32 = arith.constant 0 : i32
    %c0_i32_0 = arith.constant 0 : i32
    %c0_i32_1 = arith.constant 0 : i32
    return %c0_i32, %c0_i32_0 : i32, i32
  }
  func.func @transform_3(%arg0: i32) -> (i32, i32) {
    %c0_i32 = arith.constant 0 : i32
    %c0_i32_0 = arith.constant 0 : i32
    return %arg0, %c0_i32 : i32, i32
  }
}

module attributes {stable_mosaic.version = 11 : i64} {
  func.func @_conv_pool_kernel(%arg0: i32, %arg1: memref<512x800xbf16, #tpu.memory_space<vmem>>, %arg2: memref<800x32xbf16, #tpu.memory_space<vmem>>, %arg3: memref<1x32xf32, #tpu.memory_space<vmem>>, %arg4: memref<128x32xbf16, #tpu.memory_space<vmem>>) attributes {dimension_semantics = [#tpu.dimension_semantics<parallel>], iteration_bounds = array<i64: 1>, scalar_prefetch = 0 : i64, scratch_operands = 0 : i64, tpu.core_type = #tpu.core_type<tc>, window_params = [{transform_indices = @transform_0, window_bounds = array<i64: 512, 800>}, {pipeline_mode = #tpu.pipeline_mode<synchronous>, transform_indices = @transform_1, window_bounds = array<i64: 800, 32>}, {pipeline_mode = #tpu.pipeline_mode<synchronous>, transform_indices = @transform_2, window_bounds = array<i64: 1, 32>}, {transform_indices = @transform_3, window_bounds = array<i64: 128, 32>}]} {
    %c0 = arith.constant 0 : index
    %c0_0 = arith.constant 0 : index
    %0 = vector.load %arg1[%c0, %c0_0] : memref<512x800xbf16, #tpu.memory_space<vmem>>, vector<512x800xbf16>
    %c0_1 = arith.constant 0 : index
    %c0_2 = arith.constant 0 : index
    %1 = vector.load %arg2[%c0_1, %c0_2] : memref<800x32xbf16, #tpu.memory_space<vmem>>, vector<800x32xbf16>
    %cst = arith.constant dense<0.000000e+00> : vector<512x32xf32>
    %2 = tpu.matmul %0, %1, %cst {dimension_numbers = #tpu.dot_dimension_numbers<[1], [0], [0], [1], [0, 0, 1, 1], [], []>} : vector<512x800xbf16>, vector<800x32xbf16>, vector<512x32xf32> -> vector<512x32xf32>
    %3 = vector.shape_cast %2 : vector<512x32xf32> to vector<128x4x32xf32>
    %cst_3 = arith.constant dense<0xFF800000> : vector<128x32xf32>
    %4 = vector.multi_reduction <maximumf>, %3, %cst_3 [1] : vector<128x4x32xf32> to vector<128x32xf32>
    %c0_4 = arith.constant 0 : index
    %c0_5 = arith.constant 0 : index
    %5 = vector.load %arg3[%c0_4, %c0_5] : memref<1x32xf32, #tpu.memory_space<vmem>>, vector<1x32xf32>
    %6 = vector.broadcast %5 : vector<1x32xf32> to vector<128x32xf32>
    %7 = arith.addf %4, %6 : vector<128x32xf32>
    %8 = arith.truncf %7 : vector<128x32xf32> to vector<128x32xbf16>
    %c0_6 = arith.constant 0 : index
    %c0_7 = arith.constant 0 : index
    %9 = vector.load %arg4[%c0_6, %c0_7] : memref<128x32xbf16, #tpu.memory_space<vmem>>, vector<128x32xbf16>
    tpu.vector_store %arg4[%c0_6, %c0_7], %8 {strides = array<i32>} : memref<128x32xbf16, #tpu.memory_space<vmem>>, vector<128x32xbf16>,
    return
  }
  func.func @transform_0(%arg0: i32) -> (i32, i32) {
    %c0_i32 = arith.constant 0 : i32
    %c0_i32_0 = arith.constant 0 : i32
    return %arg0, %c0_i32 : i32, i32
  }
  func.func @transform_1(%arg0: i32) -> (i32, i32) {
    %c0_i32 = arith.constant 0 : i32
    %c0_i32_0 = arith.constant 0 : i32
    %c0_i32_1 = arith.constant 0 : i32
    return %c0_i32, %c0_i32_0 : i32, i32
  }
  func.func @transform_2(%arg0: i32) -> (i32, i32) {
    %c0_i32 = arith.constant 0 : i32
    %c0_i32_0 = arith.constant 0 : i32
    %c0_i32_1 = arith.constant 0 : i32
    return %c0_i32, %c0_i32_0 : i32, i32
  }
  func.func @transform_3(%arg0: i32) -> (i32, i32) {
    %c0_i32 = arith.constant 0 : i32
    %c0_i32_0 = arith.constant 0 : i32
    return %arg0, %c0_i32 : i32, i32
  }
}

module attributes {stable_mosaic.version = 11 : i64} {
  func.func @_conv_pool_kernel(%arg0: i32, %arg1: memref<128x800xbf16, #tpu.memory_space<vmem>>, %arg2: memref<800x64xbf16, #tpu.memory_space<vmem>>, %arg3: memref<1x64xf32, #tpu.memory_space<vmem>>, %arg4: memref<32x64xbf16, #tpu.memory_space<vmem>>) attributes {dimension_semantics = [#tpu.dimension_semantics<parallel>], iteration_bounds = array<i64: 1>, scalar_prefetch = 0 : i64, scratch_operands = 0 : i64, tpu.core_type = #tpu.core_type<tc>, window_params = [{transform_indices = @transform_0, window_bounds = array<i64: 128, 800>}, {pipeline_mode = #tpu.pipeline_mode<synchronous>, transform_indices = @transform_1, window_bounds = array<i64: 800, 64>}, {pipeline_mode = #tpu.pipeline_mode<synchronous>, transform_indices = @transform_2, window_bounds = array<i64: 1, 64>}, {transform_indices = @transform_3, window_bounds = array<i64: 32, 64>}]} {
    %c0 = arith.constant 0 : index
    %c0_0 = arith.constant 0 : index
    %0 = vector.load %arg1[%c0, %c0_0] : memref<128x800xbf16, #tpu.memory_space<vmem>>, vector<128x800xbf16>
    %c0_1 = arith.constant 0 : index
    %c0_2 = arith.constant 0 : index
    %1 = vector.load %arg2[%c0_1, %c0_2] : memref<800x64xbf16, #tpu.memory_space<vmem>>, vector<800x64xbf16>
    %cst = arith.constant dense<0.000000e+00> : vector<128x64xf32>
    %2 = tpu.matmul %0, %1, %cst {dimension_numbers = #tpu.dot_dimension_numbers<[1], [0], [0], [1], [0, 0, 1, 1], [], []>} : vector<128x800xbf16>, vector<800x64xbf16>, vector<128x64xf32> -> vector<128x64xf32>
    %3 = vector.shape_cast %2 : vector<128x64xf32> to vector<32x4x64xf32>
    %cst_3 = arith.constant dense<0xFF800000> : vector<32x64xf32>
    %4 = vector.multi_reduction <maximumf>, %3, %cst_3 [1] : vector<32x4x64xf32> to vector<32x64xf32>
    %c0_4 = arith.constant 0 : index
    %c0_5 = arith.constant 0 : index
    %5 = vector.load %arg3[%c0_4, %c0_5] : memref<1x64xf32, #tpu.memory_space<vmem>>, vector<1x64xf32>
    %6 = vector.broadcast %5 : vector<1x64xf32> to vector<32x64xf32>
    %7 = arith.addf %4, %6 : vector<32x64xf32>
    %8 = arith.truncf %7 : vector<32x64xf32> to vector<32x64xbf16>
    %c0_6 = arith.constant 0 : index
    %c0_7 = arith.constant 0 : index
    %9 = vector.load %arg4[%c0_6, %c0_7] : memref<32x64xbf16, #tpu.memory_space<vmem>>, vector<32x64xbf16>
    tpu.vector_store %arg4[%c0_6, %c0_7], %8 {strides = array<i32>} : memref<32x64xbf16, #tpu.memory_space<vmem>>, vector<32x64xbf16>,
    return
  }
  func.func @transform_0(%arg0: i32) -> (i32, i32) {
    %c0_i32 = arith.constant 0 : i32
    %c0_i32_0 = arith.constant 0 : i32
    return %arg0, %c0_i32 : i32, i32
  }
  func.func @transform_1(%arg0: i32) -> (i32, i32) {
    %c0_i32 = arith.constant 0 : i32
    %c0_i32_0 = arith.constant 0 : i32
    %c0_i32_1 = arith.constant 0 : i32
    return %c0_i32, %c0_i32_0 : i32, i32
  }
  func.func @transform_2(%arg0: i32) -> (i32, i32) {
    %c0_i32 = arith.constant 0 : i32
    %c0_i32_0 = arith.constant 0 : i32
    %c0_i32_1 = arith.constant 0 : i32
    return %c0_i32, %c0_i32_0 : i32, i32
  }
  func.func @transform_3(%arg0: i32) -> (i32, i32) {
    %c0_i32 = arith.constant 0 : i32
    %c0_i32_0 = arith.constant 0 : i32
    return %arg0, %c0_i32 : i32, i32
  }
}

module attributes {stable_mosaic.version = 11 : i64} {
  func.func @_fc_head_kernel(%arg0: i32, %arg1: memref<2x1024xbf16, #tpu.memory_space<vmem>>, %arg2: memref<1024x64xbf16, #tpu.memory_space<vmem>>, %arg3: memref<1x64xf32, #tpu.memory_space<vmem>>, %arg4: memref<64x10xbf16, #tpu.memory_space<vmem>>, %arg5: memref<1x10xf32, #tpu.memory_space<vmem>>, %arg6: memref<2x10xf32, #tpu.memory_space<vmem>>) attributes {dimension_semantics = [#tpu.dimension_semantics<parallel>], iteration_bounds = array<i64: 1>, scalar_prefetch = 0 : i64, scratch_operands = 0 : i64, tpu.core_type = #tpu.core_type<tc>, window_params = [{transform_indices = @transform_0, window_bounds = array<i64: 2, 1024>}, {pipeline_mode = #tpu.pipeline_mode<synchronous>, transform_indices = @transform_1, window_bounds = array<i64: 1024, 64>}, {pipeline_mode = #tpu.pipeline_mode<synchronous>, transform_indices = @transform_2, window_bounds = array<i64: 1, 64>}, {pipeline_mode = #tpu.pipeline_mode<synchronous>, transform_indices = @transform_3, window_bounds = array<i64: 64, 10>}, {pipeline_mode = #tpu.pipeline_mode<synchronous>, transform_indices = @transform_4, window_bounds = array<i64: 1, 10>}, {transform_indices = @transform_5, window_bounds = array<i64: 2, 10>}]} {
    %c0 = arith.constant 0 : index
    %c0_0 = arith.constant 0 : index
    %0 = vector.load %arg1[%c0, %c0_0] : memref<2x1024xbf16, #tpu.memory_space<vmem>>, vector<2x1024xbf16>
    %c0_1 = arith.constant 0 : index
    %c0_2 = arith.constant 0 : index
    %1 = vector.load %arg2[%c0_1, %c0_2] : memref<1024x64xbf16, #tpu.memory_space<vmem>>, vector<1024x64xbf16>
    %cst = arith.constant dense<0.000000e+00> : vector<2x64xf32>
    %2 = tpu.matmul %0, %1, %cst {dimension_numbers = #tpu.dot_dimension_numbers<[1], [0], [0], [1], [0, 0, 1, 1], [], []>} : vector<2x1024xbf16>, vector<1024x64xbf16>, vector<2x64xf32> -> vector<2x64xf32>
    %c0_3 = arith.constant 0 : index
    %c0_4 = arith.constant 0 : index
    %3 = vector.load %arg3[%c0_3, %c0_4] : memref<1x64xf32, #tpu.memory_space<vmem>>, vector<1x64xf32>
    %4 = vector.broadcast %3 : vector<1x64xf32> to vector<2x64xf32>
    %5 = arith.addf %2, %4 : vector<2x64xf32>
    %6 = arith.truncf %5 : vector<2x64xf32> to vector<2x64xbf16>
    %c0_5 = arith.constant 0 : index
    %c0_6 = arith.constant 0 : index
    %7 = vector.load %arg4[%c0_5, %c0_6] : memref<64x10xbf16, #tpu.memory_space<vmem>>, vector<64x10xbf16>
    %cst_7 = arith.constant dense<0.000000e+00> : vector<2x10xf32>
    %8 = tpu.matmul %6, %7, %cst_7 {dimension_numbers = #tpu.dot_dimension_numbers<[1], [0], [0], [1], [0, 0, 1, 1], [], []>} : vector<2x64xbf16>, vector<64x10xbf16>, vector<2x10xf32> -> vector<2x10xf32>
    %c0_8 = arith.constant 0 : index
    %c0_9 = arith.constant 0 : index
    %9 = vector.load %arg5[%c0_8, %c0_9] : memref<1x10xf32, #tpu.memory_space<vmem>>, vector<1x10xf32>
    %10 = vector.broadcast %9 : vector<1x10xf32> to vector<2x10xf32>
    %11 = arith.addf %8, %10 : vector<2x10xf32>
    %c0_10 = arith.constant 0 : index
    %c0_11 = arith.constant 0 : index
    %12 = vector.load %arg6[%c0_10, %c0_11] : memref<2x10xf32, #tpu.memory_space<vmem>>, vector<2x10xf32>
    tpu.vector_store %arg6[%c0_10, %c0_11], %11 {strides = array<i32>} : memref<2x10xf32, #tpu.memory_space<vmem>>, vector<2x10xf32>,
    return
  }
  func.func @transform_0(%arg0: i32) -> (i32, i32) {
    %c0_i32 = arith.constant 0 : i32
    %c0_i32_0 = arith.constant 0 : i32
    return %arg0, %c0_i32 : i32, i32
  }
  func.func @transform_1(%arg0: i32) -> (i32, i32) {
    %c0_i32 = arith.constant 0 : i32
    %c0_i32_0 = arith.constant 0 : i32
    %c0_i32_1 = arith.constant 0 : i32
    return %c0_i32, %c0_i32_0 : i32, i32
  }
  func.func @transform_2(%arg0: i32) -> (i32, i32) {
    %c0_i32 = arith.constant 0 : i32
    %c0_i32_0 = arith.constant 0 : i32
    %c0_i32_1 = arith.constant 0 : i32
    return %c0_i32, %c0_i32_0 : i32, i32
  }
  func.func @transform_3(%arg0: i32) -> (i32, i32) {
    %c0_i32 = arith.constant 0 : i32
    %c0_i32_0 = arith.constant 0 : i32
    %c0_i32_1 = arith.constant 0 : i32
    return %c0_i32, %c0_i32_0 : i32, i32
  }
  func.func @transform_4(%arg0: i32) -> (i32, i32) {
    %c0_i32 = arith.constant 0 : i32
    %c0_i32_0 = arith.constant 0 : i32
    %c0_i32_1 = arith.constant 0 : i32
    return %c0_i32, %c0_i32_0 : i32, i32
  }
  func.func @transform_5(%arg0: i32) -> (i32, i32) {
    %c0_i32 = arith.constant 0 : i32
    %c0_i32_0 = arith.constant 0 : i32
    return %arg0, %c0_i32 : i32, i32
  }
}

</mosaic_0001>

<bundles_post_ra>
// kernel: cifar_net_forward.4
= control target key start
LH: loop header
LB: loop body
LE: loop exit
PB: predicated region body
PF: predicated region fallthrough
CT: control target
= control target key end

     0   :  { %s6721_s12 = smov 0   ;;  %s9083_s0 = inlined_call_operand.vmem [shape: bf16[2048,75], index: 0, kind: input, shape index: {}]   ;;  %s9084_s1 = inlined_call_operand.vmem [shape: bf16[75,32], index: 1, kind: input, shape index: {}]   ;;  %s9085_s2 = inlined_call_operand.vmem [shape: f32[1,32], index: 2, kind: input, shape index: {}]   ;;  %s9086_s3 = inlined_call_operand.vmem [shape: bf16[512,32], index: 3, kind: output, shape index: {}]  }
   0x1 LB: > { %s5734_s13 = sadd.s32 4294967295, %s6698_s12   ;;  %p5738_p0 = scmp.ge.s32.totalorder %s6698_s12, 1  ;;  %s6698_s12 = sphi %s6721_s12, %s13_s12  }
   0x2   : > { %p138_p1 = scmp.lt.s32.totalorder %s6698_s12, 3 }
   0x4   : > { %p139_p2 = pnand %p5738_p0, %p138_p1 }
   0x5   : > { %v6617_v0 = vld [vmem:[%s9084_s1] sm:$0xff] (!%p139_p2)   ;;  %v6618_v1 = vld [vmem:[%s9084_s1 + $0x8] sm:$0xff] (!%p139_p2)   ;;  %vm855_vm0 = vcmask (!%p139_p2), 1044480   ;;  %v6619_v2 = vld [vmem:[%s9084_s1 + $0x10] sm:$0xff] (!%p139_p2)   ;;  %s5739_s20 = sshll.u32 (!%p139_p2), %s5734_s13, 7  ;;  %vm856_vm1 = vcmask (!%p139_p2), 1045504  }
   0x6   : > { %142 = sbr.rel (%p139_p2) target bundleno = 1037 (0x40d), region = 32  ;;  %6460 = vmatprep.subr.bf16.mxu0 (!%p139_p2), %v6617_v0  ;;  %6598 = vmatprep.subr.bf16.mxu1 (!%p139_p2), %v6617_v0  ;;  %v6700_v3 = vmov (!%p139_p2), 65535   ;;  %p163_p3 = scmp.lt.s32.totalorder (!%p139_p2), %s5739_s20, 255  ;;  %v6620_v5 = vld [vmem:[%s9084_s1 + $0x18] sm:$0xff] (!%p139_p2)   ;;  %v6621_v6 = vld [vmem:[%s9084_s1 + $0x20] sm:$0x3f] (!%p139_p2)  }
   0x7   : > { %6461 = vmatpush3.bf16.msra.mxu0 (!%p139_p2), %v6617_v0  ;;  %6603 = vmatpush3.bf16.msra.mxu1 (!%p139_p2), %v6617_v0  ;;  %v857_v4 = vsel (!%p139_p2), %vm855_vm0, 4294967295, %v6700_v3  ;;  %vm662_vm2 = vcmask (!%p139_p2), 613376   ;;  %vm1791_vm3 = vcmask (!%p139_p2), 257024   ;;  %vm5128_vm4 = vcmask (!%p139_p2), 1041409   ;;  %s6998_s4 = sshll.u32 (!%p139_p2), %s5734_s13, 5 }
   0x8   : > { %6462 = vmatprep.subr.bf16.mxu0 (!%p139_p2), %v6618_v1  ;;  %6599 = vmatprep.subr.bf16.mxu1 (!%p139_p2), %v6618_v1  ;;  %v858_v7 = vsel (!%p139_p2), %vm856_vm1, %v857_v4, 0  ;;  %vm5131_vm5 = vcmask (!%p139_p2), 1042434   ;;  %vm5134_vm6 = vcmask (!%p139_p2), 1043459   ;;  %vm5137_vm7 = vcmask (!%p139_p2), 1044484   ;;  %p169_p4 = scmp.lt.s32.totalorder (!%p139_p2), %s6998_s4, 63 }
   0x9   : > { %v860_v8 = vand.u32 (!%p139_p2), %v6621_v6, %v858_v7  ;;  %vm5140_vm8 = vcmask (!%p139_p2), 1045509   ;;  %vm5143_vm9 = vcmask (!%p139_p2), 1046534   ;;  %vm5146_vm10 = vcmask (!%p139_p2), 1047559  }
   0xb   : > { %6463 = vmatpush3.bf16.msra.mxu0 (!%p139_p2), %v6618_v1  ;;  %6604 = vmatpush3.bf16.msra.mxu1 (!%p139_p2), %v6618_v1 }
   0xc   : > { %6464 = vmatprep.subr.bf16.mxu0 (!%p139_p2), %v6619_v2  ;;  %6600 = vmatprep.subr.bf16.mxu1 (!%p139_p2), %v6619_v2 }
   0xd   : > { %s9148_s20 = smov (!%p163_p3, %s5739_s20), 255  ;;  %s9150_s4 = smov (!%p169_p4, %s6998_s4), 63 }
   0xe   : > { %s5740_s25 = sshll.u32 %s9148_s20, 2  ;;  %s5742_s5 = sshll.u32 %s9150_s4, 2 }
   0xf   : > { %6465 = vmatpush3.bf16.msra.mxu0 %v6619_v2  ;;  %6605 = vmatpush3.bf16.msra.mxu1 %v6619_v2  ;;  %s6749_s28 = scalar_lea.vmem %s9083_s0, %s5740_s25  ;;  %s7047_s8 = scalar_lea.vmem %s9086_s3, %s5742_s5 }
  0x10   : > { %6466 = vmatprep.subr.bf16.mxu0 %v6620_v5  ;;  %6601 = vmatprep.subr.bf16.mxu1 %v6620_v5  ;;  %v6622_v9 = vld [vmem:[%s6749_s28] sm:$0xff]   ;;  %v6624_v11 = vld [vmem:[%s6749_s28 + $0x8] sm:$0xff]   ;;  %v6626_v13 = vld [vmem:[%s6749_s28 + $0x10] sm:$0xff]  }
  0x11   : > { %v6623_v10 = vld [vmem:[%s6749_s28 + $0x100] sm:$0xff]   ;;  %6470 = vmatprep.mubr.msk.bf16.mxu0 %vm662_vm2, %v6622_v9  ;;  %v6625_v12 = vld [vmem:[%s6749_s28 + $0x108] sm:$0xff]   ;;  %v6627_v14 = vld [vmem:[%s6749_s28 + $0x110] sm:$0xff]  }
  0x12   : > { %6534 = vmatprep.mubr.msk.bf16.mxu1 %vm662_vm2, %v6623_v10  ;;  %v6628_v15 = vld [vmem:[%s6749_s28 + $0x18] sm:$0xff]   ;;  %v6630_v17 = vld [vmem:[%s6749_s28 + $0x20] sm:$0xff]   ;;  %v6632_v19 = vld [vmem:[%s6749_s28 + $0x28] sm:$0xff]  }
  0x13   : > { %6467 = vmatpush3.bf16.msra.mxu0 %v6620_v5  ;;  %6606 = vmatpush3.bf16.msra.mxu1 %v6620_v5  ;;  %v6629_v16 = vld [vmem:[%s6749_s28 + $0x118] sm:$0xff]   ;;  %v6631_v18 = vld [vmem:[%s6749_s28 + $0x120] sm:$0xff]   ;;  %v6633_v20 = vld [vmem:[%s6749_s28 + $0x128] sm:$0xff]  }
  0x14   : > { %6468 = vmatprep.subr.bf16.mxu0 %v860_v8  ;;  %6602 = vmatprep.subr.bf16.mxu1 %v860_v8  ;;  %v6634_v21 = vld [vmem:[%s6749_s28 + $0x30] sm:$0xff]   ;;  %v6636_v23 = vld [vmem:[%s6749_s28 + $0x38] sm:$0xff]   ;;  %v6638_v25 = vld [vmem:[%s6749_s28 + $0x40] sm:$0xff]  }
  0x15   : > { %v6635_v22 = vld [vmem:[%s6749_s28 + $0x130] sm:$0xff]   ;;  %v6637_v24 = vld [vmem:[%s6749_s28 + $0x138] sm:$0xff]   ;;  %v6639_v26 = vld [vmem:[%s6749_s28 + $0x140] sm:$0xff]  }
  0x16   : > { %v6640_v27 = vld [vmem:[%s6749_s28 + $0x48] sm:$0xff]   ;;  %v6642_v29 = vld [vmem:[%s6749_s28 + $0x50] sm:$0xff]   ;;  %v6644_v31 = vld [vmem:[%s6749_s28 + $0x58] sm:$0xff]  }
  0x17   : > { %6469 = vmatpush3.bf16.msra.mxu0 %v860_v8  ;;  %6607 = vmatpush3.bf16.msra.mxu1 %v860_v8  ;;  %v6641_v28 = vld [vmem:[%s6749_s28 + $0x148] sm:$0xff]   ;;  %v6643_v30 = vld [vmem:[%s6749_s28 + $0x150] sm:$0xff]   ;;  %v6645_v32 = vld [vmem:[%s6749_s28 + $0x158] sm:$0xff]  }
  0x18   : > { %v6646_v33 = vld [vmem:[%s6749_s28 + $0x60] sm:$0xff]   ;;  %v6648_v35 = vld [vmem:[%s6749_s28 + $0x68] sm:$0xff]   ;;  %v6650_v37 = vld [vmem:[%s6749_s28 + $0x70] sm:$0xff]  }
  0x19   : > { %v6647_v34 = vld [vmem:[%s6749_s28 + $0x160] sm:$0xff]   ;;  %v6649_v36 = vld [vmem:[%s6749_s28 + $0x168] sm:$0xff]   ;;  %v6651_v38 = vld [vmem:[%s6749_s28 + $0x170] sm:$0xff]  }
  0x1a   : > { %6471 = vmatmul.mubr.msk.bf16.vlgmr.msra.gmra.mrb[0].mxu0 %vm662_vm2, %v6624_v11  ;;  %6535 = vmatmul.mubr.msk.bf16.vlgmr.msra.gmra.mrb[0].mxu1 %vm662_vm2, %v6625_v12  ;;  %v6652_v39 = vld [vmem:[%s6749_s28 + $0x78] sm:$0xff]   ;;  %v6654_v41 = vld [vmem:[%s6749_s28 + $0x80] sm:$0xff]   ;;  %v6656_v43 = vld [vmem:[%s6749_s28 + $0x88] sm:$0xff]  }
  0x1b   : > { %6474 = vmatprep.mubr.msk.bf16.mxu0 %vm662_vm2, %v6626_v13  ;;  %6538 = vmatprep.mubr.msk.bf16.mxu1 %vm662_vm2, %v6627_v14  ;;  %v6653_v40 = vld [vmem:[%s6749_s28 + $0x178] sm:$0xff]   ;;  %v6655_v42 = vld [vmem:[%s6749_s28 + $0x180] sm:$0xff]   ;;  %v6657_v44 = vld [vmem:[%s6749_s28 + $0x188] sm:$0xff]  }
  0x1c   : > { %v6658_v45 = vld [vmem:[%s6749_s28 + $0x90] sm:$0xff]   ;;  %v6660_v47 = vld [vmem:[%s6749_s28 + $0x98] sm:$0xff]   ;;  %v6662_v49 = vld [vmem:[%s6749_s28 + $0xa0] sm:$0xff]  }
  0x1d   : > { %v6659_v46 = vld [vmem:[%s6749_s28 + $0x190] sm:$0xff]   ;;  %v6661_v48 = vld [vmem:[%s6749_s28 + $0x198] sm:$0xff]   ;;  %v6663_v50 = vld [vmem:[%s6749_s28 + $0x1a0] sm:$0xff]  }
  0x1e   : > { %v6664_v51 = vld [vmem:[%s6749_s28 + $0xa8] sm:$0xff]   ;;  %v6666_v53 = vld [vmem:[%s6749_s28 + $0xb0] sm:$0xff]   ;;  %v6668_v55 = vld [vmem:[%s6749_s28 + $0xb8] sm:$0xff]  }
  0x1f   : > { %v6665_v52 = vld [vmem:[%s6749_s28 + $0x1a8] sm:$0xff]   ;;  %v6667_v54 = vld [vmem:[%s6749_s28 + $0x1b0] sm:$0xff]   ;;  %v6669_v56 = vld [vmem:[%s6749_s28 + $0x1b8] sm:$0xff]  }
  0x20   : > { %v6670_v57 = vld [vmem:[%s6749_s28 + $0xc0] sm:$0xff]   ;;  %v6672_v59 = vld [vmem:[%s6749_s28 + $0xc8] sm:$0xff]   ;;  %v6674_v61 = vld [vmem:[%s6749_s28 + $0xd0] sm:$0xff]  }
  0x21   : > { %v6671_v58 = vld [vmem:[%s6749_s28 + $0x1c0] sm:$0xff]   ;;  %v6673_v60 = vld [vmem:[%s6749_s28 + $0x1c8] sm:$0xff]   ;;  %v6675_v62 = vld [vmem:[%s6749_s28 + $0x1d0] sm:$0xff]  }
  0x22   : > { %6475 = vmatmul.mubr.msk.bf16.gmra.mrb[4].mxu0 %vm662_vm2, %v6628_v15  ;;  %6539 = vmatmul.mubr.msk.bf16.gmra.mrb[4].mxu1 %vm662_vm2, %v6629_v16  ;;  %v6676_v63 = vld [vmem:[%s6749_s28 + $0xd8] sm:$0xff]   ;;  %v6678_v1 = vld [vmem:[%s6749_s28 + $0xe0] sm:$0xff]   ;;  %v6680_v3 = vld [vmem:[%s6749_s28 + $0xe8] sm:$0xff]  }
  0x23   : > { %6478 = vmatprep.mubr.msk.bf16.mxu0 %vm662_vm2, %v6630_v17  ;;  %6542 = vmatprep.mubr.msk.bf16.mxu1 %vm662_vm2, %v6631_v18  ;;  %v6677_v0 = vld [vmem:[%s6749_s28 + $0x1d8] sm:$0xff]   ;;  %v6679_v2 = vld [vmem:[%s6749_s28 + $0x1e0] sm:$0xff]   ;;  %v6681_v4 = vld [vmem:[%s6749_s28 + $0x1e8] sm:$0xff]  }
  0x24   : > { %v6682_v5 = vld [vmem:[%s6749_s28 + $0xf0] sm:$0xff]   ;;  %v6684_v7 = vld [vmem:[%s6749_s28 + $0xf8] sm:$0xff]  }
  0x25   : > { %v6683_v6 = vld [vmem:[%s6749_s28 + $0x1f0] sm:$0xff]   ;;  %v6685_v8 = vld [vmem:[%s6749_s28 + $0x1f8] sm:$0xff]  }
  0x2a   : > { %6479 = vmatmul.mubr.msk.bf16.gmra.mrb[8].mxu0 %vm662_vm2, %v6632_v19  ;;  %6543 = vmatmul.mubr.msk.bf16.gmra.mrb[8].mxu1 %vm662_vm2, %v6633_v20 }
  0x2b   : > { %6482 = vmatprep.mubr.msk.bf16.mxu0 %vm662_vm2, %v6634_v21  ;;  %6546 = vmatprep.mubr.msk.bf16.mxu1 %vm662_vm2, %v6635_v22 }
  0x32   : > { %6483 = vmatmul.mubr.msk.bf16.gmra.mrb[12].mxu0 %vm662_vm2, %v6636_v23  ;;  %6547 = vmatmul.mubr.msk.bf16.gmra.mrb[12].mxu1 %vm662_vm2, %v6637_v24 }
  0x33   : > { %6486 = vmatprep.mubr.msk.bf16.mxu0 %vm662_vm2, %v6638_v25  ;;  %6550 = vmatprep.mubr.msk.bf16.mxu1 %vm662_vm2, %v6639_v26 }
  0x3a   : > { %6487 = vmatmul.mubr.msk.bf16.gmra.mrb[16].mxu0 %vm662_vm2, %v6640_v27  ;;  %6551 = vmatmul.mubr.msk.bf16.gmra.mrb[16].mxu1 %vm662_vm2, %v6641_v28 }
  0x3b   : > { %6490 = vmatprep.mubr.msk.bf16.mxu0 %vm662_vm2, %v6642_v29  ;;  %6554 = vmatprep.mubr.msk.bf16.mxu1 %vm662_vm2, %v6643_v30 }
  0x42   : > { %6491 = vmatmul.mubr.msk.bf16.gmra.mrb[20].mxu0 %vm662_vm2, %v6644_v31  ;;  %6555 = vmatmul.mubr.msk.bf16.gmra.mrb[20].mxu1 %vm662_vm2, %v6645_v32 }
  0x43   : > { %6494 = vmatprep.mubr.msk.bf16.mxu0 %vm662_vm2, %v6646_v33  ;;  %6558 = vmatprep.mubr.msk.bf16.mxu1 %vm662_vm2, %v6647_v34 }
  0x4a   : > { %6495 = vmatmul.mubr.msk.bf16.gmra.mrb[24].mxu0 %vm662_vm2, %v6648_v35  ;;  %6559 = vmatmul.mubr.msk.bf16.gmra.mrb[24].mxu1 %vm662_vm2, %v6649_v36 }
  0x4b   : > { %6498 = vmatprep.mubr.msk.bf16.mxu0 %vm662_vm2, %v6650_v37  ;;  %6562 = vmatprep.mubr.msk.bf16.mxu1 %vm662_vm2, %v6651_v38 }
  0x52   : > { %6499 = vmatmul.mubr.msk.bf16.gmra.mrb[28].mxu0 %vm662_vm2, %v6652_v39  ;;  %6563 = vmatmul.mubr.msk.bf16.gmra.mrb[28].mxu1 %vm662_vm2, %v6653_v40 }
  0x53   : > { %6502 = vmatprep.mubr.msk.bf16.mxu0 %vm662_vm2, %v6654_v41  ;;  %6566 = vmatprep.mubr.msk.bf16.mxu1 %vm662_vm2, %v6655_v42 }
  0x5a   : > { %6503 = vmatmul.mubr.msk.bf16.gmra.mrb[32].mxu0 %vm662_vm2, %v6656_v43  ;;  %6567 = vmatmul.mubr.msk.bf16.gmra.mrb[32].mxu1 %vm662_vm2, %v6657_v44 }
  0x5b   : > { %6506 = vmatprep.mubr.msk.bf16.mxu0 %vm662_vm2, %v6658_v45  ;;  %6570 = vmatprep.mubr.msk.bf16.mxu1 %vm662_vm2, %v6659_v46 }
  0x62   : > { %6507 = vmatmul.mubr.msk.bf16.gmra.mrb[36].mxu0 %vm662_vm2, %v6660_v47  ;;  %6571 = vmatmul.mubr.msk.bf16.gmra.mrb[36].mxu1 %vm662_vm2, %v6661_v48 }
  0x63   : > { %6510 = vmatprep.mubr.msk.bf16.mxu0 %vm662_vm2, %v6662_v49  ;;  %6574 = vmatprep.mubr.msk.bf16.mxu1 %vm662_vm2, %v6663_v50 }
  0x6a   : > { %6511 = vmatmul.mubr.msk.bf16.gmra.mrb[40].mxu0 %vm662_vm2, %v6664_v51  ;;  %6575 = vmatmul.mubr.msk.bf16.gmra.mrb[40].mxu1 %vm662_vm2, %v6665_v52 }
  0x6b   : > { %6514 = vmatprep.mubr.msk.bf16.mxu0 %vm662_vm2, %v6666_v53  ;;  %6578 = vmatprep.mubr.msk.bf16.mxu1 %vm662_vm2, %v6667_v54 }
  0x72   : > { %6515 = vmatmul.mubr.msk.bf16.gmra.mrb[44].mxu0 %vm662_vm2, %v6668_v55  ;;  %6579 = vmatmul.mubr.msk.bf16.gmra.mrb[44].mxu1 %vm662_vm2, %v6669_v56 }
  0x73   : > { %6518 = vmatprep.mubr.msk.bf16.mxu0 %vm662_vm2, %v6670_v57  ;;  %6582 = vmatprep.mubr.msk.bf16.mxu1 %vm662_vm2, %v6671_v58 }
  0x7a   : > { %6519 = vmatmul.mubr.msk.bf16.gmra.mrb[48].mxu0 %vm662_vm2, %v6672_v59  ;;  %6583 = vmatmul.mubr.msk.bf16.gmra.mrb[48].mxu1 %vm662_vm2, %v6673_v60  ;;  %v6906_v59 = vld [vmem:[%s9085_s2] ss:$0 sm:$0xff] }
  0x7b   : > { %6522 = vmatprep.mubr.msk.bf16.mxu0 %vm662_vm2, %v6674_v61  ;;  %6586 = vmatprep.mubr.msk.bf16.mxu1 %vm662_vm2, %v6675_v62 }
  0x82   : > { %6523 = vmatmul.mubr.msk.bf16.gmra.mrb[52].mxu0 %vm662_vm2, %v6676_v63  ;;  %6587 = vmatmul.mubr.msk.bf16.gmra.mrb[52].mxu1 %vm662_vm2, %v6677_v0 }
  0x83   : > { %6526 = vmatprep.mubr.msk.bf16.mxu0 %vm662_vm2, %v6678_v1  ;;  %6590 = vmatprep.mubr.msk.bf16.mxu1 %vm662_vm2, %v6679_v2 }
  0x8a   : > { %6527 = vmatmul.mubr.msk.bf16.gmra.mrb[56].mxu0 %vm662_vm2, %v6680_v3  ;;  %6591 = vmatmul.mubr.msk.bf16.gmra.mrb[56].mxu1 %vm662_vm2, %v6681_v4 }
  0x8b   : > { %6530 = vmatprep.mubr.msk.bf16.mxu0 %vm662_vm2, %v6682_v5  ;;  %6594 = vmatprep.mubr.msk.bf16.mxu1 %vm662_vm2, %v6683_v6 }
  0x92   : > { %6531 = vmatmul.mubr.msk.bf16.gmra.mrb[60].mxu0 %vm662_vm2, %v6684_v7  ;;  %6595 = vmatmul.mubr.msk.bf16.gmra.mrb[60].mxu1 %vm662_vm2, %v6685_v8 }
  0xed   : > { %v6472_v9 = vpop.f32.mrb[0].mxu0  ;;  %v6536_v10 = vpop.f32.mrb[0].mxu1 }
  0xee   : > { %v1537_v11 = vcombine.high %v6472_v9, %v6472_v9  ;;  %v1820_v12 = vsel %vm1791_vm3, %v6472_v9, -inf  ;;  %v1601_v13 = vcombine.high %v6536_v10, %v6536_v10  ;;  %v2716_v14 = vsel %vm1791_vm3, %v6536_v10, -inf  ;;  %v896_v15 = vpop.f32.mrb[1].mxu0  ;;  %v1152_v16 = vpop.f32.mrb[1].mxu1 }
  0xef   : > { %v1821_v17 = vrot.slane %v1820_v12, 4  ;;  %v2717_v18 = vrot.slane %v2716_v14, 4  ;;  %v1535_v19 = vcombine.high %v896_v15, %v896_v15  ;;  %v1792_v20 = vsel %vm1791_vm3, %v896_v15, -inf  ;;  %v6882_v21 = vpop.f32.mrb[2].mxu0  ;;  %v6884_v22 = vpop.f32.mrb[2].mxu1 }
  0xf0   : > { %v1827_v23 = vsel %vm1791_vm3, %v1537_v11, -inf  ;;  %v2723_v24 = vsel %vm1791_vm3, %v1601_v13, -inf  ;;  %v1793_v25 = vrot.slane %v1792_v20, 4  ;;  %v1599_v26 = vcombine.high %v1152_v16, %v1152_v16  ;;  %v6888_v27 = vpop.f32.mrb[3].mxu0  ;;  %v6890_v28 = vpop.f32.mrb[3].mxu1 }
  0xf1   : > { %v1822_v29 = vmax.f32 %v1820_v12, %v1821_v17  ;;  %v1828_v30 = vrot.slane %v1827_v23, 4  ;;  %v2718_v31 = vmax.f32 %v2716_v14, %v2717_v18  ;;  %v2724_v32 = vrot.slane %v2723_v24, 4 }
  0xf2   : > { %v1794_v33 = vmax.f32 %v1792_v20, %v1793_v25  ;;  %v1799_v34 = vsel %vm1791_vm3, %v1535_v19, -inf  ;;  %v2688_v35 = vsel %vm1791_vm3, %v1152_v16, -inf  ;;  %v2695_v36 = vsel %vm1791_vm3, %v1599_v26, -inf }
  0xf3   : > { %v1823_v37 = vrot.slane %v1822_v29, 2  ;;  %v1829_v38 = vmax.f32 %v1827_v23, %v1828_v30  ;;  %v2719_v39 = vrot.slane %v2718_v31, 2  ;;  %v2725_v40 = vmax.f32 %v2723_v24, %v2724_v32 }
  0xf4   : > { %v1795_v41 = vrot.slane %v1794_v33, 2  ;;  %v1800_v42 = vrot.slane %v1799_v34, 4  ;;  %v2689_v43 = vrot.slane %v2688_v35, 4  ;;  %v2696_v44 = vrot.slane %v2695_v36, 4 }
  0xf5   : > { %v1824_v45 = vmax.f32 %v1822_v29, %v1823_v37  ;;  %v1830_v46 = vrot.slane %v1829_v38, 2  ;;  %v2720_v47 = vmax.f32 %v2718_v31, %v2719_v39  ;;  %v2726_v48 = vrot.slane %v2725_v40, 2  ;;  %v6895_v49 = vpop.f32.mrb[4].mxu0  ;;  %v6897_v50 = vpop.f32.mrb[4].mxu1 }
  0xf6   : > { %v1796_v51 = vmax.f32 %v1794_v33, %v1795_v41  ;;  %v1801_v52 = vmax.f32 %v1799_v34, %v1800_v42  ;;  %v2690_v53 = vmax.f32 %v2688_v35, %v2689_v43  ;;  %v2697_v54 = vmax.f32 %v2695_v36, %v2696_v44  ;;  %v6899_v55 = vpop.f32.mrb[5].mxu0  ;;  %v6901_v56 = vpop.f32.mrb[5].mxu1 }
  0xf7   : > { %v1825_v57 = vrot.slane %v1824_v45, 1  ;;  %v1831_v58 = vmax.f32 %v1829_v38, %v1830_v46  ;;  %v2721_v60 = vrot.slane %v2720_v47, 1  ;;  %v2727_v61 = vmax.f32 %v2725_v40, %v2726_v48  ;;  %v6908_v62 = vpop.f32.mrb[6].mxu0  ;;  %v6910_v63 = vpop.f32.mrb[6].mxu1 }
  0xf8   : > { %v1797_v0 = vrot.slane %v1796_v51, 1  ;;  %v1802_v1 = vrot.slane %v1801_v52, 2  ;;  %v2691_v2 = vrot.slane %v2690_v53, 2  ;;  %v2698_v3 = vrot.slane %v2697_v54, 2  ;;  %v6912_v4 = vpop.f32.mrb[7].mxu0  ;;  %v6914_v5 = vpop.f32.mrb[7].mxu1 }
  0xf9   : > { %v1826_v6 = vmax.f32 %v1824_v45, %v1825_v57  ;;  %v1832_v7 = vrot.slane %v1831_v58, 1  ;;  %v2722_v8 = vmax.f32 %v2720_v47, %v2721_v60  ;;  %v2728_v9 = vrot.slane %v2727_v61, 1 }
  0xfa   : > { %v1798_v10 = vmax.f32 %v1796_v51, %v1797_v0  ;;  %v1803_v11 = vmax.f32 %v1801_v52, %v1802_v1  ;;  %v2692_v12 = vmax.f32 %v2690_v53, %v2691_v2  ;;  %v2699_v13 = vmax.f32 %v2697_v54, %v2698_v3 }
  0xfb   : > { %v1833_v14 = vmax.f32 %v1831_v58, %v1832_v7  ;;  %v3595_v15 = vadd.f32 %v6906_v59, %v1826_v6  ;;  %v2729_v16 = vmax.f32 %v2727_v61, %v2728_v9  ;;  %v3723_v17 = vadd.f32 %v6906_v59, %v2722_v8 }
  0xfc   : > { %v1804_v18 = vrot.slane %v1803_v11, 1  ;;  %v3591_v19 = vadd.f32 %v6906_v59, %v1798_v10  ;;  %v2693_v20 = vrot.slane %v2692_v12, 1  ;;  %v2700_v23 = vrot.slane %v2699_v13, 1 }
  0xfd   : > { %v3596_v24 = vadd.f32 %v6906_v59, %v1833_v14  ;;  %v6139_v25 = vpack.c.bf16 %v3595_v15, %v3595_v15  ;;  %v3724_v26 = vadd.f32 %v6906_v59, %v2729_v16  ;;  %v6267_v29 = vpack.c.bf16 %v3723_v17, %v3723_v17  ;;  %v6921_v30 = vpop.f32.mrb[8].mxu0  ;;  %v6923_v31 = vpop.f32.mrb[8].mxu1 }
  0xfe   : > { %v1805_v32 = vmax.f32 %v1803_v11, %v1804_v18  ;;  %v6135_v33 = vpack.c.bf16 %v3591_v19, %v3591_v19  ;;  %v2694_v34 = vmax.f32 %v2692_v12, %v2693_v20  ;;  %v2701_v35 = vmax.f32 %v2699_v13, %v2700_v23  ;;  %v6925_v36 = vpop.f32.mrb[9].mxu0  ;;  %v6927_v37 = vpop.f32.mrb[9].mxu1 }
  0xff   : > { %v6140_v38 = vpack.c.bf16 %v3596_v24, %v3596_v24  ;;  %v6929_v39 = vunpack.c.l.b16 %v6139_v25  ;;  %v6268_v40 = vpack.c.bf16 %v3724_v26, %v3724_v26  ;;  %v6931_v41 = vunpack.c.l.b16 %v6267_v29  ;;  %v6933_v42 = vpop.f32.mrb[10].mxu0  ;;  %v6935_v43 = vpop.f32.mrb[10].mxu1 }
 0x100   : > { %v3592_v44 = vadd.f32 %v6906_v59, %v1805_v32  ;;  %v4871_v45 = vunpack.c.l.b16 %v6135_v33  ;;  %v3719_v46 = vadd.f32 %v6906_v59, %v2694_v34  ;;  %v3720_v47 = vadd.f32 %v6906_v59, %v2701_v35  ;;  %v6940_v48 = vpop.f32.mrb[11].mxu0  ;;  %v6942_v51 = vpop.f32.mrb[11].mxu1 }
 0x101   : > { %v6944_v52 = vunpack.c.l.b16 %v6140_v38  ;;  %v5136_v53 = vrot.slane %v6929_v39, 4  ;;  %v6947_v54 = vunpack.c.l.b16 %v6268_v40  ;;  %v5364_v57 = vrot.slane %v6931_v41, 4 }
 0x102   : > { %v6136_v58 = vpack.c.bf16 %v3592_v44, %v3592_v44  ;;  %v6263_v60 = vpack.c.bf16 %v3719_v46, %v3719_v46  ;;  %v6264_v61 = vpack.c.bf16 %v3720_v47, %v3720_v47  ;;  %v1538_v0 = vcombine.high %v6882_v21, %v6882_v21 }
 0x103   : > { %v5139_v1 = vrot.slane %v6944_v52, 3  ;;  %v5366_v2 = vrot.slane %v6947_v54, 3  ;;  %v1834_v3 = vsel %vm1791_vm3, %v6882_v21, -inf  ;;  %v1602_v6 = vcombine.high %v6884_v22, %v6884_v22 }
 0x104   : > { %v4872_v7 = vunpack.c.l.b16 %v6136_v58  ;;  %v4999_v8 = vunpack.c.l.b16 %v6263_v60  ;;  %v5000_v9 = vunpack.c.l.b16 %v6264_v61  ;;  %v1835_v10 = vrot.slane %v1834_v3, 4 }
 0x105   : > { %v1841_v11 = vsel %vm1791_vm3, %v1538_v0, -inf  ;;  %v2730_v12 = vsel %vm1791_vm3, %v6884_v22, -inf  ;;  %v2737_v13 = vsel %vm1791_vm3, %v1602_v6, -inf  ;;  %v1536_v14 = vcombine.high %v6888_v27, %v6888_v27  ;;  %v6964_v15 = vpop.f32.mrb[12].mxu0  ;;  %v6966_v21 = vpop.f32.mrb[12].mxu1 }
 0x106   : > { %v5127_v16 = vrot.slane %v4872_v7, 7  ;;  %v5358_v17 = vrot.slane %v5000_v9, 7  ;;  %v1836_v18 = vmax.f32 %v1834_v3, %v1835_v10  ;;  %v1842_v19 = vrot.slane %v1841_v11, 4  ;;  %v6968_v20 = vpop.f32.mrb[13].mxu0  ;;  %v6983_v0 = vpop.f32.mrb[13].mxu1 }
 0x107   : > { %v2731_v23 = vrot.slane %v2730_v12, 4  ;;  %v2738_v24 = vrot.slane %v2737_v13, 4  ;;  %v1806_v22 = vsel %vm1791_vm3, %v6888_v27, -inf  ;;  %v1813_v25 = vsel %vm1791_vm3, %v1536_v14, -inf }
 0x108   : > { %v6974_v26 = vsel %vm5128_vm4, %v5127_v16, %v4871_v45  ;;  %v6977_v29 = vsel %vm5128_vm4, %v5358_v17, %v4999_v8  ;;  %v1837_v32 = vrot.slane %v1836_v18, 2  ;;  %v1843_v33 = vmax.f32 %v1841_v11, %v1842_v19 }
 0x109   : > { %v2732_v34 = vmax.f32 %v2730_v12, %v2731_v23  ;;  %v2739_v35 = vmax.f32 %v2737_v13, %v2738_v24  ;;  %v1807_v38 = vrot.slane %v1806_v22, 4  ;;  %v1814_v40 = vrot.slane %v1813_v25, 4  ;;  %v6986_v24 = vpop.f32.mrb[14].mxu0 }
 0x10a   : > { %v1838_v44 = vmax.f32 %v1836_v18, %v1837_v32  ;;  %v1844_v46 = vrot.slane %v1843_v33, 2  ;;  %v1600_v47 = vcombine.high %v6890_v28, %v6890_v28  ;;  %v2702_v27 = vsel %vm1791_vm3, %v6890_v28, -inf }
 0x10b   : > { %v2733_v58 = vrot.slane %v2732_v34, 2  ;;  %v2740_v45 = vrot.slane %v2739_v35, 2  ;;  %v1808_v60 = vmax.f32 %v1806_v22, %v1807_v38  ;;  %v1815_v61 = vmax.f32 %v1813_v25, %v1814_v40  ;;  %v6989_v38 = vpop.f32.mrb[14].mxu1 }
 0x10c   : > { %v1839_v3 = vrot.slane %v1838_v44, 1  ;;  %v1845_v6 = vmax.f32 %v1843_v33, %v1844_v46  ;;  %v2703_v7 = vrot.slane %v2702_v27, 4  ;;  %v2709_v8 = vsel %vm1791_vm3, %v1600_v47, -inf }
 0x10d   : > { %v2734_v9 = vmax.f32 %v2732_v34, %v2733_v58  ;;  %v2741_v10 = vmax.f32 %v2739_v35, %v2740_v45  ;;  %v1809_v11 = vrot.slane %v1808_v60, 2  ;;  %v1816_v12 = vrot.slane %v1815_v61, 2 }
 0x10e   : > { %v1840_v13 = vmax.f32 %v1838_v44, %v1839_v3  ;;  %v1846_v14 = vrot.slane %v1845_v6, 1  ;;  %v2704_v16 = vmax.f32 %v2702_v27, %v2703_v7  ;;  %v2710_v17 = vrot.slane %v2709_v8, 4 }
 0x10f   : > { %v2735_v28 = vrot.slane %v2734_v9, 1  ;;  %v2742_v18 = vrot.slane %v2741_v10, 1  ;;  %v1810_v19 = vmax.f32 %v1808_v60, %v1809_v11  ;;  %v1817_v23 = vmax.f32 %v1815_v61, %v1816_v12 }
 0x110   : > { %v1847_v22 = vmax.f32 %v1845_v6, %v1846_v14  ;;  %v3597_v25 = vadd.f32 %v6906_v59, %v1840_v13  ;;  %v2705_v32 = vrot.slane %v2704_v16, 2  ;;  %v2711_v33 = vmax.f32 %v2709_v8, %v2710_v17 }
 0x111   : > { %v2736_v34 = vmax.f32 %v2734_v9, %v2735_v28  ;;  %v2743_v35 = vmax.f32 %v2741_v10, %v2742_v18  ;;  %v1811_v40 = vrot.slane %v1810_v19, 1  ;;  %v1818_v44 = vrot.slane %v1817_v23, 1  ;;  %v7000_v10 = vpop.f32.mrb[15].mxu0 }
 0x112   : > { %v3598_v46 = vadd.f32 %v6906_v59, %v1847_v22  ;;  %v6141_v47 = vpack.c.bf16 %v3597_v25, %v3597_v25  ;;  %v2706_v27 = vmax.f32 %v2704_v16, %v2705_v32  ;;  %v2712_v58 = vrot.slane %v2711_v33, 2 }
 0x113   : > { %v3725_v45 = vadd.f32 %v6906_v59, %v2736_v34  ;;  %v3726_v60 = vadd.f32 %v6906_v59, %v2743_v35  ;;  %v1812_v61 = vmax.f32 %v1810_v19, %v1811_v40  ;;  %v1819_v3 = vmax.f32 %v1817_v23, %v1818_v44 }
 0x114   : > { %v6142_v6 = vpack.c.bf16 %v3598_v46, %v3598_v46  ;;  %v6994_v7 = vunpack.c.l.b16 %v6141_v47  ;;  %v2707_v8 = vrot.slane %v2706_v27, 1  ;;  %v2713_v9 = vmax.f32 %v2711_v33, %v2712_v58 }
 0x115   : > { %v6269_v11 = vpack.c.bf16 %v3725_v45, %v3725_v45  ;;  %v6270_v12 = vpack.c.bf16 %v3726_v60, %v3726_v60  ;;  %v3593_v13 = vadd.f32 %v6906_v59, %v1812_v61  ;;  %v3594_v14 = vadd.f32 %v6906_v59, %v1819_v3 }
 0x116   : > { %v4878_v16 = vunpack.c.l.b16 %v6142_v6  ;;  %v5142_v17 = vrot.slane %v6994_v7, 2  ;;  %v2708_v28 = vmax.f32 %v2706_v27, %v2707_v8  ;;  %v2714_v18 = vrot.slane %v2713_v9, 1 }
 0x117   : > { %v7005_v19 = vunpack.c.l.b16 %v6269_v11  ;;  %v7007_v23 = vunpack.c.l.b16 %v6270_v12  ;;  %v6137_v22 = vpack.c.bf16 %v3593_v13, %v3593_v13  ;;  %v6138_v25 = vpack.c.bf16 %v3594_v14, %v3594_v14 }
 0x118   : > { %v5145_v32 = vrot.slane %v4878_v16, 1  ;;  %v2715_v33 = vmax.f32 %v2713_v9, %v2714_v18  ;;  %v3721_v34 = vadd.f32 %v6906_v59, %v2708_v28  ;;  %v1541_v35 = vcombine.high %v6895_v49, %v6895_v49 }
 0x119   : > { %v5368_v40 = vrot.slane %v7005_v19, 2  ;;  %v5370_v44 = vrot.slane %v7007_v23, 1  ;;  %v4873_v46 = vunpack.c.l.b16 %v6137_v22  ;;  %v4874_v47 = vunpack.c.l.b16 %v6138_v25 }
 0x11a   : > { %v3722_v27 = vadd.f32 %v6906_v59, %v2715_v33  ;;  %v6265_v58 = vpack.c.bf16 %v3721_v34, %v3721_v34  ;;  %v1876_v45 = vsel %vm1791_vm3, %v6895_v49, -inf  ;;  %v1883_v60 = vsel %vm1791_vm3, %v1541_v35, -inf }
 0x11b   : > { %v5130_v61 = vrot.slane %v4873_v46, 6  ;;  %v5133_v3 = vrot.slane %v4874_v47, 5  ;;  %v1877_v6 = vrot.slane %v1876_v45, 4  ;;  %v1884_v7 = vrot.slane %v1883_v60, 4  ;;  %v7041_v47 = vpop.f32.mrb[15].mxu1 }
 0x11c   : > { %v6266_v8 = vpack.c.bf16 %v3722_v27, %v3722_v27  ;;  %v5001_v9 = vunpack.c.l.b16 %v6265_v58  ;;  %v1605_v11 = vcombine.high %v6897_v50, %v6897_v50  ;;  %v2772_v12 = vsel %vm1791_vm3, %v6897_v50, -inf }
 0x11d   : > { %v5132_v49 = vsel %vm5131_vm5, %v5130_v61, %v6974_v26  ;;  %v1878_v13 = vmax.f32 %v1876_v45, %v1877_v6  ;;  %v1885_v14 = vmax.f32 %v1883_v60, %v1884_v7  ;;  %v2773_v16 = vrot.slane %v2772_v12, 4 }
 0x11e   : > { %v5135_v28 = vsel %vm5134_vm6, %v5133_v3, %v5132_v49  ;;  %v5002_v18 = vunpack.c.l.b16 %v6266_v8  ;;  %v5360_v19 = vrot.slane %v5001_v9, 6  ;;  %v2779_v23 = vsel %vm1791_vm3, %v1605_v11, -inf }
 0x11f   : > { %v5138_v22 = vsel %vm5137_vm7, %v5136_v53, %v5135_v28  ;;  %v1879_v25 = vrot.slane %v1878_v13, 2  ;;  %v1886_v33 = vrot.slane %v1885_v14, 2  ;;  %v2774_v50 = vmax.f32 %v2772_v12, %v2773_v16 }
 0x120   : > { %v5141_v26 = vsel %vm5140_vm8, %v5139_v1, %v5138_v22  ;;  %v5361_v34 = vsel %vm5131_vm5, %v5360_v19, %v6977_v29  ;;  %v5362_v35 = vrot.slane %v5002_v18, 5  ;;  %v2780_v46 = vrot.slane %v2779_v23, 4 }
 0x121   : > { %v5144_v27 = vsel %vm5143_vm9, %v5142_v17, %v5141_v26  ;;  %v1880_v58 = vmax.f32 %v1878_v13, %v1879_v25  ;;  %v1887_v39 = vmax.f32 %v1885_v14, %v1886_v33  ;;  %v2775_v45 = vrot.slane %v2774_v50, 2  ;;  %v7074_v26 = vpop.f32.mrb[16].mxu0 }
 0x122   : > { %v5147_v52 = vsel %vm5146_vm10, %v5145_v32, %v5144_v27  ;;  %v5363_v53 = vsel %vm5134_vm6, %v5362_v35, %v5361_v34  ;;  %v2781_v1 = vmax.f32 %v2779_v23, %v2780_v46  ;;  %v1539_v29 = vcombine.high %v6899_v55, %v6899_v55  ;;  %v7076_v34 = vpop.f32.mrb[16].mxu1 }
 0x123   : > { %v5582_v60 = vpack.c.b16 %v5147_v52, %v5147_v52  ;;  %v5365_v17 = vsel %vm5137_vm7, %v5364_v57, %v5363_v53  ;;  %v1881_v61 = vrot.slane %v1880_v58, 1  ;;  %v1888_v3 = vrot.slane %v1887_v39, 1 }
 0x124   : > { %v5367_v6 = vsel %vm5140_vm8, %v5366_v2, %v5365_v17  ;;  %v2776_v7 = vmax.f32 %v2774_v50, %v2775_v45  ;;  %v2782_v8 = vrot.slane %v2781_v1, 2  ;;  %v1848_v32 = vsel %vm1791_vm3, %v6899_v55, -inf }
 0x125   : > { %5646 = vst.msk [vmem:[%s7047_s8] sm:$0xf] %vm1791_vm3, %v5582_v60  ;;  %v5369_v9 = vsel %vm5143_vm9, %v5368_v40, %v5367_v6  ;;  %v1882_v11 = vmax.f32 %v1880_v58, %v1881_v61  ;;  %v1889_v41 = vmax.f32 %v1887_v39, %v1888_v3  ;;  %v1849_v12 = vrot.slane %v1848_v32, 4 }
 0x126   : > { %v5371_v57 = vsel %vm5146_vm10, %v5370_v44, %v5369_v9  ;;  %v2777_v49 = vrot.slane %v2776_v7, 1  ;;  %v2783_v13 = vmax.f32 %v2781_v1, %v2782_v8  ;;  %v1855_v54 = vsel %vm1791_vm3, %v1539_v29, -inf }
 0x127   : > { %v5598_v2 = vpack.c.b16 %v5371_v57, %v5371_v57  ;;  %v3603_v14 = vadd.f32 %v6906_v59, %v1882_v11  ;;  %v3604_v16 = vadd.f32 %v6906_v59, %v1889_v41  ;;  %v1850_v55 = vmax.f32 %v1848_v32, %v1849_v12 }
 0x128   : > { %v2778_v28 = vmax.f32 %v2776_v7, %v2777_v49  ;;  %v2784_v18 = vrot.slane %v2783_v13, 1  ;;  %v1856_v19 = vrot.slane %v1855_v54, 4  ;;  %v1603_v40 = vcombine.high %v6901_v56, %v6901_v56 }
 0x129   : > { %5662 = vst.msk [vmem:[%s7047_s8 + $0x40] sm:$0xf] %vm1791_vm3, %v5598_v2  ;;  %v6147_v23 = vpack.c.bf16 %v3603_v14, %v3603_v14  ;;  %v1851_v44 = vrot.slane %v1850_v55, 2  ;;  %v2744_v22 = vsel %vm1791_vm3, %v6901_v56, -inf  ;;  %v6148_v25 = vpack.c.bf16 %v3604_v16, %v3604_v16  ;;  %v7082_v56 = vpop.f32.mrb[17].mxu0 }
 0x12a   : > { %v1857_v33 = vmax.f32 %v1855_v54, %v1856_v19  ;;  %v2745_v50 = vrot.slane %v2744_v22, 4  ;;  %v2785_v35 = vmax.f32 %v2783_v13, %v2784_v18  ;;  %v2751_v27 = vsel %vm1791_vm3, %v1603_v40, -inf }
 0x12b   : > { %v1852_v46 = vmax.f32 %v1850_v55, %v1851_v44  ;;  %v7079_v58 = vunpack.c.l.b16 %v6147_v23  ;;  %v3731_v39 = vadd.f32 %v6906_v59, %v2778_v28  ;;  %v2752_v1 = vrot.slane %v2751_v27, 4 }
 0x12c   : > { %v1858_v45 = vrot.slane %v1857_v33, 2  ;;  %v2746_v52 = vmax.f32 %v2744_v22, %v2745_v50  ;;  %v7084_v29 = vunpack.c.l.b16 %v6148_v25  ;;  %v7087_v61 = vadd.f32 %v6906_v59, %v2785_v35 }
 0x12d   : > { %v1853_v53 = vrot.slane %v1852_v46, 1  ;;  %v2753_v3 = vmax.f32 %v2751_v27, %v2752_v1  ;;  %v1542_v6 = vcombine.high %v6908_v62, %v6908_v62  ;;  %v1890_v7 = vsel %vm1791_vm3, %v6908_v62, -inf }
 0x12e   : > { %v1859_v60 = vmax.f32 %v1857_v33, %v1858_v45  ;;  %v2747_v17 = vrot.slane %v2746_v52, 2  ;;  %v5154_v8 = vrot.slane %v7079_v58, 4  ;;  %v6275_v32 = vpack.c.bf16 %v3731_v39, %v3731_v39 }
 0x12f   : > { %v1854_v41 = vmax.f32 %v1852_v46, %v1853_v53  ;;  %v2754_v12 = vrot.slane %v2753_v3, 2  ;;  %v1891_v57 = vrot.slane %v1890_v7, 4  ;;  %v1897_v49 = vsel %vm1791_vm3, %v1542_v6, -inf }
 0x130   : > { %v1860_v9 = vrot.slane %v1859_v60, 1  ;;  %v2748_v11 = vmax.f32 %v2746_v52, %v2747_v17  ;;  %v5156_v13 = vrot.slane %v7084_v29, 3  ;;  %v1898_v14 = vrot.slane %v1897_v49, 4 }
 0x131   : > { %v6276_v16 = vpack.c.bf16 %v7087_v61, %v7087_v61  ;;  %v2755_v55 = vmax.f32 %v2753_v3, %v2754_v12  ;;  %v1892_v62 = vmax.f32 %v1890_v7, %v1891_v57  ;;  %v1606_v28 = vcombine.high %v6910_v63, %v6910_v63 }
 0x132   : > { %v1861_v54 = vmax.f32 %v1859_v60, %v1860_v9  ;;  %v2749_v2 = vrot.slane %v2748_v11, 1  ;;  %v1899_v40 = vmax.f32 %v1897_v49, %v1898_v14  ;;  %v2786_v23 = vsel %vm1791_vm3, %v6910_v63, -inf }
 0x133   : > { %v3599_v44 = vadd.f32 %v6906_v59, %v1854_v41  ;;  %v2756_v22 = vrot.slane %v2755_v55, 1  ;;  %v1893_v25 = vrot.slane %v1892_v62, 2  ;;  %v2787_v33 = vrot.slane %v2786_v23, 4 }
 0x134   : > { %v3600_v18 = vadd.f32 %v6906_v59, %v1861_v54  ;;  %v2750_v19 = vmax.f32 %v2748_v11, %v2749_v2  ;;  %v1900_v46 = vrot.slane %v1899_v40, 2  ;;  %v2793_v27 = vsel %vm1791_vm3, %v1606_v28, -inf  ;;  %v7114_v28 = vpop.f32.mrb[17].mxu1 }
 0x135   : > { %v2757_v39 = vmax.f32 %v2755_v55, %v2756_v22  ;;  %v1894_v45 = vmax.f32 %v1892_v62, %v1893_v25  ;;  %v2788_v52 = vmax.f32 %v2786_v23, %v2787_v33  ;;  %v2794_v53 = vrot.slane %v2793_v27, 4 }
 0x136   : > { %v6144_v50 = vpack.c.bf16 %v3600_v18, %v3600_v18  ;;  %v3727_v35 = vadd.f32 %v6906_v59, %v2750_v19  ;;  %v7106_v1 = vunpack.c.l.b16 %v6275_v32  ;;  %v1901_v17 = vmax.f32 %v1899_v40, %v1900_v46 }
 0x137   : > { %v1540_v63 = vcombine.high %v6912_v4, %v6912_v4  ;;  %v3728_v61 = vadd.f32 %v6906_v59, %v2757_v39  ;;  %v1895_v3 = vrot.slane %v1894_v45, 1  ;;  %v2789_v6 = vrot.slane %v2788_v52, 2 }
 0x138   : > { %v4880_v60 = vunpack.c.l.b16 %v6144_v50  ;;  %v2795_v7 = vmax.f32 %v2793_v27, %v2794_v53  ;;  %v6143_v9 = vpack.c.bf16 %v3599_v44, %v3599_v44  ;;  %v6271_v11 = vpack.c.bf16 %v3727_v35, %v3727_v35  ;;  %v7122_v53 = vpop.f32.mrb[18].mxu0 }
 0x139   : > { %v1902_v41 = vrot.slane %v1901_v17, 1  ;;  %v1862_v12 = vsel %vm1791_vm3, %v6912_v4, -inf  ;;  %v6272_v57 = vpack.c.bf16 %v3728_v61, %v3728_v61  ;;  %v1896_v49 = vmax.f32 %v1894_v45, %v1895_v3 }
 0x13a   : > { %v2790_v32 = vmax.f32 %v2788_v52, %v2789_v6  ;;  %v2796_v54 = vrot.slane %v2795_v7, 2  ;;  %v5148_v2 = vrot.slane %v4880_v60, 7  ;;  %v1863_v55 = vrot.slane %v1862_v12, 4 }
 0x13b   : > { %v1903_v14 = vmax.f32 %v1901_v17, %v1902_v41  ;;  %v1869_v62 = vsel %vm1791_vm3, %v1540_v63, -inf  ;;  %v5008_v18 = vunpack.c.l.b16 %v6272_v57  ;;  %v3605_v19 = vadd.f32 %v6906_v59, %v1896_v49 }
 0x13c   : > { %v2791_v40 = vrot.slane %v2790_v32, 1  ;;  %v2797_v23 = vmax.f32 %v2795_v7, %v2796_v54  ;;  %v1864_v22 = vmax.f32 %v1862_v12, %v1863_v55  ;;  %v1870_v4 = vrot.slane %v1869_v62, 4  ;;  %v7128_v12 = vpop.f32.mrb[18].mxu1 }
 0x13d   : > { %v3606_v44 = vadd.f32 %v6906_v59, %v1903_v14  ;;  %v1604_v25 = vcombine.high %v6914_v5, %v6914_v5  ;;  %v5372_v33 = vrot.slane %v5008_v18, 7  ;;  %v6149_v50 = vpack.c.bf16 %v3605_v19, %v3605_v19  ;;  %v7146_v18 = vpop.f32.mrb[19].mxu0 }
 0x13e   : > { %v2792_v35 = vmax.f32 %v2790_v32, %v2791_v40  ;;  %v2798_v46 = vrot.slane %v2797_v23, 1  ;;  %v1865_v39 = vrot.slane %v1864_v22, 2  ;;  %v1871_v45 = vmax.f32 %v1869_v62, %v1870_v4 }
 0x13f   : > { %v6150_v27 = vpack.c.bf16 %v3606_v44, %v3606_v44  ;;  %v2758_v52 = vsel %vm1791_vm3, %v6914_v5, -inf  ;;  %v7124_v60 = vunpack.c.l.b16 %v6276_v16  ;;  %v4879_v17 = vunpack.c.l.b16 %v6143_v9 }
 0x140   : > { %v7126_v63 = vunpack.c.l.b16 %v6149_v50  ;;  %v2799_v61 = vmax.f32 %v2797_v23, %v2798_v46  ;;  %v5007_v3 = vunpack.c.l.b16 %v6271_v11  ;;  %v1866_v6 = vmax.f32 %v1864_v22, %v1865_v39 }
 0x141   : > { %v1872_v7 = vrot.slane %v1871_v45, 2  ;;  %v2759_v41 = vrot.slane %v2758_v52, 4  ;;  %v5149_v57 = vsel %vm5128_vm4, %v5148_v2, %v4879_v17  ;;  %v7131_v49 = vunpack.c.l.b16 %v6150_v27 }
 0x142   : > { %v7134_v5 = vadd.f32 %v6906_v59, %v2792_v35  ;;  %v2765_v16 = vsel %vm1791_vm3, %v1604_v25, -inf  ;;  %v7138_v9 = vsel %vm5128_vm4, %v5372_v33, %v5007_v3  ;;  %v1867_v32 = vrot.slane %v1866_v6, 1 }
 0x143   : > { %v1873_v54 = vmax.f32 %v1871_v45, %v1872_v7  ;;  %v2760_v11 = vmax.f32 %v2758_v52, %v2759_v41  ;;  %v5158_v14 = vrot.slane %v7126_v63, 2  ;;  %v7142_v55 = vadd.f32 %v6906_v59, %v2799_v61 }
 0x144   : > { %v2766_v62 = vrot.slane %v2765_v16, 4  ;;  %v1545_v2 = vcombine.high %v6921_v30, %v6921_v30  ;;  %v1868_v19 = vmax.f32 %v1866_v6, %v1867_v32  ;;  %v1932_v44 = vsel %vm1791_vm3, %v6921_v30, -inf }
 0x145   : > { %v1874_v40 = vrot.slane %v1873_v54, 1  ;;  %v2761_v23 = vrot.slane %v2760_v11, 2  ;;  %v5160_v22 = vrot.slane %v7131_v49, 1  ;;  %v6277_v4 = vpack.c.bf16 %v7134_v5, %v7134_v5 }
 0x146   : > { %v2767_v25 = vmax.f32 %v2765_v16, %v2766_v62  ;;  %v1933_v33 = vrot.slane %v1932_v44, 4  ;;  %v3601_v35 = vadd.f32 %v6906_v59, %v1868_v19  ;;  %v1939_v27 = vsel %vm1791_vm3, %v1545_v2, -inf }
 0x147   : > { %v1875_v50 = vmax.f32 %v1873_v54, %v1874_v40  ;;  %v2762_v46 = vmax.f32 %v2760_v11, %v2761_v23  ;;  %v6278_v39 = vpack.c.bf16 %v7142_v55, %v7142_v55  ;;  %v1940_v17 = vrot.slane %v1939_v27, 4 }
 0x148   : > { %v2768_v45 = vrot.slane %v2767_v25, 2  ;;  %v1934_v52 = vmax.f32 %v1932_v44, %v1933_v33  ;;  %v6145_v61 = vpack.c.bf16 %v3601_v35, %v3601_v35  ;;  %v1609_v6 = vcombine.high %v6923_v31, %v6923_v31 }
 0x149   : > { %v3602_v30 = vadd.f32 %v6906_v59, %v1875_v50  ;;  %v2763_v3 = vrot.slane %v2762_v46, 1  ;;  %v1941_v49 = vmax.f32 %v1939_v27, %v1940_v17  ;;  %v2828_v5 = vsel %vm1791_vm3, %v6923_v31, -inf }
 0x14a   : > { %v2769_v7 = vmax.f32 %v2767_v25, %v2768_v45  ;;  %v1935_v41 = vrot.slane %v1934_v52, 2  ;;  %v4881_v32 = vunpack.c.l.b16 %v6145_v61  ;;  %v2829_v11 = vrot.slane %v2828_v5, 4 }
 0x14b   : > { %v6146_v16 = vpack.c.bf16 %v3602_v30, %v3602_v30  ;;  %v2764_v54 = vmax.f32 %v2762_v46, %v2763_v3  ;;  %v1942_v2 = vrot.slane %v1941_v49, 2  ;;  %v2835_v19 = vsel %vm1791_vm3, %v1609_v6, -inf  ;;  %v7166_v6 = vpop.f32.mrb[19].mxu1 }
 0x14c   : > { %v2770_v55 = vrot.slane %v2769_v7, 1  ;;  %v1936_v62 = vmax.f32 %v1934_v52, %v1935_v41  ;;  %v5150_v23 = vrot.slane %v4881_v32, 6  ;;  %v2830_v33 = vmax.f32 %v2828_v5, %v2829_v11 }
 0x14d   : > { %v4882_v40 = vunpack.c.l.b16 %v6146_v16  ;;  %v3729_v44 = vadd.f32 %v6906_v59, %v2764_v54  ;;  %v1943_v35 = vmax.f32 %v1941_v49, %v1942_v2  ;;  %v2836_v27 = vrot.slane %v2835_v19, 4 }
 0x14e   : > { %v2771_v25 = vmax.f32 %v2769_v7, %v2770_v55  ;;  %v1937_v50 = vrot.slane %v1936_v62, 1  ;;  %v5151_v31 = vsel %vm5131_vm5, %v5150_v23, %v5149_v57  ;;  %v2831_v46 = vrot.slane %v2830_v33, 2 }
 0x14f   : > { %v5152_v45 = vrot.slane %v4882_v40, 5  ;;  %v6273_v17 = vpack.c.bf16 %v3729_v44, %v3729_v44  ;;  %v1944_v61 = vrot.slane %v1943_v35, 1  ;;  %v2837_v3 = vmax.f32 %v2835_v19, %v2836_v27 }
 0x150   : > { %v3730_v30 = vadd.f32 %v6906_v59, %v2771_v25  ;;  %v1938_v52 = vmax.f32 %v1936_v62, %v1937_v50  ;;  %v2832_v5 = vmax.f32 %v2830_v33, %v2831_v46  ;;  %v1543_v7 = vcombine.high %v6925_v36, %v6925_v36 }
 0x151   : > { %v5153_v41 = vsel %vm5134_vm6, %v5152_v45, %v5151_v31  ;;  %v5009_v16 = vunpack.c.l.b16 %v6273_v17  ;;  %v1945_v32 = vmax.f32 %v1943_v35, %v1944_v61  ;;  %v2838_v2 = vrot.slane %v2837_v3, 2 }
 0x152   : > { %v5155_v57 = vsel %vm5137_vm7, %v5154_v8, %v5153_v41  ;;  %v6274_v49 = vpack.c.bf16 %v3730_v30, %v3730_v30  ;;  %v3611_v54 = vadd.f32 %v6906_v59, %v1938_v52  ;;  %v2833_v62 = vrot.slane %v2832_v5, 1 }
 0x153   : > { %v5157_v11 = vsel %vm5140_vm8, %v5156_v13, %v5155_v57  ;;  %v5374_v55 = vrot.slane %v5009_v16, 6  ;;  %v5013_v19 = vunpack.c.l.b16 %v6277_v4  ;;  %v3612_v58 = vadd.f32 %v6906_v59, %v1945_v32 }
 0x154   : > { %v5159_v40 = vsel %vm5143_vm9, %v5158_v14, %v5157_v11  ;;  %v5010_v23 = vunpack.c.l.b16 %v6274_v49  ;;  %v6155_v29 = vpack.c.bf16 %v3611_v54, %v3611_v54  ;;  %v2839_v33 = vmax.f32 %v2837_v3, %v2838_v2  ;;  %v7201_v3 = vpop.f32.mrb[20].mxu1 }
 0x155   : > { %v5161_v8 = vsel %vm5146_vm10, %v5160_v22, %v5159_v40  ;;  %v5375_v44 = vsel %vm5131_vm5, %v5374_v55, %v7138_v9  ;;  %v5378_v13 = vrot.slane %v7106_v1, 4  ;;  %v5014_v25 = vunpack.c.l.b16 %v6278_v39 }
 0x156   : > { %v5583_v50 = vpack.c.b16 %v5161_v8, %v5161_v8  ;;  %v5376_v4 = vrot.slane %v5010_v23, 5  ;;  %v6156_v35 = vpack.c.bf16 %v3612_v58, %v3612_v58  ;;  %v2834_v63 = vmax.f32 %v2832_v5, %v2833_v62 }
 0x157   : > { %v1904_v14 = vsel %vm1791_vm3, %v6925_v36, -inf  ;;  %v1911_v27 = vsel %vm1791_vm3, %v1543_v7, -inf  ;;  %v5380_v31 = vrot.slane %v7124_v60, 3  ;;  %v5382_v22 = vrot.slane %v5013_v19, 2  ;;  %v7199_v60 = vpop.f32.mrb[20].mxu0 }
 0x158   : > { %5647 = vst.msk [vmem:[%s7047_s8 + $0x4] sm:$0xf] %vm1791_vm3, %v5583_v50  ;;  %v5377_v9 = vsel %vm5134_vm6, %v5376_v4, %v5375_v44  ;;  %v1905_v45 = vrot.slane %v1904_v14, 4  ;;  %v7194_v39 = vunpack.c.l.b16 %v6155_v29  ;;  %v2840_v17 = vrot.slane %v2839_v33, 1  ;;  %v7212_v19 = vpop.f32.mrb[21].mxu0 }
 0x159   : > { %v5379_v1 = vsel %vm5137_vm7, %v5378_v13, %v5377_v9  ;;  %v1912_v46 = vrot.slane %v1911_v27, 4  ;;  %v5384_v30 = vrot.slane %v5014_v25, 1  ;;  %v1607_v61 = vcombine.high %v6927_v37, %v6927_v37 }
 0x15a   : > { %v5381_v52 = vsel %vm5140_vm8, %v5380_v31, %v5379_v1  ;;  %v1906_v36 = vmax.f32 %v1904_v14, %v1905_v45  ;;  %v7204_v16 = vunpack.c.l.b16 %v6156_v35  ;;  %v3739_v5 = vadd.f32 %v6906_v59, %v2834_v63 }
 0x15b   : > { %v5383_v41 = vsel %vm5143_vm9, %v5382_v22, %v5381_v52  ;;  %v1913_v7 = vmax.f32 %v1911_v27, %v1912_v46  ;;  %v2800_v32 = vsel %vm1791_vm3, %v6927_v37, -inf  ;;  %v2807_v54 = vsel %vm1791_vm3, %v1607_v61, -inf }
 0x15c   : > { %v5385_v57 = vsel %vm5146_vm10, %v5384_v30, %v5383_v41  ;;  %v1907_v49 = vrot.slane %v1906_v36, 2  ;;  %v2841_v62 = vmax.f32 %v2839_v33, %v2840_v17  ;;  %v2801_v23 = vrot.slane %v2800_v32, 4 }
 0x15d   : > { %v5599_v11 = vpack.c.b16 %v5385_v57, %v5385_v57  ;;  %v1914_v2 = vrot.slane %v1913_v7, 2  ;;  %v2808_v58 = vrot.slane %v2807_v54, 4  ;;  %v1546_v8 = vcombine.high %v6933_v42, %v6933_v42 }
 0x15e   : > { %v1908_v40 = vmax.f32 %v1906_v36, %v1907_v49  ;;  %v6283_v44 = vpack.c.bf16 %v3739_v5, %v3739_v5  ;;  %v1946_v37 = vsel %vm1791_vm3, %v6933_v42, -inf  ;;  %v1610_v13 = vcombine.high %v6935_v43, %v6935_v43 }
 0x15f   : > { %5663 = vst.msk [vmem:[%s7047_s8 + $0x44] sm:$0xf] %vm1791_vm3, %v5599_v11  ;;  %v1915_v29 = vmax.f32 %v1913_v7, %v1914_v2  ;;  %v2802_v25 = vmax.f32 %v2800_v32, %v2801_v23  ;;  %v2809_v50 = vmax.f32 %v2807_v54, %v2808_v58  ;;  %v1947_v4 = vrot.slane %v1946_v37, 4 }
 0x160   : > { %v1909_v33 = vrot.slane %v1908_v40, 1  ;;  %v1953_v14 = vsel %vm1791_vm3, %v1546_v8, -inf  ;;  %v2842_v27 = vsel %vm1791_vm3, %v6935_v43, -inf  ;;  %v7227_v31 = vadd.f32 %v6906_v59, %v2841_v62 }
 0x161   : > { %v1916_v63 = vrot.slane %v1915_v29, 1  ;;  %v2803_v22 = vrot.slane %v2802_v25, 2  ;;  %v2810_v42 = vrot.slane %v2809_v50, 2  ;;  %v1948_v9 = vmax.f32 %v1946_v37, %v1947_v4 }
 0x162   : > { %v1954_v1 = vrot.slane %v1953_v14, 4  ;;  %v2843_v17 = vrot.slane %v2842_v27, 4  ;;  %v2849_v46 = vsel %vm1791_vm3, %v1610_v13, -inf  ;;  %v1910_v30 = vmax.f32 %v1908_v40, %v1909_v33 }
 0x163   : > { %v1917_v45 = vmax.f32 %v1915_v29, %v1916_v63  ;;  %v2804_v52 = vmax.f32 %v2802_v25, %v2803_v22  ;;  %v2811_v36 = vmax.f32 %v2809_v50, %v2810_v42  ;;  %v1949_v61 = vrot.slane %v1948_v9, 2 }
 0x164   : > { %v1955_v5 = vmax.f32 %v1953_v14, %v1954_v1  ;;  %v2844_v7 = vmax.f32 %v2842_v27, %v2843_v17  ;;  %v2850_v43 = vrot.slane %v2849_v46, 4  ;;  %v7231_v57 = vunpack.c.l.b16 %v6283_v44  ;;  %v7243_v1 = vld [vmem:[%s9085_s2] ss:$0 sm:$0xff] }
 0x165   : > { %v3608_v41 = vadd.f32 %v6906_v59, %v1917_v45  ;;  %v2805_v49 = vrot.slane %v2804_v52, 1  ;;  %v2812_v32 = vrot.slane %v2811_v36, 1  ;;  %v1950_v54 = vmax.f32 %v1948_v9, %v1949_v61 }
 0x166   : > { %v1956_v62 = vrot.slane %v1955_v5, 2  ;;  %v2845_v2 = vrot.slane %v2844_v7, 2  ;;  %v2851_v23 = vmax.f32 %v2849_v46, %v2850_v43  ;;  %v3607_v58 = vadd.f32 %v6906_v59, %v1910_v30 }
 0x167   : > { %v6152_v11 = vpack.c.bf16 %v3608_v41, %v3608_v41  ;;  %v2806_v40 = vmax.f32 %v2804_v52, %v2805_v49  ;;  %v2813_v8 = vmax.f32 %v2811_v36, %v2812_v32  ;;  %v1951_v29 = vrot.slane %v1950_v54, 1  ;;  %v7248_v36 = vpop.f32.mrb[21].mxu1 }
 0x168   : > { %v1957_v13 = vmax.f32 %v1955_v5, %v1956_v62  ;;  %v2846_v33 = vmax.f32 %v2844_v7, %v2845_v2  ;;  %v2852_v25 = vrot.slane %v2851_v23, 2  ;;  %v6284_v44 = vpack.c.bf16 %v7227_v31, %v7227_v31 }
 0x169   : > { %v4888_v37 = vunpack.c.l.b16 %v6152_v11  ;;  %v3735_v50 = vadd.f32 %v6906_v59, %v2806_v40  ;;  %v3736_v4 = vadd.f32 %v6906_v59, %v2813_v8  ;;  %v1952_v63 = vmax.f32 %v1950_v54, %v1951_v29 }
 0x16a   : > { %v1958_v14 = vrot.slane %v1957_v13, 1  ;;  %v2847_v27 = vrot.slane %v2846_v33, 1  ;;  %v2853_v22 = vmax.f32 %v2851_v23, %v2852_v25  ;;  %v1544_v42 = vcombine.high %v6940_v48, %v6940_v48  ;;  %v7256_v23 = vpop.f32.mrb[22].mxu0 }
 0x16b   : > { %v6151_v9 = vpack.c.bf16 %v3607_v58, %v3607_v58  ;;  %v6280_v45 = vpack.c.bf16 %v3736_v4, %v3736_v4  ;;  %v3613_v31 = vadd.f32 %v7243_v1, %v1952_v63  ;;  %v1918_v17 = vsel %vm1791_vm3, %v6940_v48, -inf }
 0x16c   : > { %v5162_v59 = vrot.slane %v4888_v37, 7  ;;  %v1959_v46 = vmax.f32 %v1957_v13, %v1958_v14  ;;  %v2848_v30 = vmax.f32 %v2846_v33, %v2847_v27  ;;  %v2854_v52 = vrot.slane %v2853_v22, 1 }
 0x16d   : > { %v6279_v61 = vpack.c.bf16 %v3735_v50, %v3735_v50  ;;  %v5016_v41 = vunpack.c.l.b16 %v6280_v45  ;;  %v6157_v5 = vpack.c.bf16 %v3613_v31, %v3613_v31  ;;  %v1919_v7 = vrot.slane %v1918_v17, 4  ;;  %v7267_v50 = vpop.f32.mrb[22].mxu1 }
 0x16e   : > { %v3614_v43 = vadd.f32 %v7243_v1, %v1959_v46  ;;  %v2855_v49 = vmax.f32 %v2853_v22, %v2854_v52  ;;  %v7252_v32 = vadd.f32 %v7243_v1, %v2848_v30  ;;  %v1925_v54 = vsel %vm1791_vm3, %v1544_v42, -inf }
 0x16f   : > { %v4887_v11 = vunpack.c.l.b16 %v6151_v9  ;;  %v1920_v62 = vmax.f32 %v1918_v17, %v1919_v7  ;;  %v1926_v2 = vrot.slane %v1925_v54, 4  ;;  %v5386_v58 = vrot.slane %v5016_v41, 7 }
 0x170   : > { %v6158_v40 = vpack.c.bf16 %v3614_v43, %v3614_v43  ;;  %v7258_v8 = vunpack.c.l.b16 %v6157_v5  ;;  %v1608_v29 = vcombine.high %v6942_v51, %v6942_v51  ;;  %v7262_v37 = vunpack.c.l.b16 %v6284_v44 }
 0x171   : > { %v7265_v13 = vsel %vm5128_vm4, %v5162_v59, %v4887_v11  ;;  %v1921_v33 = vrot.slane %v1920_v62, 2  ;;  %v1927_v25 = vmax.f32 %v1925_v54, %v1926_v2  ;;  %v5015_v4 = vunpack.c.l.b16 %v6279_v61 }
 0x172   : > { %v7270_v63 = vadd.f32 %v7243_v1, %v2855_v49  ;;  %v2814_v27 = vsel %vm1791_vm3, %v6942_v51, -inf  ;;  %v2821_v9 = vsel %vm1791_vm3, %v1608_v29, -inf  ;;  %v7280_v31 = vunpack.c.l.b16 %v6158_v40  ;;  %v7285_v51 = vpop.f32.mrb[23].mxu0 }
 0x173   : > { %v1922_v22 = vmax.f32 %v1920_v62, %v1921_v33  ;;  %v1928_v44 = vrot.slane %v1927_v25, 2  ;;  %v2815_v42 = vrot.slane %v2814_v27, 4  ;;  %v7278_v45 = vsel %vm5128_vm4, %v5386_v58, %v5015_v4 }
 0x174   : > { %v2822_v59 = vrot.slane %v2821_v9, 4  ;;  %v1549_v61 = vcombine.high %v6964_v15, %v6964_v15  ;;  %v1988_v7 = vsel %vm1791_vm3, %v6964_v15, -inf  ;;  %v1613_v43 = vcombine.high %v6966_v21, %v6966_v21 }
 0x175   : > { %v1923_v46 = vrot.slane %v1922_v22, 1  ;;  %v1929_v30 = vmax.f32 %v1927_v25, %v1928_v44  ;;  %v2816_v52 = vmax.f32 %v2814_v27, %v2815_v42  ;;  %v1989_v62 = vrot.slane %v1988_v7, 4 }
 0x176   : > { %v2823_v5 = vmax.f32 %v2821_v9, %v2822_v59  ;;  %v1995_v58 = vsel %vm1791_vm3, %v1549_v61, -inf  ;;  %v2884_v40 = vsel %vm1791_vm3, %v6966_v21, -inf  ;;  %v2891_v29 = vsel %vm1791_vm3, %v1613_v43, -inf }
 0x177   : > { %v1924_v49 = vmax.f32 %v1922_v22, %v1923_v46  ;;  %v1930_v54 = vrot.slane %v1929_v30, 1  ;;  %v2817_v11 = vrot.slane %v2816_v52, 2  ;;  %v1990_v15 = vmax.f32 %v1988_v7, %v1989_v62 }
 0x178   : > { %v2824_v2 = vrot.slane %v2823_v5, 2  ;;  %v1996_v44 = vrot.slane %v1995_v58, 4  ;;  %v2885_v42 = vrot.slane %v2884_v40, 4  ;;  %v2892_v22 = vrot.slane %v2891_v29, 4 }
 0x179   : > { %v1931_v33 = vmax.f32 %v1929_v30, %v1930_v54  ;;  %v3609_v25 = vadd.f32 %v7243_v1, %v1924_v49  ;;  %v2818_v4 = vmax.f32 %v2816_v52, %v2817_v11  ;;  %v1991_v48 = vrot.slane %v1990_v15, 2 }
 0x17a   : > { %v2825_v27 = vmax.f32 %v2823_v5, %v2824_v2  ;;  %v1997_v17 = vmax.f32 %v1995_v58, %v1996_v44  ;;  %v2886_v41 = vmax.f32 %v2884_v40, %v2885_v42  ;;  %v2893_v21 = vmax.f32 %v2891_v29, %v2892_v22 }
 0x17b   : > { %v3610_v9 = vadd.f32 %v7243_v1, %v1931_v33  ;;  %v6153_v59 = vpack.c.bf16 %v3609_v25, %v3609_v25  ;;  %v2819_v46 = vrot.slane %v2818_v4, 1  ;;  %v1992_v54 = vmax.f32 %v1990_v15, %v1991_v48  ;;  %v7303_v15 = vpop.f32.mrb[23].mxu1 }
 0x17c   : > { %v2826_v61 = vrot.slane %v2825_v27, 1  ;;  %v1998_v52 = vrot.slane %v1997_v17, 2  ;;  %v2887_v7 = vrot.slane %v2886_v41, 2  ;;  %v2894_v5 = vrot.slane %v2893_v21, 2 }
 0x17d   : > { %v6154_v35 = vpack.c.bf16 %v3610_v9, %v3610_v9  ;;  %v4889_v43 = vunpack.c.l.b16 %v6153_v59  ;;  %v2820_v30 = vmax.f32 %v2818_v4, %v2819_v46  ;;  %v1993_v33 = vrot.slane %v1992_v54, 1 }
 0x17e   : > { %v2827_v49 = vmax.f32 %v2825_v27, %v2826_v61  ;;  %v1999_v55 = vmax.f32 %v1997_v17, %v1998_v52  ;;  %v2888_v14 = vmax.f32 %v2886_v41, %v2887_v7  ;;  %v2895_v58 = vmax.f32 %v2893_v21, %v2894_v5 }
 0x17f   : > { %v4890_v11 = vunpack.c.l.b16 %v6154_v35  ;;  %v5164_v62 = vrot.slane %v4889_v43, 6  ;;  %v3737_v2 = vadd.f32 %v7243_v1, %v2820_v30  ;;  %v1994_v48 = vmax.f32 %v1992_v54, %v1993_v33 }
 0x180   : > { %v3738_v25 = vadd.f32 %v7243_v1, %v2827_v49  ;;  %v2000_v44 = vrot.slane %v1999_v55, 1  ;;  %v2889_v35 = vrot.slane %v2888_v14, 1  ;;  %v2896_v42 = vrot.slane %v2895_v58, 1 }
 0x181   : > { %v5165_v40 = vsel %vm5131_vm5, %v5164_v62, %v7265_v13  ;;  %v5166_v29 = vrot.slane %v4890_v11, 5  ;;  %v6281_v4 = vpack.c.bf16 %v3737_v2, %v3737_v2  ;;  %v9087_v22 = vpack.c.bf16 %v7252_v32, %v7252_v32 }
 0x182   : > { %v6282_v27 = vpack.c.bf16 %v3738_v25, %v3738_v25  ;;  %v3619_v59 = vadd.f32 %v7243_v1, %v1994_v48  ;;  %v9088_v13 = vrot.slane %v7194_v39, 4  ;;  %v2001_v21 = vmax.f32 %v1999_v55, %v2000_v44 }
 0x183   : > { %v5021_v9 = vunpack.c.l.b16 %v9087_v22  ;;  %v5167_v17 = vsel %vm5134_vm6, %v5166_v29, %v5165_v40  ;;  %v5017_v41 = vunpack.c.l.b16 %v6281_v4  ;;  %v2890_v43 = vmax.f32 %v2888_v14, %v2889_v35  ;;  %v7351_v22 = vpop.f32.mrb[24].mxu0 }
 0x184   : > { %v5169_v46 = vsel %vm5137_vm7, %v9088_v13, %v5167_v17  ;;  %v5018_v61 = vunpack.c.l.b16 %v6282_v27  ;;  %v5174_v30 = vrot.slane %v7280_v31, 1  ;;  %v9089_v54 = vrot.slane %v7204_v16, 3 }
 0x185   : > { %v5388_v32 = vrot.slane %v5017_v41, 6  ;;  %v2897_v52 = vmax.f32 %v2895_v58, %v2896_v42  ;;  %v5394_v7 = vrot.slane %v7262_v37, 3  ;;  %v9090_v5 = vpack.c.bf16 %v7270_v63, %v7270_v63 }
 0x186   : > { %v5171_v49 = vsel %vm5140_vm8, %v9089_v54, %v5169_v46  ;;  %v9091_v39 = vrot.slane %v7258_v8, 2  ;;  %v5390_v14 = vrot.slane %v5018_v61, 5  ;;  %v6163_v62 = vpack.c.bf16 %v3619_v59, %v3619_v59 }
 0x187   : > { %v5022_v11 = vunpack.c.l.b16 %v9090_v5  ;;  %v5389_v16 = vsel %vm5131_vm5, %v5388_v32, %v7278_v45  ;;  %v1547_v2 = vcombine.high %v6968_v20, %v6968_v20  ;;  %v3620_v63 = vadd.f32 %v7243_v1, %v2001_v21 }
 0x188   : > { %v5173_v55 = vsel %vm5143_vm9, %v9091_v39, %v5171_v49  ;;  %v5391_v33 = vsel %vm5134_vm6, %v5390_v14, %v5389_v16  ;;  %v7332_v8 = vadd.f32 %v7243_v1, %v2890_v43  ;;  %v5396_v25 = vrot.slane %v5021_v9, 2  ;;  %v7353_v9 = vpop.f32.mrb[24].mxu1  ;;  %v7362_v43 = vpop.f32.mrb[25].mxu0 }
 0x189   : > { %v5175_v31 = vsel %vm5146_vm10, %v5174_v30, %v5173_v55  ;;  %v9092_v58 = vrot.slane %v7231_v57, 4  ;;  %v7338_v29 = vadd.f32 %v7243_v1, %v2897_v52  ;;  %v1960_v45 = vsel %vm1791_vm3, %v6968_v20, -inf }
 0x18a   : > { %v5584_v37 = vpack.c.b16 %v5175_v31, %v5175_v31  ;;  %v5398_v4 = vrot.slane %v5022_v11, 1  ;;  %v1961_v27 = vrot.slane %v1960_v45, 4  ;;  %v7346_v35 = vunpack.c.l.b16 %v6163_v62 }
 0x18b   : > { %v5393_v40 = vsel %vm5137_vm7, %v9092_v58, %v5391_v33  ;;  %v1967_v57 = vsel %vm1791_vm3, %v1547_v2, -inf  ;;  %v1611_v42 = vcombine.high %v6983_v0, %v6983_v0  ;;  %v6164_v17 = vpack.c.bf16 %v3620_v63, %v3620_v63 }
 0x18c   : > { %5648 = vst.msk [vmem:[%s7047_s8 + $0x8] sm:$0xf] %vm1791_vm3, %v5584_v37  ;;  %v5395_v48 = vsel %vm5140_vm8, %v5394_v7, %v5393_v40  ;;  %v6291_v41 = vpack.c.bf16 %v7332_v8, %v7332_v8  ;;  %v1962_v59 = vmax.f32 %v1960_v45, %v1961_v27  ;;  %v6292_v46 = vpack.c.bf16 %v7338_v29, %v7338_v29 }
 0x18d   : > { %v5397_v44 = vsel %vm5143_vm9, %v5396_v25, %v5395_v48  ;;  %v1968_v61 = vrot.slane %v1967_v57, 4  ;;  %v2856_v21 = vsel %vm1791_vm3, %v6983_v0, -inf  ;;  %v2863_v49 = vsel %vm1791_vm3, %v1611_v42, -inf }
 0x18e   : > { %v5399_v20 = vsel %vm5146_vm10, %v5398_v4, %v5397_v44  ;;  %v1963_v30 = vrot.slane %v1962_v59, 2  ;;  %v2857_v54 = vrot.slane %v2856_v21, 4  ;;  %v1550_v32 = vcombine.high %v6986_v24, %v6986_v24 }
 0x18f   : > { %v5600_v13 = vpack.c.b16 %v5399_v20, %v5399_v20  ;;  %v1969_v52 = vmax.f32 %v1967_v57, %v1968_v61  ;;  %v2864_v7 = vrot.slane %v2863_v49, 4  ;;  %v2002_v5 = vsel %vm1791_vm3, %v6986_v24, -inf }
 0x190   : > { %v1614_v11 = vcombine.high %v6989_v38, %v6989_v38  ;;  %v1964_v0 = vmax.f32 %v1962_v59, %v1963_v30  ;;  %v2858_v39 = vmax.f32 %v2856_v21, %v2857_v54  ;;  %v2003_v55 = vrot.slane %v2002_v5, 4 }
 0x191   : > { %5664 = vst.msk [vmem:[%s7047_s8 + $0x48] sm:$0xf] %vm1791_vm3, %v5600_v13  ;;  %v2009_v14 = vsel %vm1791_vm3, %v1550_v32, -inf  ;;  %v1970_v31 = vrot.slane %v1969_v52, 2  ;;  %v2865_v16 = vmax.f32 %v2863_v49, %v2864_v7  ;;  %v2898_v2 = vsel %vm1791_vm3, %v6989_v38, -inf }
 0x192   : > { %v2010_v62 = vrot.slane %v2009_v14, 4  ;;  %v1965_v37 = vrot.slane %v1964_v0, 1  ;;  %v2859_v33 = vrot.slane %v2858_v39, 2  ;;  %v2004_v63 = vmax.f32 %v2002_v5, %v2003_v55 }
 0x193   : > { %v2899_v8 = vrot.slane %v2898_v2, 4  ;;  %v1971_v25 = vmax.f32 %v1969_v52, %v1970_v31  ;;  %v2866_v24 = vrot.slane %v2865_v16, 2  ;;  %v2905_v40 = vsel %vm1791_vm3, %v1614_v11, -inf }
 0x194   : > { %v2011_v58 = vmax.f32 %v2009_v14, %v2010_v62  ;;  %v1966_v29 = vmax.f32 %v1964_v0, %v1965_v37  ;;  %v2860_v45 = vmax.f32 %v2858_v39, %v2859_v33  ;;  %v2005_v4 = vrot.slane %v2004_v63, 2 }
 0x195   : > { %v2900_v48 = vmax.f32 %v2898_v2, %v2899_v8  ;;  %v1972_v27 = vrot.slane %v1971_v25, 1  ;;  %v2867_v44 = vmax.f32 %v2865_v16, %v2866_v24  ;;  %v2906_v42 = vrot.slane %v2905_v40, 4 }
 0x196   : > { %v2012_v57 = vrot.slane %v2011_v58, 2  ;;  %v7377_v20 = vunpack.c.l.b16 %v6164_v17  ;;  %v2861_v38 = vrot.slane %v2860_v45, 1  ;;  %v2006_v59 = vmax.f32 %v2004_v63, %v2005_v4 }
 0x197   : > { %v2901_v13 = vrot.slane %v2900_v48, 2  ;;  %v1973_v61 = vmax.f32 %v1971_v25, %v1972_v27  ;;  %v2868_v21 = vrot.slane %v2867_v44, 1  ;;  %v2907_v54 = vmax.f32 %v2905_v40, %v2906_v42 }
 0x198   : > { %v2013_v30 = vmax.f32 %v2011_v58, %v2012_v57  ;;  %v3615_v49 = vadd.f32 %v7243_v1, %v1966_v29  ;;  %v2862_v32 = vmax.f32 %v2860_v45, %v2861_v38  ;;  %v2007_v52 = vrot.slane %v2006_v59, 1  ;;  %v7390_v29 = vpop.f32.mrb[25].mxu1 }
 0x199   : > { %v2902_v7 = vmax.f32 %v2900_v48, %v2901_v13  ;;  %v3616_v5 = vadd.f32 %v7243_v1, %v1973_v61  ;;  %v2869_v11 = vmax.f32 %v2867_v44, %v2868_v21  ;;  %v2908_v39 = vrot.slane %v2907_v54, 2 }
 0x19a   : > { %v2014_v0 = vrot.slane %v2013_v30, 1  ;;  %v7381_v55 = vunpack.c.l.b16 %v6291_v41  ;;  %v3743_v17 = vadd.f32 %v7243_v1, %v2862_v32  ;;  %v2008_v14 = vmax.f32 %v2006_v59, %v2007_v52 }
 0x19b   : > { %v2903_v31 = vrot.slane %v2902_v7, 1  ;;  %v6160_v16 = vpack.c.bf16 %v3616_v5, %v3616_v5  ;;  %v3744_v62 = vadd.f32 %v7243_v1, %v2869_v11  ;;  %v2909_v37 = vmax.f32 %v2907_v54, %v2908_v39 }
 0x19c   : > { %v2015_v2 = vmax.f32 %v2013_v30, %v2014_v0  ;;  %v7385_v33 = vunpack.c.l.b16 %v6292_v46  ;;  %v3621_v63 = vadd.f32 %v7243_v1, %v2008_v14  ;;  %v1548_v25 = vcombine.high %v7000_v10, %v7000_v10 }
 0x19d   : > { %v2904_v8 = vmax.f32 %v2902_v7, %v2903_v31  ;;  %v6159_v24 = vpack.c.bf16 %v3615_v49, %v3615_v49  ;;  %v4896_v41 = vunpack.c.l.b16 %v6160_v16  ;;  %v6288_v58 = vpack.c.bf16 %v3744_v62, %v3744_v62 }
 0x19e   : > { %v2910_v40 = vrot.slane %v2909_v37, 1  ;;  %v6287_v45 = vpack.c.bf16 %v3743_v17, %v3743_v17  ;;  %v7393_v4 = vadd.f32 %v7243_v1, %v2015_v2  ;;  %v1974_v46 = vsel %vm1791_vm3, %v7000_v10, -inf  ;;  %v7407_v10 = vpop.f32.mrb[26].mxu0  ;;  %v7422_v17 = vpop.f32.mrb[26].mxu1 }
 0x19f   : > { %v6165_v27 = vpack.c.bf16 %v3621_v63, %v3621_v63  ;;  %v7399_v57 = vadd.f32 %v7243_v1, %v2904_v8  ;;  %v5176_v38 = vrot.slane %v4896_v41, 7  ;;  %v1975_v59 = vrot.slane %v1974_v46, 4 }
 0x1a0   : > { %v2911_v44 = vmax.f32 %v2909_v37, %v2910_v40  ;;  %v1981_v13 = vsel %vm1791_vm3, %v1548_v25, -inf  ;;  %v4895_v30 = vunpack.c.l.b16 %v6159_v24  ;;  %v7405_v54 = vunpack.c.l.b16 %v6288_v58  ;;  %v7435_v40 = vpop.f32.mrb[27].mxu0 }
 0x1a1   : > { %v7409_v49 = vunpack.c.l.b16 %v6287_v45  ;;  %v6166_v32 = vpack.c.bf16 %v7393_v4, %v7393_v4  ;;  %v1976_v52 = vmax.f32 %v1974_v46, %v1975_v59  ;;  %v1982_v7 = vrot.slane %v1981_v13, 4 }
 0x1a2   : > { %v7413_v5 = vunpack.c.l.b16 %v6165_v27  ;;  %v7416_v11 = vadd.f32 %v7243_v1, %v2911_v44  ;;  %v1612_v39 = vcombine.high %v7041_v47, %v7041_v47  ;;  %v7425_v14 = vsel %vm5128_vm4, %v5176_v38, %v4895_v30 }
 0x1a3   : > { %v1977_v31 = vrot.slane %v1976_v52, 2  ;;  %v1983_v16 = vmax.f32 %v1981_v13, %v1982_v7  ;;  %v2870_v62 = vsel %vm1791_vm3, %v7041_v47, -inf  ;;  %v1553_v8 = vcombine.high %v7074_v26, %v7074_v26 }
 0x1a4   : > { %v2871_v37 = vrot.slane %v2870_v62, 4  ;;  %v2877_v63 = vsel %vm1791_vm3, %v1612_v39, -inf  ;;  %v2044_v58 = vsel %vm1791_vm3, %v7074_v26, -inf  ;;  %v6294_v45 = vpack.c.bf16 %v7416_v11, %v7416_v11 }
 0x1a5   : > { %v1978_v25 = vmax.f32 %v1976_v52, %v1977_v31  ;;  %v1984_v24 = vrot.slane %v1983_v16, 2  ;;  %v2878_v41 = vrot.slane %v2877_v63, 4  ;;  %v2045_v46 = vrot.slane %v2044_v58, 4 }
 0x1a6   : > { %v2872_v47 = vmax.f32 %v2870_v62, %v2871_v37  ;;  %v2051_v27 = vsel %vm1791_vm3, %v1553_v8, -inf  ;;  %v1617_v7 = vcombine.high %v7076_v34, %v7076_v34  ;;  %v2940_v26 = vsel %vm1791_vm3, %v7076_v34, -inf }
 0x1a7   : > { %v1979_v44 = vrot.slane %v1978_v25, 1  ;;  %v1985_v38 = vmax.f32 %v1983_v16, %v1984_v24  ;;  %v2879_v59 = vmax.f32 %v2877_v63, %v2878_v41  ;;  %v2052_v13 = vrot.slane %v2051_v27, 4 }
 0x1a8   : > { %v2873_v30 = vrot.slane %v2872_v47, 2  ;;  %v2046_v52 = vmax.f32 %v2044_v58, %v2045_v46  ;;  %v2941_v61 = vrot.slane %v2940_v26, 4  ;;  %v2947_v8 = vsel %vm1791_vm3, %v1617_v7, -inf }
 0x1a9   : > { %v1980_v39 = vmax.f32 %v1978_v25, %v1979_v44  ;;  %v1986_v31 = vrot.slane %v1985_v38, 1  ;;  %v2880_v21 = vrot.slane %v2879_v59, 2  ;;  %v2053_v11 = vmax.f32 %v2051_v27, %v2052_v13 }
 0x1aa   : > { %v2874_v62 = vmax.f32 %v2872_v47, %v2873_v30  ;;  %v2047_v37 = vrot.slane %v2046_v52, 2  ;;  %v2942_v42 = vmax.f32 %v2940_v26, %v2941_v61  ;;  %v2948_v48 = vrot.slane %v2947_v8, 4 }
 0x1ab   : > { %v1987_v16 = vmax.f32 %v1985_v38, %v1986_v31  ;;  %v3617_v63 = vadd.f32 %v7243_v1, %v1980_v39  ;;  %v2881_v24 = vmax.f32 %v2879_v59, %v2880_v21  ;;  %v2054_v41 = vrot.slane %v2053_v11, 2 }
 0x1ac   : > { %v2875_v58 = vrot.slane %v2874_v62, 1  ;;  %v2048_v46 = vmax.f32 %v2046_v52, %v2047_v37  ;;  %v2943_v13 = vrot.slane %v2942_v42, 2  ;;  %v2949_v30 = vmax.f32 %v2947_v8, %v2948_v48 }
 0x1ad   : > { %v3618_v34 = vadd.f32 %v7243_v1, %v1987_v16  ;;  %v6161_v25 = vpack.c.bf16 %v3617_v63, %v3617_v63  ;;  %v2882_v44 = vrot.slane %v2881_v24, 1  ;;  %v2055_v0 = vmax.f32 %v2053_v11, %v2054_v41  ;;  %v7449_v63 = vpop.f32.mrb[27].mxu1 }
 0x1ae   : > { %v2876_v27 = vmax.f32 %v2874_v62, %v2875_v58  ;;  %v2049_v47 = vrot.slane %v2048_v46, 1  ;;  %v2944_v39 = vmax.f32 %v2942_v42, %v2943_v13  ;;  %v2950_v52 = vrot.slane %v2949_v30, 2 }
 0x1af   : > { %v6162_v2 = vpack.c.bf16 %v3618_v34, %v3618_v34  ;;  %v4897_v7 = vunpack.c.l.b16 %v6161_v25  ;;  %v2883_v38 = vmax.f32 %v2881_v24, %v2882_v44  ;;  %v2056_v31 = vrot.slane %v2055_v0, 1 }
 0x1b0   : > { %v3745_v21 = vadd.f32 %v7243_v1, %v2876_v27  ;;  %v2050_v59 = vmax.f32 %v2048_v46, %v2049_v47  ;;  %v4902_v48 = vunpack.c.l.b16 %v6166_v32  ;;  %v5186_v11 = vrot.slane %v7413_v5, 2 }
 0x1b1   : > { %v4898_v61 = vunpack.c.l.b16 %v6162_v2  ;;  %v5178_v26 = vrot.slane %v4897_v7, 6  ;;  %v3746_v37 = vadd.f32 %v7243_v1, %v2883_v38  ;;  %v2057_v16 = vmax.f32 %v2055_v0, %v2056_v31 }
 0x1b2   : > { %v6289_v62 = vpack.c.bf16 %v3745_v21, %v3745_v21  ;;  %v2951_v8 = vmax.f32 %v2949_v30, %v2950_v52  ;;  %v3627_v2 = vadd.f32 %v7243_v1, %v2050_v59  ;;  %v9093_v0 = vrot.slane %v7405_v54, 7 }
 0x1b3   : > { %v5179_v24 = vsel %vm5131_vm5, %v5178_v26, %v7425_v14  ;;  %v5180_v42 = vrot.slane %v4898_v61, 5  ;;  %v6290_v41 = vpack.c.bf16 %v3746_v37, %v3746_v37  ;;  %v9094_v4 = vpack.c.bf16 %v7399_v57, %v7399_v57 }
 0x1b4   : > { %v5401_v58 = vsel %vm5128_vm4, %v9093_v0, %v7409_v49  ;;  %v5025_v46 = vunpack.c.l.b16 %v6289_v62  ;;  %v3628_v5 = vadd.f32 %v7243_v1, %v2057_v16  ;;  %v5030_v34 = vunpack.c.l.b16 %v6294_v45 }
 0x1b5   : > { %v5029_v32 = vunpack.c.l.b16 %v9094_v4  ;;  %v5181_v25 = vsel %vm5134_vm6, %v5180_v42, %v5179_v24  ;;  %v5026_v14 = vunpack.c.l.b16 %v6290_v41  ;;  %v2945_v44 = vrot.slane %v2944_v39, 1 }
 0x1b6   : > { %v5188_v27 = vrot.slane %v4902_v48, 1  ;;  %v9095_v47 = vrot.slane %v7346_v35, 4  ;;  %v5402_v54 = vrot.slane %v5025_v46, 6  ;;  %v2952_v30 = vrot.slane %v2951_v8, 1 }
 0x1b7   : > { %v9096_v49 = vrot.slane %v7377_v20, 3  ;;  %v5404_v7 = vrot.slane %v5026_v14, 5  ;;  %v6171_v38 = vpack.c.bf16 %v3627_v2, %v3627_v2  ;;  %v1551_v45 = vcombine.high %v7082_v56, %v7082_v56 }
 0x1b8   : > { %v5183_v13 = vsel %vm5137_vm7, %v9095_v47, %v5181_v25  ;;  %v5410_v31 = vrot.slane %v5029_v32, 2  ;;  %v5403_v59 = vsel %vm5131_vm5, %v5402_v54, %v5401_v58  ;;  %v6172_v35 = vpack.c.bf16 %v3628_v5, %v3628_v5  ;;  %v7490_v58 = vpop.f32.mrb[28].mxu0 }
 0x1b9   : > { %v5185_v57 = vsel %vm5140_vm8, %v9096_v49, %v5183_v13  ;;  %v5412_v52 = vrot.slane %v5030_v34, 1  ;;  %v5405_v26 = vsel %vm5134_vm6, %v5404_v7, %v5403_v59  ;;  %v2946_v20 = vmax.f32 %v2944_v39, %v2945_v44  ;;  %v7492_v39 = vpop.f32.mrb[28].mxu1 }
 0x1ba   : > { %v5187_v21 = vsel %vm5143_vm9, %v5186_v11, %v5185_v57  ;;  %v9097_v16 = vrot.slane %v7381_v55, 4  ;;  %v2953_v62 = vmax.f32 %v2951_v8, %v2952_v30  ;;  %v2016_v24 = vsel %vm1791_vm3, %v7082_v56, -inf }
 0x1bb   : > { %v5189_v61 = vsel %vm5146_vm10, %v5188_v27, %v5187_v21  ;;  %v9098_v11 = vrot.slane %v7385_v33, 3  ;;  %v7487_v41 = vunpack.c.l.b16 %v6171_v38  ;;  %v2017_v2 = vrot.slane %v2016_v24, 4  ;;  %v7510_v27 = vpop.f32.mrb[29].mxu0 }
 0x1bc   : > { %v5585_v37 = vpack.c.b16 %v5189_v61, %v5189_v61  ;;  %v5407_v48 = vsel %vm5137_vm7, %v9097_v16, %v5405_v26  ;;  %v2023_v0 = vsel %vm1791_vm3, %v1551_v45, -inf  ;;  %v7497_v8 = vunpack.c.l.b16 %v6172_v35 }
 0x1bd   : > { %v5409_v42 = vsel %vm5140_vm8, %v9098_v11, %v5407_v48  ;;  %v2024_v56 = vrot.slane %v2023_v0, 4  ;;  %v1615_v33 = vcombine.high %v7114_v28, %v7114_v28  ;;  %v7503_v32 = vadd.f32 %v7243_v1, %v2946_v20 }
 0x1be   : > { %5649 = vst.msk [vmem:[%s7047_s8 + $0xc] sm:$0xf] %vm1791_vm3, %v5585_v37  ;;  %v5411_v55 = vsel %vm5143_vm9, %v5410_v31, %v5409_v42  ;;  %v2018_v46 = vmax.f32 %v2016_v24, %v2017_v2  ;;  %v2912_v5 = vsel %vm1791_vm3, %v7114_v28, -inf  ;;  %v7508_v25 = vadd.f32 %v7243_v1, %v2953_v62 }
 0x1bf   : > { %v5413_v4 = vsel %vm5146_vm10, %v5412_v52, %v5411_v55  ;;  %v2025_v14 = vmax.f32 %v2023_v0, %v2024_v56  ;;  %v2913_v44 = vrot.slane %v2912_v5, 4  ;;  %v2919_v13 = vsel %vm1791_vm3, %v1615_v33, -inf }
 0x1c0   : > { %v5601_v34 = vpack.c.b16 %v5413_v4, %v5413_v4  ;;  %v2019_v47 = vrot.slane %v2018_v46, 2  ;;  %v1554_v54 = vcombine.high %v7122_v53, %v7122_v53  ;;  %v2058_v30 = vsel %vm1791_vm3, %v7122_v53, -inf }
 0x1c1   : > { %v2026_v28 = vrot.slane %v2025_v14, 2  ;;  %v2914_v49 = vmax.f32 %v2912_v5, %v2913_v44  ;;  %v2920_v57 = vrot.slane %v2919_v13, 4  ;;  %v2059_v7 = vrot.slane %v2058_v30, 4 }
 0x1c2   : > { %5665 = vst.msk [vmem:[%s7047_s8 + $0x4c] sm:$0xf] %vm1791_vm3, %v5601_v34  ;;  %v2020_v38 = vmax.f32 %v2018_v46, %v2019_v47  ;;  %v2065_v45 = vsel %vm1791_vm3, %v1554_v54, -inf  ;;  %v1618_v31 = vcombine.high %v7128_v12, %v7128_v12  ;;  %v2954_v21 = vsel %vm1791_vm3, %v7128_v12, -inf }
 0x1c3   : > { %v2027_v59 = vmax.f32 %v2025_v14, %v2026_v28  ;;  %v2915_v35 = vrot.slane %v2914_v49, 2  ;;  %v2921_v52 = vmax.f32 %v2919_v13, %v2920_v57  ;;  %v2060_v61 = vmax.f32 %v2058_v30, %v2059_v7 }
 0x1c4   : > { %v2021_v53 = vrot.slane %v2020_v38, 1  ;;  %v2066_v26 = vrot.slane %v2065_v45, 4  ;;  %v2955_v20 = vrot.slane %v2954_v21, 4  ;;  %v2961_v37 = vsel %vm1791_vm3, %v1618_v31, -inf }
 0x1c5   : > { %v2028_v16 = vrot.slane %v2027_v59, 1  ;;  %v2916_v48 = vmax.f32 %v2914_v49, %v2915_v35  ;;  %v2922_v62 = vrot.slane %v2921_v52, 2  ;;  %v2061_v24 = vrot.slane %v2060_v61, 2 }
 0x1c6   : > { %v2022_v11 = vmax.f32 %v2020_v38, %v2021_v53  ;;  %v2067_v42 = vmax.f32 %v2065_v45, %v2066_v26  ;;  %v2956_v2 = vmax.f32 %v2954_v21, %v2955_v20  ;;  %v2962_v0 = vrot.slane %v2961_v37, 4 }
 0x1c7   : > { %v2029_v55 = vmax.f32 %v2027_v59, %v2028_v16  ;;  %v2917_v56 = vrot.slane %v2916_v48, 1  ;;  %v2923_v12 = vmax.f32 %v2921_v52, %v2922_v62  ;;  %v2062_v33 = vmax.f32 %v2060_v61, %v2061_v24 }
 0x1c8   : > { %v3623_v4 = vadd.f32 %v7243_v1, %v2022_v11  ;;  %v2068_v46 = vrot.slane %v2067_v42, 2  ;;  %v2957_v5 = vrot.slane %v2956_v2, 2  ;;  %v2963_v34 = vmax.f32 %v2961_v37, %v2962_v0  ;;  %v7541_v11 = vpop.f32.mrb[29].mxu1 }
 0x1c9   : > { %v3624_v14 = vadd.f32 %v7243_v1, %v2029_v55  ;;  %v2918_v44 = vmax.f32 %v2916_v48, %v2917_v56  ;;  %v2924_v47 = vrot.slane %v2923_v12, 1  ;;  %v2063_v13 = vrot.slane %v2062_v33, 1 }
 0x1ca   : > { %v6299_v54 = vpack.c.bf16 %v7503_v32, %v7503_v32  ;;  %v2069_v30 = vmax.f32 %v2067_v42, %v2068_v46  ;;  %v2958_v28 = vmax.f32 %v2956_v2, %v2957_v5  ;;  %v2964_v49 = vrot.slane %v2963_v34, 2 }
 0x1cb   : > { %v6300_v57 = vpack.c.bf16 %v7508_v25, %v7508_v25  ;;  %v6168_v7 = vpack.c.bf16 %v3624_v14, %v3624_v14  ;;  %v2925_v38 = vmax.f32 %v2923_v12, %v2924_v47  ;;  %v2064_v45 = vmax.f32 %v2062_v33, %v2063_v13 }
 0x1cc   : > { %v3751_v31 = vadd.f32 %v7243_v1, %v2918_v44  ;;  %v2070_v21 = vrot.slane %v2069_v30, 1  ;;  %v2959_v59 = vrot.slane %v2958_v28, 1  ;;  %v2965_v35 = vmax.f32 %v2963_v34, %v2964_v49  ;;  %v7553_v44 = vpop.f32.mrb[30].mxu0 }
 0x1cd   : > { %v6167_v52 = vpack.c.bf16 %v3623_v4, %v3623_v4  ;;  %v4904_v61 = vunpack.c.l.b16 %v6168_v7  ;;  %v3752_v53 = vadd.f32 %v7243_v1, %v2925_v38  ;;  %v3629_v32 = vadd.f32 %v7243_v1, %v2064_v45  ;;  %v7564_v7 = vpop.f32.mrb[30].mxu1 }
 0x1ce   : > { %v2071_v26 = vmax.f32 %v2069_v30, %v2070_v21  ;;  %v2960_v20 = vmax.f32 %v2958_v28, %v2959_v59  ;;  %v2966_v37 = vrot.slane %v2965_v35, 1  ;;  %v1552_v25 = vcombine.high %v7146_v18, %v7146_v18 }
 0x1cf   : > { %v7537_v48 = vunpack.c.l.b16 %v6299_v54  ;;  %v7539_v62 = vunpack.c.l.b16 %v6300_v57  ;;  %v6296_v24 = vpack.c.bf16 %v3752_v53, %v3752_v53  ;;  %v5190_v42 = vrot.slane %v4904_v61, 7 }
 0x1d0   : > { %v6295_v2 = vpack.c.bf16 %v3751_v31, %v3751_v31  ;;  %v3630_v0 = vadd.f32 %v7243_v1, %v2071_v26  ;;  %v2030_v55 = vsel %vm1791_vm3, %v7146_v18, -inf  ;;  %v4903_v12 = vunpack.c.l.b16 %v6167_v52 }
 0x1d1   : > { %v6173_v33 = vpack.c.bf16 %v3629_v32, %v3629_v32  ;;  %v2031_v4 = vrot.slane %v2030_v55, 4  ;;  %v7547_v46 = vunpack.c.l.b16 %v6296_v24  ;;  %v2967_v5 = vmax.f32 %v2965_v35, %v2966_v37 }
 0x1d2   : > { %v7550_v34 = vadd.f32 %v7243_v1, %v2960_v20  ;;  %v2037_v14 = vsel %vm1791_vm3, %v1552_v25, -inf  ;;  %v7558_v30 = vsel %vm5128_vm4, %v5190_v42, %v4903_v12  ;;  %v7560_v28 = vunpack.c.l.b16 %v6295_v2  ;;  %v7583_v42 = vpop.f32.mrb[31].mxu0 }
 0x1d3   : > { %v2032_v18 = vmax.f32 %v2030_v55, %v2031_v4  ;;  %v2038_v54 = vrot.slane %v2037_v14, 4  ;;  %v6174_v49 = vpack.c.bf16 %v3630_v0, %v3630_v0  ;;  %v1616_v57 = vcombine.high %v7166_v6, %v7166_v6 }
 0x1d4   : > { %v7566_v38 = vunpack.c.l.b16 %v6173_v33  ;;  %v2926_v21 = vsel %vm1791_vm3, %v7166_v6, -inf  ;;  %v7572_v35 = vadd.f32 %v7243_v1, %v2967_v5  ;;  %v6301_v52 = vpack.c.bf16 %v7550_v34, %v7550_v34 }
 0x1d5   : > { %v2033_v45 = vrot.slane %v2032_v18, 2  ;;  %v2039_v31 = vmax.f32 %v2037_v14, %v2038_v54  ;;  %v2927_v61 = vrot.slane %v2926_v21, 4  ;;  %v2933_v26 = vsel %vm1791_vm3, %v1616_v57, -inf }
 0x1d6   : > { %v1557_v20 = vcombine.high %v7199_v60, %v7199_v60  ;;  %v7579_v37 = vunpack.c.l.b16 %v6174_v49  ;;  %v2934_v6 = vrot.slane %v2933_v26, 4  ;;  %v2100_v24 = vsel %vm1791_vm3, %v7199_v60, -inf }
 0x1d7   : > { %v2034_v53 = vmax.f32 %v2032_v18, %v2033_v45  ;;  %v2040_v32 = vrot.slane %v2039_v31, 2  ;;  %v2928_v25 = vmax.f32 %v2926_v21, %v2927_v61  ;;  %v2101_v55 = vrot.slane %v2100_v24, 4 }
 0x1d8   : > { %v2107_v12 = vsel %vm1791_vm3, %v1557_v20, -inf  ;;  %v2935_v4 = vmax.f32 %v2933_v26, %v2934_v6  ;;  %v1621_v14 = vcombine.high %v7201_v3, %v7201_v3  ;;  %v2996_v57 = vsel %vm1791_vm3, %v7201_v3, -inf }
 0x1d9   : > { %v2035_v2 = vrot.slane %v2034_v53, 1  ;;  %v2041_v0 = vmax.f32 %v2039_v31, %v2040_v32  ;;  %v2929_v33 = vrot.slane %v2928_v25, 2  ;;  %v2108_v5 = vrot.slane %v2107_v12, 4 }
 0x1da   : > { %v2102_v49 = vmax.f32 %v2100_v24, %v2101_v55  ;;  %v2936_v45 = vrot.slane %v2935_v4, 2  ;;  %v2997_v61 = vrot.slane %v2996_v57, 4  ;;  %v3003_v26 = vsel %vm1791_vm3, %v1621_v14, -inf }
 0x1db   : > { %v2036_v18 = vmax.f32 %v2034_v53, %v2035_v2  ;;  %v2042_v54 = vrot.slane %v2041_v0, 1  ;;  %v2930_v60 = vmax.f32 %v2928_v25, %v2929_v33  ;;  %v2109_v21 = vmax.f32 %v2107_v12, %v2108_v5 }
 0x1dc   : > { %v2103_v20 = vrot.slane %v2102_v49, 2  ;;  %v2937_v13 = vmax.f32 %v2935_v4, %v2936_v45  ;;  %v2998_v56 = vmax.f32 %v2996_v57, %v2997_v61  ;;  %v3004_v55 = vrot.slane %v3003_v26, 4 }
 0x1dd   : > { %v2043_v31 = vmax.f32 %v2041_v0, %v2042_v54  ;;  %v3625_v32 = vadd.f32 %v7243_v1, %v2036_v18  ;;  %v2931_v6 = vrot.slane %v2930_v60, 1  ;;  %v2110_v47 = vrot.slane %v2109_v21, 2 }
 0x1de   : > { %v2104_v2 = vmax.f32 %v2102_v49, %v2103_v20  ;;  %v2938_v25 = vrot.slane %v2937_v13, 1  ;;  %v2999_v12 = vrot.slane %v2998_v56, 2  ;;  %v3005_v18 = vmax.f32 %v3003_v26, %v3004_v55 }
 0x1df   : > { %v3626_v53 = vadd.f32 %v7243_v1, %v2043_v31  ;;  %v6169_v24 = vpack.c.bf16 %v3625_v32, %v3625_v32  ;;  %v2932_v3 = vmax.f32 %v2930_v60, %v2931_v6  ;;  %v2111_v33 = vmax.f32 %v2109_v21, %v2110_v47  ;;  %v7597_v32 = vpop.f32.mrb[31].mxu1 }
 0x1e0   : > { %v2105_v54 = vrot.slane %v2104_v2, 1  ;;  %v2939_v16 = vmax.f32 %v2937_v13, %v2938_v25  ;;  %v3000_v4 = vmax.f32 %v2998_v56, %v2999_v12  ;;  %v3006_v31 = vrot.slane %v3005_v18, 2 }
 0x1e1   : > { %v6170_v5 = vpack.c.bf16 %v3626_v53, %v3626_v53  ;;  %v4905_v0 = vunpack.c.l.b16 %v6169_v24  ;;  %v3753_v14 = vadd.f32 %v7243_v1, %v2932_v3  ;;  %v2112_v59 = vrot.slane %v2111_v33, 1 }
 0x1e2   : > { %v2106_v61 = vmax.f32 %v2104_v2, %v2105_v54  ;;  %v6302_v49 = vpack.c.bf16 %v7572_v35, %v7572_v35  ;;  %v3754_v60 = vadd.f32 %v7243_v1, %v2939_v16  ;;  %v3007_v56 = vmax.f32 %v3005_v18, %v3006_v31 }
 0x1e3   : > { %v4906_v45 = vunpack.c.l.b16 %v6170_v5  ;;  %v5192_v57 = vrot.slane %v4905_v0, 6  ;;  %v6297_v47 = vpack.c.bf16 %v3753_v14, %v3753_v14  ;;  %v2113_v21 = vmax.f32 %v2111_v33, %v2112_v59 }
 0x1e4   : > { %v3635_v26 = vadd.f32 %v7243_v1, %v2106_v61  ;;  %v5200_v6 = vrot.slane %v7566_v38, 2  ;;  %v5037_v53 = vunpack.c.l.b16 %v6301_v52  ;;  %v6298_v35 = vpack.c.bf16 %v3754_v60, %v3754_v60  ;;  %v7614_v1 = vld [vmem:[%s9085_s2] ss:$0 sm:$0xff] }
 0x1e5   : > { %v5193_v13 = vsel %vm5131_vm5, %v5192_v57, %v7558_v30  ;;  %v5194_v20 = vrot.slane %v4906_v45, 5  ;;  %v5033_v24 = vunpack.c.l.b16 %v6297_v47  ;;  %v9099_v16 = vrot.slane %v7547_v46, 7 }
 0x1e6   : > { %v3636_v30 = vadd.f32 %v7614_v1, %v2113_v21  ;;  %v3001_v38 = vrot.slane %v3000_v4, 1  ;;  %v5038_v55 = vunpack.c.l.b16 %v6302_v49  ;;  %v9100_v34 = vrot.slane %v7487_v41, 4 }
 0x1e7   : > { %v5415_v59 = vsel %vm5128_vm4, %v9099_v16, %v7560_v28  ;;  %v5195_v2 = vsel %vm5134_vm6, %v5194_v20, %v5193_v13  ;;  %v5034_v3 = vunpack.c.l.b16 %v6298_v35  ;;  %v5416_v25 = vrot.slane %v5033_v24, 6  ;;  %v7649_v35 = vpop.f32.mrb[32].mxu1 }
 0x1e8   : > { %v5197_v52 = vsel %vm5137_vm7, %v9100_v34, %v5195_v2  ;;  %v5202_v46 = vrot.slane %v7579_v37, 1  ;;  %v9101_v28 = vrot.slane %v7497_v8, 3  ;;  %v6179_v12 = vpack.c.bf16 %v3635_v26, %v3635_v26 }
 0x1e9   : > { %v3008_v5 = vrot.slane %v3007_v56, 1  ;;  %v5417_v54 = vsel %vm5131_vm5, %v5416_v25, %v5415_v59  ;;  %v5418_v18 = vrot.slane %v5034_v3, 5  ;;  %v1555_v41 = vcombine.high %v7212_v19, %v7212_v19 }
 0x1ea   : > { %v5199_v33 = vsel %vm5140_vm8, %v9101_v28, %v5197_v52  ;;  %v5424_v14 = vrot.slane %v5037_v53, 2  ;;  %v6180_v57 = vpack.c.bf16 %v3636_v30, %v3636_v30  ;;  %v3002_v37 = vmax.f32 %v3000_v4, %v3001_v38 }
 0x1eb   : > { %v5201_v0 = vsel %vm5143_vm9, %v5200_v6, %v5199_v33  ;;  %v5426_v61 = vrot.slane %v5038_v55, 1  ;;  %v5419_v31 = vsel %vm5134_vm6, %v5418_v18, %v5417_v54  ;;  %v2072_v49 = vsel %vm1791_vm3, %v7212_v19, -inf }
 0x1ec   : > { %v5203_v45 = vsel %vm5146_vm10, %v5202_v46, %v5201_v0  ;;  %v9102_v60 = vrot.slane %v7537_v48, 4  ;;  %v7635_v21 = vunpack.c.l.b16 %v6179_v12  ;;  %v3009_v13 = vmax.f32 %v3007_v56, %v3008_v5  ;;  %v7647_v48 = vpop.f32.mrb[32].mxu0 }
 0x1ed   : > { %v5586_v8 = vpack.c.b16 %v5203_v45, %v5203_v45  ;;  %v2073_v20 = vrot.slane %v2072_v49, 4  ;;  %v9103_v26 = vrot.slane %v7539_v62, 3  ;;  %v2079_v6 = vsel %vm1791_vm3, %v1555_v41, -inf  ;;  %v7657_v55 = vpop.f32.mrb[33].mxu0 }
 0x1ee   : > { %v5421_v47 = vsel %vm5137_vm7, %v9102_v60, %v5419_v31  ;;  %v1619_v53 = vcombine.high %v7248_v36, %v7248_v36  ;;  %v2968_v19 = vsel %vm1791_vm3, %v7248_v36, -inf  ;;  %v7652_v24 = vunpack.c.l.b16 %v6180_v57 }
 0x1ef   : > { %5650 = vst.msk [vmem:[%s7047_s8 + $0x10] sm:$0xf] %vm1791_vm3, %v5586_v8  ;;  %v5423_v4 = vsel %vm5140_vm8, %v9103_v26, %v5421_v47  ;;  %v3763_v62 = vadd.f32 %v7614_v1, %v3002_v37  ;;  %v2074_v16 = vmax.f32 %v2072_v49, %v2073_v20  ;;  %v2080_v2 = vrot.slane %v2079_v6, 4 }
 0x1f0   : > { %v5425_v56 = vsel %vm5143_vm9, %v5424_v14, %v5423_v4  ;;  %v2969_v30 = vrot.slane %v2968_v19, 4  ;;  %v2975_v38 = vsel %vm1791_vm3, %v1619_v53, -inf  ;;  %v3764_v34 = vadd.f32 %v7614_v1, %v3009_v13 }
 0x1f1   : > { %v5427_v59 = vsel %vm5146_vm10, %v5426_v61, %v5425_v56  ;;  %v2075_v52 = vrot.slane %v2074_v16, 2  ;;  %v2976_v3 = vrot.slane %v2975_v38, 4  ;;  %v2081_v25 = vmax.f32 %v2079_v6, %v2080_v2 }
 0x1f2   : > { %v5602_v36 = vpack.c.b16 %v5427_v59, %v5427_v59  ;;  %v2970_v46 = vmax.f32 %v2968_v19, %v2969_v30  ;;  %v1558_v28 = vcombine.high %v7256_v23, %v7256_v23  ;;  %v2114_v33 = vsel %vm1791_vm3, %v7256_v23, -inf }
 0x1f3   : > { %v2076_v12 = vmax.f32 %v2074_v16, %v2075_v52  ;;  %v2977_v5 = vmax.f32 %v2975_v38, %v2976_v3  ;;  %v2115_v0 = vrot.slane %v2114_v33, 4  ;;  %v1622_v54 = vcombine.high %v7267_v50, %v7267_v50 }
 0x1f4   : > { %5666 = vst.msk [vmem:[%s7047_s8 + $0x50] sm:$0xf] %vm1791_vm3, %v5602_v36  ;;  %v2082_v18 = vrot.slane %v2081_v25, 2  ;;  %v2971_v41 = vrot.slane %v2970_v46, 2  ;;  %v2121_v14 = vsel %vm1791_vm3, %v1558_v28, -inf  ;;  %v3010_v45 = vsel %vm1791_vm3, %v7267_v50, -inf }
 0x1f5   : > { %v2077_v57 = vrot.slane %v2076_v12, 1  ;;  %v2978_v37 = vrot.slane %v2977_v5, 2  ;;  %v2116_v61 = vmax.f32 %v2114_v33, %v2115_v0  ;;  %v2122_v8 = vrot.slane %v2121_v14, 4 }
 0x1f6   : > { %v2083_v23 = vmax.f32 %v2081_v25, %v2082_v18  ;;  %v2972_v31 = vmax.f32 %v2970_v46, %v2971_v41  ;;  %v3011_v49 = vrot.slane %v3010_v45, 4  ;;  %v3017_v60 = vsel %vm1791_vm3, %v1622_v54, -inf }
 0x1f7   : > { %v2078_v47 = vmax.f32 %v2076_v12, %v2077_v57  ;;  %v2979_v13 = vmax.f32 %v2977_v5, %v2978_v37  ;;  %v2117_v20 = vrot.slane %v2116_v61, 2  ;;  %v2123_v26 = vmax.f32 %v2121_v14, %v2122_v8 }
 0x1f8   : > { %v2084_v4 = vrot.slane %v2083_v23, 1  ;;  %v2973_v6 = vrot.slane %v2972_v31, 1  ;;  %v3012_v53 = vmax.f32 %v3010_v45, %v3011_v49  ;;  %v3018_v19 = vrot.slane %v3017_v60, 4 }
 0x1f9   : > { %v6307_v56 = vpack.c.bf16 %v3763_v62, %v3763_v62  ;;  %v2980_v16 = vrot.slane %v2979_v13, 1  ;;  %v2118_v50 = vmax.f32 %v2116_v61, %v2117_v20  ;;  %v2124_v59 = vrot.slane %v2123_v26, 2 }
 0x1fa   : > { %v2085_v2 = vmax.f32 %v2083_v23, %v2084_v4  ;;  %v2974_v30 = vmax.f32 %v2972_v31, %v2973_v6  ;;  %v3013_v38 = vrot.slane %v3012_v53, 2  ;;  %v3019_v36 = vmax.f32 %v3017_v60, %v3018_v19 }
 0x1fb   : > { %v6308_v52 = vpack.c.bf16 %v3764_v34, %v3764_v34  ;;  %v2981_v3 = vmax.f32 %v2979_v13, %v2980_v16  ;;  %v2119_v25 = vrot.slane %v2118_v50, 1  ;;  %v2125_v46 = vmax.f32 %v2123_v26, %v2124_v59 }
 0x1fc   : > { %v3631_v28 = vadd.f32 %v7614_v1, %v2078_v47  ;;  %v3632_v33 = vadd.f32 %v7614_v1, %v2085_v2  ;;  %v3014_v12 = vmax.f32 %v3012_v53, %v3013_v38  ;;  %v3020_v5 = vrot.slane %v3019_v36, 2  ;;  %v7683_v47 = vpop.f32.mrb[33].mxu1 }
 0x1fd   : > { %v3759_v0 = vadd.f32 %v7614_v1, %v2974_v30  ;;  %v3760_v62 = vadd.f32 %v7614_v1, %v2981_v3  ;;  %v2120_v54 = vmax.f32 %v2118_v50, %v2119_v25  ;;  %v2126_v18 = vrot.slane %v2125_v46, 1 }
 0x1fe   : > { %v7676_v41 = vunpack.c.l.b16 %v6307_v56  ;;  %v6176_v14 = vpack.c.bf16 %v3632_v33, %v3632_v33  ;;  %v3015_v45 = vrot.slane %v3014_v12, 1  ;;  %v3021_v34 = vmax.f32 %v3019_v36, %v3020_v5 }
 0x1ff   : > { %v6304_v57 = vpack.c.bf16 %v3760_v62, %v3760_v62  ;;  %v2127_v37 = vmax.f32 %v2125_v46, %v2126_v18  ;;  %v3637_v61 = vadd.f32 %v7614_v1, %v2120_v54  ;;  %v1556_v8 = vcombine.high %v7285_v51, %v7285_v51  ;;  %v7712_v62 = vpop.f32.mrb[34].mxu1 }
 0x200   : > { %v7681_v23 = vunpack.c.l.b16 %v6308_v52  ;;  %v4912_v31 = vunpack.c.l.b16 %v6176_v14  ;;  %v3016_v49 = vmax.f32 %v3014_v12, %v3015_v45  ;;  %v3022_v60 = vrot.slane %v3021_v34, 1  ;;  %v7700_v52 = vpop.f32.mrb[34].mxu0 }
 0x201   : > { %v6175_v13 = vpack.c.bf16 %v3631_v28, %v3631_v28  ;;  %v6303_v20 = vpack.c.bf16 %v3759_v0, %v3759_v0  ;;  %v7685_v26 = vunpack.c.l.b16 %v6304_v57  ;;  %v2086_v4 = vsel %vm1791_vm3, %v7285_v51, -inf }
 0x202   : > { %v7691_v53 = vadd.f32 %v7614_v1, %v2127_v37  ;;  %v3023_v19 = vmax.f32 %v3021_v34, %v3022_v60  ;;  %v2087_v56 = vrot.slane %v2086_v4, 4  ;;  %v6181_v59 = vpack.c.bf16 %v3637_v61, %v3637_v61 }
 0x203   : > { %v2093_v2 = vsel %vm1791_vm3, %v1556_v8, -inf  ;;  %v5204_v38 = vrot.slane %v4912_v31, 7  ;;  %v7698_v36 = vadd.f32 %v7614_v1, %v3016_v49  ;;  %v4911_v3 = vunpack.c.l.b16 %v6175_v13  ;;  %v7727_v13 = vpop.f32.mrb[35].mxu0 }
 0x204   : > { %v2088_v51 = vmax.f32 %v2086_v4, %v2087_v56  ;;  %v7702_v25 = vunpack.c.l.b16 %v6303_v20  ;;  %v2094_v28 = vrot.slane %v2093_v2, 4  ;;  %v7708_v12 = vadd.f32 %v7614_v1, %v3023_v19 }
 0x205   : > { %v1620_v0 = vcombine.high %v7303_v15, %v7303_v15  ;;  %v7714_v54 = vunpack.c.l.b16 %v6181_v59  ;;  %v2982_v14 = vsel %vm1791_vm3, %v7303_v15, -inf  ;;  %v1561_v45 = vcombine.high %v7351_v22, %v7351_v22 }
 0x206   : > { %v2089_v5 = vrot.slane %v2088_v51, 2  ;;  %v2095_v18 = vmax.f32 %v2093_v2, %v2094_v28  ;;  %v5205_v34 = vsel %vm5128_vm4, %v5204_v38, %v4911_v3  ;;  %v2983_v61 = vrot.slane %v2982_v14, 4 }
 0x207   : > { %v2989_v31 = vsel %vm1791_vm3, %v1620_v0, -inf  ;;  %v2156_v49 = vsel %vm1791_vm3, %v7351_v22, -inf  ;;  %v2163_v60 = vsel %vm1791_vm3, %v1561_v45, -inf  ;;  %v6310_v15 = vpack.c.bf16 %v7708_v12, %v7708_v12 }
 0x208   : > { %v2090_v37 = vmax.f32 %v2088_v51, %v2089_v5  ;;  %v2096_v8 = vrot.slane %v2095_v18, 2  ;;  %v2984_v4 = vmax.f32 %v2982_v14, %v2983_v61  ;;  %v2990_v19 = vrot.slane %v2989_v31, 4 }
 0x209   : > { %v2157_v59 = vrot.slane %v2156_v49, 4  ;;  %v2164_v2 = vrot.slane %v2163_v60, 4  ;;  %v1625_v38 = vcombine.high %v7353_v9, %v7353_v9  ;;  %v3052_v22 = vsel %vm1791_vm3, %v7353_v9, -inf }
 0x20a   : > { %v2091_v20 = vrot.slane %v2090_v37, 1  ;;  %v2097_v56 = vmax.f32 %v2095_v18, %v2096_v8  ;;  %v2985_v3 = vrot.slane %v2984_v4, 2  ;;  %v2991_v28 = vmax.f32 %v2989_v31, %v2990_v19 }
 0x20b   : > { %v2158_v0 = vmax.f32 %v2156_v49, %v2157_v59  ;;  %v2165_v45 = vmax.f32 %v2163_v60, %v2164_v2  ;;  %v3053_v30 = vrot.slane %v3052_v22, 4  ;;  %v3059_v18 = vsel %vm1791_vm3, %v1625_v38, -inf }
 0x20c   : > { %v2092_v51 = vmax.f32 %v2090_v37, %v2091_v20  ;;  %v2098_v5 = vrot.slane %v2097_v56, 1  ;;  %v2986_v14 = vmax.f32 %v2984_v4, %v2985_v3  ;;  %v2992_v61 = vrot.slane %v2991_v28, 2 }
 0x20d   : > { %v2159_v50 = vrot.slane %v2158_v0, 2  ;;  %v2166_v16 = vrot.slane %v2165_v45, 2  ;;  %v3054_v6 = vmax.f32 %v3052_v22, %v3053_v30  ;;  %v3060_v19 = vrot.slane %v3059_v18, 4 }
 0x20e   : > { %v3633_v12 = vadd.f32 %v7614_v1, %v2092_v51  ;;  %v2099_v8 = vmax.f32 %v2097_v56, %v2098_v5  ;;  %v2987_v20 = vrot.slane %v2986_v14, 1  ;;  %v2993_v31 = vmax.f32 %v2991_v28, %v2992_v61 }
 0x20f   : > { %v2160_v57 = vmax.f32 %v2158_v0, %v2159_v50  ;;  %v2167_v49 = vmax.f32 %v2165_v45, %v2166_v16  ;;  %v3055_v60 = vrot.slane %v3054_v6, 2  ;;  %v3061_v4 = vmax.f32 %v3059_v18, %v3060_v19  ;;  %v7739_v50 = vpop.f32.mrb[35].mxu1 }
 0x210   : > { %v6177_v37 = vpack.c.bf16 %v3633_v12, %v3633_v12  ;;  %v3634_v9 = vadd.f32 %v7614_v1, %v2099_v8  ;;  %v2988_v2 = vmax.f32 %v2986_v14, %v2987_v20  ;;  %v2994_v51 = vrot.slane %v2993_v31, 1 }
 0x211   : > { %v2161_v33 = vrot.slane %v2160_v57, 1  ;;  %v2168_v38 = vrot.slane %v2167_v49, 1  ;;  %v3056_v56 = vmax.f32 %v3054_v6, %v3055_v60  ;;  %v3062_v22 = vrot.slane %v3061_v4, 2 }
 0x212   : > { %v4913_v59 = vunpack.c.l.b16 %v6177_v37  ;;  %v6178_v3 = vpack.c.bf16 %v3634_v9, %v3634_v9  ;;  %v2995_v46 = vmax.f32 %v2993_v31, %v2994_v51  ;;  %v3761_v30 = vadd.f32 %v7614_v1, %v2988_v2 }
 0x213   : > { %v2162_v12 = vmax.f32 %v2160_v57, %v2161_v33  ;;  %v2169_v61 = vmax.f32 %v2167_v49, %v2168_v38  ;;  %v3057_v8 = vrot.slane %v3056_v56, 1  ;;  %v3063_v14 = vmax.f32 %v3061_v4, %v3062_v22 }
 0x214   : > { %v5206_v5 = vrot.slane %v4913_v59, 6  ;;  %v4914_v28 = vunpack.c.l.b16 %v6178_v3  ;;  %v3762_v0 = vadd.f32 %v7614_v1, %v2995_v46  ;;  %v6305_v45 = vpack.c.bf16 %v3761_v30, %v3761_v30 }
 0x215   : > { %v9104_v6 = vrot.slane %v7685_v26, 7  ;;  %v9105_v37 = vpack.c.bf16 %v7691_v53, %v7691_v53  ;;  %v3643_v57 = vadd.f32 %v7614_v1, %v2162_v12  ;;  %v5214_v31 = vrot.slane %v7714_v54, 2 }
 0x216   : > { %v5207_v16 = vsel %vm5131_vm5, %v5206_v5, %v5205_v34  ;;  %v5208_v33 = vrot.slane %v4914_v28, 5  ;;  %v6306_v19 = vpack.c.bf16 %v3762_v0, %v3762_v0  ;;  %v5041_v34 = vunpack.c.l.b16 %v6305_v45 }
 0x217   : > { %v5429_v18 = vsel %vm5128_vm4, %v9104_v6, %v7702_v25  ;;  %v4918_v20 = vunpack.c.l.b16 %v9105_v37  ;;  %v3644_v46 = vadd.f32 %v7614_v1, %v2169_v61  ;;  %v9106_v9 = vpack.c.bf16 %v7698_v36, %v7698_v36 }
 0x218   : > { %v5046_v26 = vunpack.c.l.b16 %v6310_v15  ;;  %v5209_v25 = vsel %vm5134_vm6, %v5208_v33, %v5207_v16  ;;  %v3058_v60 = vmax.f32 %v3056_v56, %v3057_v8  ;;  %v9107_v53 = vrot.slane %v7635_v21, 4  ;;  %v7780_v33 = vpop.f32.mrb[36].mxu0 }
 0x219   : > { %v5045_v49 = vunpack.c.l.b16 %v9106_v9  ;;  %v5042_v2 = vunpack.c.l.b16 %v6306_v19  ;;  %v5430_v51 = vrot.slane %v5041_v34, 6  ;;  %v3064_v4 = vrot.slane %v3063_v14, 1 }
 0x21a   : > { %v5211_v59 = vsel %vm5137_vm7, %v9107_v53, %v5209_v25  ;;  %v5216_v54 = vrot.slane %v4918_v20, 1  ;;  %v9108_v3 = vrot.slane %v7652_v24, 3  ;;  %v6187_v5 = vpack.c.bf16 %v3643_v57, %v3643_v57  ;;  %v7782_v57 = vpop.f32.mrb[36].mxu1  ;;  %v7802_v53 = vpop.f32.mrb[37].mxu0 }
 0x21b   : > { %v1559_v36 = vcombine.high %v7362_v43, %v7362_v43  ;;  %v5431_v56 = vsel %vm5131_vm5, %v5430_v51, %v5429_v18  ;;  %v5432_v30 = vrot.slane %v5042_v2, 5  ;;  %v6188_v21 = vpack.c.bf16 %v3644_v46, %v3644_v46 }
 0x21c   : > { %v5213_v38 = vsel %vm5140_vm8, %v9108_v3, %v5211_v59  ;;  %v5438_v22 = vrot.slane %v5045_v49, 2  ;;  %v5440_v28 = vrot.slane %v5046_v26, 1  ;;  %v7769_v61 = vadd.f32 %v7614_v1, %v3058_v60 }
 0x21d   : > { %v5215_v15 = vsel %vm5143_vm9, %v5214_v31, %v5213_v38  ;;  %v5433_v8 = vsel %vm5134_vm6, %v5432_v30, %v5431_v56  ;;  %v3065_v16 = vmax.f32 %v3063_v14, %v3064_v4  ;;  %v2128_v0 = vsel %vm1791_vm3, %v7362_v43, -inf }
 0x21e   : > { %v5217_v12 = vsel %vm5146_vm10, %v5216_v54, %v5215_v15  ;;  %v9109_v45 = vrot.slane %v7676_v41, 4  ;;  %v7777_v18 = vunpack.c.l.b16 %v6187_v5  ;;  %v2129_v37 = vrot.slane %v2128_v0, 4 }
 0x21f   : > { %v5587_v24 = vpack.c.b16 %v5217_v12, %v5217_v12  ;;  %v2135_v20 = vsel %vm1791_vm3, %v1559_v36, -inf  ;;  %v9110_v14 = vrot.slane %v7681_v23, 3  ;;  %v7789_v43 = vunpack.c.l.b16 %v6188_v21 }
 0x220   : > { %v5435_v6 = vsel %vm5137_vm7, %v9109_v45, %v5433_v8  ;;  %v2136_v41 = vrot.slane %v2135_v20, 4  ;;  %v1623_v19 = vcombine.high %v7390_v29, %v7390_v29  ;;  %v2130_v46 = vmax.f32 %v2128_v0, %v2129_v37 }
 0x221   : > { %5651 = vst.msk [vmem:[%s7047_s8 + $0x14] sm:$0xf] %vm1791_vm3, %v5587_v24  ;;  %v5437_v31 = vsel %vm5140_vm8, %v9110_v14, %v5435_v6  ;;  %v3024_v9 = vsel %vm1791_vm3, %v7390_v29, -inf  ;;  %v1562_v49 = vcombine.high %v7407_v10, %v7407_v10  ;;  %v7800_v26 = vadd.f32 %v7614_v1, %v3065_v16 }
 0x222   : > { %v5439_v34 = vsel %vm5143_vm9, %v5438_v22, %v5437_v31  ;;  %v2137_v25 = vmax.f32 %v2135_v20, %v2136_v41  ;;  %v3025_v60 = vrot.slane %v3024_v9, 4  ;;  %v2131_v2 = vrot.slane %v2130_v46, 2 }
 0x223   : > { %v5441_v23 = vsel %vm5146_vm10, %v5440_v28, %v5439_v34  ;;  %v3031_v51 = vsel %vm1791_vm3, %v1623_v19, -inf  ;;  %v2170_v4 = vsel %vm1791_vm3, %v7407_v10, -inf  ;;  %v2177_v36 = vsel %vm1791_vm3, %v1562_v49, -inf }
 0x224   : > { %v5603_v59 = vpack.c.b16 %v5441_v23, %v5441_v23  ;;  %v2138_v29 = vrot.slane %v2137_v25, 2  ;;  %v3026_v54 = vmax.f32 %v3024_v9, %v3025_v60  ;;  %v3032_v3 = vrot.slane %v3031_v51, 4 }
 0x225   : > { %v2171_v38 = vrot.slane %v2170_v4, 4  ;;  %v2132_v5 = vmax.f32 %v2130_v46, %v2131_v2  ;;  %v1626_v15 = vcombine.high %v7422_v17, %v7422_v17  ;;  %v3066_v56 = vsel %vm1791_vm3, %v7422_v17, -inf }
 0x226   : > { %5667 = vst.msk [vmem:[%s7047_s8 + $0x54] sm:$0xf] %vm1791_vm3, %v5603_v59  ;;  %v2139_v30 = vmax.f32 %v2137_v25, %v2138_v29  ;;  %v3027_v21 = vrot.slane %v3026_v54, 2  ;;  %v3033_v22 = vmax.f32 %v3031_v51, %v3032_v3  ;;  %v2178_v12 = vrot.slane %v2177_v36, 4 }
 0x227   : > { %v2172_v28 = vmax.f32 %v2170_v4, %v2171_v38  ;;  %v2133_v10 = vrot.slane %v2132_v5, 1  ;;  %v3067_v24 = vrot.slane %v3066_v56, 4  ;;  %v3073_v8 = vsel %vm1791_vm3, %v1626_v15, -inf }
 0x228   : > { %v2140_v16 = vrot.slane %v2139_v30, 1  ;;  %v3028_v0 = vmax.f32 %v3026_v54, %v3027_v21  ;;  %v3034_v45 = vrot.slane %v3033_v22, 2  ;;  %v2179_v20 = vmax.f32 %v2177_v36, %v2178_v12 }
 0x229   : > { %v2173_v6 = vrot.slane %v2172_v28, 2  ;;  %v2134_v37 = vmax.f32 %v2132_v5, %v2133_v10  ;;  %v3068_v14 = vmax.f32 %v3066_v56, %v3067_v24  ;;  %v3074_v31 = vrot.slane %v3073_v8, 4 }
 0x22a   : > { %v2141_v41 = vmax.f32 %v2139_v30, %v2140_v16  ;;  %v3029_v19 = vrot.slane %v3028_v0, 1  ;;  %v3035_v17 = vmax.f32 %v3033_v22, %v3034_v45  ;;  %v2180_v9 = vrot.slane %v2179_v20, 2 }
 0x22b   : > { %v2174_v34 = vmax.f32 %v2172_v28, %v2173_v6  ;;  %v3639_v46 = vadd.f32 %v7614_v1, %v2134_v37  ;;  %v3069_v49 = vrot.slane %v3068_v14, 2  ;;  %v3075_v23 = vmax.f32 %v3073_v8, %v3074_v31  ;;  %v7831_v37 = vpop.f32.mrb[37].mxu1 }
 0x22c   : > { %v3640_v25 = vadd.f32 %v7614_v1, %v2141_v41  ;;  %v3030_v60 = vmax.f32 %v3028_v0, %v3029_v19  ;;  %v3036_v59 = vrot.slane %v3035_v17, 1  ;;  %v6315_v51 = vpack.c.bf16 %v7769_v61, %v7769_v61 }
 0x22d   : > { %v2175_v2 = vrot.slane %v2174_v34, 1  ;;  %v2181_v4 = vmax.f32 %v2179_v20, %v2180_v9  ;;  %v3070_v29 = vmax.f32 %v3068_v14, %v3069_v49  ;;  %v3076_v54 = vrot.slane %v3075_v23, 2 }
 0x22e   : > { %v6316_v3 = vpack.c.bf16 %v7800_v26, %v7800_v26  ;;  %v6184_v38 = vpack.c.bf16 %v3640_v25, %v3640_v25  ;;  %v3037_v5 = vmax.f32 %v3035_v17, %v3036_v59  ;;  %v3767_v15 = vadd.f32 %v7614_v1, %v3030_v60  ;;  %v7843_v60 = vpop.f32.mrb[38].mxu0 }
 0x22f   : > { %v2176_v36 = vmax.f32 %v2174_v34, %v2175_v2  ;;  %v2182_v56 = vrot.slane %v2181_v4, 1  ;;  %v3071_v30 = vrot.slane %v3070_v29, 1  ;;  %v3077_v21 = vmax.f32 %v3075_v23, %v3076_v54 }
 0x230   : > { %v6183_v22 = vpack.c.bf16 %v3639_v46, %v3639_v46  ;;  %v4920_v28 = vunpack.c.l.b16 %v6184_v38  ;;  %v3768_v10 = vadd.f32 %v7614_v1, %v3037_v5  ;;  %v1560_v26 = vcombine.high %v7435_v40, %v7435_v40  ;;  %v7854_v38 = vpop.f32.mrb[38].mxu1 }
 0x231   : > { %v3645_v61 = vadd.f32 %v7614_v1, %v2176_v36  ;;  %v2183_v12 = vmax.f32 %v2181_v4, %v2182_v56  ;;  %v3072_v24 = vmax.f32 %v3070_v29, %v3071_v30  ;;  %v3078_v8 = vrot.slane %v3077_v21, 1 }
 0x232   : > { %v7827_v0 = vunpack.c.l.b16 %v6315_v51  ;;  %v7829_v45 = vunpack.c.l.b16 %v6316_v3  ;;  %v6312_v6 = vpack.c.bf16 %v3768_v10, %v3768_v10  ;;  %v5218_v20 = vrot.slane %v4920_v28, 7 }
 0x233   : > { %v6311_v14 = vpack.c.bf16 %v3767_v15, %v3767_v15  ;;  %v3646_v31 = vadd.f32 %v7614_v1, %v2183_v12  ;;  %v2142_v41 = vsel %vm1791_vm3, %v7435_v40, -inf  ;;  %v4919_v17 = vunpack.c.l.b16 %v6183_v22 }
 0x234   : > { %v6189_v34 = vpack.c.bf16 %v3645_v61, %v3645_v61  ;;  %v2143_v46 = vrot.slane %v2142_v41, 4  ;;  %v7837_v9 = vunpack.c.l.b16 %v6312_v6  ;;  %v3079_v49 = vmax.f32 %v3077_v21, %v3078_v8 }
 0x235   : > { %v7840_v23 = vadd.f32 %v7614_v1, %v3072_v24  ;;  %v2149_v25 = vsel %vm1791_vm3, %v1560_v26, -inf  ;;  %v7848_v4 = vsel %vm5128_vm4, %v5218_v20, %v4919_v17  ;;  %v7850_v29 = vunpack.c.l.b16 %v6311_v14  ;;  %v7873_v20 = vpop.f32.mrb[39].mxu0 }
 0x236   : > { %v2144_v40 = vmax.f32 %v2142_v41, %v2143_v46  ;;  %v2150_v51 = vrot.slane %v2149_v25, 4  ;;  %v6190_v54 = vpack.c.bf16 %v3646_v31, %v3646_v31  ;;  %v1624_v3 = vcombine.high %v7449_v63, %v7449_v63 }
 0x237   : > { %v7856_v5 = vunpack.c.l.b16 %v6189_v34  ;;  %v3038_v56 = vsel %vm1791_vm3, %v7449_v63, -inf  ;;  %v7862_v21 = vadd.f32 %v7614_v1, %v3079_v49  ;;  %v6317_v22 = vpack.c.bf16 %v7840_v23, %v7840_v23 }
 0x238   : > { %v2145_v36 = vrot.slane %v2144_v40, 2  ;;  %v2151_v15 = vmax.f32 %v2149_v25, %v2150_v51  ;;  %v3039_v28 = vrot.slane %v3038_v56, 4  ;;  %v3045_v12 = vsel %vm1791_vm3, %v1624_v3, -inf }
 0x239   : > { %v1565_v24 = vcombine.high %v7490_v58, %v7490_v58  ;;  %v7869_v8 = vunpack.c.l.b16 %v6190_v54  ;;  %v3046_v63 = vrot.slane %v3045_v12, 4  ;;  %v2212_v6 = vsel %vm1791_vm3, %v7490_v58, -inf }
 0x23a   : > { %v2146_v10 = vmax.f32 %v2144_v40, %v2145_v36  ;;  %v2152_v61 = vrot.slane %v2151_v15, 2  ;;  %v3040_v26 = vmax.f32 %v3038_v56, %v3039_v28  ;;  %v2213_v41 = vrot.slane %v2212_v6, 4 }
 0x23b   : > { %v2219_v17 = vsel %vm1791_vm3, %v1565_v24, -inf  ;;  %v3047_v46 = vmax.f32 %v3045_v12, %v3046_v63  ;;  %v1629_v25 = vcombine.high %v7492_v39, %v7492_v39  ;;  %v3108_v3 = vsel %vm1791_vm3, %v7492_v39, -inf }
 0x23c   : > { %v2147_v14 = vrot.slane %v2146_v10, 1  ;;  %v2153_v31 = vmax.f32 %v2151_v15, %v2152_v61  ;;  %v3041_v34 = vrot.slane %v3040_v26, 2  ;;  %v2220_v49 = vrot.slane %v2219_v17, 4 }
 0x23d   : > { %v2214_v54 = vmax.f32 %v2212_v6, %v2213_v41  ;;  %v3048_v36 = vrot.slane %v3047_v46, 2  ;;  %v3109_v28 = vrot.slane %v3108_v3, 4  ;;  %v3115_v12 = vsel %vm1791_vm3, %v1629_v25, -inf }
 0x23e   : > { %v2148_v40 = vmax.f32 %v2146_v10, %v2147_v14  ;;  %v2154_v51 = vrot.slane %v2153_v31, 1  ;;  %v3042_v58 = vmax.f32 %v3040_v26, %v3041_v34  ;;  %v2221_v56 = vmax.f32 %v2219_v17, %v2220_v49 }
 0x23f   : > { %v2215_v24 = vrot.slane %v2214_v54, 2  ;;  %v3049_v2 = vmax.f32 %v3047_v46, %v3048_v36  ;;  %v3110_v19 = vmax.f32 %v3108_v3, %v3109_v28  ;;  %v3116_v41 = vrot.slane %v3115_v12, 4 }
 0x240   : > { %v2155_v15 = vmax.f32 %v2153_v31, %v2154_v51  ;;  %v3641_v61 = vadd.f32 %v7614_v1, %v2148_v40  ;;  %v3043_v63 = vrot.slane %v3042_v58, 1  ;;  %v2222_v59 = vrot.slane %v2221_v56, 2 }
 0x241   : > { %v2216_v14 = vmax.f32 %v2214_v54, %v2215_v24  ;;  %v3050_v26 = vrot.slane %v3049_v2, 1  ;;  %v3111_v17 = vrot.slane %v3110_v19, 2  ;;  %v3117_v40 = vmax.f32 %v3115_v12, %v3116_v41 }
 0x242   : > { %v3642_v10 = vadd.f32 %v7614_v1, %v2155_v15  ;;  %v6185_v6 = vpack.c.bf16 %v3641_v61, %v3641_v61  ;;  %v3044_v39 = vmax.f32 %v3042_v58, %v3043_v63  ;;  %v2223_v34 = vmax.f32 %v2221_v56, %v2222_v59  ;;  %v7887_v61 = vpop.f32.mrb[39].mxu1 }
 0x243   : > { %v2217_v51 = vrot.slane %v2216_v14, 1  ;;  %v3051_v16 = vmax.f32 %v3049_v2, %v3050_v26  ;;  %v3112_v46 = vmax.f32 %v3110_v19, %v3111_v17  ;;  %v3118_v15 = vrot.slane %v3117_v40, 2 }
 0x244   : > { %v6186_v49 = vpack.c.bf16 %v3642_v10, %v3642_v10  ;;  %v4921_v31 = vunpack.c.l.b16 %v6185_v6  ;;  %v3769_v25 = vadd.f32 %v7614_v1, %v3044_v39  ;;  %v2224_v30 = vrot.slane %v2223_v34, 1 }
 0x245   : > { %v2218_v28 = vmax.f32 %v2216_v14, %v2217_v51  ;;  %v6318_v54 = vpack.c.bf16 %v7862_v21, %v7862_v21  ;;  %v3770_v58 = vadd.f32 %v7614_v1, %v3051_v16  ;;  %v3119_v19 = vmax.f32 %v3117_v40, %v3118_v15 }
 0x246   : > { %v4922_v36 = vunpack.c.l.b16 %v6186_v49  ;;  %v5220_v3 = vrot.slane %v4921_v31, 6  ;;  %v6313_v59 = vpack.c.bf16 %v3769_v25, %v3769_v25  ;;  %v2225_v56 = vmax.f32 %v2223_v34, %v2224_v30 }
 0x247   : > { %v3651_v12 = vadd.f32 %v7614_v1, %v2218_v28  ;;  %v5228_v63 = vrot.slane %v7856_v5, 2  ;;  %v5053_v10 = vunpack.c.l.b16 %v6317_v22  ;;  %v6314_v21 = vpack.c.bf16 %v3770_v58, %v3770_v58 }
 0x248   : > { %v5221_v2 = vsel %vm5131_vm5, %v5220_v3, %v7848_v4  ;;  %v5222_v24 = vrot.slane %v4922_v36, 5  ;;  %v5049_v6 = vunpack.c.l.b16 %v6313_v59  ;;  %v9111_v16 = vrot.slane %v7837_v9, 7 }
 0x249   : > { %v3652_v4 = vadd.f32 %v7614_v1, %v2225_v56  ;;  %v3113_v41 = vrot.slane %v3112_v46, 1  ;;  %v5054_v39 = vunpack.c.l.b16 %v6318_v54  ;;  %v9112_v26 = vrot.slane %v7777_v18, 4 }
 0x24a   : > { %v5443_v30 = vsel %vm5128_vm4, %v9111_v16, %v7850_v29  ;;  %v5223_v14 = vsel %vm5134_vm6, %v5222_v24, %v5221_v2  ;;  %v5050_v34 = vunpack.c.l.b16 %v6314_v21  ;;  %v5444_v23 = vrot.slane %v5049_v6, 6  ;;  %v7934_v21 = vpop.f32.mrb[40].mxu1 }
 0x24b   : > { %v5225_v5 = vsel %vm5137_vm7, %v9112_v26, %v5223_v14  ;;  %v5230_v22 = vrot.slane %v7869_v8, 1  ;;  %v9113_v17 = vrot.slane %v7789_v43, 3  ;;  %v6195_v49 = vpack.c.bf16 %v3651_v12, %v3651_v12 }
 0x24c   : > { %v3120_v29 = vrot.slane %v3119_v19, 1  ;;  %v5445_v51 = vsel %vm5131_vm5, %v5444_v23, %v5443_v30  ;;  %v5446_v40 = vrot.slane %v5050_v34, 5  ;;  %v1563_v18 = vcombine.high %v7510_v27, %v7510_v27 }
 0x24d   : > { %v5227_v9 = vsel %vm5140_vm8, %v9113_v17, %v5225_v5  ;;  %v5452_v25 = vrot.slane %v5053_v10, 2  ;;  %v6196_v3 = vpack.c.bf16 %v3652_v4, %v3652_v4  ;;  %v3114_v8 = vmax.f32 %v3112_v46, %v3113_v41 }
 0x24e   : > { %v5229_v31 = vsel %vm5143_vm9, %v5228_v63, %v5227_v9  ;;  %v5454_v28 = vrot.slane %v5054_v39, 1  ;;  %v5447_v15 = vsel %vm5134_vm6, %v5446_v40, %v5445_v51  ;;  %v2184_v54 = vsel %vm1791_vm3, %v7510_v27, -inf }
 0x24f   : > { %v5231_v36 = vsel %vm5146_vm10, %v5230_v22, %v5229_v31  ;;  %v9114_v58 = vrot.slane %v7827_v0, 4  ;;  %v7920_v56 = vunpack.c.l.b16 %v6195_v49  ;;  %v3121_v2 = vmax.f32 %v3119_v19, %v3120_v29  ;;  %v7932_v0 = vpop.f32.mrb[40].mxu0 }
 0x250   : > { %v5588_v43 = vpack.c.b16 %v5231_v36, %v5231_v36  ;;  %v2185_v24 = vrot.slane %v2184_v54, 4  ;;  %v9115_v12 = vrot.slane %v7829_v45, 3  ;;  %v2191_v63 = vsel %vm1791_vm3, %v1563_v18, -inf  ;;  %v7942_v39 = vpop.f32.mrb[41].mxu0 }
 0x251   : > { %v5449_v59 = vsel %vm5137_vm7, %v9114_v58, %v5447_v15  ;;  %v1627_v10 = vcombine.high %v7541_v11, %v7541_v11  ;;  %v3080_v27 = vsel %vm1791_vm3, %v7541_v11, -inf  ;;  %v7937_v6 = vunpack.c.l.b16 %v6196_v3 }
 0x252   : > { %5652 = vst.msk [vmem:[%s7047_s8 + $0x18] sm:$0xf] %vm1791_vm3, %v5588_v43  ;;  %v5451_v46 = vsel %vm5140_vm8, %v9115_v12, %v5449_v59  ;;  %v3779_v45 = vadd.f32 %v7614_v1, %v3114_v8  ;;  %v2186_v16 = vmax.f32 %v2184_v54, %v2185_v24  ;;  %v2192_v14 = vrot.slane %v2191_v63, 4 }
 0x253   : > { %v5453_v19 = vsel %vm5143_vm9, %v5452_v25, %v5451_v46  ;;  %v3081_v4 = vrot.slane %v3080_v27, 4  ;;  %v3087_v41 = vsel %vm1791_vm3, %v1627_v10, -inf  ;;  %v3780_v26 = vadd.f32 %v7614_v1, %v3121_v2 }
 0x254   : > { %v5455_v30 = vsel %vm5146_vm10, %v5454_v28, %v5453_v19  ;;  %v2187_v5 = vrot.slane %v2186_v16, 2  ;;  %v3088_v34 = vrot.slane %v3087_v41, 4  ;;  %v2193_v23 = vmax.f32 %v2191_v63, %v2192_v14 }
 0x255   : > { %v5604_v11 = vpack.c.b16 %v5455_v30, %v5455_v30  ;;  %v3082_v22 = vmax.f32 %v3080_v27, %v3081_v4  ;;  %v1566_v17 = vcombine.high %v7553_v44, %v7553_v44  ;;  %v2226_v9 = vsel %vm1791_vm3, %v7553_v44, -inf }
 0x256   : > { %v2188_v49 = vmax.f32 %v2186_v16, %v2187_v5  ;;  %v3089_v29 = vmax.f32 %v3087_v41, %v3088_v34  ;;  %v2227_v31 = vrot.slane %v2226_v9, 4  ;;  %v1630_v51 = vcombine.high %v7564_v7, %v7564_v7 }
 0x257   : > { %5668 = vst.msk [vmem:[%s7047_s8 + $0x58] sm:$0xf] %vm1791_vm3, %v5604_v11  ;;  %v2194_v40 = vrot.slane %v2193_v23, 2  ;;  %v3083_v18 = vrot.slane %v3082_v22, 2  ;;  %v2233_v25 = vsel %vm1791_vm3, %v1566_v17, -inf  ;;  %v3122_v36 = vsel %vm1791_vm3, %v7564_v7, -inf }
 0x258   : > { %v2189_v3 = vrot.slane %v2188_v49, 1  ;;  %v3090_v8 = vrot.slane %v3089_v29, 2  ;;  %v2228_v28 = vmax.f32 %v2226_v9, %v2227_v31  ;;  %v2234_v43 = vrot.slane %v2233_v25, 4 }
 0x259   : > { %v2195_v44 = vmax.f32 %v2193_v23, %v2194_v40  ;;  %v3084_v15 = vmax.f32 %v3082_v22, %v3083_v18  ;;  %v3123_v54 = vrot.slane %v3122_v36, 4  ;;  %v3129_v58 = vsel %vm1791_vm3, %v1630_v51, -inf }
 0x25a   : > { %v2190_v59 = vmax.f32 %v2188_v49, %v2189_v3  ;;  %v3091_v2 = vmax.f32 %v3089_v29, %v3090_v8  ;;  %v2229_v24 = vrot.slane %v2228_v28, 2  ;;  %v2235_v12 = vmax.f32 %v2233_v25, %v2234_v43 }
 0x25b   : > { %v2196_v46 = vrot.slane %v2195_v44, 1  ;;  %v3085_v63 = vrot.slane %v3084_v15, 1  ;;  %v3124_v10 = vmax.f32 %v3122_v36, %v3123_v54  ;;  %v3130_v27 = vrot.slane %v3129_v58, 4 }
 0x25c   : > { %v6323_v19 = vpack.c.bf16 %v3779_v45, %v3779_v45  ;;  %v3092_v16 = vrot.slane %v3091_v2, 1  ;;  %v2230_v7 = vmax.f32 %v2228_v28, %v2229_v24  ;;  %v2236_v30 = vrot.slane %v2235_v12, 2  ;;  %v7966_v28 = vld [vmem:[%s9085_s2] ss:$0 sm:$0xff] }
 0x25d   : > { %v2197_v14 = vmax.f32 %v2195_v44, %v2196_v46  ;;  %v3086_v4 = vmax.f32 %v3084_v15, %v3085_v63  ;;  %v3125_v41 = vrot.slane %v3124_v10, 2  ;;  %v3131_v11 = vmax.f32 %v3129_v58, %v3130_v27 }
 0x25e   : > { %v6324_v5 = vpack.c.bf16 %v3780_v26, %v3780_v26  ;;  %v3093_v34 = vmax.f32 %v3091_v2, %v3092_v16  ;;  %v2231_v23 = vrot.slane %v2230_v7, 1  ;;  %v2237_v22 = vmax.f32 %v2235_v12, %v2236_v30 }
 0x25f   : > { %v3647_v17 = vadd.f32 %v7614_v1, %v2190_v59  ;;  %v3648_v9 = vadd.f32 %v7614_v1, %v2197_v14  ;;  %v3126_v49 = vmax.f32 %v3124_v10, %v3125_v41  ;;  %v3132_v29 = vrot.slane %v3131_v11, 2  ;;  %v7973_v59 = vpop.f32.mrb[41].mxu1 }
 0x260   : > { %v3775_v31 = vadd.f32 %v7614_v1, %v3086_v4  ;;  %v3776_v45 = vadd.f32 %v7614_v1, %v3093_v34  ;;  %v2232_v51 = vmax.f32 %v2230_v7, %v2231_v23  ;;  %v2238_v40 = vrot.slane %v2237_v22, 1 }
 0x261   : > { %v7961_v18 = vunpack.c.l.b16 %v6323_v19  ;;  %v6192_v25 = vpack.c.bf16 %v3648_v9, %v3648_v9  ;;  %v3127_v36 = vrot.slane %v3126_v49, 1  ;;  %v3133_v26 = vmax.f32 %v3131_v11, %v3132_v29 }
 0x262   : > { %v6320_v3 = vpack.c.bf16 %v3776_v45, %v3776_v45  ;;  %v2239_v8 = vmax.f32 %v2237_v22, %v2238_v40  ;;  %v3653_v43 = vadd.f32 %v7966_v28, %v2232_v51  ;;  %v1564_v44 = vcombine.high %v7583_v42, %v7583_v42  ;;  %v8002_v45 = vpop.f32.mrb[42].mxu1 }
 0x263   : > { %v7971_v1 = vunpack.c.l.b16 %v6324_v5  ;;  %v4928_v15 = vunpack.c.l.b16 %v6192_v25  ;;  %v3128_v54 = vmax.f32 %v3126_v49, %v3127_v36  ;;  %v3134_v58 = vrot.slane %v3133_v26, 1  ;;  %v7990_v5 = vpop.f32.mrb[42].mxu0 }
 0x264   : > { %v6191_v2 = vpack.c.bf16 %v3647_v17, %v3647_v17  ;;  %v6319_v24 = vpack.c.bf16 %v3775_v31, %v3775_v31  ;;  %v7975_v12 = vunpack.c.l.b16 %v6320_v3  ;;  %v2198_v46 = vsel %vm1791_vm3, %v7583_v42, -inf }
 0x265   : > { %v7981_v10 = vadd.f32 %v7966_v28, %v2239_v8  ;;  %v3135_v27 = vmax.f32 %v3133_v26, %v3134_v58  ;;  %v2199_v19 = vrot.slane %v2198_v46, 4  ;;  %v6197_v30 = vpack.c.bf16 %v3653_v43, %v3653_v43 }
 0x266   : > { %v2205_v14 = vsel %vm1791_vm3, %v1564_v44, -inf  ;;  %v5232_v41 = vrot.slane %v4928_v15, 7  ;;  %v7988_v11 = vadd.f32 %v7966_v28, %v3128_v54  ;;  %v4927_v34 = vunpack.c.l.b16 %v6191_v2  ;;  %v8017_v2 = vpop.f32.mrb[43].mxu0 }
 0x267   : > { %v2200_v42 = vmax.f32 %v2198_v46, %v2199_v19  ;;  %v7992_v23 = vunpack.c.l.b16 %v6319_v24  ;;  %v2206_v17 = vrot.slane %v2205_v14, 4  ;;  %v7998_v49 = vadd.f32 %v7966_v28, %v3135_v27 }
 0x268   : > { %v1628_v31 = vcombine.high %v7597_v32, %v7597_v32  ;;  %v8004_v51 = vunpack.c.l.b16 %v6197_v30  ;;  %v3094_v25 = vsel %vm1791_vm3, %v7597_v32, -inf  ;;  %v1569_v36 = vcombine.high %v7647_v48, %v7647_v48 }
 0x269   : > { %v2201_v29 = vrot.slane %v2200_v42, 2  ;;  %v2207_v40 = vmax.f32 %v2205_v14, %v2206_v17  ;;  %v5233_v26 = vsel %vm5128_vm4, %v5232_v41, %v4927_v34  ;;  %v3095_v43 = vrot.slane %v3094_v25, 4 }
 0x26a   : > { %v3101_v15 = vsel %vm1791_vm3, %v1628_v31, -inf  ;;  %v2268_v54 = vsel %vm1791_vm3, %v7647_v48, -inf  ;;  %v2275_v58 = vsel %vm1791_vm3, %v1569_v36, -inf  ;;  %v6326_v32 = vpack.c.bf16 %v7998_v49, %v7998_v49 }
 0x26b   : > { %v2202_v8 = vmax.f32 %v2200_v42, %v2201_v29  ;;  %v2208_v44 = vrot.slane %v2207_v40, 2  ;;  %v3096_v46 = vmax.f32 %v3094_v25, %v3095_v43  ;;  %v3102_v27 = vrot.slane %v3101_v15, 4 }
 0x26c   : > { %v2269_v30 = vrot.slane %v2268_v54, 4  ;;  %v2276_v14 = vrot.slane %v2275_v58, 4  ;;  %v1633_v41 = vcombine.high %v7649_v35, %v7649_v35  ;;  %v3164_v48 = vsel %vm1791_vm3, %v7649_v35, -inf }
 0x26d   : > { %v2203_v24 = vrot.slane %v2202_v8, 1  ;;  %v2209_v19 = vmax.f32 %v2207_v40, %v2208_v44  ;;  %v3097_v34 = vrot.slane %v3096_v46, 2  ;;  %v3103_v17 = vmax.f32 %v3101_v15, %v3102_v27 }
 0x26e   : > { %v2270_v31 = vmax.f32 %v2268_v54, %v2269_v30  ;;  %v2277_v36 = vmax.f32 %v2275_v58, %v2276_v14  ;;  %v3165_v4 = vrot.slane %v3164_v48, 4  ;;  %v3171_v40 = vsel %vm1791_vm3, %v1633_v41, -inf }
 0x26f   : > { %v2204_v42 = vmax.f32 %v2202_v8, %v2203_v24  ;;  %v2210_v29 = vrot.slane %v2209_v19, 1  ;;  %v3098_v25 = vmax.f32 %v3096_v46, %v3097_v34  ;;  %v3104_v43 = vrot.slane %v3103_v17, 2 }
 0x270   : > { %v2271_v7 = vrot.slane %v2270_v31, 2  ;;  %v2278_v16 = vrot.slane %v2277_v36, 2  ;;  %v3166_v63 = vmax.f32 %v3164_v48, %v3165_v4  ;;  %v3172_v27 = vrot.slane %v3171_v40, 4 }
 0x271   : > { %v3649_v49 = vadd.f32 %v7966_v28, %v2204_v42  ;;  %v2211_v44 = vmax.f32 %v2209_v19, %v2210_v29  ;;  %v3099_v24 = vrot.slane %v3098_v25, 1  ;;  %v3105_v15 = vmax.f32 %v3103_v17, %v3104_v43 }
 0x272   : > { %v2272_v3 = vmax.f32 %v2270_v31, %v2271_v7  ;;  %v2279_v54 = vmax.f32 %v2277_v36, %v2278_v16  ;;  %v3167_v58 = vrot.slane %v3166_v63, 2  ;;  %v3173_v46 = vmax.f32 %v3171_v40, %v3172_v27  ;;  %v8029_v7 = vpop.f32.mrb[43].mxu1 }
 0x273   : > { %v6193_v8 = vpack.c.bf16 %v3649_v49, %v3649_v49  ;;  %v3650_v35 = vadd.f32 %v7966_v28, %v2211_v44  ;;  %v3100_v14 = vmax.f32 %v3098_v25, %v3099_v24  ;;  %v3106_v42 = vrot.slane %v3105_v15, 1 }
 0x274   : > { %v2273_v9 = vrot.slane %v2272_v3, 1  ;;  %v2280_v41 = vrot.slane %v2279_v54, 1  ;;  %v3168_v19 = vmax.f32 %v3166_v63, %v3167_v58  ;;  %v3174_v48 = vrot.slane %v3173_v46, 2 }
 0x275   : > { %v4929_v30 = vunpack.c.l.b16 %v6193_v8  ;;  %v6194_v34 = vpack.c.bf16 %v3650_v35, %v3650_v35  ;;  %v3107_v22 = vmax.f32 %v3105_v15, %v3106_v42  ;;  %v3777_v4 = vadd.f32 %v7966_v28, %v3100_v14 }
 0x276   : > { %v2274_v49 = vmax.f32 %v2272_v3, %v2273_v9  ;;  %v2281_v43 = vmax.f32 %v2279_v54, %v2280_v41  ;;  %v3169_v44 = vrot.slane %v3168_v19, 1  ;;  %v3175_v25 = vmax.f32 %v3173_v46, %v3174_v48 }
 0x277   : > { %v5234_v29 = vrot.slane %v4929_v30, 6  ;;  %v4930_v17 = vunpack.c.l.b16 %v6194_v34  ;;  %v3778_v31 = vadd.f32 %v7966_v28, %v3107_v22  ;;  %v6321_v36 = vpack.c.bf16 %v3777_v4, %v3777_v4 }
 0x278   : > { %v9116_v63 = vrot.slane %v7975_v12, 7  ;;  %v9117_v8 = vpack.c.bf16 %v7981_v10, %v7981_v10  ;;  %v3659_v3 = vadd.f32 %v7966_v28, %v2274_v49  ;;  %v5242_v15 = vrot.slane %v8004_v51, 2 }
 0x279   : > { %v5235_v16 = vsel %vm5131_vm5, %v5234_v29, %v5233_v26  ;;  %v5236_v9 = vrot.slane %v4930_v17, 5  ;;  %v6322_v27 = vpack.c.bf16 %v3778_v31, %v3778_v31  ;;  %v5057_v26 = vunpack.c.l.b16 %v6321_v36 }
 0x27a   : > { %v5457_v40 = vsel %vm5128_vm4, %v9116_v63, %v7992_v23  ;;  %v4934_v24 = vunpack.c.l.b16 %v9117_v8  ;;  %v3660_v22 = vadd.f32 %v7966_v28, %v2281_v43  ;;  %v9118_v35 = vpack.c.bf16 %v7988_v11, %v7988_v11 }
 0x27b   : > { %v5062_v12 = vunpack.c.l.b16 %v6326_v32  ;;  %v5237_v23 = vsel %vm5134_vm6, %v5236_v9, %v5235_v16  ;;  %v3170_v58 = vmax.f32 %v3168_v19, %v3169_v44  ;;  %v9119_v10 = vrot.slane %v7920_v56, 4  ;;  %v8070_v9 = vpop.f32.mrb[44].mxu0 }
 0x27c   : > { %v5061_v54 = vunpack.c.l.b16 %v9118_v35  ;;  %v5058_v14 = vunpack.c.l.b16 %v6322_v27  ;;  %v5458_v42 = vrot.slane %v5057_v26, 6  ;;  %v3176_v46 = vrot.slane %v3175_v25, 1 }
 0x27d   : > { %v5239_v30 = vsel %vm5137_vm7, %v9119_v10, %v5237_v23  ;;  %v5244_v51 = vrot.slane %v4934_v24, 1  ;;  %v9120_v34 = vrot.slane %v7937_v6, 3  ;;  %v6203_v29 = vpack.c.bf16 %v3659_v3, %v3659_v3  ;;  %v8072_v3 = vpop.f32.mrb[44].mxu1  ;;  %v8092_v10 = vpop.f32.mrb[45].mxu0 }
 0x27e   : > { %v1567_v11 = vcombine.high %v7657_v55, %v7657_v55  ;;  %v5459_v19 = vsel %vm5131_vm5, %v5458_v42, %v5457_v40  ;;  %v5460_v4 = vrot.slane %v5058_v14, 5  ;;  %v6204_v56 = vpack.c.bf16 %v3660_v22, %v3660_v22 }
 0x27f   : > { %v5241_v41 = vsel %vm5140_vm8, %v9120_v34, %v5239_v30  ;;  %v5466_v48 = vrot.slane %v5061_v54, 2  ;;  %v5468_v17 = vrot.slane %v5062_v12, 1  ;;  %v8059_v43 = vadd.f32 %v7966_v28, %v3170_v58 }
 0x280   : > { %v5243_v32 = vsel %vm5143_vm9, %v5242_v15, %v5241_v41  ;;  %v5461_v44 = vsel %vm5134_vm6, %v5460_v4, %v5459_v19  ;;  %v3177_v16 = vmax.f32 %v3175_v25, %v3176_v46  ;;  %v2240_v31 = vsel %vm1791_vm3, %v7657_v55, -inf }
 0x281   : > { %v5245_v49 = vsel %vm5146_vm10, %v5244_v51, %v5243_v32  ;;  %v9121_v36 = vrot.slane %v7961_v18, 4  ;;  %v8067_v40 = vunpack.c.l.b16 %v6203_v29  ;;  %v2241_v8 = vrot.slane %v2240_v31, 4 }
 0x282   : > { %v5589_v6 = vpack.c.b16 %v5245_v49, %v5245_v49  ;;  %v2247_v24 = vsel %vm1791_vm3, %v1567_v11, -inf  ;;  %v9122_v25 = vrot.slane %v7971_v1, 3  ;;  %v8079_v55 = vunpack.c.l.b16 %v6204_v56 }
 0x283   : > { %v5463_v63 = vsel %vm5137_vm7, %v9121_v36, %v5461_v44  ;;  %v2248_v18 = vrot.slane %v2247_v24, 4  ;;  %v1631_v27 = vcombine.high %v7683_v47, %v7683_v47  ;;  %v2242_v22 = vmax.f32 %v2240_v31, %v2241_v8 }
 0x284   : > { %5653 = vst.msk [vmem:[%s7047_s8 + $0x1c] sm:$0xf] %vm1791_vm3, %v5589_v6  ;;  %v5465_v15 = vsel %vm5140_vm8, %v9122_v25, %v5463_v63  ;;  %v3136_v35 = vsel %vm1791_vm3, %v7683_v47, -inf  ;;  %v1570_v54 = vcombine.high %v7700_v52, %v7700_v52  ;;  %v8090_v12 = vadd.f32 %v7966_v28, %v3177_v16 }
 0x285   : > { %v5467_v26 = vsel %vm5143_vm9, %v5466_v48, %v5465_v15  ;;  %v2249_v23 = vmax.f32 %v2247_v24, %v2248_v18  ;;  %v3137_v58 = vrot.slane %v3136_v35, 4  ;;  %v2243_v14 = vrot.slane %v2242_v22, 2 }
 0x286   : > { %v5469_v1 = vsel %vm5146_vm10, %v5468_v17, %v5467_v26  ;;  %v3143_v42 = vsel %vm1791_vm3, %v1631_v27, -inf  ;;  %v2282_v46 = vsel %vm1791_vm3, %v7700_v52, -inf  ;;  %v2289_v11 = vsel %vm1791_vm3, %v1570_v54, -inf }
 0x287   : > { %v5605_v30 = vpack.c.b16 %v5469_v1, %v5469_v1  ;;  %v2250_v47 = vrot.slane %v2249_v23, 2  ;;  %v3138_v51 = vmax.f32 %v3136_v35, %v3137_v58  ;;  %v3144_v34 = vrot.slane %v3143_v42, 4 }
 0x288   : > { %v2283_v41 = vrot.slane %v2282_v46, 4  ;;  %v2244_v29 = vmax.f32 %v2242_v22, %v2243_v14  ;;  %v1634_v32 = vcombine.high %v7712_v62, %v7712_v62  ;;  %v3178_v19 = vsel %vm1791_vm3, %v7712_v62, -inf }
 0x289   : > { %5669 = vst.msk [vmem:[%s7047_s8 + $0x5c] sm:$0xf] %vm1791_vm3, %v5605_v30  ;;  %v2251_v4 = vmax.f32 %v2249_v23, %v2250_v47  ;;  %v3139_v56 = vrot.slane %v3138_v51, 2  ;;  %v3145_v48 = vmax.f32 %v3143_v42, %v3144_v34  ;;  %v2290_v49 = vrot.slane %v2289_v11, 4 }
 0x28a   : > { %v2284_v17 = vmax.f32 %v2282_v46, %v2283_v41  ;;  %v2245_v52 = vrot.slane %v2244_v29, 1  ;;  %v3179_v6 = vrot.slane %v3178_v19, 4  ;;  %v3185_v44 = vsel %vm1791_vm3, %v1634_v32, -inf }
 0x28b   : > { %v2252_v16 = vrot.slane %v2251_v4, 1  ;;  %v3140_v31 = vmax.f32 %v3138_v51, %v3139_v56  ;;  %v3146_v36 = vrot.slane %v3145_v48, 2  ;;  %v2291_v24 = vmax.f32 %v2289_v11, %v2290_v49 }
 0x28c   : > { %v2285_v63 = vrot.slane %v2284_v17, 2  ;;  %v2246_v8 = vmax.f32 %v2244_v29, %v2245_v52  ;;  %v3180_v25 = vmax.f32 %v3178_v19, %v3179_v6  ;;  %v3186_v15 = vrot.slane %v3185_v44, 4 }
 0x28d   : > { %v2253_v18 = vmax.f32 %v2251_v4, %v2252_v16  ;;  %v3141_v27 = vrot.slane %v3140_v31, 1  ;;  %v3147_v62 = vmax.f32 %v3145_v48, %v3146_v36  ;;  %v2292_v35 = vrot.slane %v2291_v24, 2 }
 0x28e   : > { %v2286_v26 = vmax.f32 %v2284_v17, %v2285_v63  ;;  %v3655_v22 = vadd.f32 %v7966_v28, %v2246_v8  ;;  %v3181_v54 = vrot.slane %v3180_v25, 2  ;;  %v3187_v1 = vmax.f32 %v3185_v44, %v3186_v15  ;;  %v8121_v8 = vpop.f32.mrb[45].mxu1 }
 0x28f   : > { %v3656_v23 = vadd.f32 %v7966_v28, %v2253_v18  ;;  %v3142_v58 = vmax.f32 %v3140_v31, %v3141_v27  ;;  %v3148_v30 = vrot.slane %v3147_v62, 1  ;;  %v6331_v42 = vpack.c.bf16 %v8059_v43, %v8059_v43 }
 0x290   : > { %v2287_v14 = vrot.slane %v2286_v26, 1  ;;  %v2293_v46 = vmax.f32 %v2291_v24, %v2292_v35  ;;  %v3182_v47 = vmax.f32 %v3180_v25, %v3181_v54  ;;  %v3188_v51 = vrot.slane %v3187_v1, 2 }
 0x291   : > { %v6332_v34 = vpack.c.bf16 %v8090_v12, %v8090_v12  ;;  %v6200_v41 = vpack.c.bf16 %v3656_v23, %v3656_v23  ;;  %v3149_v29 = vmax.f32 %v3147_v62, %v3148_v30  ;;  %v3783_v32 = vadd.f32 %v7966_v28, %v3142_v58  ;;  %v8133_v58 = vpop.f32.mrb[46].mxu0 }
 0x292   : > { %v2288_v11 = vmax.f32 %v2286_v26, %v2287_v14  ;;  %v2294_v19 = vrot.slane %v2293_v46, 1  ;;  %v3183_v4 = vrot.slane %v3182_v47, 1  ;;  %v3189_v56 = vmax.f32 %v3187_v1, %v3188_v51 }
 0x293   : > { %v6199_v48 = vpack.c.bf16 %v3655_v22, %v3655_v22  ;;  %v4936_v17 = vunpack.c.l.b16 %v6200_v41  ;;  %v3784_v52 = vadd.f32 %v7966_v28, %v3149_v29  ;;  %v1568_v12 = vcombine.high %v7727_v13, %v7727_v13  ;;  %v8144_v41 = vpop.f32.mrb[46].mxu1 }
 0x294   : > { %v3661_v43 = vadd.f32 %v7966_v28, %v2288_v11  ;;  %v2295_v49 = vmax.f32 %v2293_v46, %v2294_v19  ;;  %v3184_v6 = vmax.f32 %v3182_v47, %v3183_v4  ;;  %v3190_v44 = vrot.slane %v3189_v56, 1 }
 0x295   : > { %v8117_v31 = vunpack.c.l.b16 %v6331_v42  ;;  %v8119_v36 = vunpack.c.l.b16 %v6332_v34  ;;  %v6328_v63 = vpack.c.bf16 %v3784_v52, %v3784_v52  ;;  %v5246_v24 = vrot.slane %v4936_v17, 7 }
 0x296   : > { %v6327_v25 = vpack.c.bf16 %v3783_v32, %v3783_v32  ;;  %v3662_v15 = vadd.f32 %v7966_v28, %v2295_v49  ;;  %v2254_v18 = vsel %vm1791_vm3, %v7727_v13, -inf  ;;  %v4935_v62 = vunpack.c.l.b16 %v6199_v48 }
 0x297   : > { %v6205_v26 = vpack.c.bf16 %v3661_v43, %v3661_v43  ;;  %v2255_v22 = vrot.slane %v2254_v18, 4  ;;  %v8127_v35 = vunpack.c.l.b16 %v6328_v63  ;;  %v3191_v54 = vmax.f32 %v3189_v56, %v3190_v44 }
 0x298   : > { %v8130_v1 = vadd.f32 %v7966_v28, %v3184_v6  ;;  %v2261_v23 = vsel %vm1791_vm3, %v1568_v12, -inf  ;;  %v8138_v46 = vsel %vm5128_vm4, %v5246_v24, %v4935_v62  ;;  %v8140_v47 = vunpack.c.l.b16 %v6327_v25  ;;  %v8163_v24 = vpop.f32.mrb[47].mxu0 }
 0x299   : > { %v2256_v13 = vmax.f32 %v2254_v18, %v2255_v22  ;;  %v2262_v42 = vrot.slane %v2261_v23, 4  ;;  %v6206_v51 = vpack.c.bf16 %v3662_v15, %v3662_v15  ;;  %v1632_v34 = vcombine.high %v7739_v50, %v7739_v50 }
 0x29a   : > { %v8146_v29 = vunpack.c.l.b16 %v6205_v26  ;;  %v3150_v19 = vsel %vm1791_vm3, %v7739_v50, -inf  ;;  %v8152_v56 = vadd.f32 %v7966_v28, %v3191_v54  ;;  %v6333_v48 = vpack.c.bf16 %v8130_v1, %v8130_v1 }
 0x29b   : > { %v2257_v11 = vrot.slane %v2256_v13, 2  ;;  %v2263_v32 = vmax.f32 %v2261_v23, %v2262_v42  ;;  %v3151_v17 = vrot.slane %v3150_v19, 4  ;;  %v3157_v49 = vsel %vm1791_vm3, %v1632_v34, -inf }
 0x29c   : > { %v1573_v6 = vcombine.high %v7780_v33, %v7780_v33  ;;  %v8159_v44 = vunpack.c.l.b16 %v6206_v51  ;;  %v3158_v50 = vrot.slane %v3157_v49, 4  ;;  %v2324_v63 = vsel %vm1791_vm3, %v7780_v33, -inf }
 0x29d   : > { %v2258_v52 = vmax.f32 %v2256_v13, %v2257_v11  ;;  %v2264_v43 = vrot.slane %v2263_v32, 2  ;;  %v3152_v12 = vmax.f32 %v3150_v19, %v3151_v17  ;;  %v2325_v18 = vrot.slane %v2324_v63, 4 }
 0x29e   : > { %v2331_v62 = vsel %vm1791_vm3, %v1573_v6, -inf  ;;  %v3159_v22 = vmax.f32 %v3157_v49, %v3158_v50  ;;  %v1637_v23 = vcombine.high %v7782_v57, %v7782_v57  ;;  %v3220_v34 = vsel %vm1791_vm3, %v7782_v57, -inf }
 0x29f   : > { %v2259_v25 = vrot.slane %v2258_v52, 1  ;;  %v2265_v15 = vmax.f32 %v2263_v32, %v2264_v43  ;;  %v3153_v26 = vrot.slane %v3152_v12, 2  ;;  %v2332_v54 = vrot.slane %v2331_v62, 4 }
 0x2a0   : > { %v2326_v51 = vmax.f32 %v2324_v63, %v2325_v18  ;;  %v3160_v11 = vrot.slane %v3159_v22, 2  ;;  %v3221_v17 = vrot.slane %v3220_v34, 4  ;;  %v3227_v49 = vsel %vm1791_vm3, %v1637_v23, -inf }
 0x2a1   : > { %v2260_v13 = vmax.f32 %v2258_v52, %v2259_v25  ;;  %v2266_v42 = vrot.slane %v2265_v15, 1  ;;  %v3154_v33 = vmax.f32 %v3152_v12, %v3153_v26  ;;  %v2333_v19 = vmax.f32 %v2331_v62, %v2332_v54 }
 0x2a2   : > { %v2327_v6 = vrot.slane %v2326_v51, 2  ;;  %v3161_v14 = vmax.f32 %v3159_v22, %v3160_v11  ;;  %v3222_v27 = vmax.f32 %v3220_v34, %v3221_v17  ;;  %v3228_v18 = vrot.slane %v3227_v49, 4 }
 0x2a3   : > { %v2267_v32 = vmax.f32 %v2265_v15, %v2266_v42  ;;  %v3657_v43 = vadd.f32 %v7966_v28, %v2260_v13  ;;  %v3155_v50 = vrot.slane %v3154_v33, 1  ;;  %v2334_v30 = vrot.slane %v2333_v19, 2 }
 0x2a4   : > { %v2328_v25 = vmax.f32 %v2326_v51, %v2327_v6  ;;  %v3162_v12 = vrot.slane %v3161_v14, 1  ;;  %v3223_v62 = vrot.slane %v3222_v27, 2  ;;  %v3229_v13 = vmax.f32 %v3227_v49, %v3228_v18 }
 0x2a5   : > { %v3658_v52 = vadd.f32 %v7966_v28, %v2267_v32  ;;  %v6201_v63 = vpack.c.bf16 %v3657_v43, %v3657_v43  ;;  %v3156_v57 = vmax.f32 %v3154_v33, %v3155_v50  ;;  %v2335_v26 = vmax.f32 %v2333_v19, %v2334_v30  ;;  %v8177_v43 = vpop.f32.mrb[47].mxu1 }
 0x2a6   : > { %v2329_v42 = vrot.slane %v2328_v25, 1  ;;  %v3163_v16 = vmax.f32 %v3161_v14, %v3162_v12  ;;  %v3224_v22 = vmax.f32 %v3222_v27, %v3223_v62  ;;  %v3230_v32 = vrot.slane %v3229_v13, 2 }
 0x2a7   : > { %v6202_v54 = vpack.c.bf16 %v3658_v52, %v3658_v52  ;;  %v4937_v15 = vunpack.c.l.b16 %v6201_v63  ;;  %v3785_v23 = vadd.f32 %v7966_v28, %v3156_v57  ;;  %v2336_v4 = vrot.slane %v2335_v26, 1 }
 0x2a8   : > { %v2330_v17 = vmax.f32 %v2328_v25, %v2329_v42  ;;  %v6334_v51 = vpack.c.bf16 %v8152_v56, %v8152_v56  ;;  %v3786_v33 = vadd.f32 %v7966_v28, %v3163_v16  ;;  %v3231_v27 = vmax.f32 %v3229_v13, %v3230_v32 }
 0x2a9   : > { %v4938_v11 = vunpack.c.l.b16 %v6202_v54  ;;  %v5248_v34 = vrot.slane %v4937_v15, 6  ;;  %v6329_v30 = vpack.c.bf16 %v3785_v23, %v3785_v23  ;;  %v2337_v19 = vmax.f32 %v2335_v26, %v2336_v4 }
 0x2aa   : > { %v3667_v49 = vadd.f32 %v7966_v28, %v2330_v17  ;;  %v5256_v50 = vrot.slane %v8146_v29, 2  ;;  %v5069_v52 = vunpack.c.l.b16 %v6333_v48  ;;  %v6330_v56 = vpack.c.bf16 %v3786_v33, %v3786_v33 }
 0x2ab   : > { %v5249_v14 = vsel %vm5131_vm5, %v5248_v34, %v8138_v46  ;;  %v5250_v6 = vrot.slane %v4938_v11, 5  ;;  %v5065_v63 = vunpack.c.l.b16 %v6329_v30  ;;  %v9123_v16 = vrot.slane %v8127_v35, 7 }
 0x2ac   : > { %v3668_v46 = vadd.f32 %v7966_v28, %v2337_v19  ;;  %v3225_v18 = vrot.slane %v3224_v22, 1  ;;  %v5070_v57 = vunpack.c.l.b16 %v6334_v51  ;;  %v9124_v12 = vrot.slane %v8067_v40, 4 }
 0x2ad   : > { %v5471_v4 = vsel %vm5128_vm4, %v9123_v16, %v8140_v47  ;;  %v5251_v25 = vsel %vm5134_vm6, %v5250_v6, %v5249_v14  ;;  %v5066_v26 = vunpack.c.l.b16 %v6330_v56  ;;  %v5472_v1 = vrot.slane %v5065_v63, 6  ;;  %v8224_v56 = vpop.f32.mrb[48].mxu1 }
 0x2ae   : > { %v5253_v29 = vsel %vm5137_vm7, %v9124_v12, %v5251_v25  ;;  %v5258_v48 = vrot.slane %v8159_v44, 1  ;;  %v9125_v62 = vrot.slane %v8079_v55, 3  ;;  %v6211_v54 = vpack.c.bf16 %v3667_v49, %v3667_v49 }
 0x2af   : > { %v3232_v47 = vrot.slane %v3231_v27, 1  ;;  %v5473_v42 = vsel %vm5131_vm5, %v5472_v1, %v5471_v4  ;;  %v5474_v13 = vrot.slane %v5066_v26, 5  ;;  %v1571_v40 = vcombine.high %v7802_v53, %v7802_v53 }
 0x2b0   : > { %v5255_v35 = vsel %vm5140_vm8, %v9125_v62, %v5253_v29  ;;  %v5480_v23 = vrot.slane %v5069_v52, 2  ;;  %v6212_v34 = vpack.c.bf16 %v3668_v46, %v3668_v46  ;;  %v3226_v44 = vmax.f32 %v3224_v22, %v3225_v18 }
 0x2b1   : > { %v5257_v15 = vsel %vm5143_vm9, %v5256_v50, %v5255_v35  ;;  %v5482_v17 = vrot.slane %v5070_v57, 1  ;;  %v5475_v32 = vsel %vm5134_vm6, %v5474_v13, %v5473_v42  ;;  %v2296_v51 = vsel %vm1791_vm3, %v7802_v53, -inf }
 0x2b2   : > { %v5259_v11 = vsel %vm5146_vm10, %v5258_v48, %v5257_v15  ;;  %v9126_v33 = vrot.slane %v8117_v31, 4  ;;  %v8210_v19 = vunpack.c.l.b16 %v6211_v54  ;;  %v3233_v14 = vmax.f32 %v3231_v27, %v3232_v47  ;;  %v8222_v31 = vpop.f32.mrb[48].mxu0 }
 0x2b3   : > { %v5590_v55 = vpack.c.b16 %v5259_v11, %v5259_v11  ;;  %v2297_v6 = vrot.slane %v2296_v51, 4  ;;  %v9127_v49 = vrot.slane %v8119_v36, 3  ;;  %v2303_v50 = vsel %vm1791_vm3, %v1571_v40, -inf  ;;  %v8232_v57 = vpop.f32.mrb[49].mxu0 }
 0x2b4   : > { %v5477_v30 = vsel %vm5137_vm7, %v9126_v33, %v5475_v32  ;;  %v1635_v52 = vcombine.high %v7831_v37, %v7831_v37  ;;  %v3192_v53 = vsel %vm1791_vm3, %v7831_v37, -inf  ;;  %v8227_v63 = vunpack.c.l.b16 %v6212_v34 }
 0x2b5   : > { %5654 = vst.msk [vmem:[%s7047_s8 + $0x20] sm:$0xf] %vm1791_vm3, %v5590_v55  ;;  %v5479_v22 = vsel %vm5140_vm8, %v9127_v49, %v5477_v30  ;;  %v3795_v36 = vadd.f32 %v7966_v28, %v3226_v44  ;;  %v2298_v16 = vmax.f32 %v2296_v51, %v2297_v6  ;;  %v2304_v25 = vrot.slane %v2303_v50, 4 }
 0x2b6   : > { %v5481_v27 = vsel %vm5143_vm9, %v5480_v23, %v5479_v22  ;;  %v3193_v46 = vrot.slane %v3192_v53, 4  ;;  %v3199_v18 = vsel %vm1791_vm3, %v1635_v52, -inf  ;;  %v3796_v12 = vadd.f32 %v7966_v28, %v3233_v14 }
 0x2b7   : > { %v5483_v4 = vsel %vm5146_vm10, %v5482_v17, %v5481_v27  ;;  %v2299_v29 = vrot.slane %v2298_v16, 2  ;;  %v3200_v26 = vrot.slane %v3199_v18, 4  ;;  %v2305_v1 = vmax.f32 %v2303_v50, %v2304_v25 }
 0x2b8   : > { %v5606_v37 = vpack.c.b16 %v5483_v4, %v5483_v4  ;;  %v3194_v48 = vmax.f32 %v3192_v53, %v3193_v46  ;;  %v1574_v62 = vcombine.high %v7843_v60, %v7843_v60  ;;  %v2338_v35 = vsel %vm1791_vm3, %v7843_v60, -inf }
 0x2b9   : > { %v2300_v54 = vmax.f32 %v2298_v16, %v2299_v29  ;;  %v3201_v47 = vmax.f32 %v3199_v18, %v3200_v26  ;;  %v2339_v15 = vrot.slane %v2338_v35, 4  ;;  %v1638_v42 = vcombine.high %v7854_v38, %v7854_v38 }
 0x2ba   : > { %5670 = vst.msk [vmem:[%s7047_s8 + $0x60] sm:$0xf] %vm1791_vm3, %v5606_v37  ;;  %v2306_v13 = vrot.slane %v2305_v1, 2  ;;  %v3195_v40 = vrot.slane %v3194_v48, 2  ;;  %v2345_v23 = vsel %vm1791_vm3, %v1574_v62, -inf  ;;  %v3234_v11 = vsel %vm1791_vm3, %v7854_v38, -inf }
 0x2bb   : > { %v2301_v34 = vrot.slane %v2300_v54, 1  ;;  %v3202_v44 = vrot.slane %v3201_v47, 2  ;;  %v2340_v17 = vmax.f32 %v2338_v35, %v2339_v15  ;;  %v2346_v55 = vrot.slane %v2345_v23, 4 }
 0x2bc   : > { %v2307_v60 = vmax.f32 %v2305_v1, %v2306_v13  ;;  %v3196_v32 = vmax.f32 %v3194_v48, %v3195_v40  ;;  %v3235_v51 = vrot.slane %v3234_v11, 4  ;;  %v3241_v33 = vsel %vm1791_vm3, %v1638_v42, -inf }
 0x2bd   : > { %v2302_v30 = vmax.f32 %v2300_v54, %v2301_v34  ;;  %v3203_v14 = vmax.f32 %v3201_v47, %v3202_v44  ;;  %v2341_v6 = vrot.slane %v2340_v17, 2  ;;  %v2347_v49 = vmax.f32 %v2345_v23, %v2346_v55 }
 0x2be   : > { %v2308_v22 = vrot.slane %v2307_v60, 1  ;;  %v3197_v50 = vrot.slane %v3196_v32, 1  ;;  %v3236_v52 = vmax.f32 %v3234_v11, %v3235_v51  ;;  %v3242_v53 = vrot.slane %v3241_v33, 4 }
 0x2bf   : > { %v6339_v27 = vpack.c.bf16 %v3795_v36, %v3795_v36  ;;  %v3204_v16 = vrot.slane %v3203_v14, 1  ;;  %v2342_v38 = vmax.f32 %v2340_v17, %v2341_v6  ;;  %v2348_v4 = vrot.slane %v2347_v49, 2 }
 0x2c0   : > { %v2309_v25 = vmax.f32 %v2307_v60, %v2308_v22  ;;  %v3198_v46 = vmax.f32 %v3196_v32, %v3197_v50  ;;  %v3237_v18 = vrot.slane %v3236_v52, 2  ;;  %v3243_v37 = vmax.f32 %v3241_v33, %v3242_v53 }
 0x2c1   : > { %v6340_v29 = vpack.c.bf16 %v3796_v12, %v3796_v12  ;;  %v3205_v26 = vmax.f32 %v3203_v14, %v3204_v16  ;;  %v2343_v1 = vrot.slane %v2342_v38, 1  ;;  %v2349_v48 = vmax.f32 %v2347_v49, %v2348_v4 }
 0x2c2   : > { %v3663_v62 = vadd.f32 %v7966_v28, %v2302_v30  ;;  %v3664_v35 = vadd.f32 %v7966_v28, %v2309_v25  ;;  %v3238_v54 = vmax.f32 %v3236_v52, %v3237_v18  ;;  %v3244_v47 = vrot.slane %v3243_v37, 2  ;;  %v8258_v30 = vpop.f32.mrb[49].mxu1 }
 0x2c3   : > { %v3791_v15 = vadd.f32 %v7966_v28, %v3198_v46  ;;  %v3792_v36 = vadd.f32 %v7966_v28, %v3205_v26  ;;  %v2344_v42 = vmax.f32 %v2342_v38, %v2343_v1  ;;  %v2350_v13 = vrot.slane %v2349_v48, 1 }
 0x2c4   : > { %v8251_v40 = vunpack.c.l.b16 %v6339_v27  ;;  %v6208_v23 = vpack.c.bf16 %v3664_v35, %v3664_v35  ;;  %v3239_v11 = vrot.slane %v3238_v54, 1  ;;  %v3245_v12 = vmax.f32 %v3243_v37, %v3244_v47 }
 0x2c5   : > { %v6336_v34 = vpack.c.bf16 %v3792_v36, %v3792_v36  ;;  %v2351_v44 = vmax.f32 %v2349_v48, %v2350_v13  ;;  %v3669_v17 = vadd.f32 %v7966_v28, %v2344_v42  ;;  %v1572_v55 = vcombine.high %v7873_v20, %v7873_v20  ;;  %v8287_v36 = vpop.f32.mrb[50].mxu1 }
 0x2c6   : > { %v8256_v60 = vunpack.c.l.b16 %v6340_v29  ;;  %v4944_v32 = vunpack.c.l.b16 %v6208_v23  ;;  %v3240_v51 = vmax.f32 %v3238_v54, %v3239_v11  ;;  %v3246_v33 = vrot.slane %v3245_v12, 1  ;;  %v8275_v29 = vpop.f32.mrb[50].mxu0 }
 0x2c7   : > { %v6207_v14 = vpack.c.bf16 %v3663_v62, %v3663_v62  ;;  %v6335_v6 = vpack.c.bf16 %v3791_v15, %v3791_v15  ;;  %v8260_v49 = vunpack.c.l.b16 %v6336_v34  ;;  %v2310_v22 = vsel %vm1791_vm3, %v7873_v20, -inf }
 0x2c8   : > { %v8266_v52 = vadd.f32 %v7966_v28, %v2351_v44  ;;  %v3247_v53 = vmax.f32 %v3245_v12, %v3246_v33  ;;  %v2311_v27 = vrot.slane %v2310_v22, 4  ;;  %v6213_v4 = vpack.c.bf16 %v3669_v17, %v3669_v17 }
 0x2c9   : > { %v2317_v25 = vsel %vm1791_vm3, %v1572_v55, -inf  ;;  %v5260_v18 = vrot.slane %v4944_v32, 7  ;;  %v8273_v37 = vadd.f32 %v7966_v28, %v3240_v51  ;;  %v4943_v26 = vunpack.c.l.b16 %v6207_v14  ;;  %v8302_v14 = vpop.f32.mrb[51].mxu0 }
 0x2ca   : > { %v2312_v20 = vmax.f32 %v2310_v22, %v2311_v27  ;;  %v8277_v1 = vunpack.c.l.b16 %v6335_v6  ;;  %v2318_v62 = vrot.slane %v2317_v25, 4  ;;  %v8283_v54 = vadd.f32 %v7966_v28, %v3247_v53 }
 0x2cb   : > { %v1636_v15 = vcombine.high %v7887_v61, %v7887_v61  ;;  %v8289_v42 = vunpack.c.l.b16 %v6213_v4  ;;  %v3206_v23 = vsel %vm1791_vm3, %v7887_v61, -inf  ;;  %v1577_v11 = vcombine.high %v7932_v0, %v7932_v0 }
 0x2cc   : > { %v2313_v47 = vrot.slane %v2312_v20, 2  ;;  %v2319_v13 = vmax.f32 %v2317_v25, %v2318_v62  ;;  %v5261_v12 = vsel %vm5128_vm4, %v5260_v18, %v4943_v26  ;;  %v3207_v17 = vrot.slane %v3206_v23, 4 }
 0x2cd   : > { %v3213_v32 = vsel %vm1791_vm3, %v1636_v15, -inf  ;;  %v2380_v51 = vsel %vm1791_vm3, %v7932_v0, -inf  ;;  %v2387_v33 = vsel %vm1791_vm3, %v1577_v11, -inf  ;;  %v6342_v61 = vpack.c.bf16 %v8283_v54, %v8283_v54 }
 0x2ce   : > { %v2314_v44 = vmax.f32 %v2312_v20, %v2313_v47  ;;  %v2320_v55 = vrot.slane %v2319_v13, 2  ;;  %v3208_v22 = vmax.f32 %v3206_v23, %v3207_v17  ;;  %v3214_v53 = vrot.slane %v3213_v32, 4 }
 0x2cf   : > { %v2381_v4 = vrot.slane %v2380_v51, 4  ;;  %v2388_v25 = vrot.slane %v2387_v33, 4  ;;  %v1641_v18 = vcombine.high %v7934_v21, %v7934_v21  ;;  %v3276_v0 = vsel %vm1791_vm3, %v7934_v21, -inf }
 0x2d0   : > { %v2315_v6 = vrot.slane %v2314_v44, 1  ;;  %v2321_v27 = vmax.f32 %v2319_v13, %v2320_v55  ;;  %v3209_v26 = vrot.slane %v3208_v22, 2  ;;  %v3215_v62 = vmax.f32 %v3213_v32, %v3214_v53 }
 0x2d1   : > { %v2382_v15 = vmax.f32 %v2380_v51, %v2381_v4  ;;  %v2389_v11 = vmax.f32 %v2387_v33, %v2388_v25  ;;  %v3277_v46 = vrot.slane %v3276_v0, 4  ;;  %v3283_v13 = vsel %vm1791_vm3, %v1641_v18, -inf }
 0x2d2   : > { %v2316_v20 = vmax.f32 %v2314_v44, %v2315_v6  ;;  %v2322_v47 = vrot.slane %v2321_v27, 1  ;;  %v3210_v23 = vmax.f32 %v3208_v22, %v3209_v26  ;;  %v3216_v17 = vrot.slane %v3215_v62, 2 }
 0x2d3   : > { %v2383_v38 = vrot.slane %v2382_v15, 2  ;;  %v2390_v16 = vrot.slane %v2389_v11, 2  ;;  %v3278_v50 = vmax.f32 %v3276_v0, %v3277_v46  ;;  %v3284_v53 = vrot.slane %v3283_v13, 4 }
 0x2d4   : > { %v3665_v54 = vadd.f32 %v7966_v28, %v2316_v20  ;;  %v2323_v55 = vmax.f32 %v2321_v27, %v2322_v47  ;;  %v3211_v6 = vrot.slane %v3210_v23, 1  ;;  %v3217_v32 = vmax.f32 %v3215_v62, %v3216_v17 }
 0x2d5   : > { %v2384_v34 = vmax.f32 %v2382_v15, %v2383_v38  ;;  %v2391_v51 = vmax.f32 %v2389_v11, %v2390_v16  ;;  %v3279_v33 = vrot.slane %v3278_v50, 2  ;;  %v3285_v22 = vmax.f32 %v3283_v13, %v3284_v53  ;;  %v8314_v38 = vpop.f32.mrb[51].mxu1  ;;  %v8320_v15 = vld [vmem:[%s9085_s2] ss:$0 sm:$0xff] }
 0x2d6   : > { %v6209_v44 = vpack.c.bf16 %v3665_v54, %v3665_v54  ;;  %v3666_v21 = vadd.f32 %v7966_v28, %v2323_v55  ;;  %v3212_v25 = vmax.f32 %v3210_v23, %v3211_v6  ;;  %v3218_v20 = vrot.slane %v3217_v32, 1 }
 0x2d7   : > { %v2385_v35 = vrot.slane %v2384_v34, 1  ;;  %v2392_v18 = vrot.slane %v2391_v51, 1  ;;  %v3280_v27 = vmax.f32 %v3278_v50, %v3279_v33  ;;  %v3286_v0 = vrot.slane %v3285_v22, 2 }
 0x2d8   : > { %v4945_v4 = vunpack.c.l.b16 %v6209_v44  ;;  %v6210_v26 = vpack.c.bf16 %v3666_v21, %v3666_v21  ;;  %v3219_v48 = vmax.f32 %v3217_v32, %v3218_v20  ;;  %v3793_v46 = vadd.f32 %v7966_v28, %v3212_v25 }
 0x2d9   : > { %v2386_v54 = vmax.f32 %v2384_v34, %v2385_v35  ;;  %v2393_v17 = vmax.f32 %v2391_v51, %v2392_v18  ;;  %v3281_v55 = vrot.slane %v3280_v27, 1  ;;  %v3287_v23 = vmax.f32 %v3285_v22, %v3286_v0 }
 0x2da   : > { %v5262_v47 = vrot.slane %v4945_v4, 6  ;;  %v4946_v62 = vunpack.c.l.b16 %v6210_v26  ;;  %v3794_v50 = vadd.f32 %v8320_v15, %v3219_v48  ;;  %v6337_v11 = vpack.c.bf16 %v3793_v46, %v3793_v46 }
 0x2db   : > { %v9128_v28 = vrot.slane %v8260_v49, 7  ;;  %v9129_v34 = vpack.c.bf16 %v8266_v52, %v8266_v52  ;;  %v5270_v6 = vrot.slane %v8289_v42, 2  ;;  %v3676_v48 = vadd.f32 %v8320_v15, %v2393_v17 }
 0x2dc   : > { %v5263_v16 = vsel %vm5131_vm5, %v5262_v47, %v5261_v12  ;;  %v5264_v44 = vrot.slane %v4946_v62, 5  ;;  %v3675_v12 = vadd.f32 %v8320_v15, %v2386_v54  ;;  %v6338_v32 = vpack.c.bf16 %v3794_v50, %v3794_v50 }
 0x2dd   : > { %v5485_v35 = vsel %vm5128_vm4, %v9128_v28, %v8277_v1  ;;  %v4950_v13 = vunpack.c.l.b16 %v9129_v34  ;;  %v5073_v53 = vunpack.c.l.b16 %v6337_v11  ;;  %v9130_v21 = vpack.c.bf16 %v8273_v37, %v8273_v37 }
 0x2de   : > { %v5078_v49 = vunpack.c.l.b16 %v6342_v61  ;;  %v5265_v1 = vsel %vm5134_vm6, %v5264_v44, %v5263_v16  ;;  %v3282_v33 = vmax.f32 %v3280_v27, %v3281_v55  ;;  %v9131_v52 = vrot.slane %v8210_v19, 4  ;;  %v8360_v44 = vpop.f32.mrb[52].mxu0 }
 0x2df   : > { %v5077_v51 = vunpack.c.l.b16 %v9130_v21  ;;  %v5074_v25 = vunpack.c.l.b16 %v6338_v32  ;;  %v5486_v20 = vrot.slane %v5073_v53, 6  ;;  %v3288_v22 = vrot.slane %v3287_v23, 1 }
 0x2e0   : > { %v5267_v4 = vsel %vm5137_vm7, %v9131_v52, %v5265_v1  ;;  %v5272_v42 = vrot.slane %v4950_v13, 1  ;;  %v9132_v26 = vrot.slane %v8227_v63, 3  ;;  %v6219_v47 = vpack.c.bf16 %v3675_v12, %v3675_v12  ;;  %v8362_v12 = vpop.f32.mrb[52].mxu1  ;;  %v8382_v52 = vpop.f32.mrb[53].mxu0 }
 0x2e1   : > { %v1575_v37 = vcombine.high %v7942_v39, %v7942_v39  ;;  %v5487_v27 = vsel %vm5131_vm5, %v5486_v20, %v5485_v35  ;;  %v5488_v46 = vrot.slane %v5074_v25, 5  ;;  %v6220_v19 = vpack.c.bf16 %v3676_v48, %v3676_v48 }
 0x2e2   : > { %v5269_v18 = vsel %vm5140_vm8, %v9132_v26, %v5267_v4  ;;  %v5494_v0 = vrot.slane %v5077_v51, 2  ;;  %v5496_v62 = vrot.slane %v5078_v49, 1  ;;  %v8349_v17 = vadd.f32 %v8320_v15, %v3282_v33 }
 0x2e3   : > { %v5271_v61 = vsel %vm5143_vm9, %v5270_v6, %v5269_v18  ;;  %v5489_v55 = vsel %vm5134_vm6, %v5488_v46, %v5487_v27  ;;  %v3289_v16 = vmax.f32 %v3287_v23, %v3288_v22  ;;  %v2352_v50 = vsel %vm1791_vm3, %v7942_v39, -inf }
 0x2e4   : > { %v5273_v54 = vsel %vm5146_vm10, %v5272_v42, %v5271_v61  ;;  %v9133_v11 = vrot.slane %v8251_v40, 4  ;;  %v8357_v35 = vunpack.c.l.b16 %v6219_v47  ;;  %v2353_v34 = vrot.slane %v2352_v50, 4 }
 0x2e5   : > { %v5591_v63 = vpack.c.b16 %v5273_v54, %v5273_v54  ;;  %v2359_v13 = vsel %vm1791_vm3, %v1575_v37, -inf  ;;  %v9134_v23 = vrot.slane %v8256_v60, 3  ;;  %v8369_v39 = vunpack.c.l.b16 %v6220_v19 }
 0x2e6   : > { %v5491_v28 = vsel %vm5137_vm7, %v9133_v11, %v5489_v55  ;;  %v2360_v40 = vrot.slane %v2359_v13, 4  ;;  %v1639_v32 = vcombine.high %v7973_v59, %v7973_v59  ;;  %v2354_v48 = vmax.f32 %v2352_v50, %v2353_v34 }
 0x2e7   : > { %5655 = vst.msk [vmem:[%s7047_s8 + $0x24] sm:$0xf] %vm1791_vm3, %v5591_v63  ;;  %v5493_v6 = vsel %vm5140_vm8, %v9134_v23, %v5491_v28  ;;  %v3248_v21 = vsel %vm1791_vm3, %v7973_v59, -inf  ;;  %v1578_v51 = vcombine.high %v7990_v5, %v7990_v5  ;;  %v8380_v49 = vadd.f32 %v8320_v15, %v3289_v16 }
 0x2e8   : > { %v5495_v53 = vsel %vm5143_vm9, %v5494_v0, %v5493_v6  ;;  %v2361_v1 = vmax.f32 %v2359_v13, %v2360_v40  ;;  %v3249_v33 = vrot.slane %v3248_v21, 4  ;;  %v2355_v25 = vrot.slane %v2354_v48, 2 }
 0x2e9   : > { %v5497_v60 = vsel %vm5146_vm10, %v5496_v62, %v5495_v53  ;;  %v3255_v20 = vsel %vm1791_vm3, %v1639_v32, -inf  ;;  %v2394_v22 = vsel %vm1791_vm3, %v7990_v5, -inf  ;;  %v2401_v37 = vsel %vm1791_vm3, %v1578_v51, -inf }
 0x2ea   : > { %v5607_v4 = vpack.c.b16 %v5497_v60, %v5497_v60  ;;  %v2362_v59 = vrot.slane %v2361_v1, 2  ;;  %v3250_v42 = vmax.f32 %v3248_v21, %v3249_v33  ;;  %v3256_v26 = vrot.slane %v3255_v20, 4 }
 0x2eb   : > { %v2395_v18 = vrot.slane %v2394_v22, 4  ;;  %v2356_v47 = vmax.f32 %v2354_v48, %v2355_v25  ;;  %v1642_v61 = vcombine.high %v8002_v45, %v8002_v45  ;;  %v3290_v27 = vsel %vm1791_vm3, %v8002_v45, -inf }
 0x2ec   : > { %5671 = vst.msk [vmem:[%s7047_s8 + $0x64] sm:$0xf] %vm1791_vm3, %v5607_v4  ;;  %v2363_v46 = vmax.f32 %v2361_v1, %v2362_v59  ;;  %v3251_v19 = vrot.slane %v3250_v42, 2  ;;  %v3257_v0 = vmax.f32 %v3255_v20, %v3256_v26  ;;  %v2402_v54 = vrot.slane %v2401_v37, 4 }
 0x2ed   : > { %v2396_v62 = vmax.f32 %v2394_v22, %v2395_v18  ;;  %v2357_v5 = vrot.slane %v2356_v47, 1  ;;  %v3291_v63 = vrot.slane %v3290_v27, 4  ;;  %v3297_v55 = vsel %vm1791_vm3, %v1642_v61, -inf }
 0x2ee   : > { %v2364_v16 = vrot.slane %v2363_v46, 1  ;;  %v3252_v50 = vmax.f32 %v3250_v42, %v3251_v19  ;;  %v3258_v11 = vrot.slane %v3257_v0, 2  ;;  %v2403_v13 = vmax.f32 %v2401_v37, %v2402_v54 }
 0x2ef   : > { %v2397_v28 = vrot.slane %v2396_v62, 2  ;;  %v2358_v34 = vmax.f32 %v2356_v47, %v2357_v5  ;;  %v3292_v23 = vmax.f32 %v3290_v27, %v3291_v63  ;;  %v3298_v6 = vrot.slane %v3297_v55, 4 }
 0x2f0   : > { %v2365_v40 = vmax.f32 %v2363_v46, %v2364_v16  ;;  %v3253_v32 = vrot.slane %v3252_v50, 1  ;;  %v3259_v45 = vmax.f32 %v3257_v0, %v3258_v11  ;;  %v2404_v21 = vrot.slane %v2403_v13, 2 }
 0x2f1   : > { %v2398_v53 = vmax.f32 %v2396_v62, %v2397_v28  ;;  %v3671_v48 = vadd.f32 %v8320_v15, %v2358_v34  ;;  %v3293_v51 = vrot.slane %v3292_v23, 2  ;;  %v3299_v60 = vmax.f32 %v3297_v55, %v3298_v6  ;;  %v8411_v28 = vpop.f32.mrb[53].mxu1 }
 0x2f2   : > { %v3672_v1 = vadd.f32 %v8320_v15, %v2365_v40  ;;  %v3254_v33 = vmax.f32 %v3252_v50, %v3253_v32  ;;  %v3260_v4 = vrot.slane %v3259_v45, 1  ;;  %v6347_v20 = vpack.c.bf16 %v8349_v17, %v8349_v17 }
 0x2f3   : > { %v2399_v25 = vrot.slane %v2398_v53, 1  ;;  %v2405_v22 = vmax.f32 %v2403_v13, %v2404_v21  ;;  %v3294_v59 = vmax.f32 %v3292_v23, %v3293_v51  ;;  %v3300_v42 = vrot.slane %v3299_v60, 2 }
 0x2f4   : > { %v6348_v26 = vpack.c.bf16 %v8380_v49, %v8380_v49  ;;  %v6216_v18 = vpack.c.bf16 %v3672_v1, %v3672_v1  ;;  %v3261_v47 = vmax.f32 %v3259_v45, %v3260_v4  ;;  %v3799_v61 = vadd.f32 %v8320_v15, %v3254_v33  ;;  %v8423_v1 = vpop.f32.mrb[54].mxu0 }
 0x2f5   : > { %v2400_v37 = vmax.f32 %v2398_v53, %v2399_v25  ;;  %v2406_v27 = vrot.slane %v2405_v22, 1  ;;  %v3295_v46 = vrot.slane %v3294_v59, 1  ;;  %v3301_v19 = vmax.f32 %v3299_v60, %v3300_v42 }
 0x2f6   : > { %v6215_v0 = vpack.c.bf16 %v3671_v48, %v3671_v48  ;;  %v4952_v62 = vunpack.c.l.b16 %v6216_v18  ;;  %v3800_v5 = vadd.f32 %v8320_v15, %v3261_v47  ;;  %v1576_v49 = vcombine.high %v8017_v2, %v8017_v2 }
 0x2f7   : > { %v3677_v17 = vadd.f32 %v8320_v15, %v2400_v37  ;;  %v2407_v54 = vmax.f32 %v2405_v22, %v2406_v27  ;;  %v3296_v63 = vmax.f32 %v3294_v59, %v3295_v46  ;;  %v3302_v55 = vrot.slane %v3301_v19, 1 }
 0x2f8   : > { %v8407_v50 = vunpack.c.l.b16 %v6347_v20  ;;  %v8409_v11 = vunpack.c.l.b16 %v6348_v26  ;;  %v5274_v34 = vrot.slane %v4952_v62, 7  ;;  %v6343_v13 = vpack.c.bf16 %v3799_v61, %v3799_v61  ;;  %v8436_v26 = vpop.f32.mrb[54].mxu1 }
 0x2f9   : > { %v6344_v23 = vpack.c.bf16 %v3800_v5, %v3800_v5  ;;  %v2366_v6 = vsel %vm1791_vm3, %v8017_v2, -inf  ;;  %v4951_v32 = vunpack.c.l.b16 %v6215_v0  ;;  %v6221_v45 = vpack.c.bf16 %v3677_v17, %v3677_v17 }
 0x2fa   : > { %v2367_v53 = vrot.slane %v2366_v6, 4  ;;  %v8417_v48 = vadd.f32 %v8320_v15, %v2407_v54  ;;  %v3303_v21 = vmax.f32 %v3301_v19, %v3302_v55  ;;  %v8420_v51 = vadd.f32 %v8320_v15, %v3296_v63 }
 0x2fb   : > { %v2373_v60 = vsel %vm1791_vm3, %v1576_v49, -inf  ;;  %v8428_v20 = vsel %vm5128_vm4, %v5274_v34, %v4951_v32  ;;  %v8430_v22 = vunpack.c.l.b16 %v6343_v13  ;;  %v8432_v59 = vunpack.c.l.b16 %v6344_v23  ;;  %v8455_v34 = vpop.f32.mrb[55].mxu0 }
 0x2fc   : > { %v2368_v4 = vmax.f32 %v2366_v6, %v2367_v53  ;;  %v2374_v25 = vrot.slane %v2373_v60, 4  ;;  %v1640_v42 = vcombine.high %v8029_v7, %v8029_v7  ;;  %v8438_v18 = vunpack.c.l.b16 %v6221_v45 }
 0x2fd   : > { %v3262_v61 = vsel %vm1791_vm3, %v8029_v7, -inf  ;;  %v6222_v27 = vpack.c.bf16 %v8417_v48, %v8417_v48  ;;  %v8445_v46 = vadd.f32 %v8320_v15, %v3303_v21  ;;  %v6349_v19 = vpack.c.bf16 %v8420_v51, %v8420_v51 }
 0x2fe   : > { %v2369_v47 = vrot.slane %v2368_v4, 2  ;;  %v2375_v37 = vmax.f32 %v2373_v60, %v2374_v25  ;;  %v3263_v0 = vrot.slane %v3262_v61, 4  ;;  %v3269_v17 = vsel %vm1791_vm3, %v1640_v42, -inf }
 0x2ff   : > { %v1581_v54 = vcombine.high %v8070_v9, %v8070_v9  ;;  %v3270_v55 = vrot.slane %v3269_v17, 4  ;;  %v2436_v49 = vsel %vm1791_vm3, %v8070_v9, -inf  ;;  %v1645_v21 = vcombine.high %v8072_v3, %v8072_v3 }
 0x300   : > { %v2370_v62 = vmax.f32 %v2368_v4, %v2369_v47  ;;  %v2376_v5 = vrot.slane %v2375_v37, 2  ;;  %v3264_v7 = vmax.f32 %v3262_v61, %v3263_v0  ;;  %v2437_v6 = vrot.slane %v2436_v49, 4 }
 0x301   : > { %v2443_v32 = vsel %vm1791_vm3, %v1581_v54, -inf  ;;  %v3271_v53 = vmax.f32 %v3269_v17, %v3270_v55  ;;  %v3332_v42 = vsel %vm1791_vm3, %v8072_v3, -inf  ;;  %v3339_v17 = vsel %vm1791_vm3, %v1645_v21, -inf }
 0x302   : > { %v2371_v13 = vrot.slane %v2370_v62, 1  ;;  %v2377_v23 = vmax.f32 %v2375_v37, %v2376_v5  ;;  %v3265_v45 = vrot.slane %v3264_v7, 2  ;;  %v2444_v48 = vrot.slane %v2443_v32, 4 }
 0x303   : > { %v2438_v25 = vmax.f32 %v2436_v49, %v2437_v6  ;;  %v3272_v47 = vrot.slane %v3271_v53, 2  ;;  %v3333_v0 = vrot.slane %v3332_v42, 4  ;;  %v3340_v6 = vrot.slane %v3339_v17, 4 }
 0x304   : > { %v2372_v60 = vmax.f32 %v2370_v62, %v2371_v13  ;;  %v2378_v4 = vrot.slane %v2377_v23, 1  ;;  %v3266_v9 = vmax.f32 %v3264_v7, %v3265_v45  ;;  %v2445_v61 = vmax.f32 %v2443_v32, %v2444_v48 }
 0x305   : > { %v2439_v54 = vrot.slane %v2438_v25, 2  ;;  %v3273_v2 = vmax.f32 %v3271_v53, %v3272_v47  ;;  %v3334_v40 = vmax.f32 %v3332_v42, %v3333_v0 }
 0x306   : > { %v2379_v37 = vmax.f32 %v2377_v23, %v2378_v4  ;;  %v3673_v5 = vadd.f32 %v8320_v15, %v2372_v60  ;;  %v3267_v55 = vrot.slane %v3266_v9, 1  ;;  %v2446_v33 = vrot.slane %v2445_v61, 2 }
 0x307   : > { %v2440_v13 = vmax.f32 %v2438_v25, %v2439_v54  ;;  %v3274_v7 = vrot.slane %v3273_v2, 1  ;;  %v3335_v32 = vrot.slane %v3334_v40, 2  ;;  %v3341_v60 = vmax.f32 %v3339_v17, %v3340_v6 }
 0x308   : > { %v3674_v62 = vadd.f32 %v8320_v15, %v2379_v37  ;;  %v6217_v49 = vpack.c.bf16 %v3673_v5, %v3673_v5  ;;  %v3268_v3 = vmax.f32 %v3266_v9, %v3267_v55  ;;  %v2447_v45 = vmax.f32 %v2445_v61, %v2446_v33  ;;  %v8469_v61 = vpop.f32.mrb[55].mxu1 }
 0x309   : > { %v2441_v4 = vrot.slane %v2440_v13, 1  ;;  %v3275_v16 = vmax.f32 %v3273_v2, %v3274_v7  ;;  %v3336_v53 = vmax.f32 %v3334_v40, %v3335_v32  ;;  %v3342_v37 = vrot.slane %v3341_v60, 2 }
 0x30a   : > { %v6218_v48 = vpack.c.bf16 %v3674_v62, %v3674_v62  ;;  %v4953_v23 = vunpack.c.l.b16 %v6217_v49  ;;  %v3801_v21 = vadd.f32 %v8320_v15, %v3268_v3  ;;  %v2448_v63 = vrot.slane %v2447_v45, 1 }
 0x30b   : > { %v2442_v0 = vmax.f32 %v2440_v13, %v2441_v4  ;;  %v4958_v5 = vunpack.c.l.b16 %v6222_v27  ;;  %v6350_v25 = vpack.c.bf16 %v8445_v46, %v8445_v46  ;;  %v3802_v33 = vadd.f32 %v8320_v15, %v3275_v16 }
 0x30c   : > { %v4954_v47 = vunpack.c.l.b16 %v6218_v48  ;;  %v5276_v42 = vrot.slane %v4953_v23, 6  ;;  %v6345_v9 = vpack.c.bf16 %v3801_v21, %v3801_v21  ;;  %v2449_v17 = vmax.f32 %v2447_v45, %v2448_v63 }
 0x30d   : > { %v3343_v55 = vmax.f32 %v3341_v60, %v3342_v37  ;;  %v5284_v40 = vrot.slane %v8438_v18, 2  ;;  %v5085_v27 = vunpack.c.l.b16 %v6349_v19  ;;  %v6346_v62 = vpack.c.bf16 %v3802_v33, %v3802_v33 }
 0x30e   : > { %v5277_v2 = vsel %vm5131_vm5, %v5276_v42, %v8428_v20  ;;  %v5278_v54 = vrot.slane %v4954_v47, 5  ;;  %v5081_v49 = vunpack.c.l.b16 %v6345_v9  ;;  %v9135_v16 = vrot.slane %v8432_v59, 7 }
 0x30f   : > { %v3683_v20 = vadd.f32 %v8320_v15, %v2442_v0  ;;  %v3337_v6 = vrot.slane %v3336_v53, 1  ;;  %v5086_v63 = vunpack.c.l.b16 %v6350_v25  ;;  %v9136_v3 = vrot.slane %v8357_v35, 4 }
 0x310   : > { %v5499_v46 = vsel %vm5128_vm4, %v9135_v16, %v8430_v22  ;;  %v5279_v13 = vsel %vm5134_vm6, %v5278_v54, %v5277_v2  ;;  %v5082_v7 = vunpack.c.l.b16 %v6346_v62  ;;  %v5500_v51 = vrot.slane %v5081_v49, 6  ;;  %v8517_v62 = vpop.f32.mrb[56].mxu1 }
 0x311   : > { %v5281_v18 = vsel %vm5137_vm7, %v9136_v3, %v5279_v13  ;;  %v5286_v19 = vrot.slane %v4958_v5, 1  ;;  %v9137_v45 = vrot.slane %v8369_v39, 3  ;;  %v8490_v59 = vadd.f32 %v8320_v15, %v2449_v17 }
 0x312   : > { %v3344_v22 = vrot.slane %v3343_v55, 1  ;;  %v5501_v23 = vsel %vm5131_vm5, %v5500_v51, %v5499_v46  ;;  %v5502_v4 = vrot.slane %v5082_v7, 5  ;;  %v1579_v35 = vcombine.high %v8092_v10, %v8092_v10 }
 0x313   : > { %v5283_v32 = vsel %vm5140_vm8, %v9137_v45, %v5281_v18  ;;  %v5508_v60 = vrot.slane %v5085_v27, 2  ;;  %v6227_v47 = vpack.c.bf16 %v3683_v20, %v3683_v20  ;;  %v3338_v39 = vmax.f32 %v3336_v53, %v3337_v6  ;;  %v8515_v27 = vpop.f32.mrb[56].mxu0 }
 0x314   : > { %v5285_v48 = vsel %vm5143_vm9, %v5284_v40, %v5283_v32  ;;  %v5510_v42 = vrot.slane %v5086_v63, 1  ;;  %v5503_v37 = vsel %vm5134_vm6, %v5502_v4, %v5501_v23  ;;  %v2408_v5 = vsel %vm1791_vm3, %v8092_v10, -inf }
 0x315   : > { %v5287_v21 = vsel %vm5146_vm10, %v5286_v19, %v5285_v48  ;;  %v9138_v25 = vrot.slane %v8407_v50, 4  ;;  %v6228_v9 = vpack.c.bf16 %v8490_v59, %v8490_v59  ;;  %v3345_v2 = vmax.f32 %v3343_v55, %v3344_v22 }
 0x316   : > { %v5592_v0 = vpack.c.b16 %v5287_v21, %v5287_v21  ;;  %v2409_v54 = vrot.slane %v2408_v5, 4  ;;  %v9139_v53 = vrot.slane %v8409_v11, 3  ;;  %v2415_v40 = vsel %vm1791_vm3, %v1579_v35, -inf }
 0x317   : > { %v5505_v33 = vsel %vm5137_vm7, %v9138_v25, %v5503_v37  ;;  %v1643_v10 = vcombine.high %v8121_v8, %v8121_v8  ;;  %v3304_v50 = vsel %vm1791_vm3, %v8121_v8, -inf  ;;  %v8520_v49 = vunpack.c.l.b16 %v6227_v47  ;;  %v8527_v8 = vpop.f32.mrb[57].mxu0 }
 0x318   : > { %5656 = vst.msk [vmem:[%s7047_s8 + $0x28] sm:$0xf] %vm1791_vm3, %v5592_v0  ;;  %v5507_v17 = vsel %vm5140_vm8, %v9139_v53, %v5505_v33  ;;  %v8523_v11 = vadd.f32 %v8320_v15, %v3338_v39  ;;  %v2410_v16 = vmax.f32 %v2408_v5, %v2409_v54  ;;  %v2416_v13 = vrot.slane %v2415_v40, 4 }
 0x319   : > { %v5509_v55 = vsel %vm5143_vm9, %v5508_v60, %v5507_v17  ;;  %v3305_v20 = vrot.slane %v3304_v50, 4  ;;  %v3311_v6 = vsel %vm1791_vm3, %v1643_v10, -inf  ;;  %v3812_v3 = vadd.f32 %v8320_v15, %v3345_v2 }
 0x31a   : > { %v5511_v46 = vsel %vm5146_vm10, %v5510_v42, %v5509_v55  ;;  %v2411_v18 = vrot.slane %v2410_v16, 2  ;;  %v3312_v7 = vrot.slane %v3311_v6, 4  ;;  %v2417_v51 = vmax.f32 %v2415_v40, %v2416_v13 }
 0x31b   : > { %v5608_v63 = vpack.c.b16 %v5511_v46, %v5511_v46  ;;  %v3306_v19 = vmax.f32 %v3304_v50, %v3305_v20  ;;  %v1582_v45 = vcombine.high %v8133_v58, %v8133_v58  ;;  %v2450_v32 = vsel %vm1791_vm3, %v8133_v58, -inf }
 0x31c   : > { %v2412_v22 = vmax.f32 %v2410_v16, %v2411_v18  ;;  %v3313_v48 = vmax.f32 %v3311_v6, %v3312_v7  ;;  %v2451_v23 = vrot.slane %v2450_v32, 4  ;;  %v1646_v4 = vcombine.high %v8144_v41, %v8144_v41 }
 0x31d   : > { %5672 = vst.msk [vmem:[%s7047_s8 + $0x68] sm:$0xf] %vm1791_vm3, %v5608_v63  ;;  %v2418_v35 = vrot.slane %v2417_v51, 2  ;;  %v3307_v60 = vrot.slane %v3306_v19, 2  ;;  %v2457_v21 = vsel %vm1791_vm3, %v1582_v45, -inf  ;;  %v3346_v47 = vsel %vm1791_vm3, %v8144_v41, -inf }
 0x31e   : > { %v2413_v39 = vrot.slane %v2412_v22, 1  ;;  %v3314_v42 = vrot.slane %v3313_v48, 2  ;;  %v2452_v0 = vmax.f32 %v2450_v32, %v2451_v23  ;;  %v2458_v37 = vrot.slane %v2457_v21, 4 }
 0x31f   : > { %v2419_v58 = vmax.f32 %v2417_v51, %v2418_v35  ;;  %v3308_v5 = vmax.f32 %v3306_v19, %v3307_v60  ;;  %v3347_v25 = vrot.slane %v3346_v47, 4  ;;  %v3353_v33 = vsel %vm1791_vm3, %v1646_v4, -inf }
 0x320   : > { %v2414_v2 = vmax.f32 %v2412_v22, %v2413_v39  ;;  %v3315_v54 = vmax.f32 %v3313_v48, %v3314_v42  ;;  %v2453_v53 = vrot.slane %v2452_v0, 2  ;;  %v2459_v17 = vmax.f32 %v2457_v21, %v2458_v37 }
 0x321   : > { %v2420_v40 = vrot.slane %v2419_v58, 1  ;;  %v3309_v10 = vrot.slane %v3308_v5, 1  ;;  %v3348_v50 = vmax.f32 %v3346_v47, %v3347_v25  ;;  %v3354_v55 = vrot.slane %v3353_v33, 4 }
 0x322   : > { %v6355_v41 = vpack.c.bf16 %v8523_v11, %v8523_v11  ;;  %v3316_v16 = vrot.slane %v3315_v54, 1  ;;  %v2454_v46 = vmax.f32 %v2452_v0, %v2453_v53  ;;  %v2460_v13 = vrot.slane %v2459_v17, 2 }
 0x323   : > { %v2421_v20 = vmax.f32 %v2419_v58, %v2420_v40  ;;  %v3310_v6 = vmax.f32 %v3308_v5, %v3309_v10  ;;  %v3349_v63 = vrot.slane %v3348_v50, 2  ;;  %v3355_v18 = vmax.f32 %v3353_v33, %v3354_v55 }
 0x324   : > { %v6356_v7 = vpack.c.bf16 %v3812_v3, %v3812_v3  ;;  %v3317_v51 = vmax.f32 %v3315_v54, %v3316_v16  ;;  %v2455_v19 = vrot.slane %v2454_v46, 1  ;;  %v2461_v45 = vmax.f32 %v2459_v17, %v2460_v13 }
 0x325   : > { %v3679_v32 = vadd.f32 %v8320_v15, %v2414_v2  ;;  %v3680_v22 = vadd.f32 %v8320_v15, %v2421_v20  ;;  %v3350_v48 = vmax.f32 %v3348_v50, %v3349_v63  ;;  %v3356_v23 = vrot.slane %v3355_v18, 2  ;;  %v8560_v2 = vpop.f32.mrb[57].mxu1  ;;  %v8574_v63 = vpop.f32.mrb[58].mxu0 }
 0x326   : > { %v3807_v4 = vadd.f32 %v8320_v15, %v3310_v6  ;;  %v3808_v11 = vadd.f32 %v8320_v15, %v3317_v51  ;;  %v2456_v35 = vmax.f32 %v2454_v46, %v2455_v19  ;;  %v2462_v60 = vrot.slane %v2461_v45, 1 }
 0x327   : > { %v8551_v21 = vunpack.c.l.b16 %v6228_v9  ;;  %v6224_v3 = vpack.c.bf16 %v3680_v22, %v3680_v22  ;;  %v3351_v47 = vrot.slane %v3350_v48, 1  ;;  %v3357_v39 = vmax.f32 %v3355_v18, %v3356_v23  ;;  %v8584_v23 = vpop.f32.mrb[58].mxu1 }
 0x328   : > { %v8553_v42 = vunpack.c.l.b16 %v6355_v41  ;;  %v6352_v0 = vpack.c.bf16 %v3808_v11, %v3808_v11  ;;  %v2463_v37 = vmax.f32 %v2461_v45, %v2462_v60  ;;  %v1580_v58 = vcombine.high %v8163_v24, %v8163_v24 }
 0x329   : > { %v8557_v5 = vunpack.c.l.b16 %v6356_v7  ;;  %v4960_v25 = vunpack.c.l.b16 %v6224_v3  ;;  %v3685_v33 = vadd.f32 %v8320_v15, %v2456_v35  ;;  %v6223_v59 = vpack.c.bf16 %v3679_v32, %v3679_v32 }
 0x32a   : > { %v6351_v9 = vpack.c.bf16 %v3807_v4, %v3807_v4  ;;  %v3358_v54 = vrot.slane %v3357_v39, 1  ;;  %v2422_v53 = vsel %vm1791_vm3, %v8163_v24, -inf  ;;  %v8565_v40 = vunpack.c.l.b16 %v6352_v0 }
 0x32b   : > { %v3352_v10 = vmax.f32 %v3350_v48, %v3351_v47  ;;  %v2423_v50 = vrot.slane %v2422_v53, 4  ;;  %v8570_v16 = vadd.f32 %v8320_v15, %v2463_v37  ;;  %v2429_v46 = vsel %vm1791_vm3, %v1580_v58, -inf }
 0x32c   : > { %v5288_v20 = vrot.slane %v4960_v25, 7  ;;  %v6229_v6 = vpack.c.bf16 %v3685_v33, %v3685_v33  ;;  %v4959_v18 = vunpack.c.l.b16 %v6223_v59  ;;  %v8576_v7 = vunpack.c.l.b16 %v6351_v9  ;;  %v8599_v59 = vpop.f32.mrb[59].mxu0 }
 0x32d   : > { %v2424_v24 = vmax.f32 %v2422_v53, %v2423_v50  ;;  %v3359_v51 = vmax.f32 %v3357_v39, %v3358_v54  ;;  %v2430_v19 = vrot.slane %v2429_v46, 4  ;;  %v8580_v32 = vadd.f32 %v8320_v15, %v3352_v10 }
 0x32e   : > { %v1644_v48 = vcombine.high %v8177_v43, %v8177_v43  ;;  %v3318_v35 = vsel %vm1791_vm3, %v8177_v43, -inf  ;;  %v1585_v60 = vcombine.high %v8222_v31, %v8222_v31  ;;  %v5289_v3 = vsel %vm5128_vm4, %v5288_v20, %v4959_v18 }
 0x32f   : > { %v2425_v22 = vrot.slane %v2424_v24, 2  ;;  %v2431_v11 = vmax.f32 %v2429_v46, %v2430_v19  ;;  %v8593_v47 = vunpack.c.l.b16 %v6229_v6  ;;  %v3319_v0 = vrot.slane %v3318_v35, 4 }
 0x330   : > { %v3325_v58 = vsel %vm1791_vm3, %v1644_v48, -inf  ;;  %v2492_v25 = vsel %vm1791_vm3, %v8222_v31, -inf  ;;  %v2499_v33 = vsel %vm1791_vm3, %v1585_v60, -inf  ;;  %v3814_v43 = vadd.f32 %v8320_v15, %v3359_v51 }
 0x331   : > { %v2426_v39 = vmax.f32 %v2424_v24, %v2425_v22  ;;  %v2432_v37 = vrot.slane %v2431_v11, 2  ;;  %v3320_v54 = vmax.f32 %v3318_v35, %v3319_v0  ;;  %v3326_v53 = vrot.slane %v3325_v58, 4 }
 0x332   : > { %v2493_v50 = vrot.slane %v2492_v25, 4  ;;  %v2500_v46 = vrot.slane %v2499_v33, 4  ;;  %v1649_v20 = vcombine.high %v8224_v56, %v8224_v56  ;;  %v3388_v31 = vsel %vm1791_vm3, %v8224_v56, -inf }
 0x333   : > { %v2427_v9 = vrot.slane %v2426_v39, 1  ;;  %v2433_v10 = vmax.f32 %v2431_v11, %v2432_v37  ;;  %v3321_v24 = vrot.slane %v3320_v54, 2  ;;  %v3327_v18 = vmax.f32 %v3325_v58, %v3326_v53 }
 0x334   : > { %v2494_v22 = vmax.f32 %v2492_v25, %v2493_v50  ;;  %v2501_v48 = vmax.f32 %v2499_v33, %v2500_v46  ;;  %v3389_v60 = vrot.slane %v3388_v31, 4  ;;  %v3395_v11 = vsel %vm1791_vm3, %v1649_v20, -inf }
 0x335   : > { %v2428_v6 = vmax.f32 %v2426_v39, %v2427_v9  ;;  %v2434_v19 = vrot.slane %v2433_v10, 1  ;;  %v3322_v35 = vmax.f32 %v3320_v54, %v3321_v24  ;;  %v3328_v0 = vrot.slane %v3327_v18, 2 }
 0x336   : > { %v2495_v13 = vrot.slane %v2494_v22, 2  ;;  %v2502_v41 = vrot.slane %v2501_v48, 2  ;;  %v3390_v55 = vmax.f32 %v3388_v31, %v3389_v60  ;;  %v3396_v53 = vrot.slane %v3395_v11, 4 }
 0x337   : > { %v3681_v51 = vadd.f32 %v8320_v15, %v2428_v6  ;;  %v2435_v37 = vmax.f32 %v2433_v10, %v2434_v19  ;;  %v3323_v9 = vrot.slane %v3322_v35, 1  ;;  %v3329_v58 = vmax.f32 %v3327_v18, %v3328_v0 }
 0x338   : > { %v2496_v17 = vmax.f32 %v2494_v22, %v2495_v13  ;;  %v2503_v25 = vmax.f32 %v2501_v48, %v2502_v41  ;;  %v3391_v33 = vrot.slane %v3390_v55, 2  ;;  %v3397_v54 = vmax.f32 %v3395_v11, %v3396_v53  ;;  %v8612_v22 = vpop.f32.mrb[59].mxu1 }
 0x339   : > { %v6225_v39 = vpack.c.bf16 %v3681_v51, %v3681_v51  ;;  %v3682_v56 = vadd.f32 %v8320_v15, %v2435_v37  ;;  %v3324_v46 = vmax.f32 %v3322_v35, %v3323_v9  ;;  %v3330_v6 = vrot.slane %v3329_v58, 1 }
 0x33a   : > { %v2497_v4 = vrot.slane %v2496_v17, 1  ;;  %v2504_v20 = vrot.slane %v2503_v25, 1  ;;  %v3392_v10 = vmax.f32 %v3390_v55, %v3391_v33  ;;  %v3398_v60 = vrot.slane %v3397_v54, 2 }
 0x33b   : > { %v4961_v50 = vunpack.c.l.b16 %v6225_v39  ;;  %v6226_v24 = vpack.c.bf16 %v3682_v56, %v3682_v56  ;;  %v3331_v45 = vmax.f32 %v3329_v58, %v3330_v6  ;;  %v3809_v31 = vadd.f32 %v8320_v15, %v3324_v46 }
 0x33c   : > { %v6357_v18 = vpack.c.bf16 %v8580_v32, %v8580_v32  ;;  %v6358_v51 = vpack.c.bf16 %v3814_v43, %v3814_v43  ;;  %v2498_v41 = vmax.f32 %v2496_v17, %v2497_v4  ;;  %v3399_v11 = vmax.f32 %v3397_v54, %v3398_v60 }
 0x33d   : > { %v5290_v19 = vrot.slane %v4961_v50, 6  ;;  %v4962_v13 = vunpack.c.l.b16 %v6226_v24  ;;  %v3810_v35 = vadd.f32 %v8320_v15, %v3331_v45  ;;  %v6353_v0 = vpack.c.bf16 %v3809_v31, %v3809_v31 }
 0x33e   : > { %v9140_v55 = vrot.slane %v8565_v40, 7  ;;  %v9141_v39 = vpack.c.bf16 %v8570_v16, %v8570_v16  ;;  %v2505_v9 = vmax.f32 %v2503_v25, %v2504_v20  ;;  %v5298_v17 = vrot.slane %v8593_v47, 2 }
 0x33f   : > { %v5291_v48 = vsel %vm5131_vm5, %v5290_v19, %v5289_v3  ;;  %v5292_v43 = vrot.slane %v4962_v13, 5  ;;  %v6354_v4 = vpack.c.bf16 %v3810_v35, %v3810_v35  ;;  %v5089_v58 = vunpack.c.l.b16 %v6353_v0 }
 0x340   : > { %v5513_v37 = vsel %vm5128_vm4, %v9140_v55, %v8576_v7  ;;  %v4966_v32 = vunpack.c.l.b16 %v9141_v39  ;;  %v3393_v3 = vrot.slane %v3392_v10, 1  ;;  %v5093_v53 = vunpack.c.l.b16 %v6357_v18 }
 0x341   : > { %v5094_v45 = vunpack.c.l.b16 %v6358_v51  ;;  %v5293_v56 = vsel %vm5134_vm6, %v5292_v43, %v5291_v48  ;;  %v8626_v33 = vadd.f32 %v8320_v15, %v2498_v41  ;;  %v9142_v40 = vrot.slane %v8520_v49, 4  ;;  %v8655_v43 = vpop.f32.mrb[60].mxu1 }
 0x342   : > { %v5090_v16 = vunpack.c.l.b16 %v6354_v4  ;;  %v5514_v50 = vrot.slane %v5089_v58, 6  ;;  %v3400_v46 = vrot.slane %v3399_v11, 1  ;;  %v5300_v25 = vrot.slane %v4966_v32, 1  ;;  %v8653_v32 = vpop.f32.mrb[60].mxu0 }
 0x343   : > { %v5295_v7 = vsel %vm5137_vm7, %v9142_v40, %v5293_v56  ;;  %v9143_v47 = vrot.slane %v8551_v21, 3  ;;  %v8635_v54 = vadd.f32 %v8320_v15, %v2505_v9  ;;  %v1583_v24 = vcombine.high %v8232_v57, %v8232_v57 }
 0x344   : > { %v5515_v49 = vsel %vm5131_vm5, %v5514_v50, %v5513_v37  ;;  %v5516_v19 = vrot.slane %v5090_v16, 5  ;;  %v3394_v31 = vmax.f32 %v3392_v10, %v3393_v3  ;;  %v5522_v60 = vrot.slane %v5093_v53, 2 }
 0x345   : > { %v5297_v6 = vsel %vm5140_vm8, %v9143_v47, %v5295_v7  ;;  %v5524_v18 = vrot.slane %v5094_v45, 1  ;;  %v6235_v21 = vpack.c.bf16 %v8626_v33, %v8626_v33  ;;  %v3401_v48 = vmax.f32 %v3399_v11, %v3400_v46  ;;  %v8676_v7 = vpop.f32.mrb[61].mxu0 }
 0x346   : > { %v5299_v20 = vsel %vm5143_vm9, %v5298_v17, %v5297_v6  ;;  %v5517_v41 = vsel %vm5134_vm6, %v5516_v19, %v5515_v49  ;;  %v2464_v35 = vsel %vm1791_vm3, %v8232_v57, -inf  ;;  %v9144_v0 = vrot.slane %v8553_v42, 4 }
 0x347   : > { %v5301_v51 = vsel %vm5146_vm10, %v5300_v25, %v5299_v20  ;;  %v6236_v10 = vpack.c.bf16 %v8635_v54, %v8635_v54  ;;  %v2465_v37 = vrot.slane %v2464_v35, 4  ;;  %v2471_v39 = vsel %vm1791_vm3, %v1583_v24, -inf }
 0x348   : > { %v5593_v13 = vpack.c.b16 %v5301_v51, %v5301_v51  ;;  %v5519_v55 = vsel %vm5137_vm7, %v9144_v0, %v5517_v41  ;;  %v9145_v11 = vrot.slane %v8557_v5, 3  ;;  %v8663_v42 = vadd.f32 %v8320_v15, %v3394_v31 }
 0x349   : > { %v2472_v9 = vrot.slane %v2471_v39, 4  ;;  %v1647_v17 = vcombine.high %v8258_v30, %v8258_v30  ;;  %v2466_v58 = vmax.f32 %v2464_v35, %v2465_v37  ;;  %v3360_v3 = vsel %vm1791_vm3, %v8258_v30, -inf }
 0x34a   : > { %5657 = vst.msk [vmem:[%s7047_s8 + $0x2c] sm:$0xf] %vm1791_vm3, %v5593_v13  ;;  %v5521_v57 = vsel %vm5140_vm8, %v9145_v11, %v5519_v55  ;;  %v1586_v53 = vcombine.high %v8275_v29, %v8275_v29  ;;  %v8674_v45 = vadd.f32 %v8320_v15, %v3401_v48  ;;  %v3361_v40 = vrot.slane %v3360_v3, 4 }
 0x34b   : > { %v5523_v4 = vsel %vm5143_vm9, %v5522_v60, %v5521_v57  ;;  %v2473_v56 = vmax.f32 %v2471_v39, %v2472_v9  ;;  %v2467_v50 = vrot.slane %v2466_v58, 2  ;;  %v3367_v46 = vsel %vm1791_vm3, %v1647_v17, -inf }
 0x34c   : > { %v5525_v5 = vsel %vm5146_vm10, %v5524_v18, %v5523_v4  ;;  %v2506_v25 = vsel %vm1791_vm3, %v8275_v29, -inf  ;;  %v3362_v47 = vmax.f32 %v3360_v3, %v3361_v40  ;;  %v3368_v6 = vrot.slane %v3367_v46, 4 }
 0x34d   : > { %v5609_v16 = vpack.c.b16 %v5525_v5, %v5525_v5  ;;  %v2474_v30 = vrot.slane %v2473_v56, 2  ;;  %v2507_v24 = vrot.slane %v2506_v25, 4  ;;  %v2468_v20 = vmax.f32 %v2466_v58, %v2467_v50 }
 0x34e   : > { %v2513_v49 = vsel %vm1791_vm3, %v1586_v53, -inf  ;;  %v1650_v19 = vcombine.high %v8287_v36, %v8287_v36  ;;  %v3402_v31 = vsel %vm1791_vm3, %v8287_v36, -inf  ;;  %v3363_v18 = vrot.slane %v3362_v47, 2 }
 0x34f   : > { %5673 = vst.msk [vmem:[%s7047_s8 + $0x6c] sm:$0xf] %vm1791_vm3, %v5609_v16  ;;  %v2475_v60 = vmax.f32 %v2473_v56, %v2474_v30  ;;  %v3369_v51 = vmax.f32 %v3367_v46, %v3368_v6  ;;  %v2508_v13 = vmax.f32 %v2506_v25, %v2507_v24  ;;  %v2469_v29 = vrot.slane %v2468_v20, 1 }
 0x350   : > { %v2514_v41 = vrot.slane %v2513_v49, 4  ;;  %v3403_v48 = vrot.slane %v3402_v31, 4  ;;  %v3409_v35 = vsel %vm1791_vm3, %v1650_v19, -inf  ;;  %v3364_v55 = vmax.f32 %v3362_v47, %v3363_v18 }
 0x351   : > { %v2476_v0 = vrot.slane %v2475_v60, 1  ;;  %v3370_v37 = vrot.slane %v3369_v51, 2  ;;  %v2509_v39 = vrot.slane %v2508_v13, 2  ;;  %v2470_v11 = vmax.f32 %v2468_v20, %v2469_v29 }
 0x352   : > { %v2515_v57 = vmax.f32 %v2513_v49, %v2514_v41  ;;  %v3404_v9 = vmax.f32 %v3402_v31, %v3403_v48  ;;  %v3410_v17 = vrot.slane %v3409_v35, 4  ;;  %v3365_v58 = vrot.slane %v3364_v55, 1 }
 0x353   : > { %v2477_v4 = vmax.f32 %v2475_v60, %v2476_v0  ;;  %v3371_v36 = vmax.f32 %v3369_v51, %v3370_v37  ;;  %v2510_v3 = vmax.f32 %v2508_v13, %v2509_v39  ;;  %v6363_v53 = vpack.c.bf16 %v8663_v42, %v8663_v42  ;;  %v8702_v42 = vld [vmem:[%s9085_s2] ss:$0 sm:$0xff] }
 0x354   : > { %v2516_v5 = vrot.slane %v2515_v57, 2  ;;  %v3405_v56 = vrot.slane %v3404_v9, 2  ;;  %v3411_v40 = vmax.f32 %v3409_v35, %v3410_v17  ;;  %v3366_v50 = vmax.f32 %v3364_v55, %v3365_v58  ;;  %v8719_v55 = vpop.f32.mrb[61].mxu1 }
 0x355   : > { %v3688_v16 = vadd.f32 %v8320_v15, %v2477_v4  ;;  %v3372_v46 = vrot.slane %v3371_v36, 1  ;;  %v2511_v25 = vrot.slane %v2510_v3, 1  ;;  %v8695_v30 = vunpack.c.l.b16 %v6235_v21 }
 0x356   : > { %v2517_v47 = vmax.f32 %v2515_v57, %v2516_v5  ;;  %v3406_v6 = vmax.f32 %v3404_v9, %v3405_v56  ;;  %v3412_v24 = vrot.slane %v3411_v40, 2  ;;  %v6364_v20 = vpack.c.bf16 %v8674_v45, %v8674_v45 }
 0x357   : > { %v3687_v15 = vadd.f32 %v8702_v42, %v2470_v11  ;;  %v6232_v49 = vpack.c.bf16 %v3688_v16, %v3688_v16  ;;  %v3373_v19 = vmax.f32 %v3371_v36, %v3372_v46  ;;  %v3815_v31 = vadd.f32 %v8702_v42, %v3366_v50 }
 0x358   : > { %v2512_v33 = vmax.f32 %v2510_v3, %v2511_v25  ;;  %v2518_v21 = vrot.slane %v2517_v47, 1  ;;  %v8709_v60 = vunpack.c.l.b16 %v6236_v10  ;;  %v8711_v18 = vunpack.c.l.b16 %v6363_v53  ;;  %v8727_v53 = vpop.f32.mrb[62].mxu0 }
 0x359   : > { %v3413_v45 = vmax.f32 %v3411_v40, %v3412_v24  ;;  %v4968_v51 = vunpack.c.l.b16 %v6232_v49  ;;  %v3816_v13 = vadd.f32 %v8702_v42, %v3373_v19  ;;  %v3407_v29 = vrot.slane %v3406_v6, 1 }
 0x35a   : > { %v1584_v41 = vcombine.high %v8302_v14, %v8302_v14  ;;  %v5308_v48 = vrot.slane %v8695_v30, 4  ;;  %v8717_v35 = vunpack.c.l.b16 %v6364_v20  ;;  %v6231_v0 = vpack.c.bf16 %v3687_v15, %v3687_v15 }
 0x35b   : > { %v6359_v54 = vpack.c.bf16 %v3815_v31, %v3815_v31  ;;  %v2519_v10 = vmax.f32 %v2517_v47, %v2518_v21  ;;  %v3693_v37 = vadd.f32 %v8702_v42, %v2512_v33  ;;  %v2478_v39 = vsel %vm1791_vm3, %v8302_v14, -inf  ;;  %v8737_v47 = vpop.f32.mrb[62].mxu1 }
 0x35c   : > { %v5310_v11 = vrot.slane %v8709_v60, 3  ;;  %v5532_v57 = vrot.slane %v8711_v18, 4  ;;  %v3414_v9 = vrot.slane %v3413_v45, 1  ;;  %v2479_v17 = vrot.slane %v2478_v39, 4 }
 0x35d   : > { %v5302_v4 = vrot.slane %v4968_v51, 7  ;;  %v6360_v58 = vpack.c.bf16 %v3816_v13, %v3816_v13  ;;  %v3408_v36 = vmax.f32 %v3406_v6, %v3407_v29  ;;  %v2485_v3 = vsel %vm1791_vm3, %v1584_v41, -inf }
 0x35e   : > { %v4967_v56 = vunpack.c.l.b16 %v6231_v0  ;;  %v2480_v40 = vmax.f32 %v2478_v39, %v2479_v17  ;;  %v2486_v16 = vrot.slane %v2485_v3, 4  ;;  %v8730_v50 = vunpack.c.l.b16 %v6359_v54  ;;  %v8756_v54 = vpop.f32.mrb[63].mxu0 }
 0x35f   : > { %v8733_v14 = vadd.f32 %v8702_v42, %v2519_v10  ;;  %v6237_v46 = vpack.c.bf16 %v3693_v37, %v3693_v37  ;;  %v1648_v25 = vcombine.high %v8314_v38, %v8314_v38  ;;  %v3415_v6 = vmax.f32 %v3413_v45, %v3414_v9 }
 0x360   : > { %v2481_v24 = vrot.slane %v2480_v40, 2  ;;  %v2487_v20 = vmax.f32 %v2485_v3, %v2486_v16  ;;  %v3374_v15 = vsel %vm1791_vm3, %v8314_v38, -inf  ;;  %v8742_v49 = vsel %vm5128_vm4, %v5302_v4, %v4967_v56 }
 0x361   : > { %v8744_v19 = vunpack.c.l.b16 %v6360_v58  ;;  %v8747_v31 = vadd.f32 %v8702_v42, %v3408_v36  ;;  %v3375_v33 = vrot.slane %v3374_v15, 4  ;;  %v3381_v13 = vsel %vm1791_vm3, %v1648_v25, -inf }
 0x362   : > { %v2482_v21 = vmax.f32 %v2480_v40, %v2481_v24  ;;  %v2488_v51 = vrot.slane %v2487_v20, 2  ;;  %v1589_v45 = vcombine.high %v8360_v44, %v8360_v44  ;;  %v8752_v29 = vunpack.c.l.b16 %v6237_v46 }
 0x363   : > { %v3376_v41 = vmax.f32 %v3374_v15, %v3375_v33  ;;  %v3382_v38 = vrot.slane %v3381_v13, 4  ;;  %v2548_v0 = vsel %vm1791_vm3, %v8360_v44, -inf  ;;  %v1653_v36 = vcombine.high %v8362_v12, %v8362_v12 }
 0x364   : > { %v2483_v10 = vrot.slane %v2482_v21, 1  ;;  %v2489_v37 = vmax.f32 %v2487_v20, %v2488_v51  ;;  %v2549_v39 = vrot.slane %v2548_v0, 4  ;;  %v2555_v9 = vsel %vm1791_vm3, %v1589_v45, -inf }
 0x365   : > { %v3377_v17 = vrot.slane %v3376_v41, 2  ;;  %v3383_v4 = vmax.f32 %v3381_v13, %v3382_v38  ;;  %v2556_v58 = vrot.slane %v2555_v9, 4  ;;  %v3444_v16 = vsel %vm1791_vm3, %v8362_v12, -inf }
 0x366   : > { %v2484_v3 = vmax.f32 %v2482_v21, %v2483_v10  ;;  %v2490_v56 = vrot.slane %v2489_v37, 1  ;;  %v2550_v40 = vmax.f32 %v2548_v0, %v2549_v39  ;;  %v3445_v24 = vrot.slane %v3444_v16, 4 }
 0x367   : > { %v3378_v44 = vmax.f32 %v3376_v41, %v3377_v17  ;;  %v3384_v46 = vrot.slane %v3383_v4, 2  ;;  %v2557_v25 = vmax.f32 %v2555_v9, %v2556_v58  ;;  %v3451_v51 = vsel %vm1791_vm3, %v1653_v36, -inf }
 0x368   : > { %v2491_v20 = vmax.f32 %v2489_v37, %v2490_v56  ;;  %v3689_v15 = vadd.f32 %v8702_v42, %v2484_v3  ;;  %v2551_v33 = vrot.slane %v2550_v40, 2  ;;  %v6238_v13 = vpack.c.bf16 %v8733_v14, %v8733_v14 }
 0x369   : > { %v3379_v45 = vrot.slane %v3378_v44, 1  ;;  %v3385_v21 = vmax.f32 %v3383_v4, %v3384_v46  ;;  %v3446_v38 = vmax.f32 %v3444_v16, %v3445_v24  ;;  %v2558_v12 = vrot.slane %v2557_v25, 2 }
 0x36a   : > { %v3690_v0 = vadd.f32 %v8702_v42, %v2491_v20  ;;  %v6233_v10 = vpack.c.bf16 %v3689_v15, %v3689_v15  ;;  %v3452_v41 = vrot.slane %v3451_v51, 4  ;;  %v3822_v39 = vadd.f32 %v8702_v42, %v3415_v6 }
 0x36b   : > { %v3380_v9 = vmax.f32 %v3378_v44, %v3379_v45  ;;  %v3386_v37 = vrot.slane %v3385_v21, 1  ;;  %v2552_v17 = vmax.f32 %v2550_v40, %v2551_v33  ;;  %v3447_v56 = vrot.slane %v3446_v38, 2  ;;  %v8774_v45 = vpop.f32.mrb[63].mxu1 }
 0x36c   : > { %v6234_v58 = vpack.c.bf16 %v3690_v0, %v3690_v0  ;;  %v4969_v3 = vunpack.c.l.b16 %v6233_v10  ;;  %v3453_v36 = vmax.f32 %v3451_v51, %v3452_v41  ;;  %v5526_v5 = vrot.slane %v8744_v19, 7 }
 0x36d   : > { %v6365_v14 = vpack.c.bf16 %v8747_v31, %v8747_v31  ;;  %v3387_v4 = vmax.f32 %v3385_v21, %v3386_v37  ;;  %v3817_v16 = vadd.f32 %v8702_v42, %v3380_v9  ;;  %v2559_v20 = vmax.f32 %v2557_v25, %v2558_v12 }
 0x36e   : > { %v4970_v46 = vunpack.c.l.b16 %v6234_v58  ;;  %v5304_v24 = vrot.slane %v4969_v3, 6  ;;  %v3454_v15 = vrot.slane %v3453_v36, 2  ;;  %v4974_v6 = vunpack.c.l.b16 %v6238_v13 }
 0x36f   : > { %v6366_v44 = vpack.c.bf16 %v3822_v39, %v3822_v39  ;;  %v3818_v40 = vadd.f32 %v8702_v42, %v3387_v4  ;;  %v6361_v33 = vpack.c.bf16 %v3817_v16, %v3817_v16  ;;  %v2553_v0 = vrot.slane %v2552_v17, 1 }
 0x370   : > { %v5305_v19 = vsel %vm5131_vm5, %v5304_v24, %v8742_v49  ;;  %v5306_v51 = vrot.slane %v4970_v46, 5  ;;  %v3448_v31 = vmax.f32 %v3446_v38, %v3447_v56  ;;  %v5312_v21 = vrot.slane %v8752_v29, 2 }
 0x371   : > { %v5101_v10 = vunpack.c.l.b16 %v6365_v14  ;;  %v6362_v41 = vpack.c.bf16 %v3818_v40, %v3818_v40  ;;  %v5097_v9 = vunpack.c.l.b16 %v6361_v33  ;;  %v5527_v25 = vsel %vm5128_vm4, %v5526_v5, %v8730_v50 }
 0x372   : > { %v5307_v13 = vsel %vm5134_vm6, %v5306_v51, %v5305_v19  ;;  %v2560_v12 = vrot.slane %v2559_v20, 1  ;;  %v3455_v39 = vmax.f32 %v3453_v36, %v3454_v15  ;;  %v5102_v37 = vunpack.c.l.b16 %v6366_v44 }
 0x373   : > { %v5309_v49 = vsel %vm5137_vm7, %v5308_v48, %v5307_v13  ;;  %v5098_v58 = vunpack.c.l.b16 %v6362_v41  ;;  %v5528_v3 = vrot.slane %v5097_v9, 6  ;;  %v5314_v38 = vrot.slane %v4974_v6, 1 }
 0x374   : > { %v5311_v29 = vsel %vm5140_vm8, %v5310_v11, %v5309_v49  ;;  %v2554_v56 = vmax.f32 %v2552_v17, %v2553_v0  ;;  %v3449_v14 = vrot.slane %v3448_v31, 1  ;;  %v1587_v30 = vcombine.high %v8382_v52, %v8382_v52 }
 0x375   : > { %v5313_v5 = vsel %vm5143_vm9, %v5312_v21, %v5311_v29  ;;  %v5529_v50 = vsel %vm5131_vm5, %v5528_v3, %v5527_v25  ;;  %v5530_v36 = vrot.slane %v5098_v58, 5  ;;  %v5536_v4 = vrot.slane %v5101_v10, 2 }
 0x376   : > { %v5315_v48 = vsel %vm5146_vm10, %v5314_v38, %v5313_v5  ;;  %v2561_v16 = vmax.f32 %v2559_v20, %v2560_v12  ;;  %v3456_v46 = vrot.slane %v3455_v39, 1  ;;  %v5538_v24 = vrot.slane %v5102_v37, 1 }
 0x377   : > { %v5594_v60 = vpack.c.b16 %v5315_v48, %v5315_v48  ;;  %v5531_v11 = vsel %vm5134_vm6, %v5530_v36, %v5529_v50  ;;  %v2520_v17 = vsel %vm1791_vm3, %v8382_v52, -inf  ;;  %v8800_v6 = vadd.f32 %v8702_v42, %v2554_v56 }
 0x378   : > { %v5533_v15 = vsel %vm5137_vm7, %v5532_v57, %v5531_v11  ;;  %v3450_v44 = vmax.f32 %v3448_v31, %v3449_v14  ;;  %v2521_v40 = vrot.slane %v2520_v17, 4  ;;  %v9146_v20 = vrot.slane %v8717_v35, 3 }
 0x379   : > { %5658 = vst.msk [vmem:[%s7047_s8 + $0x30] sm:$0xf] %vm1791_vm3, %v5594_v60  ;;  %v2527_v19 = vsel %vm1791_vm3, %v1587_v30, -inf  ;;  %v1651_v52 = vcombine.high %v8411_v28, %v8411_v28  ;;  %v3416_v18 = vsel %vm1791_vm3, %v8411_v28, -inf  ;;  %v3700_v51 = vadd.f32 %v8702_v42, %v2561_v16 }
 0x37a   : > { %v5535_v33 = vsel %vm5140_vm8, %v9146_v20, %v5533_v15  ;;  %v3457_v0 = vmax.f32 %v3455_v39, %v3456_v46  ;;  %v2522_v31 = vmax.f32 %v2520_v17, %v2521_v40  ;;  %v2528_v35 = vrot.slane %v2527_v19, 4 }
 0x37b   : > { %v5537_v57 = vsel %vm5143_vm9, %v5536_v4, %v5535_v33  ;;  %v3417_v10 = vrot.slane %v3416_v18, 4  ;;  %v3423_v41 = vsel %vm1791_vm3, %v1651_v52, -inf  ;;  %v3827_v25 = vadd.f32 %v8702_v42, %v3450_v44 }
 0x37c   : > { %v5539_v21 = vsel %vm5146_vm10, %v5538_v24, %v5537_v57  ;;  %v2523_v13 = vrot.slane %v2522_v31, 2  ;;  %v3424_v12 = vrot.slane %v3423_v41, 4  ;;  %v2529_v37 = vmax.f32 %v2527_v19, %v2528_v35 }
 0x37d   : > { %v5610_v9 = vpack.c.b16 %v5539_v21, %v5539_v21  ;;  %v3418_v28 = vmax.f32 %v3416_v18, %v3417_v10  ;;  %v1590_v49 = vcombine.high %v8423_v1, %v8423_v1  ;;  %v2562_v39 = vsel %vm1791_vm3, %v8423_v1, -inf }
 0x37e   : > { %v2524_v58 = vmax.f32 %v2522_v31, %v2523_v13  ;;  %v3425_v3 = vmax.f32 %v3423_v41, %v3424_v12  ;;  %v2563_v38 = vrot.slane %v2562_v39, 4  ;;  %v1654_v29 = vcombine.high %v8436_v26, %v8436_v26 }
 0x37f   : > { %5674 = vst.msk [vmem:[%s7047_s8 + $0x70] sm:$0xf] %vm1791_vm3, %v5610_v9  ;;  %v2530_v56 = vrot.slane %v2529_v37, 2  ;;  %v3419_v14 = vrot.slane %v3418_v28, 2  ;;  %v2569_v5 = vsel %vm1791_vm3, %v1590_v49, -inf  ;;  %v3458_v50 = vsel %vm1791_vm3, %v8436_v26, -inf }
 0x380   : > { %v2525_v36 = vrot.slane %v2524_v58, 1  ;;  %v3426_v30 = vrot.slane %v3425_v3, 2  ;;  %v2564_v4 = vmax.f32 %v2562_v39, %v2563_v38  ;;  %v2570_v48 = vrot.slane %v2569_v5, 4 }
 0x381   : > { %v2531_v1 = vmax.f32 %v2529_v37, %v2530_v56  ;;  %v3420_v16 = vmax.f32 %v3418_v28, %v3419_v14  ;;  %v3459_v46 = vrot.slane %v3458_v50, 4  ;;  %v3465_v24 = vsel %vm1791_vm3, %v1654_v29, -inf }
 0x382   : > { %v3828_v60 = vadd.f32 %v8702_v42, %v3457_v0  ;;  %v3427_v11 = vmax.f32 %v3425_v3, %v3426_v30  ;;  %v2565_v17 = vrot.slane %v2564_v4, 2  ;;  %v2571_v15 = vmax.f32 %v2569_v5, %v2570_v48 }
 0x383   : > { %v2532_v44 = vrot.slane %v2531_v1, 1  ;;  %v3421_v40 = vrot.slane %v3420_v16, 1  ;;  %v3460_v20 = vmax.f32 %v3458_v50, %v3459_v46  ;;  %v3466_v33 = vrot.slane %v3465_v24, 4 }
 0x384   : > { %v2526_v19 = vmax.f32 %v2524_v58, %v2525_v36  ;;  %v3428_v26 = vrot.slane %v3427_v11, 1  ;;  %v2566_v52 = vmax.f32 %v2564_v4, %v2565_v17  ;;  %v2572_v18 = vrot.slane %v2571_v15, 2 }
 0x385   : > { %v6243_v57 = vpack.c.bf16 %v8800_v6, %v8800_v6  ;;  %v2533_v31 = vmax.f32 %v2531_v1, %v2532_v44  ;;  %v3422_v21 = vmax.f32 %v3420_v16, %v3421_v40  ;;  %v6244_v35 = vpack.c.bf16 %v3700_v51, %v3700_v51 }
 0x386   : > { %v6371_v10 = vpack.c.bf16 %v3827_v25, %v3827_v25  ;;  %v3461_v41 = vrot.slane %v3460_v20, 2  ;;  %v6372_v0 = vpack.c.bf16 %v3828_v60, %v3828_v60  ;;  %v3429_v9 = vmax.f32 %v3427_v11, %v3428_v26 }
 0x387   : > { %v3467_v13 = vmax.f32 %v3465_v24, %v3466_v33  ;;  %v3695_v12 = vadd.f32 %v8702_v42, %v2526_v19  ;;  %v2567_v37 = vrot.slane %v2566_v52, 1  ;;  %v2573_v28 = vmax.f32 %v2571_v15, %v2572_v18 }
 0x388   : > { %v8833_v49 = vunpack.c.l.b16 %v6243_v57  ;;  %v3696_v39 = vadd.f32 %v8702_v42, %v2533_v31  ;;  %v3823_v58 = vadd.f32 %v8702_v42, %v3422_v21  ;;  %v8837_v3 = vunpack.c.l.b16 %v6244_v35 }
 0x389   : > { %v8839_v6 = vunpack.c.l.b16 %v6371_v10  ;;  %v3462_v51 = vmax.f32 %v3460_v20, %v3461_v41  ;;  %v1588_v25 = vcombine.high %v8455_v34, %v8455_v34  ;;  %v8843_v38 = vunpack.c.l.b16 %v6372_v0 }
 0x38a   : > { %v3824_v29 = vadd.f32 %v8702_v42, %v3429_v9  ;;  %v3468_v56 = vrot.slane %v3467_v13, 2  ;;  %v6239_v14 = vpack.c.bf16 %v3695_v12, %v3695_v12  ;;  %v2568_v5 = vmax.f32 %v2566_v52, %v2567_v37 }
 0x38b   : > { %v2574_v50 = vrot.slane %v2573_v28, 1  ;;  %v2534_v36 = vsel %vm1791_vm3, %v8455_v34, -inf  ;;  %v5322_v30 = vrot.slane %v8833_v49, 4  ;;  %v6240_v4 = vpack.c.bf16 %v3696_v39, %v3696_v39 }
 0x38c   : > { %v6367_v48 = vpack.c.bf16 %v3823_v58, %v3823_v58  ;;  %v2535_v1 = vrot.slane %v2534_v36, 4  ;;  %v5324_v16 = vrot.slane %v8837_v3, 3  ;;  %v5546_v46 = vrot.slane %v8839_v6, 4 }
 0x38d   : > { %v3463_v24 = vrot.slane %v3462_v51, 1  ;;  %v2541_v60 = vsel %vm1791_vm3, %v1588_v25, -inf  ;;  %v5548_v11 = vrot.slane %v8843_v38, 3  ;;  %v6368_v17 = vpack.c.bf16 %v3824_v29, %v3824_v29 }
 0x38e   : > { %v3469_v15 = vmax.f32 %v3467_v13, %v3468_v56  ;;  %v2536_v44 = vmax.f32 %v2534_v36, %v2535_v1  ;;  %v4975_v40 = vunpack.c.l.b16 %v6239_v14  ;;  %v2575_v20 = vmax.f32 %v2573_v28, %v2574_v50 }
 0x38f   : > { %v3701_v34 = vadd.f32 %v8702_v42, %v2568_v5  ;;  %v2542_v33 = vrot.slane %v2541_v60, 4  ;;  %v4976_v19 = vunpack.c.l.b16 %v6240_v4  ;;  %v8854_v26 = vunpack.c.l.b16 %v6367_v48 }
 0x390   : > { %v2537_v52 = vrot.slane %v2536_v44, 2  ;;  %v1652_v18 = vcombine.high %v8469_v61, %v8469_v61  ;;  %v3464_v57 = vmax.f32 %v3462_v51, %v3463_v24  ;;  %v3430_v21 = vsel %vm1791_vm3, %v8469_v61, -inf }
 0x391   : > { %v2543_v31 = vmax.f32 %v2541_v60, %v2542_v33  ;;  %v1593_v35 = vcombine.high %v8515_v27, %v8515_v27  ;;  %v5104_v10 = vunpack.c.l.b16 %v6368_v17  ;;  %v3470_v41 = vrot.slane %v3469_v15, 1 }
 0x392   : > { %v2538_v0 = vmax.f32 %v2536_v44, %v2537_v52  ;;  %v3431_v9 = vrot.slane %v3430_v21, 4  ;;  %v3437_v12 = vsel %vm1791_vm3, %v1652_v18, -inf  ;;  %v2604_v37 = vsel %vm1791_vm3, %v8515_v27, -inf }
 0x393   : > { %v2544_v13 = vrot.slane %v2543_v31, 2  ;;  %v2611_v28 = vsel %vm1791_vm3, %v1593_v35, -inf  ;;  %v3702_v39 = vadd.f32 %v8702_v42, %v2575_v20  ;;  %v3438_v61 = vrot.slane %v3437_v12, 4 }
 0x394   : > { %v2539_v58 = vrot.slane %v2538_v0, 1  ;;  %v3432_v51 = vmax.f32 %v3430_v21, %v3431_v9  ;;  %v6245_v25 = vpack.c.bf16 %v3701_v34, %v3701_v34  ;;  %v2605_v56 = vrot.slane %v2604_v37, 4 }
 0x395   : > { %v2545_v29 = vmax.f32 %v2543_v31, %v2544_v13  ;;  %v2612_v14 = vrot.slane %v2611_v28, 4  ;;  %v5316_v5 = vrot.slane %v4976_v19, 7  ;;  %v3439_v4 = vmax.f32 %v3437_v12, %v3438_v61 }
 0x396   : > { %v2540_v50 = vmax.f32 %v2538_v0, %v2539_v58  ;;  %v3433_v36 = vrot.slane %v3432_v51, 2  ;;  %v3471_v48 = vmax.f32 %v3469_v15, %v3470_v41  ;;  %v1657_v27 = vcombine.high %v8517_v62, %v8517_v62 }
 0x397   : > { %v2546_v1 = vrot.slane %v2545_v29, 1  ;;  %v3500_v24 = vsel %vm1791_vm3, %v8517_v62, -inf  ;;  %v3440_v44 = vrot.slane %v3439_v4, 2  ;;  %v2606_v20 = vmax.f32 %v2604_v37, %v2605_v56 }
 0x398   : > { %v3697_v60 = vadd.f32 %v8702_v42, %v2540_v50  ;;  %v3434_v17 = vmax.f32 %v3432_v51, %v3433_v36  ;;  %v5540_v34 = vrot.slane %v5104_v10, 7  ;;  %v3829_v33 = vadd.f32 %v8702_v42, %v3464_v57 }
 0x399   : > { %v2547_v19 = vmax.f32 %v2545_v29, %v2546_v1  ;;  %v2613_v52 = vmax.f32 %v2611_v28, %v2612_v14  ;;  %v3441_v15 = vmax.f32 %v3439_v4, %v3440_v44  ;;  %v3501_v21 = vrot.slane %v3500_v24, 4 }
 0x39a   : > { %v6241_v18 = vpack.c.bf16 %v3697_v60, %v3697_v60  ;;  %v3435_v31 = vrot.slane %v3434_v17, 1  ;;  %v6246_v35 = vpack.c.bf16 %v3702_v39, %v3702_v39  ;;  %v3830_v41 = vadd.f32 %v8702_v42, %v3471_v48 }
 0x39b   : > { %v3698_v0 = vadd.f32 %v8702_v42, %v2547_v19  ;;  %v3507_v62 = vsel %vm1791_vm3, %v1657_v27, -inf  ;;  %v3442_v12 = vrot.slane %v3441_v15, 1  ;;  %v2607_v37 = vrot.slane %v2606_v20, 2 }
 0x39c   : > { %v4977_v9 = vunpack.c.l.b16 %v6241_v18  ;;  %v3436_v13 = vmax.f32 %v3434_v17, %v3435_v31  ;;  %v5317_v10 = vsel %vm5128_vm4, %v5316_v5, %v4975_v40  ;;  %v4981_v57 = vunpack.c.l.b16 %v6245_v25 }
 0x39d   : > { %v6242_v58 = vpack.c.bf16 %v3698_v0, %v3698_v0  ;;  %v2614_v28 = vrot.slane %v2613_v52, 2  ;;  %v3443_v61 = vmax.f32 %v3441_v15, %v3442_v12  ;;  %v3502_v39 = vmax.f32 %v3500_v24, %v3501_v21 }
 0x39e   : > { %v5318_v51 = vrot.slane %v4977_v9, 6  ;;  %v3825_v29 = vadd.f32 %v8702_v42, %v3436_v13  ;;  %v6373_v56 = vpack.c.bf16 %v3829_v33, %v3829_v33  ;;  %v6374_v14 = vpack.c.bf16 %v3830_v41, %v3830_v41 }
 0x39f   : > { %v4978_v50 = vunpack.c.l.b16 %v6242_v58  ;;  %v3508_v36 = vrot.slane %v3507_v62, 4  ;;  %v3826_v48 = vadd.f32 %v8702_v42, %v3443_v61  ;;  %v2608_v27 = vmax.f32 %v2606_v20, %v2607_v37 }
 0x3a0   : > { %v5319_v4 = vsel %vm5131_vm5, %v5318_v51, %v5317_v10  ;;  %v6369_v1 = vpack.c.bf16 %v3825_v29, %v3825_v29  ;;  %v5541_v40 = vsel %vm5128_vm4, %v5540_v34, %v8854_v26  ;;  %v4982_v25 = vunpack.c.l.b16 %v6246_v35 }
 0x3a1   : > { %v5320_v5 = vrot.slane %v4978_v50, 5  ;;  %v2615_v60 = vmax.f32 %v2613_v52, %v2614_v28  ;;  %v5326_v17 = vrot.slane %v4981_v57, 2  ;;  %v6370_v44 = vpack.c.bf16 %v3826_v48, %v3826_v48 }
 0x3a2   : > { %v5105_v19 = vunpack.c.l.b16 %v6369_v1  ;;  %v3503_v24 = vrot.slane %v3502_v39, 2  ;;  %v5109_v33 = vunpack.c.l.b16 %v6373_v56  ;;  %v5110_v18 = vunpack.c.l.b16 %v6374_v14 }
 0x3a3   : > { %v5321_v31 = vsel %vm5134_vm6, %v5320_v5, %v5319_v4  ;;  %v3509_v15 = vmax.f32 %v3507_v62, %v3508_v36  ;;  %v5106_v20 = vunpack.c.l.b16 %v6370_v44  ;;  %v2609_v0 = vrot.slane %v2608_v27, 1 }
 0x3a4   : > { %v5323_v21 = vsel %vm5137_vm7, %v5322_v30, %v5321_v31  ;;  %v5542_v41 = vrot.slane %v5105_v19, 6  ;;  %v5328_v26 = vrot.slane %v4982_v25, 1  ;;  %v2616_v52 = vrot.slane %v2615_v60, 1 }
 0x3a5   : > { %v5325_v34 = vsel %vm5140_vm8, %v5324_v16, %v5323_v21  ;;  %v1591_v35 = vcombine.high %v8527_v8, %v8527_v8  ;;  %v5544_v49 = vrot.slane %v5106_v20, 5  ;;  %v3504_v13 = vmax.f32 %v3502_v39, %v3503_v24 }
 0x3a6   : > { %v5327_v9 = vsel %vm5143_vm9, %v5326_v17, %v5325_v34  ;;  %v5543_v62 = vsel %vm5131_vm5, %v5542_v41, %v5541_v40  ;;  %v5550_v30 = vrot.slane %v5109_v33, 2  ;;  %v5552_v12 = vrot.slane %v5110_v18, 1 }
 0x3a7   : > { %v5329_v37 = vsel %vm5146_vm10, %v5328_v26, %v5327_v9  ;;  %v3510_v10 = vrot.slane %v3509_v15, 2  ;;  %v5545_v3 = vsel %vm5134_vm6, %v5544_v49, %v5543_v62  ;;  %v2610_v16 = vmax.f32 %v2608_v27, %v2609_v0 }
 0x3a8   : > { %v5595_v57 = vpack.c.b16 %v5329_v37, %v5329_v37  ;;  %v2576_v58 = vsel %vm1791_vm3, %v8527_v8, -inf  ;;  %v5547_v28 = vsel %vm5137_vm7, %v5546_v46, %v5545_v3  ;;  %v2617_v51 = vmax.f32 %v2615_v60, %v2616_v52 }
 0x3a9   : > { %v2577_v61 = vrot.slane %v2576_v58, 4  ;;  %v2583_v29 = vsel %vm1791_vm3, %v1591_v35, -inf  ;;  %v5549_v39 = vsel %vm5140_vm8, %v5548_v11, %v5547_v28  ;;  %v3505_v56 = vrot.slane %v3504_v13, 1 }
 0x3aa   : > { %5659 = vst.msk [vmem:[%s7047_s8 + $0x34] sm:$0xf] %vm1791_vm3, %v5595_v57  ;;  %v2584_v14 = vrot.slane %v2583_v29, 4  ;;  %v1655_v50 = vcombine.high %v8560_v2, %v8560_v2  ;;  %v5551_v8 = vsel %vm5143_vm9, %v5550_v30, %v5549_v39  ;;  %v3472_v46 = vsel %vm1791_vm3, %v8560_v2, -inf }
 0x3ab   : > { %v2578_v6 = vmax.f32 %v2576_v58, %v2577_v61  ;;  %v1594_v36 = vcombine.high %v8574_v63, %v8574_v63  ;;  %v5553_v4 = vsel %vm5146_vm10, %v5552_v12, %v5551_v8  ;;  %v3511_v38 = vmax.f32 %v3509_v15, %v3510_v10 }
 0x3ac   : > { %v2585_v48 = vmax.f32 %v2583_v29, %v2584_v14  ;;  %v3473_v11 = vrot.slane %v3472_v46, 4  ;;  %v5611_v1 = vpack.c.b16 %v5553_v4, %v5553_v4  ;;  %v3479_v40 = vsel %vm1791_vm3, %v1655_v50, -inf }
 0x3ad   : > { %v2579_v27 = vrot.slane %v2578_v6, 2  ;;  %v2618_v25 = vsel %vm1791_vm3, %v8574_v63, -inf  ;;  %v3480_v17 = vrot.slane %v3479_v40, 4  ;;  %v3707_v2 = vadd.f32 %v8702_v42, %v2610_v16 }
 0x3ae   : > { %v2586_v5 = vrot.slane %v2585_v48, 2  ;;  %v3474_v60 = vmax.f32 %v3472_v46, %v3473_v11  ;;  %v2619_v44 = vrot.slane %v2618_v25, 4  ;;  %5675 = vst.msk [vmem:[%s7047_s8 + $0x74] sm:$0xf] %vm1791_vm3, %v5611_v1  ;;  %v2625_v19 = vsel %vm1791_vm3, %v1594_v36, -inf }
 0x3af   : > { %v1658_v24 = vcombine.high %v8584_v23, %v8584_v23  ;;  %v3514_v33 = vsel %vm1791_vm3, %v8584_v23, -inf  ;;  %v3512_v18 = vrot.slane %v3511_v38, 1  ;;  %v3481_v15 = vmax.f32 %v3479_v40, %v3480_v17 }
 0x3b0   : > { %v2587_v31 = vmax.f32 %v2585_v48, %v2586_v5  ;;  %v2620_v63 = vmax.f32 %v2618_v25, %v2619_v44  ;;  %v2580_v21 = vmax.f32 %v2578_v6, %v2579_v27  ;;  %v3475_v20 = vrot.slane %v3474_v60, 2 }
 0x3b1   : > { %v2626_v41 = vrot.slane %v2625_v19, 4  ;;  %v3515_v0 = vrot.slane %v3514_v33, 4  ;;  %v3708_v26 = vadd.f32 %v8702_v42, %v2617_v51  ;;  %v3506_v34 = vmax.f32 %v3504_v13, %v3505_v56 }
 0x3b2   : > { %v2588_v52 = vrot.slane %v2587_v31, 1  ;;  %v3482_v35 = vrot.slane %v3481_v15, 2  ;;  %v2621_v9 = vrot.slane %v2620_v63, 2  ;;  %v3521_v62 = vsel %vm1791_vm3, %v1658_v24, -inf }
 0x3b3   : > { %v6251_v49 = vpack.c.bf16 %v3707_v2, %v3707_v2  ;;  %v3513_v30 = vmax.f32 %v3511_v38, %v3512_v18  ;;  %v2627_v12 = vmax.f32 %v2625_v19, %v2626_v41  ;;  %v2581_v23 = vrot.slane %v2580_v21, 1 }
 0x3b4   : > { %v3476_v37 = vmax.f32 %v3474_v60, %v3475_v20  ;;  %v3516_v10 = vmax.f32 %v3514_v33, %v3515_v0  ;;  %v6252_v57 = vpack.c.bf16 %v3708_v26, %v3708_v26  ;;  %v3835_v3 = vadd.f32 %v8702_v42, %v3506_v34 }
 0x3b5   : > { %v3522_v16 = vrot.slane %v3521_v62, 4  ;;  %v2589_v58 = vmax.f32 %v2587_v31, %v2588_v52  ;;  %v3483_v28 = vmax.f32 %v3481_v15, %v3482_v35  ;;  %v2622_v61 = vmax.f32 %v2620_v63, %v2621_v9 }
 0x3b6   : > { %v8928_v51 = vunpack.c.l.b16 %v6251_v49  ;;  %v3836_v13 = vadd.f32 %v8702_v42, %v3513_v30  ;;  %v2628_v29 = vrot.slane %v2627_v12, 2  ;;  %v2582_v39 = vmax.f32 %v2580_v21, %v2581_v23 }
 0x3b7   : > { %v3477_v56 = vrot.slane %v3476_v37, 1  ;;  %v3517_v14 = vrot.slane %v3516_v10, 2  ;;  %v8931_v50 = vunpack.c.l.b16 %v6252_v57  ;;  %v6379_v8 = vpack.c.bf16 %v3835_v3, %v3835_v3 }
 0x3b8   : > { %v3523_v6 = vmax.f32 %v3521_v62, %v3522_v16  ;;  %v3704_v46 = vadd.f32 %v8702_v42, %v2589_v58  ;;  %v3484_v36 = vrot.slane %v3483_v28, 1  ;;  %v2623_v4 = vrot.slane %v2622_v61, 1 }
 0x3b9   : > { %v1592_v38 = vcombine.high %v8599_v59, %v8599_v59  ;;  %v5336_v48 = vrot.slane %v8928_v51, 4  ;;  %v6380_v11 = vpack.c.bf16 %v3836_v13, %v3836_v13  ;;  %v2629_v1 = vmax.f32 %v2627_v12, %v2628_v29 }
 0x3ba   : > { %v3703_v27 = vadd.f32 %v8702_v42, %v2582_v39  ;;  %v3478_v40 = vmax.f32 %v3476_v37, %v3477_v56  ;;  %v3518_v25 = vmax.f32 %v3516_v10, %v3517_v14  ;;  %v2590_v5 = vsel %vm1791_vm3, %v8599_v59, -inf }
 0x3bb   : > { %v5338_v60 = vrot.slane %v8931_v50, 3  ;;  %v8941_v17 = vunpack.c.l.b16 %v6379_v8  ;;  %v3524_v44 = vrot.slane %v3523_v6, 2  ;;  %v2591_v2 = vrot.slane %v2590_v5, 4 }
 0x3bc   : > { %v6248_v19 = vpack.c.bf16 %v3704_v46, %v3704_v46  ;;  %v3485_v24 = vmax.f32 %v3483_v28, %v3484_v36  ;;  %v2624_v33 = vmax.f32 %v2622_v61, %v2623_v4  ;;  %v2597_v18 = vsel %vm1791_vm3, %v1592_v38, -inf }
 0x3bd   : > { %v8944_v31 = vunpack.c.l.b16 %v6380_v11  ;;  %v2630_v15 = vrot.slane %v2629_v1, 1  ;;  %v2592_v63 = vmax.f32 %v2590_v5, %v2591_v2  ;;  %v2598_v21 = vrot.slane %v2597_v18, 4 }
 0x3be   : > { %v6247_v20 = vpack.c.bf16 %v3703_v27, %v3703_v27  ;;  %v3831_v41 = vadd.f32 %v8702_v42, %v3478_v40  ;;  %v3519_v59 = vrot.slane %v3518_v25, 1  ;;  %v1656_v0 = vcombine.high %v8612_v22, %v8612_v22 }
 0x3bf   : > { %v3525_v26 = vmax.f32 %v3523_v6, %v3524_v44  ;;  %v2593_v34 = vrot.slane %v2592_v63, 2  ;;  %v2599_v52 = vmax.f32 %v2597_v18, %v2598_v21  ;;  %v3486_v35 = vsel %vm1791_vm3, %v8612_v22, -inf }
 0x3c0   : > { %v4984_v9 = vunpack.c.l.b16 %v6248_v19  ;;  %v3832_v62 = vadd.f32 %v8702_v42, %v3485_v24  ;;  %v3709_v49 = vadd.f32 %v8702_v42, %v2624_v33  ;;  %v3487_v30 = vrot.slane %v3486_v35, 4 }
 0x3c1   : > { %v2631_v12 = vmax.f32 %v2629_v1, %v2630_v15  ;;  %v2594_v23 = vmax.f32 %v2592_v63, %v2593_v34  ;;  %v2600_v37 = vrot.slane %v2599_v52, 2  ;;  %v3493_v10 = vsel %vm1791_vm3, %v1656_v0, -inf }
 0x3c2   : > { %v4983_v57 = vunpack.c.l.b16 %v6247_v20  ;;  %v6375_v3 = vpack.c.bf16 %v3831_v41, %v3831_v41  ;;  %v3488_v16 = vmax.f32 %v3486_v35, %v3487_v30  ;;  %v3494_v58 = vrot.slane %v3493_v10, 4 }
 0x3c3   : > { %v3520_v28 = vmax.f32 %v3518_v25, %v3519_v59  ;;  %v3526_v61 = vrot.slane %v3525_v26, 1  ;;  %v2595_v13 = vrot.slane %v2594_v23, 1  ;;  %v2601_v29 = vmax.f32 %v2599_v52, %v2600_v37 }
 0x3c4   : > { %v5330_v22 = vrot.slane %v4984_v9, 7  ;;  %v6376_v39 = vpack.c.bf16 %v3832_v62, %v3832_v62  ;;  %v3489_v56 = vrot.slane %v3488_v16, 2  ;;  %v3495_v14 = vmax.f32 %v3493_v10, %v3494_v58 }
 0x3c5   : > { %v3710_v8 = vadd.f32 %v8702_v42, %v2631_v12  ;;  %v6253_v6 = vpack.c.bf16 %v3709_v49, %v3709_v49  ;;  %v2596_v46 = vmax.f32 %v2594_v23, %v2595_v13  ;;  %v2602_v36 = vrot.slane %v2601_v29, 1 }
 0x3c6   : > { %v3490_v4 = vmax.f32 %v3488_v16, %v3489_v56  ;;  %v3496_v38 = vrot.slane %v3495_v14, 2  ;;  %v1597_v11 = vcombine.high %v8653_v32, %v8653_v32  ;;  %v2660_v1 = vsel %vm1791_vm3, %v8653_v32, -inf }
 0x3c7   : > { %v5111_v27 = vunpack.c.l.b16 %v6375_v3  ;;  %v3527_v40 = vmax.f32 %v3525_v26, %v3526_v61  ;;  %v2603_v25 = vmax.f32 %v2601_v29, %v2602_v36  ;;  %v3705_v5 = vadd.f32 %v8702_v42, %v2596_v46 }
 0x3c8   : > { %v5112_v44 = vunpack.c.l.b16 %v6376_v39  ;;  %v3837_v2 = vadd.f32 %v8702_v42, %v3520_v28  ;;  %v3491_v19 = vrot.slane %v3490_v4, 1  ;;  %v3497_v24 = vmax.f32 %v3495_v14, %v3496_v38 }
 0x3c9   : > { %v4989_v33 = vunpack.c.l.b16 %v6253_v6  ;;  %v3706_v18 = vadd.f32 %v8702_v42, %v2603_v25  ;;  %v6249_v15 = vpack.c.bf16 %v3705_v5, %v3705_v5  ;;  %v2661_v63 = vrot.slane %v2660_v1, 4 }
 0x3ca   : > { %v6254_v21 = vpack.c.bf16 %v3710_v8, %v3710_v8  ;;  %v3492_v20 = vmax.f32 %v3490_v4, %v3491_v19  ;;  %v3498_v41 = vrot.slane %v3497_v24, 1  ;;  %v2667_v32 = vsel %vm1791_vm3, %v1597_v11, -inf }
 0x3cb   : > { %v5331_v59 = vsel %vm5128_vm4, %v5330_v22, %v4983_v57  ;;  %v3838_v0 = vadd.f32 %v8702_v42, %v3527_v40  ;;  %v6250_v26 = vpack.c.bf16 %v3706_v18, %v3706_v18  ;;  %v4985_v34 = vunpack.c.l.b16 %v6249_v15 }
 0x3cc   : > { %v5554_v52 = vrot.slane %v5112_v44, 7  ;;  %v6381_v35 = vpack.c.bf16 %v3837_v2, %v3837_v2  ;;  %v3499_v9 = vmax.f32 %v3497_v24, %v3498_v41  ;;  %v3833_v62 = vadd.f32 %v8702_v42, %v3492_v20 }
 0x3cd   : > { %v4986_v49 = vunpack.c.l.b16 %v6250_v26  ;;  %v5332_v30 = vrot.slane %v4985_v34, 6  ;;  %v2662_v12 = vmax.f32 %v2660_v1, %v2661_v63  ;;  %v2668_v23 = vrot.slane %v2667_v32, 4 }
 0x3ce   : > { %v4990_v37 = vunpack.c.l.b16 %v6254_v21  ;;  %v5340_v10 = vrot.slane %v4989_v33, 2  ;;  %v3834_v3 = vadd.f32 %v8702_v42, %v3499_v9  ;;  %v6377_v16 = vpack.c.bf16 %v3833_v62, %v3833_v62 }
 0x3cf   : > { %v6382_v58 = vpack.c.bf16 %v3838_v0, %v3838_v0  ;;  %v5333_v57 = vsel %vm5131_vm5, %v5332_v30, %v5331_v59  ;;  %v5334_v28 = vrot.slane %v4986_v49, 5  ;;  %v1661_v61 = vcombine.high %v8655_v43, %v8655_v43 }
 0x3d0   : > { %v5117_v13 = vunpack.c.l.b16 %v6381_v35  ;;  %v6378_v29 = vpack.c.bf16 %v3834_v3, %v3834_v3  ;;  %v5113_v22 = vunpack.c.l.b16 %v6377_v16  ;;  %v3556_v39 = vsel %vm1791_vm3, %v8655_v43, -inf }
 0x3d1   : > { %v5555_v56 = vsel %vm5128_vm4, %v5554_v52, %v5111_v27  ;;  %v5335_v14 = vsel %vm5134_vm6, %v5334_v28, %v5333_v57  ;;  %v2663_v8 = vrot.slane %v2662_v12, 2  ;;  %v2669_v42 = vmax.f32 %v2667_v32, %v2668_v23 }
 0x3d2   : > { %v5342_v6 = vrot.slane %v4990_v37, 1  ;;  %v5337_v46 = vsel %vm5137_vm7, %v5336_v48, %v5335_v14  ;;  %v5114_v36 = vunpack.c.l.b16 %v6378_v29  ;;  %v5556_v4 = vrot.slane %v5113_v22, 6 }
 0x3d3   : > { %v5118_v38 = vunpack.c.l.b16 %v6382_v58  ;;  %v5339_v11 = vsel %vm5140_vm8, %v5338_v60, %v5337_v46  ;;  %v3557_v1 = vrot.slane %v3556_v39, 4  ;;  %v3563_v43 = vsel %vm1791_vm3, %v1661_v61, -inf }
 0x3d4   : > { %v5341_v27 = vsel %vm5143_vm9, %v5340_v10, %v5339_v11  ;;  %v5557_v40 = vsel %vm5131_vm5, %v5556_v4, %v5555_v56  ;;  %v5558_v25 = vrot.slane %v5114_v36, 5  ;;  %v1595_v51 = vcombine.high %v8676_v7, %v8676_v7 }
 0x3d5   : > { %v5560_v48 = vrot.slane %v8941_v17, 4  ;;  %v5343_v5 = vsel %vm5146_vm10, %v5342_v6, %v5341_v27  ;;  %v2664_v44 = vmax.f32 %v2662_v12, %v2663_v8  ;;  %v2670_v50 = vrot.slane %v2669_v42, 2 }
 0x3d6   : > { %v5562_v60 = vrot.slane %v8944_v31, 3  ;;  %v5564_v2 = vrot.slane %v5117_v13, 2  ;;  %v5596_v19 = vpack.c.b16 %v5343_v5, %v5343_v5  ;;  %v5559_v24 = vsel %vm5134_vm6, %v5558_v25, %v5557_v40 }
 0x3d7   : > { %v5566_v33 = vrot.slane %v5118_v38, 1  ;;  %v5561_v18 = vsel %vm5137_vm7, %v5560_v48, %v5559_v24  ;;  %v3564_v15 = vrot.slane %v3563_v43, 4  ;;  %v2632_v63 = vsel %vm1791_vm3, %v8676_v7, -inf }
 0x3d8   : > { %5660 = vst.msk [vmem:[%s7047_s8 + $0x38] sm:$0xf] %vm1791_vm3, %v5596_v19  ;;  %v5563_v17 = vsel %vm5140_vm8, %v5562_v60, %v5561_v18  ;;  %v3558_v21 = vmax.f32 %v3556_v39, %v3557_v1  ;;  %v2639_v20 = vsel %vm1791_vm3, %v1595_v51, -inf  ;;  %v1659_v31 = vcombine.high %v8719_v55, %v8719_v55 }
 0x3d9   : > { %v5565_v41 = vsel %vm5143_vm9, %v5564_v2, %v5563_v17  ;;  %v2665_v32 = vrot.slane %v2664_v44, 1  ;;  %v2671_v59 = vmax.f32 %v2669_v42, %v2670_v50  ;;  %v2633_v26 = vrot.slane %v2632_v63, 4 }
 0x3da   : > { %v5567_v0 = vsel %vm5146_vm10, %v5566_v33, %v5565_v41  ;;  %v2640_v34 = vrot.slane %v2639_v20, 4  ;;  %v3535_v7 = vsel %vm1791_vm3, %v1659_v31, -inf  ;;  %v3565_v35 = vmax.f32 %v3563_v43, %v3564_v15 }
 0x3db   : > { %v5612_v52 = vpack.c.b16 %v5567_v0, %v5567_v0  ;;  %v3536_v9 = vrot.slane %v3535_v7, 4  ;;  %v3559_v62 = vrot.slane %v3558_v21, 2  ;;  %v3528_v30 = vsel %vm1791_vm3, %v8719_v55, -inf }
 0x3dc   : > { %v2641_v49 = vmax.f32 %v2639_v20, %v2640_v34  ;;  %v1598_v12 = vcombine.high %v8727_v53, %v8727_v53  ;;  %v2672_v23 = vrot.slane %v2671_v59, 1  ;;  %v2674_v37 = vsel %vm1791_vm3, %v8727_v53, -inf  ;;  %v9017_v53 = vld [vmem:[%s9085_s2] ss:$0 sm:$0xff] }
 0x3dd   : > { %5676 = vst.msk [vmem:[%s7047_s8 + $0x78] sm:$0xf] %vm1791_vm3, %v5612_v52  ;;  %v2666_v10 = vmax.f32 %v2664_v44, %v2665_v32  ;;  %v2634_v3 = vmax.f32 %v2632_v63, %v2633_v26  ;;  %v3566_v57 = vrot.slane %v3565_v35, 2  ;;  %v3529_v28 = vrot.slane %v3528_v30, 4 }
 0x3de   : > { %v2642_v16 = vrot.slane %v2641_v49, 2  ;;  %v2681_v58 = vsel %vm1791_vm3, %v1598_v12, -inf  ;;  %v3537_v61 = vmax.f32 %v3535_v7, %v3536_v9  ;;  %v1662_v55 = vcombine.high %v8737_v47, %v8737_v47 }
 0x3df   : > { %v3560_v13 = vmax.f32 %v3558_v21, %v3559_v62  ;;  %v2675_v29 = vrot.slane %v2674_v37, 4  ;;  %v2673_v22 = vmax.f32 %v2671_v59, %v2672_v23  ;;  %v2682_v56 = vrot.slane %v2681_v58, 4 }
 0x3e0   : > { %v2643_v39 = vmax.f32 %v2641_v49, %v2642_v16  ;;  %v3570_v14 = vsel %vm1791_vm3, %v8737_v47, -inf  ;;  %v3715_v8 = vadd.f32 %v9017_v53, %v2666_v10  ;;  %v2635_v42 = vrot.slane %v2634_v3, 2 }
 0x3e1   : > { %v3567_v6 = vmax.f32 %v3565_v35, %v3566_v57  ;;  %v3530_v46 = vmax.f32 %v3528_v30, %v3529_v28  ;;  %v3538_v36 = vrot.slane %v3537_v61, 2  ;;  %v3577_v4 = vsel %vm1791_vm3, %v1662_v55, -inf }
 0x3e2   : > { %v3561_v38 = vrot.slane %v3560_v13, 1  ;;  %v2676_v11 = vmax.f32 %v2674_v37, %v2675_v29  ;;  %v3571_v1 = vrot.slane %v3570_v14, 4  ;;  %v3716_v43 = vadd.f32 %v9017_v53, %v2673_v22 }
 0x3e3   : > { %v2644_v27 = vrot.slane %v2643_v39, 1  ;;  %v2683_v47 = vmax.f32 %v2681_v58, %v2682_v56  ;;  %v6259_v40 = vpack.c.bf16 %v3715_v8, %v3715_v8  ;;  %v2636_v25 = vmax.f32 %v2634_v3, %v2635_v42 }
 0x3e4   : > { %v3578_v51 = vrot.slane %v3577_v4, 4  ;;  %v3568_v48 = vrot.slane %v3567_v6, 1  ;;  %v3531_v5 = vrot.slane %v3530_v46, 2  ;;  %v3539_v44 = vmax.f32 %v3537_v61, %v3538_v36 }
 0x3e5   : > { %v3562_v50 = vmax.f32 %v3560_v13, %v3561_v38  ;;  %v2677_v60 = vrot.slane %v2676_v11, 2  ;;  %v3572_v2 = vmax.f32 %v3570_v14, %v3571_v1  ;;  %v6260_v19 = vpack.c.bf16 %v3716_v43, %v3716_v43 }
 0x3e6   : > { %v2645_v24 = vmax.f32 %v2643_v39, %v2644_v27  ;;  %v2684_v33 = vrot.slane %v2683_v47, 2  ;;  %v1596_v18 = vcombine.high %v8756_v54, %v8756_v54  ;;  %v9024_v15 = vunpack.c.l.b16 %v6259_v40 }
 0x3e7   : > { %v2637_v63 = vrot.slane %v2636_v25, 1  ;;  %v3579_v17 = vmax.f32 %v3577_v4, %v3578_v51  ;;  %v3569_v21 = vmax.f32 %v3567_v6, %v3568_v48  ;;  %v3532_v20 = vmax.f32 %v3530_v46, %v3531_v5 }
 0x3e8   : > { %v3540_v31 = vrot.slane %v3539_v44, 1  ;;  %v2646_v41 = vsel %vm1791_vm3, %v8756_v54, -inf  ;;  %v9029_v32 = vadd.f32 %v9017_v53, %v3562_v50  ;;  %v2678_v59 = vmax.f32 %v2676_v11, %v2677_v60 }
 0x3e9   : > { %v3573_v0 = vrot.slane %v3572_v2, 2  ;;  %v2647_v26 = vrot.slane %v2646_v41, 4  ;;  %v9031_v34 = vunpack.c.l.b16 %v6260_v19  ;;  %v3712_v7 = vadd.f32 %v9017_v53, %v2645_v24 }
 0x3ea   : > { %v2685_v52 = vmax.f32 %v2683_v47, %v2684_v33  ;;  %v2653_v35 = vsel %vm1791_vm3, %v1596_v18, -inf  ;;  %v5350_v9 = vrot.slane %v9024_v15, 4  ;;  %v2638_v62 = vmax.f32 %v2636_v25, %v2637_v63 }
 0x3eb   : > { %v3580_v49 = vrot.slane %v3579_v17, 2  ;;  %v2648_v30 = vmax.f32 %v2646_v41, %v2647_v26  ;;  %v9037_v54 = vadd.f32 %v9017_v53, %v3569_v21  ;;  %v3533_v12 = vrot.slane %v3532_v20, 1 }
 0x3ec   : > { %v3541_v23 = vmax.f32 %v3539_v44, %v3540_v31  ;;  %v2654_v37 = vrot.slane %v2653_v35, 4  ;;  %v2679_v10 = vrot.slane %v2678_v59, 1  ;;  %v3574_v3 = vmax.f32 %v3572_v2, %v3573_v0 }
 0x3ed   : > { %v2649_v16 = vrot.slane %v2648_v30, 2  ;;  %v1660_v58 = vcombine.high %v8774_v45, %v8774_v45  ;;  %v6256_v57 = vpack.c.bf16 %v3712_v7, %v3712_v7  ;;  %v2686_v28 = vrot.slane %v2685_v52, 1 }
 0x3ee   : > { %v2655_v61 = vmax.f32 %v2653_v35, %v2654_v37  ;;  %v3542_v55 = vsel %vm1791_vm3, %v8774_v45, -inf  ;;  %v3711_v13 = vadd.f32 %v9017_v53, %v2638_v62  ;;  %v3581_v29 = vmax.f32 %v3579_v17, %v3580_v49 }
 0x3ef   : > { %v2650_v22 = vmax.f32 %v2648_v30, %v2649_v16  ;;  %v3543_v39 = vrot.slane %v3542_v55, 4  ;;  %v3534_v56 = vmax.f32 %v3532_v20, %v3533_v12  ;;  %v3840_v14 = vadd.f32 %v9017_v53, %v3541_v23 }
 0x3f0   : > { %v2656_v8 = vrot.slane %v2655_v61, 2  ;;  %v3549_v42 = vsel %vm1791_vm3, %v1660_v58, -inf  ;;  %v2680_v6 = vmax.f32 %v2678_v59, %v2679_v10  ;;  %v4992_v38 = vunpack.c.l.b16 %v6256_v57 }
 0x3f1   : > { %v2651_v46 = vrot.slane %v2650_v22, 1  ;;  %v3544_v36 = vmax.f32 %v3542_v55, %v3543_v39  ;;  %v3550_v4 = vrot.slane %v3549_v42, 4  ;;  %v2687_v11 = vmax.f32 %v2685_v52, %v2686_v28 }
 0x3f2   : > { %v3575_v1 = vrot.slane %v3574_v3, 1  ;;  %v2657_v43 = vmax.f32 %v2655_v61, %v2656_v8  ;;  %v3582_v45 = vrot.slane %v3581_v29, 1  ;;  %v6255_v25 = vpack.c.bf16 %v3711_v13, %v3711_v13 }
 0x3f3   : > { %v2652_v27 = vmax.f32 %v2650_v22, %v2651_v46  ;;  %v3545_v47 = vrot.slane %v3544_v36, 2  ;;  %v3551_v40 = vmax.f32 %v3549_v42, %v3550_v4  ;;  %v3839_v51 = vadd.f32 %v9017_v53, %v3534_v56 }
 0x3f4   : > { %v6384_v48 = vpack.c.bf16 %v3840_v14, %v3840_v14  ;;  %v2658_v5 = vrot.slane %v2657_v43, 1  ;;  %v3717_v44 = vadd.f32 %v9017_v53, %v2680_v6  ;;  %v5344_v19 = vrot.slane %v4992_v38, 7 }
 0x3f5   : > { %v3713_v50 = vadd.f32 %v9017_v53, %v2652_v27  ;;  %v3546_v60 = vmax.f32 %v3544_v36, %v3545_v47  ;;  %v3552_v2 = vrot.slane %v3551_v40, 2  ;;  %v3718_v24 = vadd.f32 %v9017_v53, %v2687_v11 }
 0x3f6   : > { %v3576_v33 = vmax.f32 %v3574_v3, %v3575_v1  ;;  %v2659_v18 = vmax.f32 %v2657_v43, %v2658_v5  ;;  %v3583_v63 = vmax.f32 %v3581_v29, %v3582_v45  ;;  %v4991_v31 = vunpack.c.l.b16 %v6255_v25 }
 0x3f7   : > { %v6257_v17 = vpack.c.bf16 %v3713_v50, %v3713_v50  ;;  %v3547_v21 = vrot.slane %v3546_v60, 1  ;;  %v3553_v20 = vmax.f32 %v3551_v40, %v3552_v2  ;;  %v6383_v41 = vpack.c.bf16 %v3839_v51, %v3839_v51 }
 0x3f8   : > { %v5120_v59 = vunpack.c.l.b16 %v6384_v48  ;;  %v3714_v0 = vadd.f32 %v9017_v53, %v2659_v18  ;;  %v6261_v26 = vpack.c.bf16 %v3717_v44, %v3717_v44  ;;  %v5345_v62 = vsel %vm5128_vm4, %v5344_v19, %v4991_v31 }
 0x3f9   : > { %v4993_v7 = vunpack.c.l.b16 %v6257_v17  ;;  %v3548_v52 = vmax.f32 %v3546_v60, %v3547_v21  ;;  %v3554_v35 = vrot.slane %v3553_v20, 1  ;;  %v6262_v49 = vpack.c.bf16 %v3718_v24, %v3718_v24 }
 0x3fa   : > { %v3845_v30 = vadd.f32 %v9017_v53, %v3576_v33  ;;  %v6258_v12 = vpack.c.bf16 %v3714_v0, %v3714_v0  ;;  %v3846_v23 = vadd.f32 %v9017_v53, %v3583_v63  ;;  %v6387_v16 = vpack.c.bf16 %v9029_v32, %v9029_v32 }
 0x3fb   : > { %v5346_v37 = vrot.slane %v4993_v7, 6  ;;  %v3555_v10 = vmax.f32 %v3553_v20, %v3554_v35  ;;  %v3841_v3 = vadd.f32 %v9017_v53, %v3548_v52  ;;  %v6388_v58 = vpack.c.bf16 %v9037_v54, %v9037_v54 }
 0x3fc   : > { %v5568_v57 = vrot.slane %v5120_v59, 7  ;;  %v4994_v28 = vunpack.c.l.b16 %v6258_v12  ;;  %v4997_v61 = vunpack.c.l.b16 %v6261_v26  ;;  %v5119_v22 = vunpack.c.l.b16 %v6383_v41 }
 0x3fd   : > { %v5347_v55 = vsel %vm5131_vm5, %v5346_v37, %v5345_v62  ;;  %v3842_v13 = vadd.f32 %v9017_v53, %v3555_v10  ;;  %v6385_v29 = vpack.c.bf16 %v3841_v3, %v3841_v3  ;;  %v4998_v39 = vunpack.c.l.b16 %v6262_v49 }
 0x3fe   : > { %v6389_v56 = vpack.c.bf16 %v3845_v30, %v3845_v30  ;;  %v5348_v14 = vrot.slane %v4994_v28, 5  ;;  %v5352_v8 = vrot.slane %v9031_v34, 3  ;;  %v6390_v42 = vpack.c.bf16 %v3846_v23, %v3846_v23 }
 0x3ff   : > { %v6386_v6 = vpack.c.bf16 %v3842_v13, %v3842_v13  ;;  %v5121_v32 = vunpack.c.l.b16 %v6385_v29  ;;  %v5123_v46 = vunpack.c.l.b16 %v6387_v16  ;;  %v5124_v36 = vunpack.c.l.b16 %v6388_v58 }
 0x400   : > { %v5569_v54 = vsel %vm5128_vm4, %v5568_v57, %v5119_v22  ;;  %v5349_v4 = vsel %vm5134_vm6, %v5348_v14, %v5347_v55  ;;  %v5354_v38 = vrot.slane %v4997_v61, 2  ;;  %v5356_v43 = vrot.slane %v4998_v39, 1 }
 0x401   : > { %v5351_v53 = vsel %vm5137_vm7, %v5350_v9, %v5349_v4  ;;  %v5122_v11 = vunpack.c.l.b16 %v6386_v6  ;;  %v5570_v1 = vrot.slane %v5121_v32, 6  ;;  %v5125_v45 = vunpack.c.l.b16 %v6389_v56 }
 0x402   : > { %v5353_v34 = vsel %vm5140_vm8, %v5352_v8, %v5351_v53  ;;  %v5126_v27 = vunpack.c.l.b16 %v6390_v42  ;;  %v5574_v51 = vrot.slane %v5123_v46, 4  ;;  %v5576_v15 = vrot.slane %v5124_v36, 3 }
 0x403   : > { %v5355_v47 = vsel %vm5143_vm9, %v5354_v38, %v5353_v34  ;;  %v5571_v40 = vsel %vm5131_vm5, %v5570_v1, %v5569_v54  ;;  %v5572_v25 = vrot.slane %v5122_v11, 5  ;;  %v5578_v44 = vrot.slane %v5125_v45, 2 }
 0x404   : > { %v5357_v48 = vsel %vm5146_vm10, %v5356_v43, %v5355_v47  ;;  %v5580_v60 = vrot.slane %v5126_v27, 1 }
 0x405   : > { %v5597_v5 = vpack.c.b16 %v5357_v48, %v5357_v48  ;;  %v5573_v9 = vsel %vm5134_vm6, %v5572_v25, %v5571_v40 }
 0x406   : > { %v5575_v50 = vsel %vm5137_vm7, %v5574_v51, %v5573_v9 }
 0x407   : > { %5661 = vst.msk [vmem:[%s7047_s8 + $0x3c] sm:$0xf] %vm1791_vm3, %v5597_v5  ;;  %v5577_v2 = vsel %vm5140_vm8, %v5576_v15, %v5575_v50 }
 0x408   : > { %v5579_v19 = vsel %vm5143_vm9, %v5578_v44, %v5577_v2 }
 0x409   : > { %v5581_v24 = vsel %vm5146_vm10, %v5580_v60, %v5579_v19 }
 0x40a   : > { %v5613_v33 = vpack.c.b16 %v5581_v24, %v5581_v24 }
 0x40c   : > { %5677 = vst.msk [vmem:[%s7047_s8 + $0x7c] sm:$0xf] %vm1791_vm3, %v5613_v33 }
 0x40d PF: > { %s13_s12 = sadd.s32 1, %s6698_s12  }
 0x40e   : > { %p10_p5 = scmp.ge.s32.totalorder %s13_s12, 4  }
 0x410   :  { %12 = sbr.rel (!%p10_p5) target bundleno = 1 (0x1), region = 62 }

// kernel: cifar_net_forward.5
= control target key start
LH: loop header
LB: loop body
LE: loop exit
PB: predicated region body
PF: predicated region fallthrough
CT: control target
= control target key end

     0   :  { %v6454_v0 = vmov 0   ;;  %vm1791_vm0 = vcmask 261120   ;;  %vm3236_vm1 = vcmask 257024   ;;  %vm4909_vm2 = vcmask 1041409   ;;  %s8850_s1 = inlined_call_operand.vmem [shape: bf16[800,32], index: 1, kind: input, shape index: {}]   ;;  %s8851_s0 = inlined_call_operand.vmem [shape: bf16[512,800], index: 0, kind: input, shape index: {}]   ;;  %s8852_s2 = inlined_call_operand.vmem [shape: f32[1,32], index: 2, kind: input, shape index: {}]   ;;  %s8853_s3 = inlined_call_operand.vmem [shape: bf16[128,32], index: 3, kind: output, shape index: {}]  }
   0x1   :  { %1888 = vmatprep.subr.bf16.mxu1 %v6454_v0  ;;  %2177 = vmatprep.subr.bf16.mxu0 %v6454_v0  ;;  %v6081_v1 = vld [vmem:[%s8850_s1] sm:$0xff]   ;;  %v6083_v3 = vld [vmem:[%s8850_s1 + $0x8] sm:$0xff]   ;;  %v6085_v5 = vld [vmem:[%s8850_s1 + $0x10] sm:$0xff]   ;;  %vm4912_vm3 = vcmask 1042434   ;;  %vm4915_vm4 = vcmask 1043459   ;;  %vm4918_vm5 = vcmask 1044484  }
   0x2   :  { %v6483_v2 = vld [vmem:[%s8850_s1 + $0x80] sm:$0xff]   ;;  %1889 = vmatpush1.bf16.msra.mxu1 %v6081_v1  ;;  %v6493_v4 = vld [vmem:[%s8850_s1 + $0x88] sm:$0xff]   ;;  %v6504_v6 = vld [vmem:[%s8850_s1 + $0x90] sm:$0xff]   ;;  %vm4921_vm6 = vcmask 1045509   ;;  %vm4924_vm7 = vcmask 1046534   ;;  %vm4927_vm8 = vcmask 1047559  }
   0x3   :  { %2178 = vmatpush1.bf16.msra.mxu0 %v6483_v2  ;;  %1890 = vmatprep.subr.bf16.mxu1 %v6454_v0  ;;  %v6087_v7 = vld [vmem:[%s8850_s1 + $0x18] sm:$0xff]   ;;  %v6089_v9 = vld [vmem:[%s8850_s1 + $0x20] sm:$0xff]   ;;  %v6091_v11 = vld [vmem:[%s8850_s1 + $0x28] sm:$0xff]  }
   0x4   :  { %2179 = vmatprep.subr.bf16.mxu0 %v6454_v0  ;;  %v6515_v8 = vld [vmem:[%s8850_s1 + $0x98] sm:$0xff]   ;;  %v6526_v10 = vld [vmem:[%s8850_s1 + $0xa0] sm:$0xff]   ;;  %v6537_v12 = vld [vmem:[%s8850_s1 + $0xa8] sm:$0xff]  }
   0x5   :  { %v6093_v13 = vld [vmem:[%s8850_s1 + $0x30] sm:$0xff]   ;;  %v6095_v15 = vld [vmem:[%s8850_s1 + $0x38] sm:$0xff]   ;;  %v6097_v17 = vld [vmem:[%s8850_s1 + $0x40] sm:$0xff]  }
   0x6   :  { %1891 = vmatpush1.bf16.msra.mxu1 %v6083_v3  ;;  %v6548_v14 = vld [vmem:[%s8850_s1 + $0xb0] sm:$0xff]   ;;  %v6559_v16 = vld [vmem:[%s8850_s1 + $0xb8] sm:$0xff]   ;;  %v6570_v18 = vld [vmem:[%s8850_s1 + $0xc0] sm:$0xff]  }
   0x7   :  { %2180 = vmatpush1.bf16.msra.mxu0 %v6493_v4  ;;  %1892 = vmatprep.subr.bf16.mxu1 %v6454_v0  ;;  %v6115_v19 = vld [vmem:[%s8851_s0 + $0x4] ss:$28 sps:$4 sm:$0xff]   ;;  %v6099_v20 = vld [vmem:[%s8850_s1 + $0x48] sm:$0xff]   ;;  %v6101_v23 = vld [vmem:[%s8850_s1 + $0x50] sm:$0xff]  }
   0x8   :  { %2181 = vmatprep.subr.bf16.mxu0 %v6454_v0  ;;  %v6118_v21 = vld [vmem:[%s8851_s0 + $0xc] ss:$28 sps:$4 sm:$0xff]   ;;  %1920 = vmatprep.mubr.bf16.mxu1 %v6115_v19  ;;  %v6598_v24 = vld [vmem:[%s8850_s1 + $0xd0] sm:$0xff]   ;;  %v6103_v25 = vld [vmem:[%s8850_s1 + $0x58] sm:$0xff]  }
   0x9   :  { %v6587_v22 = vld [vmem:[%s8850_s1 + $0xc8] sm:$0xff]   ;;  %2209 = vmatprep.mubr.bf16.mxu0 %v6118_v21  ;;  %v6609_v26 = vld [vmem:[%s8850_s1 + $0xd8] sm:$0xff]   ;;  %v6105_v27 = vld [vmem:[%s8850_s1 + $0x60] sm:$0xff]  }
   0xa   :  { %1893 = vmatpush1.bf16.msra.mxu1 %v6085_v5  ;;  %v6620_v28 = vld [vmem:[%s8850_s1 + $0xe0] sm:$0xff]   ;;  %v6107_v29 = vld [vmem:[%s8850_s1 + $0x68] sm:$0xff]   ;;  %v6109_v31 = vld [vmem:[%s8850_s1 + $0x70] sm:$0xff]  }
   0xb   :  { %2182 = vmatpush1.bf16.msra.mxu0 %v6504_v6  ;;  %1894 = vmatprep.subr.bf16.mxu1 %v6454_v0  ;;  %v6631_v30 = vld [vmem:[%s8850_s1 + $0xe8] sm:$0xff]   ;;  %v6642_v32 = vld [vmem:[%s8850_s1 + $0xf0] sm:$0xff]   ;;  %v6111_v33 = vld [vmem:[%s8850_s1 + $0x78] sm:$0xff]  }
   0xc   :  { %2183 = vmatprep.subr.bf16.mxu0 %v6454_v0  ;;  %v6653_v34 = vld [vmem:[%s8850_s1 + $0xf8] sm:$0xff]   ;;  %v6116_v36 = vld [vmem:[%s8851_s0 + $0x8] ss:$28 sps:$4 sm:$0xff]   ;;  %v6126_v43 = vld [vmem:[%s8851_s0 + $0x74] ss:$28 sps:$4 sm:$0xff]  }
   0xd   :  { %v6113_v35 = vld [vmem:[%s8851_s0] ss:$28 sps:$4 sm:$0xff]   ;;  %v6132_v40 = vld [vmem:[%s8850_s1 + $0x108] sm:$0xff]   ;;  %v6124_v41 = vld [vmem:[%s8851_s0 + $0x38] ss:$28 sps:$4 sm:$0xff]  }
   0xe   :  { %1895 = vmatpush1.bf16.msra.mxu1 %v6087_v7  ;;  %v6119_v37 = vld [vmem:[%s8850_s1 + $0x100] sm:$0xff]   ;;  %v6120_v38 = vld [vmem:[%s8851_s0 + $0x3c] ss:$28 sps:$4 sm:$0xff]   ;;  %v6139_v45 = vld [vmem:[%s8850_s1 + $0x110] sm:$0xff]  }
   0xf   :  { %2184 = vmatpush1.bf16.msra.mxu0 %v6515_v8  ;;  %1896 = vmatprep.subr.bf16.mxu1 %v6454_v0  ;;  %v6122_v39 = vld [vmem:[%s8851_s0 + $0x44] ss:$28 sps:$4 sm:$0xff]   ;;  %v6128_v44 = vld [vmem:[%s8851_s0 + $0x7c] ss:$28 sps:$4 sm:$0xff]   ;;  %v6130_v47 = vld [vmem:[%s8851_s0 + $0x70] ss:$28 sps:$4 sm:$0xff]  }
  0x10   :  { %2185 = vmatprep.subr.bf16.mxu0 %v6454_v0  ;;  %v6125_v42 = vld [vmem:[%s8851_s0 + $0x40] ss:$28 sps:$4 sm:$0xff]   ;;  %v6131_v48 = vld [vmem:[%s8851_s0 + $0x78] ss:$28 sps:$4 sm:$0xff]   ;;  %v6133_v49 = vld [vmem:[%s8851_s0 + $0xac] ss:$28 sps:$4 sm:$0xff]  }
  0x11   :  { %v6152_v46 = vld [vmem:[%s8850_s1 + $0x118] sm:$0xff]   ;;  %v6135_v50 = vld [vmem:[%s8851_s0 + $0xb4] ss:$28 sps:$4 sm:$0xff]   ;;  %v6159_v51 = vld [vmem:[%s8850_s1 + $0x120] sm:$0xff]  }
  0x12   :  { %1897 = vmatpush1.bf16.msra.mxu1 %v6089_v9  ;;  %v6172_v52 = vld [vmem:[%s8850_s1 + $0x128] sm:$0xff]   ;;  %v6140_v55 = vld [vmem:[%s8851_s0 + $0xe4] ss:$28 sps:$4 sm:$0xff]   ;;  %v6179_v57 = vld [vmem:[%s8850_s1 + $0x130] sm:$0xff]  }
  0x13   :  { %2186 = vmatpush1.bf16.msra.mxu0 %v6526_v10  ;;  %1898 = vmatprep.subr.bf16.mxu1 %v6454_v0  ;;  %v6137_v53 = vld [vmem:[%s8851_s0 + $0xa8] ss:$28 sps:$4 sm:$0xff]   ;;  %v6138_v54 = vld [vmem:[%s8851_s0 + $0xb0] ss:$28 sps:$4 sm:$0xff]   ;;  %v6192_v58 = vld [vmem:[%s8850_s1 + $0x138] sm:$0xff]  }
  0x14   :  { %2187 = vmatprep.subr.bf16.mxu0 %v6454_v0  ;;  %v6142_v56 = vld [vmem:[%s8851_s0 + $0xec] ss:$28 sps:$4 sm:$0xff]   ;;  %v6144_v59 = vld [vmem:[%s8851_s0 + $0xe0] ss:$28 sps:$4 sm:$0xff]   ;;  %v6158_v9 = vld [vmem:[%s8851_s0 + $0x158] ss:$28 sps:$4 sm:$0xff]  }
  0x15   :  { %v6145_v60 = vld [vmem:[%s8851_s0 + $0xe8] ss:$28 sps:$4 sm:$0xff]   ;;  %v6146_v61 = vld [vmem:[%s8851_s0 + $0x11c] ss:$28 sps:$4 sm:$0xff]   ;;  %v6157_v7 = vld [vmem:[%s8851_s0 + $0x150] ss:$28 sps:$4 sm:$0xff]  }
  0x16   :  { %1899 = vmatpush1.bf16.msra.mxu1 %v6091_v11  ;;  %v6148_v62 = vld [vmem:[%s8851_s0 + $0x124] ss:$28 sps:$4 sm:$0xff]   ;;  %v6212_v1 = vld [vmem:[%s8850_s1 + $0x148] sm:$0xff]   ;;  %v6155_v5 = vld [vmem:[%s8851_s0 + $0x15c] ss:$28 sps:$4 sm:$0xff]  }
  0x17   :  { %2188 = vmatpush1.bf16.msra.mxu0 %v6537_v12  ;;  %1900 = vmatprep.subr.bf16.mxu1 %v6454_v0  ;;  %v6199_v63 = vld [vmem:[%s8850_s1 + $0x140] sm:$0xff]   ;;  %v6162_v11 = vld [vmem:[%s8851_s0 + $0x194] ss:$28 sps:$4 sm:$0xff]  }
  0x18   :  { %2189 = vmatprep.subr.bf16.mxu0 %v6454_v0  ;;  %v6151_v3 = vld [vmem:[%s8851_s0 + $0x120] ss:$28 sps:$4 sm:$0xff]   ;;  %v6171_v21 = vld [vmem:[%s8851_s0 + $0x1c8] ss:$28 sps:$4 sm:$0xff]  }
  0x19   :  { %v6170_v19 = vld [vmem:[%s8851_s0 + $0x1c0] ss:$28 sps:$4 sm:$0xff]  }
  0x1a   :  { %1901 = vmatpush1.bf16.msra.mxu1 %v6093_v13  ;;  %v6164_v13 = vld [vmem:[%s8851_s0 + $0x188] ss:$28 sps:$4 sm:$0xff]  }
  0x1b   :  { %2190 = vmatpush1.bf16.msra.mxu0 %v6548_v14  ;;  %1902 = vmatprep.subr.bf16.mxu1 %v6454_v0 }
  0x1c   :  { %2191 = vmatprep.subr.bf16.mxu0 %v6454_v0 }
  0x1e   :  { %1903 = vmatpush1.bf16.msra.mxu1 %v6095_v15  ;;  %v6165_v15 = vld [vmem:[%s8851_s0 + $0x190] ss:$28 sps:$4 sm:$0xff]  }
  0x1f   :  { %2192 = vmatpush1.bf16.msra.mxu0 %v6559_v16  ;;  %1904 = vmatprep.subr.bf16.mxu1 %v6454_v0 }
  0x20   :  { %2193 = vmatprep.subr.bf16.mxu0 %v6454_v0 }
  0x22   :  { %1905 = vmatpush1.bf16.msra.mxu1 %v6097_v17  ;;  %v6168_v17 = vld [vmem:[%s8851_s0 + $0x1cc] ss:$28 sps:$4 sm:$0xff]  }
  0x23   :  { %2194 = vmatpush1.bf16.msra.mxu0 %v6570_v18  ;;  %1906 = vmatprep.subr.bf16.mxu1 %v6454_v0 }
  0x24   :  { %2195 = vmatprep.subr.bf16.mxu0 %v6454_v0 }
  0x26   :  { %1907 = vmatpush1.bf16.msra.mxu1 %v6099_v20  ;;  %v6272_v20 = vld [vmem:[%s8850_s1 + $0x178] sm:$0xff]  }
  0x27   :  { %2196 = vmatpush1.bf16.msra.mxu0 %v6587_v22  ;;  %1908 = vmatprep.subr.bf16.mxu1 %v6454_v0 }
  0x28   :  { %2197 = vmatprep.subr.bf16.mxu0 %v6454_v0 }
  0x2a   :  { %1909 = vmatpush1.bf16.msra.mxu1 %v6101_v23  ;;  %v6175_v23 = vld [vmem:[%s8851_s0 + $0x204] ss:$28 sps:$4 sm:$0xff]  }
  0x2b   :  { %2198 = vmatpush1.bf16.msra.mxu0 %v6598_v24  ;;  %1910 = vmatprep.subr.bf16.mxu1 %v6454_v0 }
  0x2c   :  { %2199 = vmatprep.subr.bf16.mxu0 %v6454_v0 }
  0x2e   :  { %1911 = vmatpush1.bf16.msra.mxu1 %v6103_v25  ;;  %v6178_v25 = vld [vmem:[%s8851_s0 + $0x200] ss:$28 sps:$4 sm:$0xff]  }
  0x2f   :  { %2200 = vmatpush1.bf16.msra.mxu0 %v6609_v26  ;;  %1912 = vmatprep.subr.bf16.mxu1 %v6454_v0 }
  0x30   :  { %2201 = vmatprep.subr.bf16.mxu0 %v6454_v0 }
  0x32   :  { %1913 = vmatpush1.bf16.msra.mxu1 %v6105_v27  ;;  %v6184_v27 = vld [vmem:[%s8851_s0 + $0x230] ss:$28 sps:$4 sm:$0xff]  }
  0x33   :  { %2202 = vmatpush1.bf16.msra.mxu0 %v6620_v28  ;;  %1914 = vmatprep.subr.bf16.mxu1 %v6454_v0 }
  0x34   :  { %2203 = vmatprep.subr.bf16.mxu0 %v6454_v0 }
  0x36   :  { %1915 = vmatpush1.bf16.msra.mxu1 %v6107_v29  ;;  %v6186_v29 = vld [vmem:[%s8851_s0 + $0x26c] ss:$28 sps:$4 sm:$0xff]  }
  0x37   :  { %2204 = vmatpush1.bf16.msra.mxu0 %v6631_v30  ;;  %1916 = vmatprep.subr.bf16.mxu1 %v6454_v0 }
  0x38   :  { %2205 = vmatprep.subr.bf16.mxu0 %v6454_v0 }
  0x3a   :  { %1917 = vmatpush1.bf16.msra.mxu1 %v6109_v31  ;;  %v6190_v31 = vld [vmem:[%s8851_s0 + $0x268] ss:$28 sps:$4 sm:$0xff]  }
  0x3b   :  { %2206 = vmatpush1.bf16.msra.mxu0 %v6642_v32  ;;  %1918 = vmatprep.subr.bf16.mxu1 %v6454_v0 }
  0x3c   :  { %2207 = vmatprep.subr.bf16.mxu0 %v6454_v0 }
  0x3e   :  { %1919 = vmatpush1.bf16.msra.mxu1 %v6111_v33  ;;  %v6193_v33 = vld [vmem:[%s8851_s0 + $0x2a4] ss:$28 sps:$4 sm:$0xff]  }
  0x3f   :  { %2208 = vmatpush1.bf16.msra.mxu0 %v6653_v34  ;;  %5856 = vmatprep.subr.bf16.mxu1 %v6454_v0 }
  0x40   :  { %2466 = vmatprep.subr.bf16.mxu0 %v6454_v0 }
  0x41   :  { %1921 = vmatmul.mubr.bf16.vlgmr.msra.gmra.mrb[0].mxu1 %v6113_v35  ;;  %v6197_v35 = vld [vmem:[%s8851_s0 + $0x2a0] ss:$28 sps:$4 sm:$0xff]  }
  0x42   :  { %2210 = vmatmul.mubr.bf16.vlgmr.msra.gmra.mrb[0].mxu0 %v6116_v36  ;;  %5872 = vmatpush1.bf16.msra.mxu1 %v6483_v2  ;;  %v6150_v2 = vld [vmem:[%s8851_s0 + $0x118] ss:$28 sps:$4 sm:$0xff]   ;;  %v6198_v36 = vld [vmem:[%s8851_s0 + $0x2a8] ss:$28 sps:$4 sm:$0xff]  }
  0x43   :  { %2467 = vmatpush1.bf16.msra.mxu0 %v6119_v37  ;;  %1928 = vmatprep.mubr.bf16.mxu1 %v6120_v38  ;;  %v6200_v37 = vld [vmem:[%s8851_s0 + $0x2dc] ss:$28 sps:$4 sm:$0xff]   ;;  %v6202_v38 = vld [vmem:[%s8851_s0 + $0x2e4] ss:$28 sps:$4 sm:$0xff]  }
  0x44   :  { %2217 = vmatprep.mubr.bf16.mxu0 %v6122_v39  ;;  %2468 = vmatprep.subr.bf16.mxu0 %v6454_v0  ;;  %v6204_v39 = vld [vmem:[%s8851_s0 + $0x2d8] ss:$28 sps:$4 sm:$0xff]  }
  0x45   :  { %5857 = vmatprep.subr.bf16.mxu1 %v6454_v0 }
  0x46   :  { %5873 = vmatpush1.bf16.msra.mxu1 %v6493_v4  ;;  %v6153_v4 = vld [vmem:[%s8851_s0 + $0x154] ss:$28 sps:$4 sm:$0xff]  }
  0x47   :  { %2469 = vmatpush1.bf16.msra.mxu0 %v6132_v40  ;;  %5858 = vmatprep.subr.bf16.mxu1 %v6454_v0  ;;  %v6205_v40 = vld [vmem:[%s8851_s0 + $0x2e0] ss:$28 sps:$4 sm:$0xff]  }
  0x48   :  { %2470 = vmatprep.subr.bf16.mxu0 %v6454_v0 }
  0x49   :  { %1929 = vmatmul.mubr.bf16.gmra.mrb[4].mxu1 %v6124_v41  ;;  %v6206_v41 = vld [vmem:[%s8851_s0 + $0x314] ss:$28 sps:$4 sm:$0xff]  }
  0x4a   :  { %2218 = vmatmul.mubr.bf16.gmra.mrb[4].mxu0 %v6125_v42  ;;  %1936 = vmatprep.mubr.bf16.mxu1 %v6126_v43  ;;  %v6208_v42 = vld [vmem:[%s8851_s0 + $0x31c] ss:$28 sps:$4 sm:$0xff]   ;;  %v6210_v43 = vld [vmem:[%s8851_s0 + $0x310] ss:$28 sps:$4 sm:$0xff]  }
  0x4b   :  { %2225 = vmatprep.mubr.bf16.mxu0 %v6128_v44  ;;  %2471 = vmatpush1.bf16.msra.mxu0 %v6139_v45  ;;  %v6211_v44 = vld [vmem:[%s8851_s0 + $0x318] ss:$28 sps:$4 sm:$0xff]   ;;  %v6213_v45 = vld [vmem:[%s8851_s0 + $0x34c] ss:$28 sps:$4 sm:$0xff]  }
  0x4c   :  { %5874 = vmatpush1.bf16.msra.mxu1 %v6504_v6  ;;  %2472 = vmatprep.subr.bf16.mxu0 %v6454_v0  ;;  %v6219_v6 = vld [vmem:[%s8850_s1 + $0x150] sm:$0xff]  }
  0x4d   :  { %5859 = vmatprep.subr.bf16.mxu1 %v6454_v0 }
  0x4f   :  { %2473 = vmatpush1.bf16.msra.mxu0 %v6152_v46  ;;  %v6215_v46 = vld [vmem:[%s8851_s0 + $0x354] ss:$28 sps:$4 sm:$0xff]  }
  0x50   :  { %5875 = vmatpush1.bf16.msra.mxu1 %v6515_v8  ;;  %2474 = vmatprep.subr.bf16.mxu0 %v6454_v0  ;;  %v6232_v8 = vld [vmem:[%s8850_s1 + $0x158] sm:$0xff]  }
  0x51   :  { %1937 = vmatmul.mubr.bf16.gmra.mrb[8].mxu1 %v6130_v47  ;;  %5860 = vmatprep.subr.bf16.mxu1 %v6454_v0  ;;  %v6217_v47 = vld [vmem:[%s8851_s0 + $0x348] ss:$28 sps:$4 sm:$0xff]  }
  0x52   :  { %2226 = vmatmul.mubr.bf16.gmra.mrb[8].mxu0 %v6131_v48  ;;  %1944 = vmatprep.mubr.bf16.mxu1 %v6133_v49  ;;  %v6218_v48 = vld [vmem:[%s8851_s0 + $0x350] ss:$28 sps:$4 sm:$0xff]   ;;  %v6220_v49 = vld [vmem:[%s8851_s0 + $0x384] ss:$28 sps:$4 sm:$0xff]  }
  0x53   :  { %2233 = vmatprep.mubr.bf16.mxu0 %v6135_v50  ;;  %2475 = vmatpush1.bf16.msra.mxu0 %v6159_v51  ;;  %v6222_v50 = vld [vmem:[%s8851_s0 + $0x38c] ss:$28 sps:$4 sm:$0xff]   ;;  %v6224_v51 = vld [vmem:[%s8851_s0 + $0x380] ss:$28 sps:$4 sm:$0xff]  }
  0x54   :  { %2476 = vmatprep.subr.bf16.mxu0 %v6454_v0  ;;  %5876 = vmatpush1.bf16.msra.mxu1 %v6526_v10  ;;  %v6160_v10 = vld [vmem:[%s8851_s0 + $0x18c] ss:$28 sps:$4 sm:$0xff]  }
  0x55   :  { %5861 = vmatprep.subr.bf16.mxu1 %v6454_v0 }
  0x57   :  { %2477 = vmatpush1.bf16.msra.mxu0 %v6172_v52  ;;  %v6225_v52 = vld [vmem:[%s8851_s0 + $0x388] ss:$28 sps:$4 sm:$0xff]  }
  0x58   :  { %2478 = vmatprep.subr.bf16.mxu0 %v6454_v0  ;;  %5877 = vmatpush1.bf16.msra.mxu1 %v6537_v12  ;;  %v6239_v12 = vld [vmem:[%s8850_s1 + $0x160] sm:$0xff]  }
  0x59   :  { %1945 = vmatmul.mubr.bf16.gmra.mrb[12].mxu1 %v6137_v53  ;;  %5862 = vmatprep.subr.bf16.mxu1 %v6454_v0  ;;  %v6226_v53 = vld [vmem:[%s8851_s0 + $0x3bc] ss:$28 sps:$4 sm:$0xff]  }
  0x5a   :  { %2234 = vmatmul.mubr.bf16.gmra.mrb[12].mxu0 %v6138_v54  ;;  %1952 = vmatprep.mubr.bf16.mxu1 %v6140_v55  ;;  %v6228_v54 = vld [vmem:[%s8851_s0 + $0x3c4] ss:$28 sps:$4 sm:$0xff]  }
  0x5b   :  { %2241 = vmatprep.mubr.bf16.mxu0 %v6142_v56  ;;  %2479 = vmatpush1.bf16.msra.mxu0 %v6179_v57  ;;  %v6960_v55 = vld [vmem:[%s8850_s1 + $0x180] sm:$0xff]   ;;  %v6230_v56 = vld [vmem:[%s8851_s0 + $0x3b8] ss:$28 sps:$4 sm:$0xff]  }
  0x5c   :  { %2480 = vmatprep.subr.bf16.mxu0 %v6454_v0  ;;  %5878 = vmatpush1.bf16.msra.mxu1 %v6548_v14  ;;  %v6252_v14 = vld [vmem:[%s8850_s1 + $0x168] sm:$0xff]   ;;  %v6231_v57 = vld [vmem:[%s8851_s0 + $0x3c0] ss:$28 sps:$4 sm:$0xff]  }
  0x5d   :  { %5863 = vmatprep.subr.bf16.mxu1 %v6454_v0 }
  0x5f   :  { %2481 = vmatpush1.bf16.msra.mxu0 %v6192_v58  ;;  %v6233_v58 = vld [vmem:[%s8851_s0 + $0x3f4] ss:$28 sps:$4 sm:$0xff]  }
  0x60   :  { %2482 = vmatprep.subr.bf16.mxu0 %v6454_v0  ;;  %5879 = vmatpush1.bf16.msra.mxu1 %v6559_v16  ;;  %v6166_v16 = vld [vmem:[%s8851_s0 + $0x1c4] ss:$28 sps:$4 sm:$0xff]  }
  0x61   :  { %1953 = vmatmul.mubr.bf16.gmra.mrb[16].mxu1 %v6144_v59  ;;  %5864 = vmatprep.subr.bf16.mxu1 %v6454_v0  ;;  %v6235_v59 = vld [vmem:[%s8851_s0 + $0x3fc] ss:$28 sps:$4 sm:$0xff]  }
  0x62   :  { %2242 = vmatmul.mubr.bf16.gmra.mrb[16].mxu0 %v6145_v60  ;;  %1960 = vmatprep.mubr.bf16.mxu1 %v6146_v61  ;;  %v6237_v60 = vld [vmem:[%s8851_s0 + $0x3f0] ss:$28 sps:$4 sm:$0xff]   ;;  %v6238_v61 = vld [vmem:[%s8851_s0 + $0x3f8] ss:$28 sps:$4 sm:$0xff]  }
  0x63   :  { %2249 = vmatprep.mubr.bf16.mxu0 %v6148_v62  ;;  %2483 = vmatpush1.bf16.msra.mxu0 %v6199_v63  ;;  %v6240_v62 = vld [vmem:[%s8851_s0 + $0x42c] ss:$28 sps:$4 sm:$0xff]   ;;  %v6242_v63 = vld [vmem:[%s8851_s0 + $0x434] ss:$28 sps:$4 sm:$0xff]  }
  0x64   :  { %2484 = vmatprep.subr.bf16.mxu0 %v6454_v0  ;;  %5880 = vmatpush1.bf16.msra.mxu1 %v6570_v18  ;;  %v6259_v18 = vld [vmem:[%s8850_s1 + $0x170] sm:$0xff]  }
  0x65   :  { %5865 = vmatprep.subr.bf16.mxu1 %v6454_v0 }
  0x67   :  { %2485 = vmatpush1.bf16.msra.mxu0 %v6212_v1  ;;  %v6244_v1 = vld [vmem:[%s8851_s0 + $0x428] ss:$28 sps:$4 sm:$0xff]  }
  0x68   :  { %2486 = vmatprep.subr.bf16.mxu0 %v6454_v0  ;;  %5881 = vmatpush1.bf16.msra.mxu1 %v6587_v22  ;;  %v6173_v22 = vld [vmem:[%s8851_s0 + $0x1fc] ss:$28 sps:$4 sm:$0xff]  }
  0x69   :  { %1961 = vmatmul.mubr.bf16.gmra.mrb[20].mxu1 %v6150_v2  ;;  %5866 = vmatprep.subr.bf16.mxu1 %v6454_v0  ;;  %v6245_v2 = vld [vmem:[%s8851_s0 + $0x430] ss:$28 sps:$4 sm:$0xff]  }
  0x6a   :  { %2250 = vmatmul.mubr.bf16.gmra.mrb[20].mxu0 %v6151_v3  ;;  %1968 = vmatprep.mubr.bf16.mxu1 %v6153_v4  ;;  %v6246_v3 = vld [vmem:[%s8851_s0 + $0x464] ss:$28 sps:$4 sm:$0xff]   ;;  %v6248_v4 = vld [vmem:[%s8851_s0 + $0x46c] ss:$28 sps:$4 sm:$0xff]  }
  0x6b   :  { %2257 = vmatprep.mubr.bf16.mxu0 %v6155_v5  ;;  %2487 = vmatpush1.bf16.msra.mxu0 %v6219_v6  ;;  %v6250_v5 = vld [vmem:[%s8851_s0 + $0x460] ss:$28 sps:$4 sm:$0xff]   ;;  %v6251_v6 = vld [vmem:[%s8851_s0 + $0x468] ss:$28 sps:$4 sm:$0xff]  }
  0x6c   :  { %2488 = vmatprep.subr.bf16.mxu0 %v6454_v0  ;;  %5882 = vmatpush1.bf16.msra.mxu1 %v6598_v24  ;;  %v6177_v24 = vld [vmem:[%s8851_s0 + $0x1f8] ss:$28 sps:$4 sm:$0xff]  }
  0x6d   :  { %5867 = vmatprep.subr.bf16.mxu1 %v6454_v0 }
  0x6f   :  { %2489 = vmatpush1.bf16.msra.mxu0 %v6232_v8  ;;  %v6255_v8 = vld [vmem:[%s8851_s0 + $0x4a4] ss:$28 sps:$4 sm:$0xff]  }
  0x70   :  { %2490 = vmatprep.subr.bf16.mxu0 %v6454_v0  ;;  %5883 = vmatpush1.bf16.msra.mxu1 %v6609_v26  ;;  %v6180_v26 = vld [vmem:[%s8851_s0 + $0x234] ss:$28 sps:$4 sm:$0xff]  }
  0x71   :  { %1969 = vmatmul.mubr.bf16.gmra.mrb[24].mxu1 %v6157_v7  ;;  %5868 = vmatprep.subr.bf16.mxu1 %v6454_v0  ;;  %v6253_v7 = vld [vmem:[%s8851_s0 + $0x49c] ss:$28 sps:$4 sm:$0xff]  }
  0x72   :  { %2258 = vmatmul.mubr.bf16.gmra.mrb[24].mxu0 %v6158_v9  ;;  %1976 = vmatprep.mubr.bf16.mxu1 %v6160_v10  ;;  %v6257_v9 = vld [vmem:[%s8851_s0 + $0x498] ss:$28 sps:$4 sm:$0xff]   ;;  %v6258_v10 = vld [vmem:[%s8851_s0 + $0x4a0] ss:$28 sps:$4 sm:$0xff]  }
  0x73   :  { %2265 = vmatprep.mubr.bf16.mxu0 %v6162_v11  ;;  %2491 = vmatpush1.bf16.msra.mxu0 %v6239_v12  ;;  %v6260_v11 = vld [vmem:[%s8851_s0 + $0x4d4] ss:$28 sps:$4 sm:$0xff]   ;;  %v6262_v12 = vld [vmem:[%s8851_s0 + $0x4dc] ss:$28 sps:$4 sm:$0xff]  }
  0x74   :  { %2492 = vmatprep.subr.bf16.mxu0 %v6454_v0  ;;  %5884 = vmatpush1.bf16.msra.mxu1 %v6620_v28  ;;  %v6185_v28 = vld [vmem:[%s8851_s0 + $0x238] ss:$28 sps:$4 sm:$0xff]  }
  0x75   :  { %5869 = vmatprep.subr.bf16.mxu1 %v6454_v0 }
  0x77   :  { %2493 = vmatpush1.bf16.msra.mxu0 %v6252_v14  ;;  %v6265_v14 = vld [vmem:[%s8851_s0 + $0x4d8] ss:$28 sps:$4 sm:$0xff]  }
  0x78   :  { %2494 = vmatprep.subr.bf16.mxu0 %v6454_v0  ;;  %5885 = vmatpush1.bf16.msra.mxu1 %v6631_v30  ;;  %v6188_v30 = vld [vmem:[%s8851_s0 + $0x274] ss:$28 sps:$4 sm:$0xff]  }
  0x79   :  { %1977 = vmatmul.mubr.bf16.gmra.mrb[28].mxu1 %v6164_v13  ;;  %5870 = vmatprep.subr.bf16.mxu1 %v6454_v0  ;;  %v6264_v13 = vld [vmem:[%s8851_s0 + $0x4d0] ss:$28 sps:$4 sm:$0xff]  }
  0x7a   :  { %2266 = vmatmul.mubr.bf16.gmra.mrb[28].mxu0 %v6165_v15  ;;  %1984 = vmatprep.mubr.bf16.mxu1 %v6166_v16  ;;  %v6266_v15 = vld [vmem:[%s8851_s0 + $0x50c] ss:$28 sps:$4 sm:$0xff]   ;;  %v6268_v16 = vld [vmem:[%s8851_s0 + $0x514] ss:$28 sps:$4 sm:$0xff]  }
  0x7b   :  { %2273 = vmatprep.mubr.bf16.mxu0 %v6168_v17  ;;  %2495 = vmatpush1.bf16.msra.mxu0 %v6259_v18  ;;  %v6270_v17 = vld [vmem:[%s8851_s0 + $0x508] ss:$28 sps:$4 sm:$0xff]   ;;  %v6271_v18 = vld [vmem:[%s8851_s0 + $0x510] ss:$28 sps:$4 sm:$0xff]  }
  0x7c   :  { %2496 = vmatprep.subr.bf16.mxu0 %v6454_v0  ;;  %5886 = vmatpush1.bf16.msra.mxu1 %v6642_v32  ;;  %v6191_v32 = vld [vmem:[%s8851_s0 + $0x270] ss:$28 sps:$4 sm:$0xff]  }
  0x7d   :  { %5871 = vmatprep.subr.bf16.mxu1 %v6454_v0  ;;  %v6182_v0 = vld [vmem:[%s8851_s0 + $0x23c] ss:$28 sps:$4 sm:$0xff]  }
  0x7f   :  { %2497 = vmatpush1.bf16.msra.mxu0 %v6272_v20  ;;  %v6277_v20 = vld [vmem:[%s8851_s0 + $0x14] ss:$28 sps:$4 sm:$0xff]  }
  0x80   :  { %5887 = vmatpush1.bf16.msra.mxu1 %v6653_v34  ;;  %v6195_v34 = vld [vmem:[%s8851_s0 + $0x2ac] ss:$28 sps:$4 sm:$0xff]  }
  0x81   :  { %1985 = vmatmul.mubr.bf16.gmra.mrb[32].mxu1 %v6170_v19  ;;  %5788 = vmatprep.subr.bf16.mxu1 %v6960_v55  ;;  %v6273_v19 = vld [vmem:[%s8851_s0 + $0x544] ss:$28 sps:$4 sm:$0xff]  }
  0x82   :  { %2274 = vmatmul.mubr.bf16.gmra.mrb[32].mxu0 %v6171_v21  ;;  %1992 = vmatprep.mubr.bf16.mxu1 %v6173_v22  ;;  %v6278_v21 = vld [vmem:[%s8851_s0 + $0x540] ss:$28 sps:$4 sm:$0xff]   ;;  %v6275_v22 = vld [vmem:[%s8851_s0 + $0x10] ss:$28 sps:$4 sm:$0xff]  }
  0x83   :  { %2281 = vmatprep.mubr.bf16.mxu0 %v6175_v23  ;;  %v6279_v23 = vld [vmem:[%s8851_s0 + $0x57c] ss:$28 sps:$4 sm:$0xff]  }
  0x89   :  { %1993 = vmatmul.mubr.bf16.gmra.mrb[36].mxu1 %v6177_v24  ;;  %v6281_v24 = vld [vmem:[%s8851_s0 + $0x4c] ss:$28 sps:$4 sm:$0xff]  }
  0x8a   :  { %2282 = vmatmul.mubr.bf16.gmra.mrb[36].mxu0 %v6178_v25  ;;  %2000 = vmatprep.mubr.bf16.mxu1 %v6180_v26  ;;  %v6283_v25 = vld [vmem:[%s8851_s0 + $0x578] ss:$28 sps:$4 sm:$0xff]   ;;  %v6284_v26 = vld [vmem:[%s8851_s0 + $0x48] ss:$28 sps:$4 sm:$0xff]  }
  0x8b   :  { %2289 = vmatprep.mubr.bf16.mxu0 %v6182_v0  ;;  %v6285_v0 = vld [vmem:[%s8851_s0 + $0x5b4] ss:$28 sps:$4 sm:$0xff]  }
  0x91   :  { %2001 = vmatmul.mubr.bf16.gmra.mrb[40].mxu1 %v6184_v27  ;;  %v6287_v27 = vld [vmem:[%s8851_s0 + $0x84] ss:$28 sps:$4 sm:$0xff]  }
  0x92   :  { %2290 = vmatmul.mubr.bf16.gmra.mrb[40].mxu0 %v6185_v28  ;;  %2008 = vmatprep.mubr.bf16.mxu1 %v6186_v29  ;;  %v6289_v28 = vld [vmem:[%s8851_s0 + $0x5b0] ss:$28 sps:$4 sm:$0xff]   ;;  %v6290_v29 = vld [vmem:[%s8851_s0 + $0x80] ss:$28 sps:$4 sm:$0xff]  }
  0x93   :  { %2297 = vmatprep.mubr.bf16.mxu0 %v6188_v30  ;;  %v6291_v30 = vld [vmem:[%s8851_s0 + $0x5ec] ss:$28 sps:$4 sm:$0xff]  }
  0x99   :  { %2009 = vmatmul.mubr.bf16.gmra.mrb[44].mxu1 %v6190_v31  ;;  %v6293_v31 = vld [vmem:[%s8851_s0 + $0xbc] ss:$28 sps:$4 sm:$0xff]  }
  0x9a   :  { %2298 = vmatmul.mubr.bf16.gmra.mrb[44].mxu0 %v6191_v32  ;;  %2016 = vmatprep.mubr.bf16.mxu1 %v6193_v33 }
  0x9b   :  { %2305 = vmatprep.mubr.bf16.mxu0 %v6195_v34  ;;  %v6295_v34 = vld [vmem:[%s8851_s0 + $0x5e8] ss:$28 sps:$4 sm:$0xff]  }
  0xa1   :  { %2017 = vmatmul.mubr.bf16.gmra.mrb[48].mxu1 %v6197_v35 }
  0xa2   :  { %2306 = vmatmul.mubr.bf16.gmra.mrb[48].mxu0 %v6198_v36  ;;  %2024 = vmatprep.mubr.bf16.mxu1 %v6200_v37  ;;  %v6296_v36 = vld [vmem:[%s8851_s0 + $0xb8] ss:$28 sps:$4 sm:$0xff]   ;;  %v6297_v37 = vld [vmem:[%s8851_s0 + $0x624] ss:$28 sps:$4 sm:$0xff]  }
  0xa3   :  { %2313 = vmatprep.mubr.bf16.mxu0 %v6202_v38 }
  0xa9   :  { %2025 = vmatmul.mubr.bf16.gmra.mrb[52].mxu1 %v6204_v39  ;;  %v6299_v39 = vld [vmem:[%s8851_s0 + $0xf4] ss:$28 sps:$4 sm:$0xff]  }
  0xaa   :  { %2314 = vmatmul.mubr.bf16.gmra.mrb[52].mxu0 %v6205_v40  ;;  %2032 = vmatprep.mubr.bf16.mxu1 %v6206_v41 }
  0xab   :  { %2321 = vmatprep.mubr.bf16.mxu0 %v6208_v42  ;;  %v6301_v42 = vld [vmem:[%s8851_s0 + $0x620] ss:$28 sps:$4 sm:$0xff]  }
  0xb1   :  { %2033 = vmatmul.mubr.bf16.gmra.mrb[56].mxu1 %v6210_v43 }
  0xb2   :  { %2322 = vmatmul.mubr.bf16.gmra.mrb[56].mxu0 %v6211_v44  ;;  %2040 = vmatprep.mubr.bf16.mxu1 %v6213_v45  ;;  %v6302_v44 = vld [vmem:[%s8851_s0 + $0xf0] ss:$28 sps:$4 sm:$0xff]   ;;  %v6303_v45 = vld [vmem:[%s8851_s0 + $0x65c] ss:$28 sps:$4 sm:$0xff]  }
  0xb3   :  { %2329 = vmatprep.mubr.bf16.mxu0 %v6215_v46 }
  0xb9   :  { %2041 = vmatmul.mubr.bf16.gmra.mrb[60].mxu1 %v6217_v47  ;;  %v6305_v47 = vld [vmem:[%s8851_s0 + $0x12c] ss:$28 sps:$4 sm:$0xff]  }
  0xba   :  { %2330 = vmatmul.mubr.bf16.gmra.mrb[60].mxu0 %v6218_v48  ;;  %2048 = vmatprep.mubr.bf16.mxu1 %v6220_v49 }
  0xbb   :  { %2337 = vmatprep.mubr.bf16.mxu0 %v6222_v50  ;;  %v6307_v50 = vld [vmem:[%s8851_s0 + $0x658] ss:$28 sps:$4 sm:$0xff]  }
  0xc1   :  { %2049 = vmatmul.mubr.bf16.gmra.mrb[64].mxu1 %v6224_v51 }
  0xc2   :  { %2338 = vmatmul.mubr.bf16.gmra.mrb[64].mxu0 %v6225_v52  ;;  %2056 = vmatprep.mubr.bf16.mxu1 %v6226_v53  ;;  %v6308_v52 = vld [vmem:[%s8851_s0 + $0x128] ss:$28 sps:$4 sm:$0xff]   ;;  %v6309_v53 = vld [vmem:[%s8851_s0 + $0x694] ss:$28 sps:$4 sm:$0xff]  }
  0xc3   :  { %2345 = vmatprep.mubr.bf16.mxu0 %v6228_v54 }
  0xc9   :  { %2057 = vmatmul.mubr.bf16.gmra.mrb[68].mxu1 %v6230_v56  ;;  %v6311_v56 = vld [vmem:[%s8851_s0 + $0x164] ss:$28 sps:$4 sm:$0xff]  }
  0xca   :  { %2346 = vmatmul.mubr.bf16.gmra.mrb[68].mxu0 %v6231_v57  ;;  %2064 = vmatprep.mubr.bf16.mxu1 %v6233_v58 }
  0xcb   :  { %2353 = vmatprep.mubr.bf16.mxu0 %v6235_v59  ;;  %v6313_v59 = vld [vmem:[%s8851_s0 + $0x690] ss:$28 sps:$4 sm:$0xff]  }
  0xd1   :  { %2065 = vmatmul.mubr.bf16.gmra.mrb[72].mxu1 %v6237_v60 }
  0xd2   :  { %2354 = vmatmul.mubr.bf16.gmra.mrb[72].mxu0 %v6238_v61  ;;  %2072 = vmatprep.mubr.bf16.mxu1 %v6240_v62  ;;  %v6314_v61 = vld [vmem:[%s8851_s0 + $0x160] ss:$28 sps:$4 sm:$0xff]   ;;  %v6315_v62 = vld [vmem:[%s8851_s0 + $0x6cc] ss:$28 sps:$4 sm:$0xff]  }
  0xd3   :  { %2361 = vmatprep.mubr.bf16.mxu0 %v6242_v63 }
  0xd9   :  { %2073 = vmatmul.mubr.bf16.gmra.mrb[76].mxu1 %v6244_v1  ;;  %v6317_v1 = vld [vmem:[%s8851_s0 + $0x19c] ss:$28 sps:$4 sm:$0xff]  }
  0xda   :  { %2362 = vmatmul.mubr.bf16.gmra.mrb[76].mxu0 %v6245_v2  ;;  %2080 = vmatprep.mubr.bf16.mxu1 %v6246_v3 }
  0xdb   :  { %2369 = vmatprep.mubr.bf16.mxu0 %v6248_v4  ;;  %v6319_v4 = vld [vmem:[%s8851_s0 + $0x6c8] ss:$28 sps:$4 sm:$0xff]  }
  0xe1   :  { %2081 = vmatmul.mubr.bf16.gmra.mrb[80].mxu1 %v6250_v5 }
  0xe2   :  { %2370 = vmatmul.mubr.bf16.gmra.mrb[80].mxu0 %v6251_v6  ;;  %2088 = vmatprep.mubr.bf16.mxu1 %v6253_v7  ;;  %v6320_v6 = vld [vmem:[%s8851_s0 + $0x198] ss:$28 sps:$4 sm:$0xff]   ;;  %v6323_v7 = vld [vmem:[%s8851_s0 + $0x54c] ss:$28 sps:$4 sm:$0xff]  }
  0xe3   :  { %2377 = vmatprep.mubr.bf16.mxu0 %v6255_v8 }
  0xe9   :  { %2089 = vmatmul.mubr.bf16.gmra.mrb[84].mxu1 %v6257_v9  ;;  %v6324_v9 = vld [vmem:[%s8851_s0 + $0x1d4] ss:$28 sps:$4 sm:$0xff]  }
  0xea   :  { %2378 = vmatmul.mubr.bf16.gmra.mrb[84].mxu0 %v6258_v10  ;;  %2096 = vmatprep.mubr.bf16.mxu1 %v6260_v11 }
  0xeb   :  { %2385 = vmatprep.mubr.bf16.mxu0 %v6262_v12  ;;  %v6321_v12 = vld [vmem:[%s8851_s0 + $0x548] ss:$28 sps:$4 sm:$0xff]  }
  0xf1   :  { %2097 = vmatmul.mubr.bf16.gmra.mrb[88].mxu1 %v6264_v13 }
  0xf2   :  { %2386 = vmatmul.mubr.bf16.gmra.mrb[88].mxu0 %v6265_v14  ;;  %2104 = vmatprep.mubr.bf16.mxu1 %v6266_v15  ;;  %v6326_v14 = vld [vmem:[%s8851_s0 + $0x1d0] ss:$28 sps:$4 sm:$0xff]  }
  0xf3   :  { %2393 = vmatprep.mubr.bf16.mxu0 %v6268_v16  ;;  %v6328_v16 = vld [vmem:[%s8851_s0 + $0x584] ss:$28 sps:$4 sm:$0xff]  }
  0xf9   :  { %2105 = vmatmul.mubr.bf16.gmra.mrb[92].mxu1 %v6270_v17  ;;  %v6330_v17 = vld [vmem:[%s8851_s0 + $0x20c] ss:$28 sps:$4 sm:$0xff]  }
  0xfa   :  { %2394 = vmatmul.mubr.bf16.gmra.mrb[92].mxu0 %v6271_v18  ;;  %2112 = vmatprep.mubr.bf16.mxu1 %v6273_v19  ;;  %v6352_v18 = vld [vmem:[%s8850_s1 + $0x188] sm:$0xff]  }
  0xfb   :  { %2498 = vmatprep.mubr.bf16.mxu0 %v6277_v20 }
 0x101   :  { %2113 = vmatmul.mubr.bf16.gmra.mrb[96].mxu1 %v6278_v21  ;;  %v6332_v21 = vld [vmem:[%s8851_s0 + $0x580] ss:$28 sps:$4 sm:$0xff]  }
 0x102   :  { %2499 = vmatmul.mubr.bf16.vlgmr.msra.gmra.mrb[0].mxu0 %v6275_v22  ;;  %2120 = vmatprep.mubr.bf16.mxu1 %v6279_v23  ;;  %v6333_v23 = vld [vmem:[%s8851_s0 + $0x208] ss:$28 sps:$4 sm:$0xff]  }
 0x103   :  { %2506 = vmatprep.mubr.bf16.mxu0 %v6281_v24 }
 0x109   :  { %2121 = vmatmul.mubr.bf16.gmra.mrb[100].mxu1 %v6283_v25  ;;  %v6336_v25 = vld [vmem:[%s8851_s0 + $0x244] ss:$28 sps:$4 sm:$0xff]  }
 0x10a   :  { %2507 = vmatmul.mubr.bf16.gmra.mrb[4].mxu0 %v6284_v26  ;;  %2128 = vmatprep.mubr.bf16.mxu1 %v6285_v0 }
 0x10b   :  { %2514 = vmatprep.mubr.bf16.mxu0 %v6287_v27  ;;  %v6338_v27 = vld [vmem:[%s8851_s0 + $0x5b8] ss:$28 sps:$4 sm:$0xff]  }
 0x111   :  { %2129 = vmatmul.mubr.bf16.gmra.mrb[104].mxu1 %v6289_v28 }
 0x112   :  { %2515 = vmatmul.mubr.bf16.gmra.mrb[8].mxu0 %v6290_v29  ;;  %2136 = vmatprep.mubr.bf16.mxu1 %v6291_v30  ;;  %v6339_v29 = vld [vmem:[%s8851_s0 + $0x240] ss:$28 sps:$4 sm:$0xff]   ;;  %v6340_v30 = vld [vmem:[%s8851_s0 + $0x5f4] ss:$28 sps:$4 sm:$0xff]  }
 0x113   :  { %2522 = vmatprep.mubr.bf16.mxu0 %v6293_v31 }
 0x114   :  { %v7083_v32 = vpop.f32.mrb[0].mxu1 }
 0x115   :  { %v1924_v33 = vpop.f32.mrb[1].mxu1 }
 0x116   :  { %v7088_v35 = vpop.f32.mrb[2].mxu1  ;;  %v6342_v33 = vld [vmem:[%s8851_s0 + $0x27c] ss:$28 sps:$4 sm:$0xff]  }
 0x117   :  { %v1927_v38 = vpop.f32.mrb[3].mxu1 }
 0x119   :  { %2137 = vmatmul.mubr.bf16.gmra.mrb[108].mxu1 %v6295_v34 }
 0x11a   :  { %2523 = vmatmul.mubr.bf16.gmra.mrb[12].mxu0 %v6296_v36  ;;  %2144 = vmatprep.mubr.bf16.mxu1 %v6297_v37  ;;  %v6344_v37 = vld [vmem:[%s8851_s0 + $0x5f0] ss:$28 sps:$4 sm:$0xff]  }
 0x11b   :  { %2530 = vmatprep.mubr.bf16.mxu0 %v6299_v39  ;;  %v6345_v39 = vld [vmem:[%s8851_s0 + $0x278] ss:$28 sps:$4 sm:$0xff]  }
 0x11c   :  { %v7099_v40 = vpop.f32.mrb[4].mxu1 }
 0x11d   :  { %v1932_v41 = vpop.f32.mrb[5].mxu1 }
 0x11e   :  { %v7104_v43 = vpop.f32.mrb[6].mxu1  ;;  %v6346_v41 = vld [vmem:[%s8851_s0 + $0x62c] ss:$28 sps:$4 sm:$0xff]  }
 0x11f   :  { %v1935_v46 = vpop.f32.mrb[7].mxu1 }
 0x121   :  { %2145 = vmatmul.mubr.bf16.gmra.mrb[112].mxu1 %v6301_v42 }
 0x122   :  { %2531 = vmatmul.mubr.bf16.gmra.mrb[16].mxu0 %v6302_v44  ;;  %2152 = vmatprep.mubr.bf16.mxu1 %v6303_v45  ;;  %v6348_v44 = vld [vmem:[%s8851_s0 + $0x2b4] ss:$28 sps:$4 sm:$0xff]  }
 0x123   :  { %2538 = vmatprep.mubr.bf16.mxu0 %v6305_v47  ;;  %v6350_v47 = vld [vmem:[%s8851_s0 + $0x628] ss:$28 sps:$4 sm:$0xff]  }
 0x124   :  { %v7115_v48 = vpop.f32.mrb[8].mxu1 }
 0x125   :  { %v1940_v49 = vpop.f32.mrb[9].mxu1 }
 0x126   :  { %v7120_v51 = vpop.f32.mrb[10].mxu1 }
 0x127   :  { %v1943_v54 = vpop.f32.mrb[11].mxu1 }
 0x128   :  { %v6355_v54 = vld [vmem:[%s8851_s0 + $0x2ec] ss:$28 sps:$4 sm:$0xff]  }
 0x129   :  { %2153 = vmatmul.mubr.bf16.gmra.mrb[116].mxu1 %v6307_v50  ;;  %v6351_v50 = vld [vmem:[%s8851_s0 + $0x2b0] ss:$28 sps:$4 sm:$0xff]  }
 0x12a   :  { %2539 = vmatmul.mubr.bf16.gmra.mrb[20].mxu0 %v6308_v52  ;;  %2160 = vmatprep.mubr.bf16.mxu1 %v6309_v53  ;;  %v6353_v52 = vld [vmem:[%s8851_s0 + $0x664] ss:$28 sps:$4 sm:$0xff]  }
 0x12b   :  { %2546 = vmatprep.mubr.bf16.mxu0 %v6311_v56 }
 0x12c   :  { %v7131_v57 = vpop.f32.mrb[12].mxu1 }
 0x12d   :  { %v1948_v58 = vpop.f32.mrb[13].mxu1 }
 0x12e   :  { %v7136_v60 = vpop.f32.mrb[14].mxu1 }
 0x12f   :  { %v1951_v63 = vpop.f32.mrb[15].mxu1 }
 0x130   :  { %v6359_v63 = vld [vmem:[%s8851_s0 + $0x69c] ss:$28 sps:$4 sm:$0xff]  }
 0x131   :  { %2161 = vmatmul.mubr.bf16.gmra.mrb[120].mxu1 %v6313_v59  ;;  %v6357_v59 = vld [vmem:[%s8851_s0 + $0x660] ss:$28 sps:$4 sm:$0xff]  }
 0x132   :  { %2547 = vmatmul.mubr.bf16.gmra.mrb[24].mxu0 %v6314_v61  ;;  %2168 = vmatprep.mubr.bf16.mxu1 %v6315_v62  ;;  %v6358_v62 = vld [vmem:[%s8851_s0 + $0x2e8] ss:$28 sps:$4 sm:$0xff]  }
 0x133   :  { %2554 = vmatprep.mubr.bf16.mxu0 %v6317_v1 }
 0x134   :  { %v7147_v2 = vpop.f32.mrb[16].mxu1 }
 0x135   :  { %v1956_v3 = vpop.f32.mrb[17].mxu1 }
 0x136   :  { %v7152_v5 = vpop.f32.mrb[18].mxu1  ;;  %v6361_v3 = vld [vmem:[%s8851_s0 + $0x324] ss:$28 sps:$4 sm:$0xff]  }
 0x137   :  { %v1959_v8 = vpop.f32.mrb[19].mxu1 }
 0x139   :  { %2169 = vmatmul.mubr.bf16.gmra.mrb[124].mxu1 %v6319_v4 }
 0x13a   :  { %2555 = vmatmul.mubr.bf16.gmra.mrb[28].mxu0 %v6320_v6  ;;  %2401 = vmatprep.mubr.bf16.mxu1 %v6323_v7  ;;  %v6363_v7 = vld [vmem:[%s8851_s0 + $0x698] ss:$28 sps:$4 sm:$0xff]  }
 0x13b   :  { %2562 = vmatprep.mubr.bf16.mxu0 %v6324_v9  ;;  %v6364_v9 = vld [vmem:[%s8851_s0 + $0x320] ss:$28 sps:$4 sm:$0xff]  }
 0x13c   :  { %v7163_v10 = vpop.f32.mrb[20].mxu1 }
 0x13d   :  { %v1964_v11 = vpop.f32.mrb[21].mxu1 }
 0x13e   :  { %v7168_v13 = vpop.f32.mrb[22].mxu1  ;;  %v6365_v11 = vld [vmem:[%s8851_s0 + $0x6d4] ss:$28 sps:$4 sm:$0xff]  }
 0x13f   :  { %v1967_v15 = vpop.f32.mrb[23].mxu1 }
 0x141   :  { %2402 = vmatmul.mubr.bf16.vlgmr.msra.gmra.mrb[96].mxu1 %v6321_v12 }
 0x142   :  { %2563 = vmatmul.mubr.bf16.gmra.mrb[32].mxu0 %v6326_v14  ;;  %5789 = vmatpush3.bf16.msra.mxu1 %v6960_v55  ;;  %v6334_v55 = vld [vmem:[%s8851_s0 + $0x5bc] ss:$28 sps:$4 sm:$0xff]  }
 0x143   :  { %2409 = vmatprep.mubr.bf16.mxu1 %v6328_v16  ;;  %2570 = vmatprep.mubr.bf16.mxu0 %v6330_v17  ;;  %v6367_v14 = vld [vmem:[%s8851_s0 + $0x35c] ss:$28 sps:$4 sm:$0xff]   ;;  %v6369_v17 = vld [vmem:[%s8851_s0 + $0x6d0] ss:$28 sps:$4 sm:$0xff]  }
 0x144   :  { %v7183_v19 = vpop.f32.mrb[24].mxu1  ;;  %5790 = vmatprep.subr.bf16.mxu1 %v6352_v18 }
 0x145   :  { %v1972_v20 = vpop.f32.mrb[25].mxu1 }
 0x146   :  { %v7188_v22 = vpop.f32.mrb[26].mxu1  ;;  %5791 = vmatpush3.bf16.msra.mxu1 %v6352_v18  ;;  %v6370_v20 = vld [vmem:[%s8851_s0 + $0x358] ss:$28 sps:$4 sm:$0xff]  }
 0x147   :  { %v1975_v24 = vpop.f32.mrb[27].mxu1 }
 0x149   :  { %2410 = vmatmul.mubr.bf16.gmra.mrb[100].mxu1 %v6332_v21  ;;  %v6373_v21 = vld [vmem:[%s8851_s0 + $0x18] ss:$28 sps:$4 sm:$0xff]  }
 0x14a   :  { %2571 = vmatmul.mubr.bf16.gmra.mrb[36].mxu0 %v6333_v23  ;;  %2417 = vmatprep.mubr.bf16.mxu1 %v6334_v55  ;;  %v6371_v55 = vld [vmem:[%s8851_s0 + $0x394] ss:$28 sps:$4 sm:$0xff]  }
 0x14b   :  { %2578 = vmatprep.mubr.bf16.mxu0 %v6336_v25 }
 0x14c   :  { %v7199_v26 = vpop.f32.mrb[28].mxu1 }
 0x14d   :  { %v1980_v0 = vpop.f32.mrb[29].mxu1 }
 0x14e   :  { %v7204_v28 = vpop.f32.mrb[30].mxu1  ;;  %v6375_v0 = vld [vmem:[%s8851_s0 + $0x50] ss:$28 sps:$4 sm:$0xff]  }
 0x14f   :  { %v1983_v31 = vpop.f32.mrb[31].mxu1 }
 0x151   :  { %2418 = vmatmul.mubr.bf16.gmra.mrb[104].mxu1 %v6338_v27 }
 0x152   :  { %2579 = vmatmul.mubr.bf16.gmra.mrb[40].mxu0 %v6339_v29  ;;  %2425 = vmatprep.mubr.bf16.mxu1 %v6340_v30  ;;  %v6374_v29 = vld [vmem:[%s8851_s0 + $0x390] ss:$28 sps:$4 sm:$0xff]   ;;  %v6378_v30 = vld [vmem:[%s8851_s0 + $0x88] ss:$28 sps:$4 sm:$0xff]  }
 0x153   :  { %2586 = vmatprep.mubr.bf16.mxu0 %v6342_v33  ;;  %v6376_v33 = vld [vmem:[%s8851_s0 + $0x3cc] ss:$28 sps:$4 sm:$0xff]  }
 0x154   :  { %v7215_v34 = vpop.f32.mrb[32].mxu1 }
 0x155   :  { %v1988_v36 = vpop.f32.mrb[33].mxu1 }
 0x156   :  { %v7220_v38 = vpop.f32.mrb[34].mxu1 }
 0x157   :  { %v1991_v42 = vpop.f32.mrb[35].mxu1 }
 0x158   :  { %v6379_v42 = vld [vmem:[%s8851_s0 + $0x3c8] ss:$28 sps:$4 sm:$0xff]  }
 0x159   :  { %2426 = vmatmul.mubr.bf16.gmra.mrb[108].mxu1 %v6344_v37 }
 0x15a   :  { %2587 = vmatmul.mubr.bf16.gmra.mrb[44].mxu0 %v6345_v39  ;;  %2433 = vmatprep.mubr.bf16.mxu1 %v6346_v41  ;;  %v6380_v39 = vld [vmem:[%s8851_s0 + $0xc0] ss:$28 sps:$4 sm:$0xff]  }
 0x15b   :  { %2594 = vmatprep.mubr.bf16.mxu0 %v6348_v44  ;;  %v6383_v44 = vld [vmem:[%s8851_s0 + $0xf8] ss:$28 sps:$4 sm:$0xff]  }
 0x15c   :  { %v7231_v45 = vpop.f32.mrb[36].mxu1 }
 0x15d   :  { %v1996_v46 = vpop.f32.mrb[37].mxu1 }
 0x15e   :  { %v7236_v49 = vpop.f32.mrb[38].mxu1 }
 0x15f   :  { %v1999_v53 = vpop.f32.mrb[39].mxu1 }
 0x160   :  { %v6385_v53 = vld [vmem:[%s8851_s0 + $0x130] ss:$28 sps:$4 sm:$0xff]  }
 0x161   :  { %2434 = vmatmul.mubr.bf16.gmra.mrb[112].mxu1 %v6350_v47  ;;  %v6381_v47 = vld [vmem:[%s8851_s0 + $0x404] ss:$28 sps:$4 sm:$0xff]  }
 0x162   :  { %2595 = vmatmul.mubr.bf16.gmra.mrb[48].mxu0 %v6351_v50  ;;  %2441 = vmatprep.mubr.bf16.mxu1 %v6353_v52 }
 0x163   :  { %2602 = vmatprep.mubr.bf16.mxu0 %v6355_v54 }
 0x164   :  { %v7247_v56 = vpop.f32.mrb[40].mxu1 }
 0x165   :  { %v2004_v58 = vpop.f32.mrb[41].mxu1 }
 0x166   :  { %v7252_v61 = vpop.f32.mrb[42].mxu1  ;;  %v6384_v58 = vld [vmem:[%s8851_s0 + $0x400] ss:$28 sps:$4 sm:$0xff]  }
 0x167   :  { %v2007_v1 = vpop.f32.mrb[43].mxu1 }
 0x169   :  { %2442 = vmatmul.mubr.bf16.gmra.mrb[116].mxu1 %v6357_v59  ;;  %v6388_v59 = vld [vmem:[%s8851_s0 + $0x168] ss:$28 sps:$4 sm:$0xff]  }
 0x16a   :  { %2603 = vmatmul.mubr.bf16.gmra.mrb[52].mxu0 %v6358_v62  ;;  %2449 = vmatprep.mubr.bf16.mxu1 %v6359_v63  ;;  %v6386_v63 = vld [vmem:[%s8851_s0 + $0x43c] ss:$28 sps:$4 sm:$0xff]  }
 0x16b   :  { %2610 = vmatprep.mubr.bf16.mxu0 %v6361_v3 }
 0x16c   :  { %v7263_v4 = vpop.f32.mrb[44].mxu1 }
 0x16d   :  { %v2012_v6 = vpop.f32.mrb[45].mxu1 }
 0x16e   :  { %v7268_v8 = vpop.f32.mrb[46].mxu1  ;;  %v6390_v6 = vld [vmem:[%s8851_s0 + $0x1a0] ss:$28 sps:$4 sm:$0xff]  }
 0x16f   :  { %v2015_v12 = vpop.f32.mrb[47].mxu1 }
 0x171   :  { %2450 = vmatmul.mubr.bf16.gmra.mrb[120].mxu1 %v6363_v7 }
 0x172   :  { %2611 = vmatmul.mubr.bf16.gmra.mrb[56].mxu0 %v6364_v9  ;;  %2457 = vmatprep.mubr.bf16.mxu1 %v6365_v11  ;;  %v6389_v9 = vld [vmem:[%s8851_s0 + $0x438] ss:$28 sps:$4 sm:$0xff]  }
 0x173   :  { %2618 = vmatprep.mubr.bf16.mxu0 %v6367_v14  ;;  %v6393_v11 = vld [vmem:[%s8851_s0 + $0x1d8] ss:$28 sps:$4 sm:$0xff]  }
 0x174   :  { %v7279_v15 = vpop.f32.mrb[48].mxu1  ;;  %v6391_v14 = vld [vmem:[%s8851_s0 + $0x474] ss:$28 sps:$4 sm:$0xff]  }
 0x175   :  { %v2020_v16 = vpop.f32.mrb[49].mxu1 }
 0x176   :  { %v7284_v18 = vpop.f32.mrb[50].mxu1 }
 0x177   :  { %v2023_v23 = vpop.f32.mrb[51].mxu1 }
 0x178   :  { %v6394_v23 = vld [vmem:[%s8851_s0 + $0x470] ss:$28 sps:$4 sm:$0xff]  }
 0x179   :  { %2458 = vmatmul.mubr.bf16.gmra.mrb[124].mxu1 %v6369_v17 }
 0x17a   :  { %2619 = vmatmul.mubr.bf16.gmra.mrb[60].mxu0 %v6370_v20  ;;  %5792 = vmatprep.mubr.msk.bf16.mxu1 %vm1791_vm0, %v6373_v21  ;;  %v6395_v20 = vld [vmem:[%s8851_s0 + $0x210] ss:$28 sps:$4 sm:$0xff]  }
 0x17b   :  { %2626 = vmatprep.mubr.bf16.mxu0 %v6371_v55  ;;  %v6398_v55 = vld [vmem:[%s8851_s0 + $0x248] ss:$28 sps:$4 sm:$0xff]  }
 0x17c   :  { %v7296_v24 = vpop.f32.mrb[52].mxu1 }
 0x17d   :  { %v2028_v25 = vpop.f32.mrb[53].mxu1 }
 0x17e   :  { %v7301_v27 = vpop.f32.mrb[54].mxu1 }
 0x17f   :  { %v2031_v31 = vpop.f32.mrb[55].mxu1 }
 0x180   :  { %v6400_v31 = vld [vmem:[%s8851_s0 + $0x280] ss:$28 sps:$4 sm:$0xff]  }
 0x181   :  { %5793 = vmatmul.mubr.msk.bf16.vlgmr.msra.gmra.mrb[128].mxu1 %vm1791_vm0, %v6375_v0  ;;  %v6396_v0 = vld [vmem:[%s8851_s0 + $0x4ac] ss:$28 sps:$4 sm:$0xff]  }
 0x182   :  { %2627 = vmatmul.mubr.bf16.gmra.mrb[64].mxu0 %v6374_v29  ;;  %5796 = vmatprep.mubr.msk.bf16.mxu1 %vm1791_vm0, %v6378_v30 }
 0x183   :  { %2634 = vmatprep.mubr.bf16.mxu0 %v6376_v33 }
 0x184   :  { %v7314_v36 = vpop.f32.mrb[56].mxu1 }
 0x185   :  { %v2036_v37 = vpop.f32.mrb[57].mxu1 }
 0x186   :  { %v7319_v41 = vpop.f32.mrb[58].mxu1  ;;  %v6399_v37 = vld [vmem:[%s8851_s0 + $0x4a8] ss:$28 sps:$4 sm:$0xff]  }
 0x187   :  { %v2039_v46 = vpop.f32.mrb[59].mxu1 }
 0x189   :  { %5797 = vmatmul.mubr.msk.bf16.gmra.mrb[132].mxu1 %vm1791_vm0, %v6380_v39  ;;  %v6403_v39 = vld [vmem:[%s8851_s0 + $0x2b8] ss:$28 sps:$4 sm:$0xff]  }
 0x18a   :  { %2635 = vmatmul.mubr.bf16.gmra.mrb[68].mxu0 %v6379_v42  ;;  %5800 = vmatprep.mubr.msk.bf16.mxu1 %vm1791_vm0, %v6383_v44  ;;  %v6401_v44 = vld [vmem:[%s8851_s0 + $0x4e4] ss:$28 sps:$4 sm:$0xff]  }
 0x18b   :  { %2642 = vmatprep.mubr.bf16.mxu0 %v6381_v47 }
 0x18c   :  { %v7332_v50 = vpop.f32.mrb[60].mxu1 }
 0x18d   :  { %v2044_v52 = vpop.f32.mrb[61].mxu1 }
 0x18e   :  { %v7337_v54 = vpop.f32.mrb[62].mxu1  ;;  %v6405_v52 = vld [vmem:[%s8851_s0 + $0x2f0] ss:$28 sps:$4 sm:$0xff]  }
 0x18f   :  { %v2047_v62 = vpop.f32.mrb[63].mxu1 }
 0x191   :  { %5801 = vmatmul.mubr.msk.bf16.gmra.mrb[136].mxu1 %vm1791_vm0, %v6385_v53 }
 0x192   :  { %2643 = vmatmul.mubr.bf16.gmra.mrb[72].mxu0 %v6384_v58  ;;  %5804 = vmatprep.mubr.msk.bf16.mxu1 %vm1791_vm0, %v6388_v59  ;;  %v6404_v58 = vld [vmem:[%s8851_s0 + $0x4e0] ss:$28 sps:$4 sm:$0xff]   ;;  %v6408_v59 = vld [vmem:[%s8851_s0 + $0x328] ss:$28 sps:$4 sm:$0xff]  }
 0x193   :  { %2650 = vmatprep.mubr.bf16.mxu0 %v6386_v63  ;;  %v6406_v63 = vld [vmem:[%s8851_s0 + $0x51c] ss:$28 sps:$4 sm:$0xff]  }
 0x194   :  { %v7350_v1 = vpop.f32.mrb[64].mxu1 }
 0x195   :  { %v2052_v3 = vpop.f32.mrb[65].mxu1 }
 0x196   :  { %v7355_v7 = vpop.f32.mrb[66].mxu1 }
 0x197   :  { %v2055_v12 = vpop.f32.mrb[67].mxu1 }
 0x198   :  { %v6409_v12 = vld [vmem:[%s8851_s0 + $0x518] ss:$28 sps:$4 sm:$0xff]  }
 0x199   :  { %5805 = vmatmul.mubr.msk.bf16.gmra.mrb[140].mxu1 %vm1791_vm0, %v6390_v6 }
 0x19a   :  { %2651 = vmatmul.mubr.bf16.gmra.mrb[76].mxu0 %v6389_v9  ;;  %5808 = vmatprep.mubr.msk.bf16.mxu1 %vm1791_vm0, %v6393_v11  ;;  %v6410_v9 = vld [vmem:[%s8851_s0 + $0x360] ss:$28 sps:$4 sm:$0xff]  }
 0x19b   :  { %2658 = vmatprep.mubr.bf16.mxu0 %v6391_v14  ;;  %v6413_v14 = vld [vmem:[%s8851_s0 + $0x398] ss:$28 sps:$4 sm:$0xff]  }
 0x19c   :  { %v7368_v16 = vpop.f32.mrb[68].mxu1 }
 0x19d   :  { %v2060_v17 = vpop.f32.mrb[69].mxu1 }
 0x19e   :  { %v7373_v21 = vpop.f32.mrb[70].mxu1 }
 0x19f   :  { %v2063_v25 = vpop.f32.mrb[71].mxu1 }
 0x1a0   :  { %v6415_v25 = vld [vmem:[%s8851_s0 + $0x3d0] ss:$28 sps:$4 sm:$0xff]  }
 0x1a1   :  { %5809 = vmatmul.mubr.msk.bf16.gmra.mrb[144].mxu1 %vm1791_vm0, %v6395_v20  ;;  %v6411_v20 = vld [vmem:[%s8851_s0 + $0x554] ss:$28 sps:$4 sm:$0xff]  }
 0x1a2   :  { %2659 = vmatmul.mubr.bf16.gmra.mrb[80].mxu0 %v6394_v23  ;;  %5812 = vmatprep.mubr.msk.bf16.mxu1 %vm1791_vm0, %v6398_v55 }
 0x1a3   :  { %2666 = vmatprep.mubr.bf16.mxu0 %v6396_v0 }
 0x1a4   :  { %v7386_v29 = vpop.f32.mrb[72].mxu1 }
 0x1a5   :  { %v2068_v30 = vpop.f32.mrb[73].mxu1 }
 0x1a6   :  { %v7391_v33 = vpop.f32.mrb[74].mxu1  ;;  %v6414_v30 = vld [vmem:[%s8851_s0 + $0x550] ss:$28 sps:$4 sm:$0xff]  }
 0x1a7   :  { %v2071_v42 = vpop.f32.mrb[75].mxu1 }
 0x1a9   :  { %5813 = vmatmul.mubr.msk.bf16.gmra.mrb[148].mxu1 %vm1791_vm0, %v6400_v31  ;;  %v6418_v31 = vld [vmem:[%s8851_s0 + $0x408] ss:$28 sps:$4 sm:$0xff]  }
 0x1aa   :  { %2667 = vmatmul.mubr.bf16.gmra.mrb[84].mxu0 %v6399_v37  ;;  %5816 = vmatprep.mubr.msk.bf16.mxu1 %vm1791_vm0, %v6403_v39  ;;  %v6416_v39 = vld [vmem:[%s8851_s0 + $0x58c] ss:$28 sps:$4 sm:$0xff]  }
 0x1ab   :  { %2674 = vmatprep.mubr.bf16.mxu0 %v6401_v44 }
 0x1ac   :  { %v7404_v46 = vpop.f32.mrb[76].mxu1 }
 0x1ad   :  { %v2076_v47 = vpop.f32.mrb[77].mxu1 }
 0x1ae   :  { %v7409_v53 = vpop.f32.mrb[78].mxu1  ;;  %v6420_v47 = vld [vmem:[%s8851_s0 + $0x440] ss:$28 sps:$4 sm:$0xff]  }
 0x1af   :  { %v2079_v62 = vpop.f32.mrb[79].mxu1 }
 0x1b1   :  { %5817 = vmatmul.mubr.msk.bf16.gmra.mrb[152].mxu1 %vm1791_vm0, %v6405_v52 }
 0x1b2   :  { %2675 = vmatmul.mubr.bf16.gmra.mrb[88].mxu0 %v6404_v58  ;;  %5820 = vmatprep.mubr.msk.bf16.mxu1 %vm1791_vm0, %v6408_v59  ;;  %v6419_v58 = vld [vmem:[%s8851_s0 + $0x588] ss:$28 sps:$4 sm:$0xff]   ;;  %v6423_v59 = vld [vmem:[%s8851_s0 + $0x478] ss:$28 sps:$4 sm:$0xff]  }
 0x1b3   :  { %2682 = vmatprep.mubr.bf16.mxu0 %v6406_v63  ;;  %v6421_v63 = vld [vmem:[%s8851_s0 + $0x5c4] ss:$28 sps:$4 sm:$0xff]  }
 0x1b4   :  { %v7422_v3 = vpop.f32.mrb[80].mxu1 }
 0x1b5   :  { %v2084_v6 = vpop.f32.mrb[81].mxu1 }
 0x1b6   :  { %v7427_v11 = vpop.f32.mrb[82].mxu1 }
 0x1b7   :  { %v2087_v17 = vpop.f32.mrb[83].mxu1 }
 0x1b8   :  { %v6424_v17 = vld [vmem:[%s8851_s0 + $0x5c0] ss:$28 sps:$4 sm:$0xff]  }
 0x1b9   :  { %5821 = vmatmul.mubr.msk.bf16.gmra.mrb[156].mxu1 %vm1791_vm0, %v6410_v9 }
 0x1ba   :  { %2683 = vmatmul.mubr.bf16.gmra.mrb[92].mxu0 %v6409_v12  ;;  %5824 = vmatprep.mubr.msk.bf16.mxu1 %vm1791_vm0, %v6413_v14  ;;  %v6425_v12 = vld [vmem:[%s8851_s0 + $0x4b0] ss:$28 sps:$4 sm:$0xff]  }
 0x1bb   :  { %2690 = vmatprep.mubr.bf16.mxu0 %v6411_v20  ;;  %v6428_v20 = vld [vmem:[%s8851_s0 + $0x4e8] ss:$28 sps:$4 sm:$0xff]  }
 0x1bc   :  { %v7440_v23 = vpop.f32.mrb[84].mxu1 }
 0x1bd   :  { %8854 = vst [vmem:[#allocation2_spill] sm:$0xff] %v7440_v23  ;;  %v2092_v55 = vpop.f32.mrb[85].mxu1 }
 0x1be   :  { %v7445_v0 = vpop.f32.mrb[86].mxu1 }
 0x1bf   :  { %8855 = vst [vmem:[#allocation3_spill] sm:$0xff] %v7445_v0  ;;  %v2095_v37 = vpop.f32.mrb[87].mxu1 }
 0x1c1   :  { %5825 = vmatmul.mubr.msk.bf16.gmra.mrb[160].mxu1 %vm1791_vm0, %v6415_v25  ;;  %v6426_v25 = vld [vmem:[%s8851_s0 + $0x5fc] ss:$28 sps:$4 sm:$0xff]  }
 0x1c2   :  { %2691 = vmatmul.mubr.bf16.gmra.mrb[96].mxu0 %v6414_v30  ;;  %5828 = vmatprep.mubr.msk.bf16.mxu1 %vm1791_vm0, %v6418_v31  ;;  %v6430_v31 = vld [vmem:[%s8851_s0 + $0x520] ss:$28 sps:$4 sm:$0xff]  }
 0x1c3   :  { %2698 = vmatprep.mubr.bf16.mxu0 %v6416_v39 }
 0x1c4   :  { %v7458_v42 = vpop.f32.mrb[88].mxu1 }
 0x1c5   :  { %8856 = vst [vmem:[#allocation4_spill] sm:$0xff] %v7458_v42  ;;  %v2100_v44 = vpop.f32.mrb[89].mxu1 }
 0x1c6   :  { %v7463_v52 = vpop.f32.mrb[90].mxu1  ;;  %v6429_v44 = vld [vmem:[%s8851_s0 + $0x5f8] ss:$28 sps:$4 sm:$0xff]  }
 0x1c7   :  { %8857 = vst [vmem:[#allocation5_spill] sm:$0xff] %v7463_v52  ;;  %v2103_v62 = vpop.f32.mrb[91].mxu1 }
 0x1c9   :  { %5829 = vmatmul.mubr.msk.bf16.gmra.mrb[164].mxu1 %vm1791_vm0, %v6420_v47  ;;  %v6433_v47 = vld [vmem:[%s8851_s0 + $0x558] ss:$28 sps:$4 sm:$0xff]  }
 0x1ca   :  { %2699 = vmatmul.mubr.bf16.gmra.mrb[100].mxu0 %v6419_v58  ;;  %5832 = vmatprep.mubr.msk.bf16.mxu1 %vm1791_vm0, %v6423_v59  ;;  %v6431_v59 = vld [vmem:[%s8851_s0 + $0x634] ss:$28 sps:$4 sm:$0xff]  }
 0x1cb   :  { %2706 = vmatprep.mubr.bf16.mxu0 %v6421_v63 }
 0x1cc   :  { %v7476_v6 = vpop.f32.mrb[92].mxu1 }
 0x1cd   :  { %8858 = vst [vmem:[#allocation6_spill] sm:$0xff] %v7476_v6  ;;  %v2108_v9 = vpop.f32.mrb[93].mxu1 }
 0x1ce   :  { %v7481_v14 = vpop.f32.mrb[94].mxu1  ;;  %v6435_v9 = vld [vmem:[%s8851_s0 + $0x590] ss:$28 sps:$4 sm:$0xff]  }
 0x1cf   :  { %8859 = vst [vmem:[#allocation7_spill] sm:$0xff] %v7481_v14  ;;  %v2111_v55 = vpop.f32.mrb[95].mxu1 }
 0x1d1   :  { %5833 = vmatmul.mubr.msk.bf16.gmra.mrb[168].mxu1 %vm1791_vm0, %v6425_v12 }
 0x1d2   :  { %2707 = vmatmul.mubr.bf16.gmra.mrb[104].mxu0 %v6424_v17  ;;  %5836 = vmatprep.mubr.msk.bf16.mxu1 %vm1791_vm0, %v6428_v20  ;;  %v6438_v20 = vld [vmem:[%s8851_s0 + $0x5c8] ss:$28 sps:$4 sm:$0xff]  }
 0x1d3   :  { %2714 = vmatprep.mubr.bf16.mxu0 %v6426_v25  ;;  %v6436_v25 = vld [vmem:[%s8851_s0 + $0x66c] ss:$28 sps:$4 sm:$0xff]  }
 0x1d5   :  { %v2500_v30 = vpop.f32.mrb[0].mxu0 }
 0x1d6   :  { %v7498_v37 = vadd.f32 %v2500_v30, %v7083_v32  ;;  %v2502_v39 = vpop.f32.mrb[1].mxu0 }
 0x1d7   :  { %v2503_v58 = vpop.f32.mrb[2].mxu0  ;;  %v6440_v39 = vld [vmem:[%s8851_s0 + $0x600] ss:$28 sps:$4 sm:$0xff]  }
 0x1d8   :  { %v7510_v62 = vadd.f32 %v2503_v58, %v7088_v35  ;;  %v2505_v63 = vpop.f32.mrb[3].mxu0  ;;  %v6434_v35 = vld [vmem:[%s8851_s0 + $0x630] ss:$28 sps:$4 sm:$0xff]   ;;  %v6443_v58 = vld [vmem:[%s8851_s0 + $0x638] ss:$28 sps:$4 sm:$0xff]  }
 0x1d9   :  { %5837 = vmatmul.mubr.msk.bf16.gmra.mrb[172].mxu1 %vm1791_vm0, %v6430_v31  ;;  %v6441_v63 = vld [vmem:[%s8851_s0 + $0x6a4] ss:$28 sps:$4 sm:$0xff]  }
 0x1da   :  { %2715 = vmatmul.mubr.bf16.gmra.mrb[108].mxu0 %v6429_v44  ;;  %5840 = vmatprep.mubr.msk.bf16.mxu1 %vm1791_vm0, %v6433_v47 }
 0x1db   :  { %2722 = vmatprep.mubr.bf16.mxu0 %v6431_v59 }
 0x1dd   :  { %v2508_v32 = vpop.f32.mrb[4].mxu0 }
 0x1de   :  { %v7518_v12 = vadd.f32 %v2508_v32, %v7099_v40  ;;  %v2510_v17 = vpop.f32.mrb[5].mxu0 }
 0x1df   :  { %v2511_v55 = vpop.f32.mrb[6].mxu0  ;;  %v6445_v17 = vld [vmem:[%s8851_s0 + $0x670] ss:$28 sps:$4 sm:$0xff]  }
 0x1e0   :  { %v7530_v30 = vadd.f32 %v2511_v55, %v7104_v43  ;;  %v2513_v31 = vpop.f32.mrb[7].mxu0  ;;  %v6439_v43 = vld [vmem:[%s8851_s0 + $0x668] ss:$28 sps:$4 sm:$0xff]  }
 0x1e1   :  { %5841 = vmatmul.mubr.msk.bf16.gmra.mrb[176].mxu1 %vm1791_vm0, %v6435_v9  ;;  %v6448_v55 = vld [vmem:[%s8851_s0 + $0x6a8] ss:$28 sps:$4 sm:$0xff]   ;;  %v6446_v31 = vld [vmem:[%s8851_s0 + $0x6dc] ss:$28 sps:$4 sm:$0xff]  }
 0x1e2   :  { %2723 = vmatmul.mubr.bf16.gmra.mrb[112].mxu0 %v6434_v35  ;;  %5844 = vmatprep.mubr.msk.bf16.mxu1 %vm1791_vm0, %v6438_v20 }
 0x1e3   :  { %2730 = vmatprep.mubr.bf16.mxu0 %v6436_v25 }
 0x1e5   :  { %v2516_v40 = vpop.f32.mrb[8].mxu0 }
 0x1e6   :  { %v7538_v44 = vadd.f32 %v2516_v40, %v7115_v48  ;;  %v2518_v47 = vpop.f32.mrb[9].mxu0 }
 0x1e7   :  { %v2519_v59 = vpop.f32.mrb[10].mxu0  ;;  %v6450_v47 = vld [vmem:[%s8851_s0 + $0x6e0] ss:$28 sps:$4 sm:$0xff]  }
 0x1e8   :  { %v7550_v32 = vadd.f32 %v2519_v59, %v7120_v51  ;;  %v2521_v9 = vpop.f32.mrb[11].mxu0  ;;  %v6444_v51 = vld [vmem:[%s8851_s0 + $0x6a0] ss:$28 sps:$4 sm:$0xff]  }
 0x1e9   :  { %5845 = vmatmul.mubr.msk.bf16.gmra.mrb[180].mxu1 %vm1791_vm0, %v6440_v39 }
 0x1ea   :  { %2731 = vmatmul.mubr.bf16.gmra.mrb[116].mxu0 %v6439_v43  ;;  %5848 = vmatprep.mubr.msk.bf16.mxu1 %vm1791_vm0, %v6443_v58 }
 0x1eb   :  { %2738 = vmatprep.mubr.bf16.mxu0 %v6441_v63 }
 0x1ed   :  { %v2524_v48 = vpop.f32.mrb[12].mxu0 }
 0x1ee   :  { %v7558_v35 = vadd.f32 %v2524_v48, %v7131_v57  ;;  %v2526_v20 = vpop.f32.mrb[13].mxu0 }
 0x1ef   :  { %v2527_v25 = vpop.f32.mrb[14].mxu0 }
 0x1f0   :  { %v7570_v40 = vadd.f32 %v2527_v25, %v7136_v60  ;;  %v2529_v39 = vpop.f32.mrb[15].mxu0  ;;  %v6449_v60 = vld [vmem:[%s8851_s0 + $0x6d8] ss:$28 sps:$4 sm:$0xff]  }
 0x1f1   :  { %5849 = vmatmul.mubr.msk.bf16.gmra.mrb[184].mxu1 %vm1791_vm0, %v6445_v17 }
 0x1f2   :  { %2739 = vmatmul.mubr.bf16.gmra.mrb[120].mxu0 %v6444_v51  ;;  %5852 = vmatprep.mubr.msk.bf16.mxu1 %vm1791_vm0, %v6448_v55 }
 0x1f3   :  { %2746 = vmatprep.mubr.bf16.mxu0 %v6446_v31 }
 0x1f5   :  { %v2532_v57 = vpop.f32.mrb[16].mxu0 }
 0x1f6   :  { %v7578_v43 = vadd.f32 %v2532_v57, %v7147_v2  ;;  %v2534_v58 = vpop.f32.mrb[17].mxu0 }
 0x1f7   :  { %v2535_v59 = vpop.f32.mrb[18].mxu0 }
 0x1f8   :  { %v7584_v63 = vadd.f32 %v2535_v59, %v7152_v5  ;;  %v2537_v9 = vpop.f32.mrb[19].mxu0 }
 0x1f9   :  { %5853 = vmatmul.mubr.msk.bf16.gmra.mrb[188].mxu1 %vm1791_vm0, %v6450_v47 }
 0x1fa   :  { %2747 = vmatmul.mubr.bf16.gmra.mrb[124].mxu0 %v6449_v60 }
 0x1fd   :  { %v2540_v48 = vpop.f32.mrb[20].mxu0 }
 0x1fe   :  { %v7588_v17 = vadd.f32 %v2540_v48, %v7163_v10  ;;  %v2542_v20 = vpop.f32.mrb[21].mxu0 }
 0x1ff   :  { %v2543_v2 = vpop.f32.mrb[22].mxu0 }
 0x200   :  { %v7591_v51 = vadd.f32 %v2543_v2, %v7168_v13  ;;  %v2545_v55 = vpop.f32.mrb[23].mxu0 }
 0x205   :  { %v2548_v25 = vpop.f32.mrb[24].mxu0 }
 0x206   :  { %v7594_v31 = vadd.f32 %v2548_v25, %v7183_v19  ;;  %v2550_v5 = vpop.f32.mrb[25].mxu0 }
 0x207   :  { %v2551_v39 = vpop.f32.mrb[26].mxu0 }
 0x208   :  { %v7597_v57 = vadd.f32 %v2551_v39, %v7188_v22  ;;  %v2553_v47 = vpop.f32.mrb[27].mxu0 }
 0x20d   :  { %v2556_v58 = vpop.f32.mrb[28].mxu0 }
 0x20e   :  { %v7600_v10 = vadd.f32 %v2556_v58, %v7199_v26  ;;  %v2558_v60 = vpop.f32.mrb[29].mxu0 }
 0x20f   :  { %v2559_v59 = vpop.f32.mrb[30].mxu0 }
 0x210   :  { %v7603_v13 = vadd.f32 %v2559_v59, %v7204_v28  ;;  %v2561_v9 = vpop.f32.mrb[31].mxu0 }
 0x214   :  { %v7605_v48 = vpop.f32.mrb[96].mxu1 }
 0x215   :  { %8860 = vst [vmem:[#allocation8_spill] sm:$0xff] %v7605_v48  ;;  %v2564_v19 = vpop.f32.mrb[32].mxu0  ;;  %v2405_v20 = vpop.f32.mrb[97].mxu1 }
 0x216   :  { %v7608_v2 = vadd.f32 %v2564_v19, %v7215_v34  ;;  %v2566_v22 = vpop.f32.mrb[33].mxu0  ;;  %v7610_v55 = vpop.f32.mrb[98].mxu1 }
 0x217   :  { %8861 = vst [vmem:[#allocation9_spill] sm:$0xff] %v7610_v55  ;;  %v2567_v25 = vpop.f32.mrb[34].mxu0  ;;  %v2408_v5 = vpop.f32.mrb[99].mxu1 }
 0x218   :  { %v7613_v26 = vadd.f32 %v2567_v25, %v7220_v38  ;;  %v2569_v39 = vpop.f32.mrb[35].mxu0 }
 0x21a   :  { %8862 = vst [vmem:[#allocation10_spill] sm:$0xff] %v7613_v26 }
 0x21c   :  { %v7615_v47 = vpop.f32.mrb[100].mxu1 }
 0x21d   :  { %8863 = vst [vmem:[#allocation11_spill] sm:$0xff] %v7615_v47  ;;  %v2572_v28 = vpop.f32.mrb[36].mxu0  ;;  %v2413_v58 = vpop.f32.mrb[101].mxu1 }
 0x21e   :  { %v7618_v60 = vadd.f32 %v2572_v28, %v7231_v45  ;;  %v2574_v59 = vpop.f32.mrb[37].mxu0  ;;  %v7620_v9 = vpop.f32.mrb[102].mxu1 }
 0x21f   :  { %8864 = vst [vmem:[#allocation12_spill] sm:$0xff] %v7620_v9  ;;  %v2575_v34 = vpop.f32.mrb[38].mxu0  ;;  %v2416_v19 = vpop.f32.mrb[103].mxu1 }
 0x220   :  { %v7623_v20 = vadd.f32 %v2575_v34, %v7236_v49  ;;  %v2577_v22 = vpop.f32.mrb[39].mxu0 }
 0x222   :  { %8865 = vst [vmem:[#allocation13_spill] sm:$0xff] %v7623_v20 }
 0x224   :  { %v7625_v5 = vpop.f32.mrb[104].mxu1 }
 0x225   :  { %8866 = vst [vmem:[#allocation14_spill] sm:$0xff] %v7625_v5  ;;  %v2580_v38 = vpop.f32.mrb[40].mxu0  ;;  %v2421_v25 = vpop.f32.mrb[105].mxu1 }
 0x226   :  { %v7628_v39 = vadd.f32 %v2580_v38, %v7247_v56  ;;  %v2582_v58 = vpop.f32.mrb[41].mxu0  ;;  %v7630_v47 = vpop.f32.mrb[106].mxu1 }
 0x227   :  { %8868 = vst [vmem:[#allocation16_spill] sm:$0xff] %v7630_v47  ;;  %v2583_v45 = vpop.f32.mrb[42].mxu0  ;;  %v2424_v28 = vpop.f32.mrb[107].mxu1 }
 0x228   :  { %8867 = vst [vmem:[#allocation15_spill] sm:$0xff] %v7628_v39  ;;  %v7633_v59 = vadd.f32 %v2583_v45, %v7252_v61  ;;  %v2585_v19 = vpop.f32.mrb[43].mxu0 }
 0x22a   :  { %8869 = vst [vmem:[#allocation17_spill] sm:$0xff] %v7633_v59 }
 0x22c   :  { %v7635_v9 = vpop.f32.mrb[108].mxu1 }
 0x22d   :  { %8870 = vst [vmem:[#allocation18_spill] sm:$0xff] %v7635_v9  ;;  %v2588_v49 = vpop.f32.mrb[44].mxu0  ;;  %v2429_v34 = vpop.f32.mrb[109].mxu1 }
 0x22e   :  { %v7638_v22 = vadd.f32 %v2588_v49, %v7263_v4  ;;  %v2590_v25 = vpop.f32.mrb[45].mxu0  ;;  %v7640_v5 = vpop.f32.mrb[110].mxu1 }
 0x22f   :  { %8872 = vst [vmem:[#allocation20_spill] sm:$0xff] %v7640_v5  ;;  %v2591_v56 = vpop.f32.mrb[46].mxu0  ;;  %v2432_v38 = vpop.f32.mrb[111].mxu1 }
 0x230   :  { %8871 = vst [vmem:[#allocation19_spill] sm:$0xff] %v7638_v22  ;;  %v7643_v58 = vadd.f32 %v2591_v56, %v7268_v8  ;;  %v2593_v28 = vpop.f32.mrb[47].mxu0 }
 0x232   :  { %8873 = vst [vmem:[#allocation21_spill] sm:$0xff] %v7643_v58 }
 0x234   :  { %v7645_v47 = vpop.f32.mrb[112].mxu1 }
 0x235   :  { %8874 = vst [vmem:[#allocation22_spill] sm:$0xff] %v7645_v47  ;;  %v2596_v61 = vpop.f32.mrb[48].mxu0  ;;  %v2437_v45 = vpop.f32.mrb[113].mxu1 }
 0x236   :  { %v7648_v19 = vadd.f32 %v2596_v61, %v7279_v15  ;;  %v2598_v34 = vpop.f32.mrb[49].mxu0  ;;  %v7650_v9 = vpop.f32.mrb[114].mxu1 }
 0x237   :  { %8876 = vst [vmem:[#allocation24_spill] sm:$0xff] %v7650_v9  ;;  %v2599_v4 = vpop.f32.mrb[50].mxu0  ;;  %v2440_v49 = vpop.f32.mrb[115].mxu1 }
 0x238   :  { %8875 = vst [vmem:[#allocation23_spill] sm:$0xff] %v7648_v19  ;;  %v7653_v25 = vadd.f32 %v2599_v4, %v7284_v18  ;;  %v2601_v38 = vpop.f32.mrb[51].mxu0 }
 0x23a   :  { %8877 = vst [vmem:[#allocation25_spill] sm:$0xff] %v7653_v25 }
 0x23c   :  { %v7655_v5 = vpop.f32.mrb[116].mxu1 }
 0x23d   :  { %8878 = vst [vmem:[#allocation26_spill] sm:$0xff] %v7655_v5  ;;  %v2604_v8 = vpop.f32.mrb[52].mxu0  ;;  %v2445_v56 = vpop.f32.mrb[117].mxu1 }
 0x23e   :  { %v7658_v28 = vadd.f32 %v2604_v8, %v7296_v24  ;;  %v2606_v45 = vpop.f32.mrb[53].mxu0  ;;  %v7660_v47 = vpop.f32.mrb[118].mxu1 }
 0x23f   :  { %8880 = vst [vmem:[#allocation28_spill] sm:$0xff] %v7660_v47  ;;  %v2607_v15 = vpop.f32.mrb[54].mxu0  ;;  %v2448_v61 = vpop.f32.mrb[119].mxu1 }
 0x240   :  { %8879 = vst [vmem:[#allocation27_spill] sm:$0xff] %v7658_v28  ;;  %v7663_v34 = vadd.f32 %v2607_v15, %v7301_v27  ;;  %v2609_v49 = vpop.f32.mrb[55].mxu0 }
 0x242   :  { %8881 = vst [vmem:[#allocation29_spill] sm:$0xff] %v7663_v34 }
 0x244   :  { %v7665_v9 = vpop.f32.mrb[120].mxu1 }
 0x245   :  { %8882 = vst [vmem:[#allocation30_spill] sm:$0xff] %v7665_v9  ;;  %v2612_v18 = vpop.f32.mrb[56].mxu0  ;;  %v2453_v4 = vpop.f32.mrb[121].mxu1 }
 0x246   :  { %v7668_v38 = vadd.f32 %v2612_v18, %v7314_v36  ;;  %v2614_v56 = vpop.f32.mrb[57].mxu0  ;;  %v7670_v5 = vpop.f32.mrb[122].mxu1 }
 0x247   :  { %8884 = vst [vmem:[#allocation32_spill] sm:$0xff] %v7670_v5  ;;  %v2615_v24 = vpop.f32.mrb[58].mxu0  ;;  %v2456_v8 = vpop.f32.mrb[123].mxu1 }
 0x248   :  { %8883 = vst [vmem:[#allocation31_spill] sm:$0xff] %v7668_v38  ;;  %v7673_v45 = vadd.f32 %v2615_v24, %v7319_v41  ;;  %v2617_v61 = vpop.f32.mrb[59].mxu0 }
 0x24a   :  { %8885 = vst [vmem:[#allocation33_spill] sm:$0xff] %v7673_v45 }
 0x24c   :  { %v7675_v47 = vpop.f32.mrb[124].mxu1 }
 0x24d   :  { %8886 = vst [vmem:[#allocation34_spill] sm:$0xff] %v7675_v47  ;;  %v2620_v27 = vpop.f32.mrb[60].mxu0  ;;  %v2461_v15 = vpop.f32.mrb[125].mxu1 }
 0x24e   :  { %v7678_v49 = vadd.f32 %v2620_v27, %v7332_v50  ;;  %v2622_v4 = vpop.f32.mrb[61].mxu0  ;;  %v7680_v9 = vpop.f32.mrb[126].mxu1 }
 0x24f   :  { %8888 = vst [vmem:[#allocation36_spill] sm:$0xff] %v7680_v9  ;;  %v2623_v36 = vpop.f32.mrb[62].mxu0  ;;  %v2464_v18 = vpop.f32.mrb[127].mxu1 }
 0x250   :  { %8887 = vst [vmem:[#allocation35_spill] sm:$0xff] %v7678_v49  ;;  %v7683_v56 = vadd.f32 %v2623_v36, %v7337_v54  ;;  %v2625_v8 = vpop.f32.mrb[63].mxu0 }
 0x252   :  { %8889 = vst [vmem:[#allocation37_spill] sm:$0xff] %v7683_v56 }
 0x254   :  { %v5794_v5 = vpop.f32.mrb[128].mxu1 }
 0x255   :  { %v2628_v41 = vpop.f32.mrb[64].mxu0  ;;  %v2798_v24 = vadd.f32 %v7518_v12, %v5794_v5  ;;  %v2789_v61 = vpop.f32.mrb[129].mxu1 }
 0x256   :  { %v7687_v15 = vadd.f32 %v2628_v41, %v7350_v1  ;;  %v2630_v50 = vpop.f32.mrb[65].mxu0  ;;  %v2790_v27 = vadd.f32 %v7498_v37, %v2789_v61  ;;  %v5795_v4 = vpop.f32.mrb[130].mxu1 }
 0x257   :  { %v3110_v9 = vcombine.high %v2798_v24, %v2798_v24  ;;  %v3265_v18 = vsel %vm3236_vm1, %v2798_v24, -inf  ;;  %v2631_v47 = vpop.f32.mrb[66].mxu0  ;;  %v2801_v54 = vadd.f32 %v7530_v30, %v5795_v4  ;;  %v2792_v36 = vpop.f32.mrb[131].mxu1 }
 0x258   :  { %8890 = vst [vmem:[#allocation38_spill] sm:$0xff] %v7687_v15  ;;  %v3266_v8 = vrot.slane %v3265_v18, 4  ;;  %v3108_v55 = vcombine.high %v2790_v27, %v2790_v27  ;;  %v3237_v48 = vsel %vm3236_vm1, %v2790_v27, -inf  ;;  %v7694_v12 = vadd.f32 %v2631_v47, %v7355_v7  ;;  %v2633_v1 = vpop.f32.mrb[67].mxu0 }
 0x259   :  { %v3272_v5 = vsel %vm3236_vm1, %v3110_v9, -inf  ;;  %v3238_v41 = vrot.slane %v3237_v48, 4  ;;  %v3111_v37 = vcombine.high %v2801_v54, %v2801_v54  ;;  %v3279_v61 = vsel %vm3236_vm1, %v2801_v54, -inf }
 0x25a   :  { %8891 = vst [vmem:[#allocation39_spill] sm:$0xff] %v7694_v12  ;;  %v3267_v50 = vmax.f32 %v3265_v18, %v3266_v8  ;;  %v3273_v24 = vrot.slane %v3272_v5, 4  ;;  %v3244_v15 = vsel %vm3236_vm1, %v3108_v55, -inf  ;;  %v3280_v30 = vrot.slane %v3279_v61, 4 }
 0x25b   :  { %v3239_v4 = vmax.f32 %v3237_v48, %v3238_v41  ;;  %v3245_v45 = vrot.slane %v3244_v15, 4  ;;  %v3286_v56 = vsel %vm3236_vm1, %v3111_v37, -inf  ;;  %v2793_v27 = vadd.f32 %v7510_v62, %v2792_v36 }
 0x25c   :  { %v3268_v7 = vrot.slane %v3267_v50, 2  ;;  %v3274_v47 = vmax.f32 %v3272_v5, %v3273_v24  ;;  %v3281_v1 = vmax.f32 %v3279_v61, %v3280_v30  ;;  %v3287_v12 = vrot.slane %v3286_v56, 4  ;;  %v7701_v9 = vpop.f32.mrb[132].mxu1 }
 0x25d   :  { %v3240_v14 = vrot.slane %v3239_v4, 2  ;;  %v3246_v38 = vmax.f32 %v3244_v15, %v3245_v45  ;;  %v3109_v54 = vcombine.high %v2793_v27, %v2793_v27  ;;  %v3251_v18 = vsel %vm3236_vm1, %v2793_v27, -inf  ;;  %v7704_v8 = vpop.f32.mrb[68].mxu0  ;;  %v7706_v55 = vpop.f32.mrb[133].mxu1 }
 0x25e   :  { %v3269_v48 = vmax.f32 %v3267_v50, %v3268_v7  ;;  %v3275_v41 = vrot.slane %v3274_v47, 2  ;;  %v3282_v37 = vrot.slane %v3281_v1, 2  ;;  %v3288_v49 = vmax.f32 %v3286_v56, %v3287_v12  ;;  %v2638_v62 = vpop.f32.mrb[69].mxu0  ;;  %v7708_v36 = vpop.f32.mrb[134].mxu1  ;;  %v7718_v56 = vld [vmem:[%s8852_s2] ss:$0 sm:$0xff] }
 0x25f   :  { %v3241_v5 = vmax.f32 %v3239_v4, %v3240_v14  ;;  %v3247_v61 = vrot.slane %v3246_v38, 2  ;;  %v3252_v24 = vrot.slane %v3251_v18, 4  ;;  %v3258_v30 = vsel %vm3236_vm1, %v3109_v54, -inf  ;;  %v7711_v45 = vpop.f32.mrb[70].mxu0  ;;  %v7713_v15 = vpop.f32.mrb[135].mxu1 }
 0x260   :  { %v3270_v27 = vrot.slane %v3269_v48, 1  ;;  %v3276_v6 = vmax.f32 %v3274_v47, %v3275_v41  ;;  %v3283_v25 = vmax.f32 %v3281_v1, %v3282_v37  ;;  %v3289_v34 = vrot.slane %v3288_v49, 2  ;;  %v2641_v50 = vpop.f32.mrb[71].mxu0 }
 0x261   :  { %v3242_v12 = vrot.slane %v3241_v5, 1  ;;  %v3248_v14 = vmax.f32 %v3246_v38, %v3247_v61  ;;  %v3253_v4 = vmax.f32 %v3251_v18, %v3252_v24  ;;  %v3259_v7 = vrot.slane %v3258_v30, 4 }
 0x262   :  { %v3271_v62 = vmax.f32 %v3269_v48, %v3270_v27  ;;  %v3277_v54 = vrot.slane %v3276_v6, 1  ;;  %v3284_v52 = vrot.slane %v3283_v25, 1  ;;  %v3290_v19 = vmax.f32 %v3288_v49, %v3289_v34 }
 0x263   :  { %v3243_v28 = vmax.f32 %v3241_v5, %v3242_v12  ;;  %v3249_v42 = vrot.slane %v3248_v14, 1  ;;  %v3254_v59 = vrot.slane %v3253_v4, 2  ;;  %v3260_v47 = vmax.f32 %v3258_v30, %v3259_v7 }
 0x264   :  { %v3278_v1 = vmax.f32 %v3276_v6, %v3277_v54  ;;  %v4144_v41 = vadd.f32 %v7718_v56, %v3271_v62  ;;  %v3285_v37 = vmax.f32 %v3283_v25, %v3284_v52  ;;  %v3291_v50 = vrot.slane %v3290_v19, 1  ;;  %v7721_v58 = vpop.f32.mrb[136].mxu1 }
 0x265   :  { %v3250_v0 = vmax.f32 %v3248_v14, %v3249_v42  ;;  %v4140_v38 = vadd.f32 %v7718_v56, %v3243_v28  ;;  %v3255_v18 = vmax.f32 %v3253_v4, %v3254_v59  ;;  %v3261_v48 = vrot.slane %v3260_v47, 2  ;;  %v7724_v61 = vpop.f32.mrb[72].mxu0  ;;  %v7726_v34 = vpop.f32.mrb[137].mxu1 }
 0x266   :  { %v4145_v49 = vadd.f32 %v7718_v56, %v3278_v1  ;;  %v5630_v5 = vpack.c.bf16 %v4144_v41, %v4144_v41  ;;  %v3292_v6 = vmax.f32 %v3290_v19, %v3291_v50  ;;  %v4146_v24 = vadd.f32 %v7718_v56, %v3285_v37  ;;  %v2646_v30 = vpop.f32.mrb[73].mxu0  ;;  %v7730_v52 = vpop.f32.mrb[138].mxu1 }
 0x267   :  { %v4141_v25 = vadd.f32 %v7718_v56, %v3250_v0  ;;  %v5626_v42 = vpack.c.bf16 %v4140_v38, %v4140_v38  ;;  %v3256_v27 = vrot.slane %v3255_v18, 1  ;;  %v3262_v28 = vmax.f32 %v3260_v47, %v3261_v48  ;;  %v7733_v59 = vpop.f32.mrb[74].mxu0  ;;  %v7735_v12 = vpop.f32.mrb[139].mxu1 }
 0x268   :  { %v5631_v14 = vpack.c.bf16 %v4145_v49, %v4145_v49  ;;  %v7737_v4 = vunpack.c.l.b16 %v5630_v5  ;;  %v4147_v7 = vadd.f32 %v7718_v56, %v3292_v6  ;;  %v5632_v19 = vpack.c.bf16 %v4146_v24, %v4146_v24  ;;  %v2649_v62 = vpop.f32.mrb[75].mxu0 }
 0x269   :  { %v5627_v54 = vpack.c.bf16 %v4141_v25, %v4141_v25  ;;  %v4780_v1 = vunpack.c.l.b16 %v5626_v42  ;;  %v3257_v41 = vmax.f32 %v3255_v18, %v3256_v27  ;;  %v3263_v37 = vrot.slane %v3262_v28, 1 }
 0x26a   :  { %v7740_v0 = vunpack.c.l.b16 %v5631_v14  ;;  %v5633_v50 = vpack.c.bf16 %v4147_v7, %v4147_v7  ;;  %v7743_v38 = vunpack.c.l.b16 %v5632_v19  ;;  %v7748_v6 = vadd.f32 %v7704_v8, %v7368_v16 }
 0x26b   :  { %v4781_v48 = vunpack.c.l.b16 %v5627_v54  ;;  %v3264_v49 = vmax.f32 %v3262_v28, %v3263_v37  ;;  %v4142_v5 = vadd.f32 %v7718_v56, %v3257_v41  ;;  %v2814_v25 = vadd.f32 %v7558_v35, %v7701_v9 }
 0x26c   :  { %8892 = vst [vmem:[#allocation40_spill] sm:$0xff] %v7748_v6  ;;  %v4920_v18 = vrot.slane %v7740_v0, 3  ;;  %v7751_v24 = vunpack.c.l.b16 %v5633_v50  ;;  %v7756_v42 = vpop.f32.mrb[140].mxu1  ;;  %v2806_v16 = vadd.f32 %v7538_v44, %v7706_v55  ;;  %v7769_v9 = vadd.f32 %v7711_v45, %v7373_v21 }
 0x26d   :  { %v4908_v27 = vrot.slane %v4781_v48, 7  ;;  %v4143_v28 = vadd.f32 %v7718_v56, %v3264_v49  ;;  %v5628_v14 = vpack.c.bf16 %v4142_v5, %v4142_v5  ;;  %v7761_v8 = vpop.f32.mrb[76].mxu0  ;;  %v7763_v7 = vpop.f32.mrb[141].mxu1  ;;  %v3114_v62 = vcombine.high %v2814_v25, %v2814_v25 }
 0x26e   :  { %v4926_v19 = vrot.slane %v7751_v24, 1  ;;  %v3321_v35 = vsel %vm3236_vm1, %v2814_v25, -inf  ;;  %8893 = vst [vmem:[#allocation41_spill] sm:$0xff] %v7769_v9  ;;  %v2654_v54 = vpop.f32.mrb[77].mxu0  ;;  %v7771_v41 = vpop.f32.mrb[142].mxu1  ;;  %v3112_v5 = vcombine.high %v2806_v16, %v2806_v16  ;;  %v3293_v24 = vsel %vm3236_vm1, %v2806_v16, -inf }
 0x26f   :  { %v4910_v37 = vsel %vm4909_vm2, %v4908_v27, %v4780_v1  ;;  %v5629_v44 = vpack.c.bf16 %v4143_v28, %v4143_v28  ;;  %v4782_v55 = vunpack.c.l.b16 %v5628_v14  ;;  %v3322_v0 = vrot.slane %v3321_v35, 4  ;;  %v7774_v50 = vpop.f32.mrb[78].mxu0  ;;  %v7776_v48 = vpop.f32.mrb[143].mxu1 }
 0x270   :  { %v3328_v49 = vsel %vm3236_vm1, %v3114_v62, -inf  ;;  %v2817_v21 = vadd.f32 %v7570_v40, %v7708_v36  ;;  %v2657_v45 = vpop.f32.mrb[79].mxu0  ;;  %v3294_v27 = vrot.slane %v3293_v24, 4  ;;  %v3300_v28 = vsel %vm3236_vm1, %v3112_v5, -inf }
 0x271   :  { %v4783_v25 = vunpack.c.l.b16 %v5629_v44  ;;  %v4911_v54 = vrot.slane %v4782_v55, 6  ;;  %v3323_v30 = vmax.f32 %v3321_v35, %v3322_v0  ;;  %v3329_v1 = vrot.slane %v3328_v49, 4 }
 0x272   :  { %v3115_v14 = vcombine.high %v2817_v21, %v2817_v21  ;;  %v3335_v47 = vsel %vm3236_vm1, %v2817_v21, -inf  ;;  %v3295_v16 = vmax.f32 %v3293_v24, %v3294_v27  ;;  %v3301_v22 = vrot.slane %v3300_v28, 4 }
 0x273   :  { %v4913_v9 = vsel %vm4912_vm3, %v4911_v54, %v4910_v37  ;;  %v4914_v62 = vrot.slane %v4783_v25, 5  ;;  %v3324_v6 = vrot.slane %v3323_v30, 2  ;;  %v3330_v39 = vmax.f32 %v3328_v49, %v3329_v1 }
 0x274   :  { %v3336_v23 = vrot.slane %v3335_v47, 4  ;;  %v3342_v40 = vsel %vm3236_vm1, %v3115_v14, -inf  ;;  %v7786_v36 = vpop.f32.mrb[144].mxu1  ;;  %v8894_v37 = vrot.slane %v7737_v4, 4  ;;  %v3296_v24 = vrot.slane %v3295_v16, 2 }
 0x275   :  { %v4916_v35 = vsel %vm4915_vm4, %v4914_v62, %v4913_v9  ;;  %v3325_v44 = vmax.f32 %v3323_v30, %v3324_v6  ;;  %v3331_v55 = vrot.slane %v3330_v39, 2  ;;  %v3343_v0 = vrot.slane %v3342_v40, 4  ;;  %v7789_v5 = vpop.f32.mrb[80].mxu0  ;;  %v7791_v21 = vpop.f32.mrb[145].mxu1 }
 0x276   :  { %v4919_v49 = vsel %vm4918_vm5, %v8894_v37, %v4916_v35  ;;  %v3302_v45 = vmax.f32 %v3300_v28, %v3301_v22  ;;  %v3337_v25 = vmax.f32 %v3335_v47, %v3336_v23  ;;  %v2662_v54 = vpop.f32.mrb[81].mxu0  ;;  %v7796_v1 = vpop.f32.mrb[146].mxu1  ;;  %v8896_v26 = vrot.slane %v7743_v38, 2 }
 0x277   :  { %v4922_v27 = vsel %vm4921_vm6, %v4920_v18, %v4919_v49  ;;  %v3326_v9 = vrot.slane %v3325_v44, 1  ;;  %v3332_v6 = vmax.f32 %v3330_v39, %v3331_v55  ;;  %v3344_v30 = vmax.f32 %v3342_v40, %v3343_v0  ;;  %v7799_v14 = vpop.f32.mrb[82].mxu0  ;;  %v7801_v62 = vpop.f32.mrb[147].mxu1 }
 0x278   :  { %8895 = vst [vmem:[#allocation42_spill] sm:$0xff] %v7801_v62  ;;  %v4925_v4 = vsel %vm4924_vm7, %v8896_v26, %v4922_v27  ;;  %v3297_v35 = vmax.f32 %v3295_v16, %v3296_v24  ;;  %v3303_v37 = vrot.slane %v3302_v45, 2  ;;  %v3338_v22 = vrot.slane %v3337_v25, 2  ;;  %v2665_v23 = vpop.f32.mrb[83].mxu0 }
 0x279   :  { %v4928_v47 = vsel %vm4927_vm8, %v4926_v19, %v4925_v4  ;;  %v3327_v28 = vmax.f32 %v3325_v44, %v3326_v9  ;;  %v3333_v54 = vrot.slane %v3332_v6, 1  ;;  %v3345_v18 = vrot.slane %v3344_v30, 2 }
 0x27a   :  { %v5139_v49 = vpack.c.b16 %v4928_v47, %v4928_v47  ;;  %v3298_v39 = vrot.slane %v3297_v35, 1  ;;  %v3304_v40 = vmax.f32 %v3302_v45, %v3303_v37  ;;  %v3339_v55 = vmax.f32 %v3337_v25, %v3338_v22 }
 0x27b   :  { %v3334_v0 = vmax.f32 %v3332_v6, %v3333_v54  ;;  %v4152_v62 = vadd.f32 %v7718_v56, %v3327_v28  ;;  %v3346_v20 = vmax.f32 %v3344_v30, %v3345_v18  ;;  %v2809_v26 = vadd.f32 %v7550_v32, %v7713_v15 }
 0x27c   :  { %5171 = vst.msk [vmem:[%s8853_s3] sm:$0xf] %vm3236_vm1, %v5139_v49  ;;  %v3299_v38 = vmax.f32 %v3297_v35, %v3298_v39  ;;  %v3305_v19 = vrot.slane %v3304_v40, 1  ;;  %v3340_v16 = vrot.slane %v3339_v55, 1  ;;  %v7816_v44 = vadd.f32 %v7724_v61, %v7386_v29  ;;  %v7818_v24 = vpop.f32.mrb[148].mxu1 }
 0x27d   :  { %v4153_v45 = vadd.f32 %v7718_v56, %v3334_v0  ;;  %v5638_v25 = vpack.c.bf16 %v4152_v62, %v4152_v62  ;;  %v3347_v27 = vrot.slane %v3346_v20, 1  ;;  %v3113_v9 = vcombine.high %v2809_v26, %v2809_v26  ;;  %v7821_v32 = vpop.f32.mrb[84].mxu0  ;;  %v7823_v15 = vpop.f32.mrb[149].mxu1 }
 0x27e   :  { %8897 = vst [vmem:[#allocation43_spill] sm:$0xff] %v7816_v44  ;;  %v3306_v6 = vmax.f32 %v3304_v40, %v3305_v19  ;;  %v4148_v30 = vadd.f32 %v7718_v56, %v3299_v38  ;;  %v3341_v4 = vmax.f32 %v3339_v55, %v3340_v16  ;;  %v3307_v35 = vsel %vm3236_vm1, %v2809_v26, -inf  ;;  %v2670_v37 = vpop.f32.mrb[85].mxu0  ;;  %v7827_v29 = vpop.f32.mrb[150].mxu1 }
 0x27f   :  { %v5639_v61 = vpack.c.bf16 %v4153_v45, %v4153_v45  ;;  %v3348_v22 = vmax.f32 %v3346_v20, %v3347_v27  ;;  %v3308_v23 = vrot.slane %v3307_v35, 4  ;;  %v7829_v47 = vpop.f32.mrb[86].mxu0  ;;  %v7831_v62 = vpop.f32.mrb[151].mxu1  ;;  %v7833_v28 = vunpack.c.l.b16 %v5638_v25 }
 0x280   :  { %v4149_v54 = vadd.f32 %v7718_v56, %v3306_v6  ;;  %v4154_v18 = vadd.f32 %v7718_v56, %v3341_v4  ;;  %v3314_v49 = vsel %vm3236_vm1, %v3113_v9, -inf  ;;  %v2673_v39 = vpop.f32.mrb[87].mxu0  ;;  %v5634_v40 = vpack.c.bf16 %v4148_v30, %v4148_v30 }
 0x281   :  { %v3309_v55 = vmax.f32 %v3307_v35, %v3308_v23  ;;  %v7839_v26 = vadd.f32 %v7718_v56, %v3348_v22  ;;  %v3315_v20 = vrot.slane %v3314_v49, 4  ;;  %v7841_v38 = vunpack.c.l.b16 %v5639_v61 }
 0x282   :  { %v5635_v0 = vpack.c.bf16 %v4149_v54, %v4149_v54  ;;  %v5640_v19 = vpack.c.bf16 %v4154_v18, %v4154_v18  ;;  %v2830_v45 = vadd.f32 %v7588_v17, %v7721_v58  ;;  %v2822_v9 = vadd.f32 %v7578_v43, %v7726_v34 }
 0x283   :  { %v3310_v16 = vrot.slane %v3309_v55, 2  ;;  %v3316_v6 = vmax.f32 %v3314_v49, %v3315_v20  ;;  %v4788_v4 = vunpack.c.l.b16 %v5634_v40 }
 0x284   :  { %v4789_v27 = vunpack.c.l.b16 %v5635_v0  ;;  %v7848_v30 = vpop.f32.mrb[152].mxu1  ;;  %v3118_v37 = vcombine.high %v2830_v45, %v2830_v45  ;;  %v3377_v61 = vsel %vm3236_vm1, %v2830_v45, -inf  ;;  %v7859_v43 = vunpack.c.l.b16 %v5640_v19 }
 0x285   :  { %8898 = vst [vmem:[#allocation44_spill] sm:$0xff] %v7848_v30  ;;  %v3311_v35 = vmax.f32 %v3309_v55, %v3310_v16  ;;  %v7851_v22 = vpop.f32.mrb[88].mxu0  ;;  %v7853_v23 = vpop.f32.mrb[153].mxu1  ;;  %v3317_v58 = vrot.slane %v3316_v6, 2  ;;  %v3378_v18 = vrot.slane %v3377_v61, 4  ;;  %v3116_v55 = vcombine.high %v2822_v9, %v2822_v9 }
 0x286   :  { %8899 = vst [vmem:[#allocation45_spill] sm:$0xff] %v7851_v22  ;;  %8900 = vst [vmem:[#allocation46_spill] sm:$0xff] %v7853_v23  ;;  %v4929_v54 = vrot.slane %v4789_v27, 7  ;;  %v2678_v49 = vpop.f32.mrb[89].mxu0  ;;  %v7857_v39 = vpop.f32.mrb[154].mxu1  ;;  %v3384_v40 = vsel %vm3236_vm1, %v3118_v37, -inf }
 0x287   :  { %8901 = vst [vmem:[#allocation47_spill] sm:$0xff] %v7857_v39  ;;  %v3312_v34 = vrot.slane %v3311_v35, 1  ;;  %v7862_v0 = vpop.f32.mrb[90].mxu0  ;;  %v7864_v20 = vpop.f32.mrb[155].mxu1  ;;  %v3318_v45 = vmax.f32 %v3316_v6, %v3317_v58  ;;  %v3379_v27 = vmax.f32 %v3377_v61, %v3378_v18  ;;  %v3385_v25 = vrot.slane %v3384_v40, 4 }
 0x288   :  { %8902 = vst [vmem:[#allocation48_spill] sm:$0xff] %v7862_v0  ;;  %8903 = vst [vmem:[#allocation49_spill] sm:$0xff] %v7864_v20  ;;  %v4930_v16 = vsel %vm4909_vm2, %v4929_v54, %v4788_v4  ;;  %v2681_v17 = vpop.f32.mrb[91].mxu0  ;;  %v3349_v49 = vsel %vm3236_vm1, %v2822_v9, -inf  ;;  %v3356_v19 = vsel %vm3236_vm1, %v3116_v55, -inf  ;;  %v7871_v39 = vadd.f32 %v7733_v59, %v7391_v33 }
 0x289   :  { %v3313_v44 = vmax.f32 %v3311_v35, %v3312_v34  ;;  %v3319_v37 = vrot.slane %v3318_v45, 1  ;;  %v3380_v23 = vrot.slane %v3379_v27, 2  ;;  %v3386_v0 = vmax.f32 %v3384_v40, %v3385_v25 }
 0x28a   :  { %8904 = vst [vmem:[#allocation50_spill] sm:$0xff] %v7871_v39  ;;  %v3350_v30 = vrot.slane %v3349_v49, 4  ;;  %v3357_v4 = vrot.slane %v3356_v19, 4  ;;  %v2833_v6 = vadd.f32 %v7591_v51, %v7730_v52  ;;  %v7878_v35 = vadd.f32 %v7584_v63, %v7735_v12 }
 0x28b   :  { %v4150_v20 = vadd.f32 %v7718_v56, %v3313_v44  ;;  %v3320_v9 = vmax.f32 %v3318_v45, %v3319_v37  ;;  %v3381_v61 = vmax.f32 %v3379_v27, %v3380_v23  ;;  %v3387_v54 = vrot.slane %v3386_v0, 2 }
 0x28c   :  { %v3351_v17 = vmax.f32 %v3349_v49, %v3350_v30  ;;  %v7880_v33 = vpop.f32.mrb[156].mxu1  ;;  %v3358_v58 = vmax.f32 %v3356_v19, %v3357_v4  ;;  %v3119_v25 = vcombine.high %v2833_v6, %v2833_v6  ;;  %v3391_v18 = vsel %vm3236_vm1, %v2833_v6, -inf }
 0x28d   :  { %8905 = vst [vmem:[#allocation51_spill] sm:$0xff] %v7880_v33  ;;  %v5636_v59 = vpack.c.bf16 %v4150_v20, %v4150_v20  ;;  %v7883_v44 = vpop.f32.mrb[92].mxu0  ;;  %v7885_v34 = vpop.f32.mrb[157].mxu1  ;;  %v4151_v51 = vadd.f32 %v7718_v56, %v3320_v9  ;;  %v3382_v52 = vrot.slane %v3381_v61, 1  ;;  %v3388_v63 = vmax.f32 %v3386_v0, %v3387_v54 }
 0x28e   :  { %8906 = vst [vmem:[#allocation52_spill] sm:$0xff] %v7883_v44  ;;  %8907 = vst [vmem:[#allocation53_spill] sm:$0xff] %v7885_v34  ;;  %v3352_v12 = vrot.slane %v3351_v17, 2  ;;  %v2686_v40 = vpop.f32.mrb[93].mxu0  ;;  %v7888_v23 = vpop.f32.mrb[158].mxu1  ;;  %v3359_v55 = vrot.slane %v3358_v58, 2 }
 0x28f   :  { %8908 = vst [vmem:[#allocation54_spill] sm:$0xff] %v7888_v23  ;;  %v4790_v30 = vunpack.c.l.b16 %v5636_v59  ;;  %v3392_v45 = vrot.slane %v3391_v18, 4  ;;  %v3398_v20 = vsel %vm3236_vm1, %v3119_v25, -inf  ;;  %v7891_v27 = vpop.f32.mrb[94].mxu0  ;;  %v7893_v49 = vpop.f32.mrb[159].mxu1  ;;  %v5637_v19 = vpack.c.bf16 %v4151_v51, %v4151_v51 }
 0x290   :  { %8909 = vst [vmem:[#allocation55_spill] sm:$0xff] %v7891_v27  ;;  %v3383_v37 = vmax.f32 %v3381_v61, %v3382_v52  ;;  %v3389_v4 = vrot.slane %v3388_v63, 1  ;;  %v3353_v6 = vmax.f32 %v3351_v17, %v3352_v12  ;;  %v2689_v9 = vpop.f32.mrb[95].mxu0  ;;  %v3360_v0 = vmax.f32 %v3358_v58, %v3359_v55 }
 0x291   :  { %v4931_v39 = vrot.slane %v4790_v30, 6  ;;  %v3393_v54 = vmax.f32 %v3391_v18, %v3392_v45  ;;  %v3399_v40 = vrot.slane %v3398_v20, 4  ;;  %v4791_v34 = vunpack.c.l.b16 %v5637_v19 }
 0x292   :  { %v3390_v23 = vmax.f32 %v3388_v63, %v3389_v4  ;;  %v4160_v59 = vadd.f32 %v7718_v56, %v3383_v37  ;;  %v3354_v33 = vrot.slane %v3353_v6, 1  ;;  %v3361_v44 = vrot.slane %v3360_v0, 1 }
 0x293   :  { %v4932_v25 = vsel %vm4912_vm3, %v4931_v39, %v4930_v16  ;;  %v3394_v27 = vrot.slane %v3393_v54, 2  ;;  %v3400_v22 = vmax.f32 %v3398_v20, %v3399_v40  ;;  %v8910_v61 = vpack.c.bf16 %v7839_v26, %v7839_v26 }
 0x294   :  { %v4933_v17 = vrot.slane %v4791_v34, 5  ;;  %v4161_v52 = vadd.f32 %v7718_v56, %v3390_v23  ;;  %v3355_v58 = vmax.f32 %v3353_v6, %v3354_v33  ;;  %v4937_v18 = vrot.slane %v7841_v38, 3 }
 0x295   :  { %v4795_v51 = vunpack.c.l.b16 %v8910_v61  ;;  %v3362_v12 = vmax.f32 %v3360_v0, %v3361_v44  ;;  %v3395_v63 = vmax.f32 %v3393_v54, %v3394_v27  ;;  %v3401_v30 = vrot.slane %v3400_v22, 2 }
 0x296   :  { %v4939_v55 = vrot.slane %v7859_v43, 2  ;;  %v4934_v39 = vsel %vm4915_vm4, %v4933_v17, %v4932_v25  ;;  %v5646_v16 = vpack.c.bf16 %v4160_v59, %v4160_v59  ;;  %v4156_v45 = vadd.f32 %v7718_v56, %v3355_v58 }
 0x297   :  { %v8911_v20 = vrot.slane %v7833_v28, 4  ;;  %v4157_v34 = vadd.f32 %v7718_v56, %v3362_v12  ;;  %v3396_v23 = vrot.slane %v3395_v63, 1  ;;  %v3402_v33 = vmax.f32 %v3400_v22, %v3401_v30 }
 0x298   :  { %v4941_v19 = vrot.slane %v4795_v51, 1  ;;  %v5647_v44 = vpack.c.bf16 %v4161_v52, %v4161_v52  ;;  %v3117_v43 = vcombine.high %v7878_v35, %v7878_v35  ;;  %v7914_v9 = vunpack.c.l.b16 %v5646_v16 }
 0x299   :  { %v4936_v26 = vsel %vm4918_vm5, %v8911_v20, %v4934_v39  ;;  %v5643_v37 = vpack.c.bf16 %v4157_v34, %v4157_v34  ;;  %v3397_v4 = vmax.f32 %v3395_v63, %v3396_v23  ;;  %v3403_v6 = vrot.slane %v3402_v33, 1 }
 0x29a   :  { %v4938_v38 = vsel %vm4921_vm6, %v4937_v18, %v4936_v26  ;;  %v5642_v0 = vpack.c.bf16 %v4156_v45, %v4156_v45  ;;  %v3363_v22 = vsel %vm3236_vm1, %v7878_v35, -inf  ;;  %v3370_v51 = vsel %vm3236_vm1, %v3117_v43, -inf }
 0x29b   :  { %v4940_v27 = vsel %vm4924_vm7, %v4939_v55, %v4938_v38  ;;  %v4797_v40 = vunpack.c.l.b16 %v5643_v37  ;;  %v3404_v59 = vmax.f32 %v3402_v33, %v3403_v6  ;;  %v4162_v25 = vadd.f32 %v7718_v56, %v3397_v4  ;;  %v7945_v38 = vpop.f32.mrb[96].mxu0 }
 0x29c   :  { %v4942_v28 = vsel %vm4927_vm8, %v4941_v19, %v4940_v27  ;;  %v3364_v61 = vrot.slane %v3363_v22, 4  ;;  %v7922_v17 = vadd.f32 %v7761_v8, %v7404_v46  ;;  %v2846_v52 = vadd.f32 %v7600_v10, %v7756_v42  ;;  %v2694_v37 = vpop.f32.mrb[97].mxu0 }
 0x29d   :  { %v5140_v54 = vpack.c.b16 %v4942_v28, %v4942_v28  ;;  %v7930_v35 = vunpack.c.l.b16 %v5647_v44  ;;  %v4943_v58 = vrot.slane %v4797_v40, 7  ;;  %v7933_v18 = vadd.f32 %v7718_v56, %v3404_v59 }
 0x29e   :  { %v3371_v12 = vrot.slane %v3370_v51, 4  ;;  %v3365_v63 = vmax.f32 %v3363_v22, %v3364_v61  ;;  %v3122_v30 = vcombine.high %v2846_v52, %v2846_v52  ;;  %v3433_v46 = vsel %vm3236_vm1, %v2846_v52, -inf }
 0x29f   :  { %5172 = vst.msk [vmem:[%s8853_s3 + $0x4] sm:$0xf] %vm3236_vm1, %v5140_v54  ;;  %v2838_v8 = vadd.f32 %v7594_v31, %v7763_v7  ;;  %v4949_v10 = vrot.slane %v7914_v9, 4  ;;  %v4796_v42 = vunpack.c.l.b16 %v5642_v0  ;;  %v5648_v55 = vpack.c.bf16 %v4162_v25, %v4162_v25  ;;  %v7947_v31 = vpop.f32.mrb[160].mxu1  ;;  %v7955_v54 = vpop.f32.mrb[98].mxu0 }
 0x2a0   :  { %v3372_v39 = vmax.f32 %v3370_v51, %v3371_v12  ;;  %v3366_v16 = vrot.slane %v3365_v63, 2  ;;  %v3434_v45 = vrot.slane %v3433_v46, 4  ;;  %v3440_v20 = vsel %vm3236_vm1, %v3122_v30, -inf  ;;  %v7951_v4 = vpop.f32.mrb[161].mxu1  ;;  %v2697_v52 = vpop.f32.mrb[99].mxu0 }
 0x2a1   :  { %v3120_v26 = vcombine.high %v2838_v8, %v2838_v8  ;;  %v7941_v34 = vsel %vm4909_vm2, %v4943_v58, %v4796_v42  ;;  %v5649_v23 = vpack.c.bf16 %v7933_v18, %v7933_v18  ;;  %v3441_v19 = vrot.slane %v3440_v20, 4  ;;  %v7957_v40 = vpop.f32.mrb[162].mxu1 }
 0x2a2   :  { %v3373_v33 = vrot.slane %v3372_v39, 2  ;;  %v3367_v7 = vmax.f32 %v3365_v63, %v3366_v16  ;;  %v3435_v44 = vmax.f32 %v3433_v46, %v3434_v45  ;;  %v3405_v43 = vsel %vm3236_vm1, %v2838_v8, -inf }
 0x2a3   :  { %v3412_v27 = vsel %vm3236_vm1, %v3120_v26, -inf  ;;  %v7953_v6 = vunpack.c.l.b16 %v5648_v55  ;;  %v3442_v0 = vmax.f32 %v3440_v20, %v3441_v19  ;;  %v3406_v22 = vrot.slane %v3405_v43, 4 }
 0x2a4   :  { %v3374_v28 = vmax.f32 %v3372_v39, %v3373_v33  ;;  %v3368_v59 = vrot.slane %v3367_v7, 1  ;;  %v3436_v25 = vrot.slane %v3435_v44, 2  ;;  %v3413_v61 = vrot.slane %v3412_v27, 4 }
 0x2a5   :  { %v7961_v51 = vadd.f32 %v7774_v50, %v7409_v53  ;;  %v3443_v18 = vrot.slane %v3442_v0, 2  ;;  %v3407_v12 = vmax.f32 %v3405_v43, %v3406_v22  ;;  %v2849_v63 = vadd.f32 %v7603_v13, %v7771_v41  ;;  %v7969_v53 = vpop.f32.mrb[163].mxu1 }
 0x2a6   :  { %v3375_v58 = vrot.slane %v3374_v28, 1  ;;  %v3369_v30 = vmax.f32 %v3367_v7, %v3368_v59  ;;  %v3437_v46 = vmax.f32 %v3435_v44, %v3436_v25  ;;  %v3414_v8 = vmax.f32 %v3412_v27, %v3413_v61 }
 0x2a7   :  { %v7967_v42 = vadd.f32 %v7597_v57, %v7776_v48  ;;  %v3444_v39 = vmax.f32 %v3442_v0, %v3443_v18  ;;  %v3408_v16 = vrot.slane %v3407_v12, 2  ;;  %v3123_v45 = vcombine.high %v2849_v63, %v2849_v63 }
 0x2a8   :  { %v3376_v55 = vmax.f32 %v3374_v28, %v3375_v58  ;;  %v4158_v50 = vadd.f32 %v7718_v56, %v3369_v30  ;;  %v3438_v20 = vrot.slane %v3437_v46, 1  ;;  %v3415_v26 = vrot.slane %v3414_v8, 2 }
 0x2a9   :  { %v3447_v33 = vsel %vm3236_vm1, %v2849_v63, -inf  ;;  %v3445_v41 = vrot.slane %v3444_v39, 1  ;;  %v3409_v19 = vmax.f32 %v3407_v12, %v3408_v16  ;;  %v3454_v43 = vsel %vm3236_vm1, %v3123_v45, -inf }
 0x2aa   :  { %v4159_v13 = vadd.f32 %v7718_v56, %v3376_v55  ;;  %v3448_v7 = vrot.slane %v3447_v33, 4  ;;  %v5644_v44 = vpack.c.bf16 %v4158_v50, %v4158_v50  ;;  %v3439_v57 = vmax.f32 %v3437_v46, %v3438_v20 }
 0x2ab   :  { %v3416_v48 = vmax.f32 %v3414_v8, %v3415_v26  ;;  %v3446_v37 = vmax.f32 %v3444_v39, %v3445_v41  ;;  %v3410_v28 = vrot.slane %v3409_v19, 1  ;;  %v3455_v61 = vrot.slane %v3454_v43, 4 }
 0x2ac   :  { %v5645_v27 = vpack.c.bf16 %v4159_v13, %v4159_v13  ;;  %v3449_v0 = vmax.f32 %v3447_v33, %v3448_v7  ;;  %v4798_v22 = vunpack.c.l.b16 %v5644_v44  ;;  %v4168_v59 = vadd.f32 %v7718_v56, %v3439_v57 }
 0x2ad   :  { %v3417_v25 = vrot.slane %v3416_v48, 1  ;;  %v4803_v52 = vunpack.c.l.b16 %v5649_v23  ;;  %v3411_v18 = vmax.f32 %v3409_v19, %v3410_v28  ;;  %v4169_v30 = vadd.f32 %v7718_v56, %v3446_v37 }
 0x2ae   :  { %v4799_v58 = vunpack.c.l.b16 %v5645_v27  ;;  %v3450_v63 = vrot.slane %v3449_v0, 2  ;;  %v4945_v12 = vrot.slane %v4798_v22, 6  ;;  %v3456_v8 = vmax.f32 %v3454_v43, %v3455_v61 }
 0x2af   :  { %v3418_v46 = vmax.f32 %v3416_v48, %v3417_v25  ;;  %v5654_v16 = vpack.c.bf16 %v4168_v59, %v4168_v59  ;;  %v4164_v39 = vadd.f32 %v7718_v56, %v3411_v18  ;;  %v4951_v50 = vrot.slane %v7930_v35, 3 }
 0x2b0   :  { %v4947_v55 = vrot.slane %v4799_v58, 5  ;;  %v3451_v45 = vmax.f32 %v3449_v0, %v3450_v63  ;;  %v4946_v20 = vsel %vm4912_vm3, %v4945_v12, %v7941_v34  ;;  %v3457_v26 = vrot.slane %v3456_v8, 2 }
 0x2b1   :  { %v4165_v23 = vadd.f32 %v7718_v56, %v3418_v46  ;;  %v4953_v33 = vrot.slane %v7953_v6, 2  ;;  %v4955_v13 = vrot.slane %v4803_v52, 1  ;;  %v5655_v44 = vpack.c.bf16 %v4169_v30, %v4169_v30 }
 0x2b2   :  { %v4948_v41 = vsel %vm4915_vm4, %v4947_v55, %v4946_v20  ;;  %v3452_v19 = vrot.slane %v3451_v45, 1  ;;  %v3458_v48 = vmax.f32 %v3456_v8, %v3457_v26  ;;  %v7988_v43 = vunpack.c.l.b16 %v5654_v16 }
 0x2b3   :  { %v4950_v7 = vsel %vm4918_vm5, %v4949_v10, %v4948_v41  ;;  %v5651_v57 = vpack.c.bf16 %v4165_v23, %v4165_v23  ;;  %v5650_v34 = vpack.c.bf16 %v4164_v39, %v4164_v39  ;;  %v3121_v0 = vcombine.high %v7967_v42, %v7967_v42 }
 0x2b4   :  { %v4952_v35 = vsel %vm4921_vm6, %v4951_v50, %v4950_v7  ;;  %v3453_v27 = vmax.f32 %v3451_v45, %v3452_v19  ;;  %v3459_v28 = vrot.slane %v3458_v48, 1  ;;  %v3419_v22 = vsel %vm3236_vm1, %v7967_v42, -inf  ;;  %v8017_v45 = vpop.f32.mrb[100].mxu0 }
 0x2b5   :  { %v4954_v37 = vsel %vm4924_vm7, %v4953_v33, %v4952_v35  ;;  %v4805_v6 = vunpack.c.l.b16 %v5651_v57  ;;  %v7999_v59 = vadd.f32 %v7789_v5, %v7422_v3  ;;  %v8001_v61 = vunpack.c.l.b16 %v5655_v44  ;;  %v8025_v33 = vpop.f32.mrb[164].mxu1 }
 0x2b6   :  { %v4956_v9 = vsel %vm4927_vm8, %v4955_v13, %v4954_v37  ;;  %v4170_v10 = vadd.f32 %v7718_v56, %v3453_v27  ;;  %v3460_v52 = vmax.f32 %v3458_v48, %v3459_v28  ;;  %v3420_v58 = vrot.slane %v3419_v22, 4  ;;  %v2702_v13 = vpop.f32.mrb[101].mxu0  ;;  %v8029_v57 = vpop.f32.mrb[165].mxu1 }
 0x2b7   :  { %v5141_v25 = vpack.c.b16 %v4956_v9, %v4956_v9  ;;  %v4957_v18 = vrot.slane %v4805_v6, 7  ;;  %v3426_v63 = vsel %vm3236_vm1, %v3121_v0, -inf  ;;  %v2862_v12 = vadd.f32 %v7618_v60, %v7786_v36 }
 0x2b8   :  { %v2854_v30 = vadd.f32 %v7608_v2, %v7791_v21  ;;  %v4963_v3 = vrot.slane %v7988_v43, 4  ;;  %v5656_v5 = vpack.c.bf16 %v4170_v10, %v4170_v10  ;;  %v3421_v42 = vmax.f32 %v3419_v22, %v3420_v58  ;;  %v8039_v58 = vpop.f32.mrb[102].mxu0 }
 0x2b9   :  { %5173 = vst.msk [vmem:[%s8853_s3 + $0x8] sm:$0xf] %vm3236_vm1, %v5141_v25  ;;  %v3427_v46 = vrot.slane %v3426_v63, 4  ;;  %v4804_v8 = vunpack.c.l.b16 %v5650_v34  ;;  %v3126_v55 = vcombine.high %v2862_v12, %v2862_v12  ;;  %v3489_v16 = vsel %vm3236_vm1, %v2862_v12, -inf  ;;  %v8912_v25 = vld [vmem:[#allocation13_spill] sm:$0xff] }
 0x2ba   :  { %v3124_v39 = vcombine.high %v2854_v30, %v2854_v30  ;;  %v8015_v60 = vadd.f32 %v7718_v56, %v3460_v52  ;;  %v3422_v36 = vrot.slane %v3421_v42, 2  ;;  %v3490_v21 = vrot.slane %v3489_v16, 4 }
 0x2bb   :  { %v3428_v2 = vmax.f32 %v3426_v63, %v3427_v46  ;;  %v8020_v50 = vsel %vm4909_vm2, %v4957_v18, %v4804_v8  ;;  %v3496_v20 = vsel %vm3236_vm1, %v3126_v55, -inf  ;;  %v3461_v23 = vsel %vm3236_vm1, %v2854_v30, -inf  ;;  %v8041_v18 = vpop.f32.mrb[166].mxu1  ;;  %v8914_v30 = vld [vmem:[#allocation10_spill] sm:$0xff]  ;;  %v2705_v46 = vpop.f32.mrb[103].mxu0 }
 0x2bc   :  { %v3468_v26 = vsel %vm3236_vm1, %v3124_v39, -inf  ;;  %v8027_v41 = vunpack.c.l.b16 %v5656_v5  ;;  %v3423_v19 = vmax.f32 %v3421_v42, %v3422_v36  ;;  %v3491_v44 = vmax.f32 %v3489_v16, %v3490_v21  ;;  %v8047_v42 = vpop.f32.mrb[167].mxu1 }
 0x2bd   :  { %v3429_v7 = vrot.slane %v3428_v2, 2  ;;  %v3497_v48 = vrot.slane %v3496_v20, 4  ;;  %v3462_v35 = vrot.slane %v3461_v23, 4  ;;  %v3469_v34 = vrot.slane %v3468_v26, 4 }
 0x2be   :  { %v8033_v27 = vadd.f32 %v7799_v14, %v7427_v11  ;;  %v5657_v37 = vpack.c.bf16 %v8015_v60, %v8015_v60  ;;  %v3424_v6 = vrot.slane %v3423_v19, 1  ;;  %v3492_v0 = vrot.slane %v3491_v44, 2  ;;  %v8913_v14 = vld [vmem:[#allocation42_spill] sm:$0xff] }
 0x2bf   :  { %v3430_v28 = vmax.f32 %v3428_v2, %v3429_v7  ;;  %v3498_v9 = vmax.f32 %v3496_v20, %v3497_v48  ;;  %v3463_v10 = vmax.f32 %v3461_v23, %v3462_v35  ;;  %v3470_v22 = vmax.f32 %v3468_v26, %v3469_v34 }
 0x2c0   :  { %v2865_v52 = vadd.f32 %v8912_v25, %v7796_v1  ;;  %v3425_v63 = vmax.f32 %v3423_v19, %v3424_v6  ;;  %v3493_v11 = vmax.f32 %v3491_v44, %v3492_v0  ;;  %v8045_v5 = vadd.f32 %v8914_v30, %v8913_v14 }
 0x2c1   :  { %v3431_v12 = vrot.slane %v3430_v28, 1  ;;  %v3499_v8 = vrot.slane %v3498_v9, 2  ;;  %v3464_v55 = vrot.slane %v3463_v10, 2  ;;  %v3471_v16 = vrot.slane %v3470_v22, 2 }
 0x2c2   :  { %v3127_v39 = vcombine.high %v2865_v52, %v2865_v52  ;;  %v4166_v1 = vadd.f32 %v7718_v56, %v3425_v63  ;;  %v3494_v36 = vrot.slane %v3493_v11, 1  ;;  %v3503_v2 = vsel %vm3236_vm1, %v2865_v52, -inf }
 0x2c3   :  { %v3432_v60 = vmax.f32 %v3430_v28, %v3431_v12  ;;  %v3500_v21 = vmax.f32 %v3498_v9, %v3499_v8  ;;  %v3465_v20 = vmax.f32 %v3463_v10, %v3464_v55  ;;  %v3472_v23 = vmax.f32 %v3470_v22, %v3471_v16 }
 0x2c4   :  { %v3504_v26 = vrot.slane %v3503_v2, 4  ;;  %v5652_v19 = vpack.c.bf16 %v4166_v1, %v4166_v1  ;;  %v3495_v7 = vmax.f32 %v3493_v11, %v3494_v36  ;;  %v3510_v44 = vsel %vm3236_vm1, %v3127_v39, -inf }
 0x2c5   :  { %v4167_v13 = vadd.f32 %v7718_v56, %v3432_v60  ;;  %v3501_v48 = vrot.slane %v3500_v21, 1  ;;  %v3466_v35 = vrot.slane %v3465_v20, 1  ;;  %v3473_v34 = vrot.slane %v3472_v23, 1 }
 0x2c6   :  { %v3505_v6 = vmax.f32 %v3503_v2, %v3504_v26  ;;  %v4806_v0 = vunpack.c.l.b16 %v5652_v19  ;;  %v4176_v25 = vadd.f32 %v7718_v56, %v3495_v7  ;;  %v3511_v63 = vrot.slane %v3510_v44, 4 }
 0x2c7   :  { %v5653_v28 = vpack.c.bf16 %v4167_v13, %v4167_v13  ;;  %v3502_v52 = vmax.f32 %v3500_v21, %v3501_v48  ;;  %v3467_v9 = vmax.f32 %v3465_v20, %v3466_v35  ;;  %v3474_v10 = vmax.f32 %v3472_v23, %v3473_v34 }
 0x2c8   :  { %v3506_v22 = vrot.slane %v3505_v6, 2  ;;  %v4959_v14 = vrot.slane %v4806_v0, 6  ;;  %v5662_v30 = vpack.c.bf16 %v4176_v25, %v4176_v25  ;;  %v3512_v46 = vmax.f32 %v3510_v44, %v3511_v63 }
 0x2c9   :  { %v4807_v12 = vunpack.c.l.b16 %v5653_v28  ;;  %v4811_v11 = vunpack.c.l.b16 %v5657_v37  ;;  %v4177_v8 = vadd.f32 %v7718_v56, %v3502_v52  ;;  %v4173_v55 = vadd.f32 %v7718_v56, %v3474_v10 }
 0x2ca   :  { %v3507_v16 = vmax.f32 %v3505_v6, %v3506_v22  ;;  %v4965_v39 = vrot.slane %v8001_v61, 3  ;;  %v4960_v60 = vsel %vm4912_vm3, %v4959_v14, %v8020_v50  ;;  %v3513_v36 = vrot.slane %v3512_v46, 2  ;;  %v8915_v14 = vld [vmem:[#allocation2_spill] sm:$0xff] }
 0x2cb   :  { %v4961_v1 = vrot.slane %v4807_v12, 5  ;;  %v4967_v2 = vrot.slane %v8027_v41, 2  ;;  %v4172_v21 = vadd.f32 %v7718_v56, %v3467_v9  ;;  %v5659_v20 = vpack.c.bf16 %v4173_v55, %v4173_v55 }
 0x2cc   :  { %v3508_v23 = vrot.slane %v3507_v16, 1  ;;  %v8062_v26 = vunpack.c.l.b16 %v5662_v30  ;;  %v3514_v13 = vmax.f32 %v3512_v46, %v3513_v36  ;;  %v3125_v19 = vcombine.high %v8045_v5, %v8045_v5  ;;  %v8916_v46 = vld [vmem:[#allocation19_spill] sm:$0xff] }
 0x2cd   :  { %v4962_v37 = vsel %vm4915_vm4, %v4961_v1, %v4960_v60  ;;  %v4969_v61 = vrot.slane %v4811_v11, 1  ;;  %v5663_v7 = vpack.c.bf16 %v4177_v8, %v4177_v8  ;;  %v4813_v44 = vunpack.c.l.b16 %v5659_v20  ;;  %v8918_v60 = vld [vmem:[#allocation3_spill] sm:$0xff] }
 0x2ce   :  { %v4964_v50 = vsel %vm4918_vm5, %v4963_v3, %v4962_v37  ;;  %v3509_v56 = vmax.f32 %v3507_v16, %v3508_v23  ;;  %v3515_v48 = vrot.slane %v3514_v13, 1  ;;  %v3475_v35 = vsel %vm3236_vm1, %v8045_v5, -inf  ;;  %v8081_v5 = vld [vmem:[%s8852_s2] ss:$0 sm:$0xff]  ;;  %v8917_v16 = vld [vmem:[#allocation15_spill] sm:$0xff] }
 0x2cf   :  { %v4966_v41 = vsel %vm4921_vm6, %v4965_v39, %v4964_v50  ;;  %v5658_v6 = vpack.c.bf16 %v4172_v21, %v4172_v21  ;;  %v3476_v28 = vrot.slane %v3475_v35, 4  ;;  %v3482_v3 = vsel %vm3236_vm1, %v3125_v19, -inf  ;;  %v8113_v50 = vpop.f32.mrb[168].mxu1 }
 0x2d0   :  { %v4968_v34 = vsel %vm4924_vm7, %v4967_v2, %v4966_v41  ;;  %v3516_v43 = vmax.f32 %v3514_v13, %v3515_v48  ;;  %v8076_v52 = vunpack.c.l.b16 %v5663_v7  ;;  %v3483_v10 = vrot.slane %v3482_v3, 4 }
 0x2d1   :  { %v4970_v0 = vsel %vm4927_vm8, %v4969_v61, %v4968_v34  ;;  %v3477_v9 = vmax.f32 %v3475_v35, %v3476_v28  ;;  %v4971_v22 = vrot.slane %v4813_v44, 7  ;;  %v8084_v12 = vadd.f32 %v8081_v5, %v3509_v56  ;;  %v8111_v61 = vpop.f32.mrb[104].mxu0  ;;  %v8115_v35 = vpop.f32.mrb[169].mxu1 }
 0x2d2   :  { %v5142_v63 = vpack.c.b16 %v4970_v0, %v4970_v0  ;;  %v8088_v30 = vadd.f32 %v7821_v32, %v8915_v14  ;;  %v2878_v11 = vadd.f32 %v8916_v46, %v7818_v24  ;;  %v3484_v55 = vmax.f32 %v3482_v3, %v3483_v10  ;;  %v2710_v48 = vpop.f32.mrb[105].mxu0  ;;  %v8919_v0 = vld [vmem:[#allocation21_spill] sm:$0xff] }
 0x2d3   :  { %v3478_v8 = vrot.slane %v3477_v9, 2  ;;  %v2870_v39 = vadd.f32 %v8917_v16, %v7823_v15  ;;  %v8100_v1 = vadd.f32 %v7829_v47, %v8918_v60  ;;  %v4812_v36 = vunpack.c.l.b16 %v5658_v6  ;;  %v8122_v3 = vpop.f32.mrb[106].mxu0 }
 0x2d4   :  { %5174 = vst.msk [vmem:[%s8853_s3 + $0xc] sm:$0xf] %vm3236_vm1, %v5142_v63  ;;  %v8103_v32 = vadd.f32 %v8081_v5, %v3516_v43  ;;  %v3130_v2 = vcombine.high %v2878_v11, %v2878_v11  ;;  %v3545_v24 = vsel %vm3236_vm1, %v2878_v11, -inf  ;;  %v3485_v20 = vrot.slane %v3484_v55, 2  ;;  %v8124_v63 = vpop.f32.mrb[170].mxu1  ;;  %v2713_v14 = vpop.f32.mrb[107].mxu0 }
 0x2d5   :  { %v3479_v21 = vmax.f32 %v3477_v9, %v3478_v8  ;;  %v3546_v23 = vrot.slane %v3545_v24, 4  ;;  %v3128_v37 = vcombine.high %v2870_v39, %v2870_v39  ;;  %v4972_v13 = vsel %vm4909_vm2, %v4971_v22, %v4812_v36 }
 0x2d6   :  { %v5664_v15 = vpack.c.bf16 %v8084_v12, %v8084_v12  ;;  %v3552_v19 = vsel %vm3236_vm1, %v3130_v2, -inf  ;;  %v3517_v47 = vsel %vm3236_vm1, %v2870_v39, -inf  ;;  %v3486_v44 = vmax.f32 %v3484_v55, %v3485_v20 }
 0x2d7   :  { %v3480_v7 = vrot.slane %v3479_v21, 1  ;;  %v3547_v41 = vmax.f32 %v3545_v24, %v3546_v23  ;;  %v3553_v56 = vrot.slane %v3552_v19, 4  ;;  %v5665_v34 = vpack.c.bf16 %v8103_v32, %v8103_v32 }
 0x2d8   :  { %v3518_v6 = vrot.slane %v3517_v47, 4  ;;  %v3524_v28 = vsel %vm3236_vm1, %v3128_v37, -inf  ;;  %v2881_v43 = vadd.f32 %v8919_v0, %v7827_v29  ;;  %v3487_v10 = vrot.slane %v3486_v44, 1  ;;  %v8128_v29 = vpop.f32.mrb[171].mxu1 }
 0x2d9   :  { %v3481_v9 = vmax.f32 %v3479_v21, %v3480_v7  ;;  %v3548_v22 = vrot.slane %v3547_v41, 2  ;;  %v3554_v12 = vmax.f32 %v3552_v19, %v3553_v56  ;;  %v3525_v11 = vrot.slane %v3524_v28, 4 }
 0x2da   :  { %v3519_v46 = vmax.f32 %v3517_v47, %v3518_v6  ;;  %v3131_v8 = vcombine.high %v2881_v43, %v2881_v43  ;;  %v3559_v55 = vsel %vm3236_vm1, %v2881_v43, -inf  ;;  %v3488_v16 = vmax.f32 %v3486_v44, %v3487_v10 }
 0x2db   :  { %v4174_v39 = vadd.f32 %v8081_v5, %v3481_v9  ;;  %v3549_v60 = vmax.f32 %v3547_v41, %v3548_v22  ;;  %v3555_v36 = vrot.slane %v3554_v12, 2  ;;  %v3526_v2 = vmax.f32 %v3524_v28, %v3525_v11 }
 0x2dc   :  { %v3520_v32 = vrot.slane %v3519_v46, 2  ;;  %v3560_v24 = vrot.slane %v3559_v55, 4  ;;  %v3566_v21 = vsel %vm3236_vm1, %v3131_v8, -inf  ;;  %v4175_v20 = vadd.f32 %v8081_v5, %v3488_v16 }
 0x2dd   :  { %v5660_v23 = vpack.c.bf16 %v4174_v39, %v4174_v39  ;;  %v3550_v37 = vrot.slane %v3549_v60, 1  ;;  %v3556_v19 = vmax.f32 %v3554_v12, %v3555_v36  ;;  %v3527_v7 = vrot.slane %v3526_v2, 2 }
 0x2de   :  { %v3521_v47 = vmax.f32 %v3519_v46, %v3520_v32  ;;  %v3561_v56 = vmax.f32 %v3559_v55, %v3560_v24  ;;  %v3567_v44 = vrot.slane %v3566_v21, 4  ;;  %v5661_v48 = vpack.c.bf16 %v4175_v20, %v4175_v20 }
 0x2df   :  { %v4814_v6 = vunpack.c.l.b16 %v5660_v23  ;;  %v3551_v41 = vmax.f32 %v3549_v60, %v3550_v37  ;;  %v3557_v0 = vrot.slane %v3556_v19, 1  ;;  %v3528_v9 = vmax.f32 %v3526_v2, %v3527_v7  ;;  %v8920_v37 = vld [vmem:[#allocation17_spill] sm:$0xff] }
 0x2e0   :  { %v3522_v43 = vrot.slane %v3521_v47, 1  ;;  %v3562_v10 = vrot.slane %v3561_v56, 2  ;;  %v3568_v28 = vmax.f32 %v3566_v21, %v3567_v44  ;;  %v4818_v22 = vunpack.c.l.b16 %v5664_v15 }
 0x2e1   :  { %v4815_v14 = vunpack.c.l.b16 %v5661_v48  ;;  %v4973_v11 = vrot.slane %v4814_v6, 6  ;;  %v3558_v8 = vmax.f32 %v3556_v19, %v3557_v0  ;;  %v3529_v39 = vrot.slane %v3528_v9, 1 }
 0x2e2   :  { %v3523_v16 = vmax.f32 %v3521_v47, %v3522_v43  ;;  %v3563_v25 = vmax.f32 %v3561_v56, %v3562_v10  ;;  %v3569_v12 = vrot.slane %v3568_v28, 2  ;;  %v4819_v46 = vunpack.c.l.b16 %v5665_v34 }
 0x2e3   :  { %v4974_v55 = vsel %vm4912_vm3, %v4973_v11, %v4972_v13  ;;  %v4975_v36 = vrot.slane %v4815_v14, 5  ;;  %v4184_v32 = vadd.f32 %v8081_v5, %v3551_v41  ;;  %v4185_v60 = vadd.f32 %v8081_v5, %v3558_v8 }
 0x2e4   :  { %v3530_v24 = vmax.f32 %v3528_v9, %v3529_v39  ;;  %v3564_v2 = vrot.slane %v3563_v25, 1  ;;  %v3570_v20 = vmax.f32 %v3568_v28, %v3569_v12  ;;  %v4979_v15 = vrot.slane %v8076_v52, 3  ;;  %v8922_v12 = vld [vmem:[#allocation4_spill] sm:$0xff] }
 0x2e5   :  { %v4976_v21 = vsel %vm4915_vm4, %v4975_v36, %v4974_v55  ;;  %v4180_v23 = vadd.f32 %v8081_v5, %v3523_v16  ;;  %v2873_v19 = vadd.f32 %v8920_v37, %v7831_v62  ;;  %v4981_v34 = vrot.slane %v4818_v22, 2  ;;  %v8928_v37 = vld [vmem:[#allocation23_spill] sm:$0xff] }
 0x2e6   :  { %v8921_v13 = vrot.slane %v8062_v26, 4  ;;  %v4181_v7 = vadd.f32 %v8081_v5, %v3530_v24  ;;  %v3565_v56 = vmax.f32 %v3563_v25, %v3564_v2  ;;  %v4983_v44 = vrot.slane %v4819_v46, 1  ;;  %v8923_v46 = vld [vmem:[#allocation45_spill] sm:$0xff]  ;;  %v8925_v24 = vld [vmem:[#allocation44_spill] sm:$0xff]  ;;  %v8926_v2 = vld [vmem:[#allocation27_spill] sm:$0xff] }
 0x2e7   :  { %v5670_v6 = vpack.c.bf16 %v4184_v32, %v4184_v32  ;;  %v3571_v52 = vrot.slane %v3570_v20, 1  ;;  %v5671_v0 = vpack.c.bf16 %v4185_v60, %v4185_v60  ;;  %v5666_v10 = vpack.c.bf16 %v4180_v23, %v4180_v23  ;;  %v8927_v23 = vld [vmem:[#allocation46_spill] sm:$0xff] }
 0x2e8   :  { %v4978_v47 = vsel %vm4918_vm5, %v8921_v13, %v4976_v21  ;;  %v5667_v43 = vpack.c.bf16 %v4181_v7, %v4181_v7  ;;  %v4186_v9 = vadd.f32 %v8081_v5, %v3565_v56  ;;  %v3129_v28 = vcombine.high %v2873_v19, %v2873_v19  ;;  %v8930_v13 = vld [vmem:[#allocation48_spill] sm:$0xff] }
 0x2e9   :  { %v4980_v48 = vsel %vm4921_vm6, %v4979_v15, %v4978_v47  ;;  %v3572_v26 = vmax.f32 %v3570_v20, %v3571_v52  ;;  %v3531_v25 = vsel %vm3236_vm1, %v2873_v19, -inf  ;;  %v8155_v55 = vadd.f32 %v8923_v46, %v8922_v12  ;;  %v8932_v46 = vld [vmem:[#allocation47_spill] sm:$0xff] }
 0x2ea   :  { %v4982_v41 = vsel %vm4924_vm7, %v4981_v34, %v4980_v48  ;;  %v4821_v14 = vunpack.c.l.b16 %v5667_v43  ;;  %v5672_v11 = vpack.c.bf16 %v4186_v9, %v4186_v9  ;;  %v3532_v16 = vrot.slane %v3531_v25, 4  ;;  %v8929_v34 = vld [vmem:[#allocation5_spill] sm:$0xff] }
 0x2eb   :  { %v4984_v62 = vsel %vm4927_vm8, %v4983_v44, %v4982_v41  ;;  %v8150_v8 = vadd.f32 %v8081_v5, %v3572_v26  ;;  %v3538_v39 = vsel %vm3236_vm1, %v3129_v28, -inf  ;;  %8924 = vst [vmem:[#allocation13_spill] sm:$0xff] %v8155_v55  ;;  %v8161_v36 = vunpack.c.l.b16 %v5670_v6 }
 0x2ec   :  { %v5143_v22 = vpack.c.b16 %v4984_v62, %v4984_v62  ;;  %v8163_v32 = vunpack.c.l.b16 %v5671_v0  ;;  %v3539_v60 = vrot.slane %v3538_v39, 4  ;;  %v2894_v20 = vadd.f32 %v8926_v2, %v8925_v24 }
 0x2ed   :  { %v4985_v15 = vrot.slane %v4821_v14, 7  ;;  %v3533_v21 = vmax.f32 %v3531_v25, %v3532_v16  ;;  %v2886_v19 = vadd.f32 %v8928_v37, %v8927_v23  ;;  %v8171_v47 = vadd.f32 %v8930_v13, %v8929_v34  ;;  %v8185_v25 = vpop.f32.mrb[172].mxu1 }
 0x2ee   :  { %5175 = vst.msk [vmem:[%s8853_s3 + $0x10] sm:$0xf] %vm3236_vm1, %v5143_v22  ;;  %v4820_v7 = vunpack.c.l.b16 %v5666_v10  ;;  %v8173_v56 = vunpack.c.l.b16 %v5672_v11  ;;  %v3540_v44 = vmax.f32 %v3538_v39, %v3539_v60  ;;  %v3134_v48 = vcombine.high %v2894_v20, %v2894_v20  ;;  %v8183_v11 = vpop.f32.mrb[108].mxu0  ;;  %v8933_v60 = vld [vmem:[#allocation29_spill] sm:$0xff] }
 0x2ef   :  { %8931 = vst [vmem:[#allocation42_spill] sm:$0xff] %v8171_v47  ;;  %v3534_v52 = vrot.slane %v3533_v21, 2  ;;  %v3601_v41 = vsel %vm3236_vm1, %v2894_v20, -inf  ;;  %v3132_v0 = vcombine.high %v2886_v19, %v2886_v19  ;;  %v3573_v26 = vsel %vm3236_vm1, %v2886_v19, -inf  ;;  %v2718_v2 = vpop.f32.mrb[109].mxu0  ;;  %v8190_v20 = vpop.f32.mrb[173].mxu1 }
 0x2f0   :  { %v3541_v43 = vrot.slane %v3540_v44, 2  ;;  %v3602_v9 = vrot.slane %v3601_v41, 4  ;;  %v3608_v62 = vsel %vm3236_vm1, %v3134_v48, -inf  ;;  %v8181_v28 = vsel %vm4909_vm2, %v4985_v15, %v4820_v7  ;;  %8934 = vst [vmem:[#allocation10_spill] sm:$0xff] %v8190_v20  ;;  %v8192_v19 = vpop.f32.mrb[110].mxu0  ;;  %v8194_v34 = vpop.f32.mrb[174].mxu1 }
 0x2f1   :  { %v3535_v10 = vmax.f32 %v3533_v21, %v3534_v52  ;;  %v3609_v22 = vrot.slane %v3608_v62, 4  ;;  %v3574_v14 = vrot.slane %v3573_v26, 4  ;;  %v3580_v12 = vsel %vm3236_vm1, %v3132_v0, -inf  ;;  %8935 = vst [vmem:[#allocation2_spill] sm:$0xff] %v8192_v19  ;;  %8936 = vst [vmem:[#allocation19_spill] sm:$0xff] %v8194_v34  ;;  %v2721_v52 = vpop.f32.mrb[111].mxu0 }
 0x2f2   :  { %v3542_v16 = vmax.f32 %v3540_v44, %v3541_v43  ;;  %v3603_v39 = vmax.f32 %v3601_v41, %v3602_v9  ;;  %v2897_v24 = vadd.f32 %v8933_v60, %v8932_v46  ;;  %v3581_v21 = vrot.slane %v3580_v12, 4 }
 0x2f3   :  { %v3536_v23 = vrot.slane %v3535_v10, 1  ;;  %v3610_v15 = vmax.f32 %v3608_v62, %v3609_v22  ;;  %v3575_v37 = vmax.f32 %v3573_v26, %v3574_v14  ;;  %v8198_v26 = vpop.f32.mrb[175].mxu1 }
 0x2f4   :  { %v3543_v13 = vrot.slane %v3542_v16, 1  ;;  %v3604_v7 = vrot.slane %v3603_v39, 2  ;;  %v3135_v44 = vcombine.high %v2897_v24, %v2897_v24  ;;  %v3615_v48 = vsel %vm3236_vm1, %v2897_v24, -inf  ;;  %8937 = vst [vmem:[#allocation15_spill] sm:$0xff] %v8198_v26 }
 0x2f5   :  { %v3537_v41 = vmax.f32 %v3535_v10, %v3536_v23  ;;  %v3611_v0 = vrot.slane %v3610_v15, 2  ;;  %v3576_v43 = vrot.slane %v3575_v37, 2  ;;  %v3582_v9 = vmax.f32 %v3580_v12, %v3581_v21 }
 0x2f6   :  { %v3544_v46 = vmax.f32 %v3542_v16, %v3543_v13  ;;  %v3605_v60 = vmax.f32 %v3603_v39, %v3604_v7  ;;  %v3616_v2 = vrot.slane %v3615_v48, 4  ;;  %v3622_v62 = vsel %vm3236_vm1, %v3135_v44, -inf }
 0x2f7   :  { %v4182_v22 = vadd.f32 %v8081_v5, %v3537_v41  ;;  %v3612_v14 = vmax.f32 %v3610_v15, %v3611_v0  ;;  %v3577_v6 = vmax.f32 %v3575_v37, %v3576_v43  ;;  %v3583_v47 = vrot.slane %v3582_v9, 2 }
 0x2f8   :  { %v4183_v34 = vadd.f32 %v8081_v5, %v3544_v46  ;;  %v3606_v24 = vrot.slane %v3605_v60, 1  ;;  %v3617_v52 = vmax.f32 %v3615_v48, %v3616_v2  ;;  %v3623_v10 = vrot.slane %v3622_v62, 4 }
 0x2f9   :  { %v5668_v23 = vpack.c.bf16 %v4182_v22, %v4182_v22  ;;  %v3613_v19 = vrot.slane %v3612_v14, 1  ;;  %v3578_v12 = vrot.slane %v3577_v6, 1  ;;  %v3584_v16 = vmax.f32 %v3582_v9, %v3583_v47 }
 0x2fa   :  { %v5669_v39 = vpack.c.bf16 %v4183_v34, %v4183_v34  ;;  %v3607_v21 = vmax.f32 %v3605_v60, %v3606_v24  ;;  %v3618_v13 = vrot.slane %v3617_v52, 2  ;;  %v3624_v7 = vmax.f32 %v3622_v62, %v3623_v10 }
 0x2fb   :  { %v4822_v44 = vunpack.c.l.b16 %v5668_v23  ;;  %v3614_v26 = vmax.f32 %v3612_v14, %v3613_v19  ;;  %v3579_v55 = vmax.f32 %v3577_v6, %v3578_v12  ;;  %v3585_v41 = vrot.slane %v3584_v16, 1 }
 0x2fc   :  { %v4823_v15 = vunpack.c.l.b16 %v5669_v39  ;;  %v4192_v37 = vadd.f32 %v8081_v5, %v3607_v21  ;;  %v3619_v0 = vmax.f32 %v3617_v52, %v3618_v13  ;;  %v3625_v43 = vrot.slane %v3624_v7, 2 }
 0x2fd   :  { %v8938_v48 = vpack.c.bf16 %v8150_v8, %v8150_v8  ;;  %v4987_v2 = vrot.slane %v4822_v44, 6  ;;  %v4193_v47 = vadd.f32 %v8081_v5, %v3614_v26  ;;  %v3586_v34 = vmax.f32 %v3584_v16, %v3585_v41  ;;  %v8939_v44 = vld [vmem:[#allocation49_spill] sm:$0xff] }
 0x2fe   :  { %v4989_v9 = vrot.slane %v4823_v15, 5  ;;  %v4188_v60 = vadd.f32 %v8081_v5, %v3579_v55  ;;  %v3620_v62 = vrot.slane %v3619_v0, 1  ;;  %v3626_v19 = vmax.f32 %v3624_v7, %v3625_v43  ;;  %v8940_v41 = vld [vmem:[#allocation25_spill] sm:$0xff]  ;;  %v8941_v43 = vld [vmem:[#allocation6_spill] sm:$0xff] }
 0x2ff   :  { %v4827_v46 = vunpack.c.l.b16 %v8938_v48  ;;  %v4991_v6 = vrot.slane %v8161_v36, 4  ;;  %v4988_v22 = vsel %vm4912_vm3, %v4987_v2, %v8181_v28  ;;  %v5678_v14 = vpack.c.bf16 %v4192_v37, %v4192_v37  ;;  %v8942_v48 = vld [vmem:[#allocation52_spill] sm:$0xff] }
 0x300   :  { %v4189_v24 = vadd.f32 %v8081_v5, %v3586_v34  ;;  %v4993_v8 = vrot.slane %v8163_v32, 3  ;;  %v4990_v52 = vsel %vm4915_vm4, %v4989_v9, %v4988_v22  ;;  %v3621_v10 = vmax.f32 %v3619_v0, %v3620_v62  ;;  %v8944_v22 = vld [vmem:[#allocation35_spill] sm:$0xff] }
 0x301   :  { %v3627_v26 = vrot.slane %v3626_v19, 1  ;;  %v4995_v23 = vrot.slane %v8173_v56, 2  ;;  %v4992_v55 = vsel %vm4918_vm5, %v4991_v6, %v4990_v52  ;;  %v5679_v12 = vpack.c.bf16 %v4193_v47, %v4193_v47  ;;  %v8943_v6 = vld [vmem:[#allocation51_spill] sm:$0xff]  ;;  %v8945_v52 = vld [vmem:[#allocation53_spill] sm:$0xff] }
 0x302   :  { %v5675_v16 = vpack.c.bf16 %v4189_v24, %v4189_v24  ;;  %v4997_v39 = vrot.slane %v4827_v46, 1  ;;  %v4994_v36 = vsel %vm4921_vm6, %v4993_v8, %v4992_v55  ;;  %v5674_v21 = vpack.c.bf16 %v4188_v60, %v4188_v60  ;;  %v8948_v55 = vld [vmem:[#allocation55_spill] sm:$0xff] }
 0x303   :  { %v3628_v28 = vmax.f32 %v3626_v19, %v3627_v26  ;;  %v4996_v13 = vsel %vm4924_vm7, %v4995_v23, %v4994_v36  ;;  %v8218_v7 = vunpack.c.l.b16 %v5678_v14  ;;  %v2889_v15 = vadd.f32 %v8940_v41, %v8939_v44  ;;  %v8947_v23 = vld [vmem:[#allocation7_spill] sm:$0xff]  ;;  %v8256_v41 = vpop.f32.mrb[112].mxu0 }
 0x304   :  { %v4829_v32 = vunpack.c.l.b16 %v5675_v16  ;;  %v4998_v37 = vsel %vm4927_vm8, %v4997_v39, %v4996_v13  ;;  %v8224_v56 = vadd.f32 %v8081_v5, %v3621_v10  ;;  %v8231_v46 = vadd.f32 %v8942_v48, %v8941_v43  ;;  %v8946_v10 = vld [vmem:[#allocation31_spill] sm:$0xff]  ;;  %8950 = vst [vmem:[#allocation21_spill] sm:$0xff] %v8256_v41 }
 0x305   :  { %v8227_v0 = vadd.f32 %v8081_v5, %v3628_v28  ;;  %v5144_v2 = vpack.c.b16 %v4998_v37, %v4998_v37  ;;  %v8233_v47 = vunpack.c.l.b16 %v5679_v12  ;;  %v3133_v34 = vcombine.high %v2889_v15, %v2889_v15 }
 0x306   :  { %v3587_v9 = vsel %vm3236_vm1, %v2889_v15, -inf  ;;  %v4828_v60 = vunpack.c.l.b16 %v5674_v21  ;;  %v4999_v62 = vrot.slane %v4829_v32, 7  ;;  %v2910_v14 = vadd.f32 %v8944_v22, %v8943_v6  ;;  %v8258_v15 = vpop.f32.mrb[176].mxu1 }
 0x307   :  { %v3588_v19 = vrot.slane %v3587_v9, 4  ;;  %5176 = vst.msk [vmem:[%s8853_s3 + $0x14] sm:$0xf] %vm3236_vm1, %v5144_v2  ;;  %v3594_v8 = vsel %vm3236_vm1, %v3133_v34, -inf  ;;  %v2902_v26 = vadd.f32 %v8946_v10, %v8945_v52  ;;  %v8248_v12 = vadd.f32 %v8948_v55, %v8947_v23  ;;  %8951 = vst [vmem:[#allocation17_spill] sm:$0xff] %v8258_v15  ;;  %v2726_v34 = vpop.f32.mrb[113].mxu0 }
 0x308   :  { %v3595_v21 = vrot.slane %v3594_v8, 4  ;;  %v3138_v28 = vcombine.high %v2910_v14, %v2910_v14  ;;  %v3657_v13 = vsel %vm3236_vm1, %v2910_v14, -inf  ;;  %v8261_v37 = vsel %vm4909_vm2, %v4999_v62, %v4828_v60  ;;  %v8263_v6 = vpop.f32.mrb[177].mxu1  ;;  %v8953_v14 = vld [vmem:[#allocation54_spill] sm:$0xff]  ;;  %v8954_v52 = vld [vmem:[#allocation37_spill] sm:$0xff] }
 0x309   :  { %8949 = vst [vmem:[#allocation3_spill] sm:$0xff] %v8248_v12  ;;  %v3589_v36 = vmax.f32 %v3587_v9, %v3588_v19  ;;  %v3136_v32 = vcombine.high %v2902_v26, %v2902_v26  ;;  %v3629_v44 = vsel %vm3236_vm1, %v2902_v26, -inf  ;;  %v3658_v2 = vrot.slane %v3657_v13, 4  ;;  %8952 = vst [vmem:[#allocation4_spill] sm:$0xff] %v8263_v6  ;;  %v8269_v26 = vpop.f32.mrb[114].mxu0 }
 0x30a   :  { %v3596_v48 = vmax.f32 %v3594_v8, %v3595_v21  ;;  %v3664_v9 = vsel %vm3236_vm1, %v3138_v28, -inf  ;;  %v3630_v19 = vrot.slane %v3629_v44, 4  ;;  %v2913_v10 = vadd.f32 %v8954_v52, %v8953_v14  ;;  %8955 = vst [vmem:[#allocation45_spill] sm:$0xff] %v8269_v26  ;;  %v2729_v24 = vpop.f32.mrb[115].mxu0 }
 0x30b   :  { %v3590_v43 = vrot.slane %v3589_v36, 2  ;;  %v3636_v22 = vsel %vm3236_vm1, %v3136_v32, -inf  ;;  %v3659_v60 = vmax.f32 %v3657_v13, %v3658_v2  ;;  %v3665_v62 = vrot.slane %v3664_v9, 4  ;;  %v8272_v32 = vpop.f32.mrb[178].mxu1 }
 0x30c   :  { %v3597_v55 = vrot.slane %v3596_v48, 2  ;;  %v3631_v8 = vmax.f32 %v3629_v44, %v3630_v19  ;;  %v3637_v21 = vrot.slane %v3636_v22, 4  ;;  %v3139_v34 = vcombine.high %v2913_v10, %v2913_v10  ;;  %8956 = vst [vmem:[#allocation44_spill] sm:$0xff] %v8272_v32 }
 0x30d   :  { %v3591_v23 = vmax.f32 %v3589_v36, %v3590_v43  ;;  %v3671_v39 = vsel %vm3236_vm1, %v2913_v10, -inf  ;;  %v3660_v6 = vrot.slane %v3659_v60, 2  ;;  %v3666_v15 = vmax.f32 %v3664_v9, %v3665_v62 }
 0x30e   :  { %v3598_v28 = vmax.f32 %v3596_v48, %v3597_v55  ;;  %v3632_v41 = vrot.slane %v3631_v8, 2  ;;  %v3638_v14 = vmax.f32 %v3636_v22, %v3637_v21  ;;  %v3672_v52 = vrot.slane %v3671_v39, 4  ;;  %v8276_v21 = vpop.f32.mrb[179].mxu1 }
 0x30f   :  { %v3592_v16 = vrot.slane %v3591_v23, 1  ;;  %v3678_v36 = vsel %vm3236_vm1, %v3139_v34, -inf  ;;  %v3661_v2 = vmax.f32 %v3659_v60, %v3660_v6  ;;  %v3667_v24 = vrot.slane %v3666_v15, 2 }
 0x310   :  { %v3599_v13 = vrot.slane %v3598_v28, 1  ;;  %v3633_v44 = vmax.f32 %v3631_v8, %v3632_v41  ;;  %v3639_v19 = vrot.slane %v3638_v14, 2  ;;  %v3673_v26 = vmax.f32 %v3671_v39, %v3672_v52 }
 0x311   :  { %v3593_v43 = vmax.f32 %v3591_v23, %v3592_v16  ;;  %v3679_v12 = vrot.slane %v3678_v36, 4  ;;  %v3662_v55 = vrot.slane %v3661_v2, 1  ;;  %v3668_v9 = vmax.f32 %v3666_v15, %v3667_v24 }
 0x312   :  { %v3600_v10 = vmax.f32 %v3598_v28, %v3599_v13  ;;  %v3634_v62 = vrot.slane %v3633_v44, 1  ;;  %v3640_v32 = vmax.f32 %v3638_v14, %v3639_v19  ;;  %v3674_v20 = vrot.slane %v3673_v26, 2 }
 0x313   :  { %v4190_v48 = vadd.f32 %v8081_v5, %v3593_v43  ;;  %v3680_v22 = vmax.f32 %v3678_v36, %v3679_v12  ;;  %v3663_v6 = vmax.f32 %v3661_v2, %v3662_v55  ;;  %v3669_v60 = vrot.slane %v3668_v9, 1 }
 0x314   :  { %v4191_v16 = vadd.f32 %v8081_v5, %v3600_v10  ;;  %v3635_v41 = vmax.f32 %v3633_v44, %v3634_v62  ;;  %v3641_v8 = vrot.slane %v3640_v32, 1  ;;  %v3675_v39 = vmax.f32 %v3673_v26, %v3674_v20 }
 0x315   :  { %v5676_v23 = vpack.c.bf16 %v4190_v48, %v4190_v48  ;;  %v3681_v34 = vrot.slane %v3680_v22, 2  ;;  %v3670_v43 = vmax.f32 %v3668_v9, %v3669_v60  ;;  %v4200_v15 = vadd.f32 %v8081_v5, %v3663_v6 }
 0x316   :  { %v5677_v28 = vpack.c.bf16 %v4191_v16, %v4191_v16  ;;  %v3642_v13 = vmax.f32 %v3640_v32, %v3641_v8  ;;  %v4196_v14 = vadd.f32 %v8081_v5, %v3635_v41  ;;  %v3676_v12 = vrot.slane %v3675_v39, 1 }
 0x317   :  { %v4830_v52 = vunpack.c.l.b16 %v5676_v23  ;;  %v3682_v36 = vmax.f32 %v3680_v22, %v3681_v34  ;;  %v8957_v24 = vpack.c.bf16 %v8224_v56, %v8224_v56  ;;  %v4201_v44 = vadd.f32 %v8081_v5, %v3670_v43 }
 0x318   :  { %v4831_v2 = vunpack.c.l.b16 %v5677_v28  ;;  %v5007_v20 = vrot.slane %v8233_v47, 3  ;;  %v4197_v26 = vadd.f32 %v8081_v5, %v3642_v13  ;;  %v3677_v48 = vmax.f32 %v3675_v39, %v3676_v12  ;;  %v8959_v39 = vld [vmem:[#allocation33_spill] sm:$0xff] }
 0x319   :  { %v4834_v19 = vunpack.c.l.b16 %v8957_v24  ;;  %v5001_v10 = vrot.slane %v4830_v52, 6  ;;  %v3683_v55 = vrot.slane %v3682_v36, 1  ;;  %v8958_v32 = vpack.c.bf16 %v8227_v0, %v8227_v0 }
 0x31a   :  { %v5003_v22 = vrot.slane %v4831_v2, 5  ;;  %v5686_v56 = vpack.c.bf16 %v4200_v15, %v4200_v15  ;;  %v5682_v16 = vpack.c.bf16 %v4196_v14, %v4196_v14  ;;  %v5683_v23 = vpack.c.bf16 %v4197_v26, %v4197_v26 }
 0x31b   :  { %v4835_v9 = vunpack.c.l.b16 %v8958_v32  ;;  %v5002_v62 = vsel %vm4912_vm3, %v5001_v10, %v8261_v37  ;;  %v3684_v6 = vmax.f32 %v3682_v36, %v3683_v55  ;;  %v4202_v60 = vadd.f32 %v8081_v5, %v3677_v48 }
 0x31c   :  { %v5009_v41 = vrot.slane %v4834_v19, 2  ;;  %v5004_v47 = vsel %vm4915_vm4, %v5003_v22, %v5002_v62  ;;  %v5687_v8 = vpack.c.bf16 %v4201_v44, %v4201_v44  ;;  %v2905_v34 = vadd.f32 %v8959_v39, %v7893_v49  ;;  %v8961_v44 = vld [vmem:[#allocation8_spill] sm:$0xff]  ;;  %v8342_v39 = vpop.f32.mrb[180].mxu1 }
 0x31d   :  { %v8960_v0 = vrot.slane %v8218_v7, 4  ;;  %v4837_v52 = vunpack.c.l.b16 %v5683_v23  ;;  %v8300_v37 = vadd.f32 %v8081_v5, %v3684_v6  ;;  %v5688_v43 = vpack.c.bf16 %v4202_v60, %v4202_v60  ;;  %v8962_v22 = vld [vmem:[#allocation40_spill] sm:$0xff]  ;;  %v8323_v6 = vpop.f32.mrb[116].mxu0  ;;  %v8964_v60 = vld [vmem:[#allocation9_spill] sm:$0xff] }
 0x31e   :  { %v5011_v15 = vrot.slane %v4835_v9, 1  ;;  %v3137_v14 = vcombine.high %v2905_v34, %v2905_v34  ;;  %v3643_v12 = vsel %vm3236_vm1, %v2905_v34, -inf  ;;  %v8305_v24 = vunpack.c.l.b16 %v5686_v56  ;;  %v2734_v34 = vpop.f32.mrb[117].mxu0 }
 0x31f   :  { %v5006_v28 = vsel %vm4918_vm5, %v8960_v0, %v5004_v47  ;;  %v4836_v49 = vunpack.c.l.b16 %v5682_v16  ;;  %v5013_v19 = vrot.slane %v4837_v52, 7  ;;  %v3644_v2 = vrot.slane %v3643_v12, 4  ;;  %v8963_v16 = vld [vmem:[#allocation38_spill] sm:$0xff]  ;;  %v8965_v47 = vld [vmem:[#allocation41_spill] sm:$0xff] }
 0x320   :  { %v5008_v13 = vsel %vm4921_vm6, %v5007_v20, %v5006_v28  ;;  %v3650_v10 = vsel %vm3236_vm1, %v3137_v14, -inf  ;;  %v8311_v26 = vadd.f32 %v7945_v38, %v8961_v44  ;;  %v8313_v20 = vunpack.c.l.b16 %v5687_v8  ;;  %v8966_v8 = vld [vmem:[#allocation39_spill] sm:$0xff]  ;;  %v8351_v44 = vpop.f32.mrb[118].mxu0 }
 0x321   :  { %v5010_v36 = vsel %vm4924_vm7, %v5009_v41, %v5008_v13  ;;  %v8317_v32 = vunpack.c.l.b16 %v5688_v43  ;;  %v3645_v9 = vmax.f32 %v3643_v12, %v3644_v2  ;;  %v3651_v62 = vrot.slane %v3650_v10, 4  ;;  %8967 = vst [vmem:[#allocation27_spill] sm:$0xff] %v8351_v44 }
 0x322   :  { %v5012_v7 = vsel %vm4927_vm8, %v5011_v15, %v5010_v36  ;;  %v2926_v56 = vadd.f32 %v8962_v22, %v7947_v31  ;;  %v2918_v23 = vadd.f32 %v8963_v16, %v7951_v4  ;;  %v8330_v38 = vsel %vm4909_vm2, %v5013_v19, %v4836_v49  ;;  %v8345_v15 = vpop.f32.mrb[181].mxu1 }
 0x323   :  { %v5145_v48 = vpack.c.b16 %v5012_v7, %v5012_v7  ;;  %v8334_v41 = vadd.f32 %v7955_v54, %v8964_v60  ;;  %v2929_v31 = vadd.f32 %v8965_v47, %v7957_v40  ;;  %v8340_v4 = vadd.f32 %v8966_v8, %v7969_v53 }
 0x324   :  { %v3646_v0 = vrot.slane %v3645_v9, 2  ;;  %v3652_v28 = vmax.f32 %v3650_v10, %v3651_v62  ;;  %v3142_v52 = vcombine.high %v2926_v56, %v2926_v56  ;;  %v3713_v43 = vsel %vm3236_vm1, %v2926_v56, -inf }
 0x325   :  { %5177 = vst.msk [vmem:[%s8853_s3 + $0x18] sm:$0xf] %vm3236_vm1, %v5145_v48  ;;  %v3714_v13 = vrot.slane %v3713_v43, 4  ;;  %v3140_v54 = vcombine.high %v2918_v23, %v2918_v23  ;;  %v3685_v14 = vsel %vm3236_vm1, %v2918_v23, -inf  ;;  %v3143_v12 = vcombine.high %v2929_v31, %v2929_v31  ;;  %v8353_v48 = vpop.f32.mrb[182].mxu1  ;;  %v2737_v23 = vpop.f32.mrb[119].mxu0 }
 0x326   :  { %v3647_v40 = vmax.f32 %v3645_v9, %v3646_v0  ;;  %v3653_v36 = vrot.slane %v3652_v28, 2  ;;  %v3720_v53 = vsel %vm3236_vm1, %v3142_v52, -inf  ;;  %v3686_v49 = vrot.slane %v3685_v14, 4  ;;  %8968 = vst [vmem:[#allocation46_spill] sm:$0xff] %v8353_v48 }
 0x327   :  { %v3715_v19 = vmax.f32 %v3713_v43, %v3714_v13  ;;  %v3721_v7 = vrot.slane %v3720_v53, 4  ;;  %v3692_v2 = vsel %vm3236_vm1, %v3140_v54, -inf  ;;  %v3727_v10 = vsel %vm3236_vm1, %v2929_v31, -inf }
 0x328   :  { %v3648_v62 = vrot.slane %v3647_v40, 1  ;;  %v3654_v22 = vmax.f32 %v3652_v28, %v3653_v36  ;;  %v3687_v56 = vmax.f32 %v3685_v14, %v3686_v49  ;;  %v3693_v16 = vrot.slane %v3692_v2, 4  ;;  %v8357_v36 = vpop.f32.mrb[183].mxu1 }
 0x329   :  { %v3716_v9 = vrot.slane %v3715_v19, 2  ;;  %v3722_v60 = vmax.f32 %v3720_v53, %v3721_v7  ;;  %v3728_v47 = vrot.slane %v3727_v10, 4  ;;  %v3734_v8 = vsel %vm3236_vm1, %v3143_v12, -inf  ;;  %8969 = vst [vmem:[#allocation23_spill] sm:$0xff] %v8357_v36 }
 0x32a   :  { %v3649_v34 = vmax.f32 %v3647_v40, %v3648_v62  ;;  %v3655_v0 = vrot.slane %v3654_v22, 1  ;;  %v3688_v52 = vrot.slane %v3687_v56, 2  ;;  %v3694_v43 = vmax.f32 %v3692_v2, %v3693_v16 }
 0x32b   :  { %v3717_v13 = vmax.f32 %v3715_v19, %v3716_v9  ;;  %v3723_v31 = vrot.slane %v3722_v60, 2  ;;  %v3729_v54 = vmax.f32 %v3727_v10, %v3728_v47  ;;  %v3735_v55 = vrot.slane %v3734_v8, 4 }
 0x32c   :  { %v3656_v44 = vmax.f32 %v3654_v22, %v3655_v0  ;;  %v4198_v48 = vadd.f32 %v8081_v5, %v3649_v34  ;;  %v3689_v28 = vmax.f32 %v3687_v56, %v3688_v52  ;;  %v3695_v14 = vrot.slane %v3694_v43, 2 }
 0x32d   :  { %v3718_v49 = vrot.slane %v3717_v13, 1  ;;  %v3724_v53 = vmax.f32 %v3722_v60, %v3723_v31  ;;  %v3730_v7 = vrot.slane %v3729_v54, 2  ;;  %v3736_v23 = vmax.f32 %v3734_v8, %v3735_v55 }
 0x32e   :  { %v4199_v12 = vadd.f32 %v8081_v5, %v3656_v44  ;;  %v5684_v40 = vpack.c.bf16 %v4198_v48, %v4198_v48  ;;  %v3690_v62 = vrot.slane %v3689_v28, 1  ;;  %v3696_v2 = vmax.f32 %v3694_v43, %v3695_v14 }
 0x32f   :  { %v3719_v19 = vmax.f32 %v3717_v13, %v3718_v49  ;;  %v3725_v16 = vrot.slane %v3724_v53, 1  ;;  %v3731_v10 = vmax.f32 %v3729_v54, %v3730_v7  ;;  %v3737_v9 = vrot.slane %v3736_v23, 2 }
 0x330   :  { %v5685_v22 = vpack.c.bf16 %v4199_v12, %v4199_v12  ;;  %v4838_v47 = vunpack.c.l.b16 %v5684_v40  ;;  %v3691_v34 = vmax.f32 %v3689_v28, %v3690_v62  ;;  %v3697_v56 = vrot.slane %v3696_v2, 1 }
 0x331   :  { %v3726_v0 = vmax.f32 %v3724_v53, %v3725_v16  ;;  %v4208_v52 = vadd.f32 %v8081_v5, %v3719_v19  ;;  %v3732_v36 = vrot.slane %v3731_v10, 1  ;;  %v3738_v60 = vmax.f32 %v3736_v23, %v3737_v9 }
 0x332   :  { %v4839_v31 = vunpack.c.l.b16 %v5685_v22  ;;  %v5015_v55 = vrot.slane %v4838_v47, 6  ;;  %v3698_v8 = vmax.f32 %v3696_v2, %v3697_v56  ;;  %v4204_v44 = vadd.f32 %v8081_v5, %v3691_v34 }
 0x333   :  { %v8970_v48 = vpack.c.bf16 %v8300_v37, %v8300_v37  ;;  %v4209_v13 = vadd.f32 %v8081_v5, %v3726_v0  ;;  %v3733_v54 = vmax.f32 %v3731_v10, %v3732_v36  ;;  %v3739_v14 = vrot.slane %v3738_v60, 1 }
 0x334   :  { %v5019_v28 = vrot.slane %v8305_v24, 4  ;;  %v5016_v49 = vsel %vm4912_vm3, %v5015_v55, %v8330_v38  ;;  %v5017_v53 = vrot.slane %v4839_v31, 5  ;;  %v4205_v7 = vadd.f32 %v8081_v5, %v3698_v8 }
 0x335   :  { %v4843_v43 = vunpack.c.l.b16 %v8970_v48  ;;  %v5021_v23 = vrot.slane %v8313_v20, 3  ;;  %v5023_v12 = vrot.slane %v8317_v32, 2  ;;  %v5694_v40 = vpack.c.bf16 %v4208_v52, %v4208_v52 }
 0x336   :  { %v3740_v62 = vmax.f32 %v3738_v60, %v3739_v14  ;;  %v5018_v37 = vsel %vm4915_vm4, %v5017_v53, %v5016_v49  ;;  %v5690_v2 = vpack.c.bf16 %v4204_v44, %v4204_v44  ;;  %v5691_v19 = vpack.c.bf16 %v4205_v7, %v4205_v7  ;;  %v8972_v7 = vld [vmem:[#allocation43_spill] sm:$0xff] }
 0x337   :  { %v3141_v36 = vcombine.high %v8340_v4, %v8340_v4  ;;  %v5025_v24 = vrot.slane %v4843_v43, 1  ;;  %v5020_v16 = vsel %vm4918_vm5, %v5019_v28, %v5018_v37  ;;  %v5695_v38 = vpack.c.bf16 %v4209_v13, %v4209_v13  ;;  %v8971_v13 = vld [vmem:[#allocation11_spill] sm:$0xff]  ;;  %v8420_v37 = vpop.f32.mrb[184].mxu1 }
 0x338   :  { %v8377_v10 = vadd.f32 %v8081_v5, %v3733_v54  ;;  %v5022_v20 = vsel %vm4921_vm6, %v5021_v23, %v5020_v16  ;;  %v4845_v9 = vunpack.c.l.b16 %v5691_v19  ;;  %v8381_v32 = vadd.f32 %v8081_v5, %v3740_v62 }
 0x339   :  { %v3699_v22 = vsel %vm3236_vm1, %v8340_v4, -inf  ;;  %v5024_v47 = vsel %vm4924_vm7, %v5023_v12, %v5022_v20  ;;  %v8386_v34 = vunpack.c.l.b16 %v5694_v40  ;;  %v4844_v52 = vunpack.c.l.b16 %v5690_v2  ;;  %v8973_v40 = vld [vmem:[#allocation12_spill] sm:$0xff] }
 0x33a   :  { %v3700_v56 = vrot.slane %v3699_v22, 4  ;;  %v5026_v0 = vsel %vm4927_vm8, %v5025_v24, %v5024_v47  ;;  %v5027_v60 = vrot.slane %v4845_v9, 7  ;;  %v3706_v31 = vsel %vm3236_vm1, %v3141_v36, -inf }
 0x33b   :  { %v5146_v55 = vpack.c.b16 %v5026_v0, %v5026_v0  ;;  %v8390_v8 = vunpack.c.l.b16 %v5695_v38  ;;  %v3707_v48 = vrot.slane %v3706_v31, 4  ;;  %v8398_v54 = vadd.f32 %v8017_v45, %v8971_v13 }
 0x33c   :  { %v3701_v44 = vmax.f32 %v3699_v22, %v3700_v56  ;;  %v2942_v14 = vadd.f32 %v7922_v17, %v8025_v33  ;;  %v8407_v28 = vsel %vm4909_vm2, %v5027_v60, %v4844_v52  ;;  %v2934_v23 = vadd.f32 %v8972_v7, %v8029_v57  ;;  %v8418_v33 = vpop.f32.mrb[120].mxu0  ;;  %v8422_v57 = vpop.f32.mrb[185].mxu1 }
 0x33d   :  { %5178 = vst.msk [vmem:[%s8853_s3 + $0x1c] sm:$0xf] %vm3236_vm1, %v5146_v55  ;;  %v3708_v53 = vmax.f32 %v3706_v31, %v3707_v48  ;;  %v8414_v62 = vadd.f32 %v8039_v58, %v8973_v40  ;;  %v2945_v17 = vadd.f32 %v7961_v51, %v8041_v18  ;;  %v2742_v16 = vpop.f32.mrb[121].mxu0  ;;  %v8429_v51 = vpop.f32.mrb[186].mxu1 }
 0x33e   :  { %v3702_v49 = vrot.slane %v3701_v44, 2  ;;  %v3146_v12 = vcombine.high %v2942_v14, %v2942_v14  ;;  %v3769_v45 = vsel %vm3236_vm1, %v2942_v14, -inf  ;;  %v3144_v24 = vcombine.high %v2934_v23, %v2934_v23  ;;  %v8427_v22 = vpop.f32.mrb[122].mxu0 }
 0x33f   :  { %v3709_v19 = vrot.slane %v3708_v53, 2  ;;  %v3770_v36 = vrot.slane %v3769_v45, 4  ;;  %v3741_v20 = vsel %vm3236_vm1, %v2934_v23, -inf  ;;  %v3147_v58 = vcombine.high %v2945_v17, %v2945_v17  ;;  %v2745_v52 = vpop.f32.mrb[123].mxu0 }
 0x340   :  { %v3703_v2 = vmax.f32 %v3701_v44, %v3702_v49  ;;  %v3776_v38 = vsel %vm3236_vm1, %v3146_v12, -inf  ;;  %v3783_v9 = vsel %vm3236_vm1, %v2945_v17, -inf  ;;  %v3742_v60 = vrot.slane %v3741_v20, 4 }
 0x341   :  { %v3710_v47 = vmax.f32 %v3708_v53, %v3709_v19  ;;  %v3771_v56 = vmax.f32 %v3769_v45, %v3770_v36  ;;  %v3777_v0 = vrot.slane %v3776_v38, 4  ;;  %v3748_v31 = vsel %vm3236_vm1, %v3144_v24, -inf  ;;  %v8434_v36 = vpop.f32.mrb[187].mxu1 }
 0x342   :  { %v3704_v18 = vrot.slane %v3703_v2, 1  ;;  %v3784_v55 = vrot.slane %v3783_v9, 4  ;;  %v3790_v44 = vsel %vm3236_vm1, %v3147_v58, -inf  ;;  %v3743_v7 = vmax.f32 %v3741_v20, %v3742_v60  ;;  %8974 = vst [vmem:[#allocation5_spill] sm:$0xff] %v8434_v36 }
 0x343   :  { %v3711_v13 = vrot.slane %v3710_v47, 1  ;;  %v3772_v14 = vrot.slane %v3771_v56, 2  ;;  %v3778_v49 = vmax.f32 %v3776_v38, %v3777_v0  ;;  %v3749_v23 = vrot.slane %v3748_v31, 4 }
 0x344   :  { %v3705_v48 = vmax.f32 %v3703_v2, %v3704_v18  ;;  %v3785_v12 = vmax.f32 %v3783_v9, %v3784_v55  ;;  %v3791_v40 = vrot.slane %v3790_v44, 4  ;;  %v3744_v16 = vrot.slane %v3743_v7, 2 }
 0x345   :  { %v3712_v17 = vmax.f32 %v3710_v47, %v3711_v13  ;;  %v3773_v45 = vmax.f32 %v3771_v56, %v3772_v14  ;;  %v3779_v19 = vrot.slane %v3778_v49, 2  ;;  %v3750_v24 = vmax.f32 %v3748_v31, %v3749_v23 }
 0x346   :  { %v4206_v53 = vadd.f32 %v8081_v5, %v3705_v48  ;;  %v3786_v52 = vrot.slane %v3785_v12, 2  ;;  %v3792_v4 = vmax.f32 %v3790_v44, %v3791_v40  ;;  %v3745_v20 = vmax.f32 %v3743_v7, %v3744_v16 }
 0x347   :  { %v4207_v2 = vadd.f32 %v8081_v5, %v3712_v17  ;;  %v3774_v18 = vrot.slane %v3773_v45, 1  ;;  %v3780_v38 = vmax.f32 %v3778_v49, %v3779_v19  ;;  %v3751_v0 = vrot.slane %v3750_v24, 2  ;;  %v8443_v49 = vld [vmem:[%s8852_s2] ss:$0 sm:$0xff] }
 0x348   :  { %v5692_v58 = vpack.c.bf16 %v4206_v53, %v4206_v53  ;;  %v3787_v9 = vmax.f32 %v3785_v12, %v3786_v52  ;;  %v3793_v60 = vrot.slane %v3792_v4, 2  ;;  %v3746_v13 = vrot.slane %v3745_v20, 1 }
 0x349   :  { %v5693_v47 = vpack.c.bf16 %v4207_v2, %v4207_v2  ;;  %v3775_v48 = vmax.f32 %v3773_v45, %v3774_v18  ;;  %v3781_v56 = vrot.slane %v3780_v38, 1  ;;  %v3752_v14 = vmax.f32 %v3750_v24, %v3751_v0 }
 0x34a   :  { %v4846_v55 = vunpack.c.l.b16 %v5692_v58  ;;  %v3788_v43 = vrot.slane %v3787_v9, 1  ;;  %v3794_v36 = vmax.f32 %v3792_v4, %v3793_v60  ;;  %v8975_v31 = vpack.c.bf16 %v8377_v10, %v8377_v10 }
 0x34b   :  { %v4847_v5 = vunpack.c.l.b16 %v5693_v47  ;;  %v3782_v40 = vmax.f32 %v3780_v38, %v3781_v56  ;;  %v4216_v7 = vadd.f32 %v8443_v49, %v3775_v48  ;;  %v3747_v12 = vmax.f32 %v3745_v20, %v3746_v13 }
 0x34c   :  { %v4850_v44 = vunpack.c.l.b16 %v8975_v31  ;;  %v5029_v23 = vrot.slane %v4846_v55, 6  ;;  %v3753_v17 = vrot.slane %v3752_v14, 1  ;;  %v3795_v53 = vrot.slane %v3794_v36, 1 }
 0x34d   :  { %v8976_v4 = vpack.c.bf16 %v8381_v32, %v8381_v32  ;;  %v5031_v19 = vrot.slane %v4847_v5, 5  ;;  %v3789_v16 = vmax.f32 %v3787_v9, %v3788_v43  ;;  %v5033_v24 = vrot.slane %v8386_v34, 4  ;;  %v8977_v32 = vld [vmem:[#allocation50_spill] sm:$0xff] }
 0x34e   :  { %v5030_v10 = vsel %vm4912_vm3, %v5029_v23, %v8407_v28  ;;  %v3754_v52 = vmax.f32 %v3752_v14, %v3753_v17  ;;  %v4212_v2 = vadd.f32 %v8443_v49, %v3747_v12  ;;  %v3796_v58 = vmax.f32 %v3794_v36, %v3795_v53  ;;  %v8978_v17 = vld [vmem:[#allocation14_spill] sm:$0xff] }
 0x34f   :  { %v4851_v45 = vunpack.c.l.b16 %v8976_v4  ;;  %v5035_v18 = vrot.slane %v8390_v8, 3  ;;  %v5032_v38 = vsel %vm4915_vm4, %v5031_v19, %v5030_v10  ;;  %v8456_v20 = vadd.f32 %v8443_v49, %v3782_v40 }
 0x350   :  { %v2937_v0 = vadd.f32 %v8977_v32, %v8047_v42  ;;  %v5037_v60 = vrot.slane %v4850_v44, 2  ;;  %v5034_v28 = vsel %vm4918_vm5, %v5033_v24, %v5032_v38  ;;  %v5702_v43 = vpack.c.bf16 %v4216_v7, %v4216_v7 }
 0x351   :  { %v4213_v34 = vadd.f32 %v8443_v49, %v3754_v52  ;;  %v5039_v9 = vrot.slane %v4851_v45, 1  ;;  %v5036_v47 = vsel %vm4921_vm6, %v5035_v18, %v5034_v28  ;;  %v8464_v36 = vadd.f32 %v8443_v49, %v3789_v16  ;;  %v8506_v28 = vpop.f32.mrb[124].mxu0 }
 0x352   :  { %v5038_v8 = vsel %vm4924_vm7, %v5037_v60, %v5036_v47  ;;  %v5698_v55 = vpack.c.bf16 %v4212_v2, %v4212_v2  ;;  %v8468_v56 = vadd.f32 %v8443_v49, %v3796_v58  ;;  %v3145_v14 = vcombine.high %v2937_v0, %v2937_v0 }
 0x353   :  { %v5699_v48 = vpack.c.bf16 %v4213_v34, %v4213_v34  ;;  %v5040_v42 = vsel %vm4927_vm8, %v5039_v9, %v5038_v8  ;;  %v8473_v44 = vunpack.c.l.b16 %v5702_v43  ;;  %v3755_v23 = vsel %vm3236_vm1, %v2937_v0, -inf }
 0x354   :  { %v5147_v31 = vpack.c.b16 %v5040_v42, %v5040_v42  ;;  %v3756_v7 = vrot.slane %v3755_v23, 4  ;;  %v3762_v12 = vsel %vm3236_vm1, %v3145_v14, -inf  ;;  %v8483_v53 = vadd.f32 %v8111_v61, %v8978_v17  ;;  %v8979_v61 = vld [vmem:[#allocation16_spill] sm:$0xff] }
 0x355   :  { %v8475_v5 = vunpack.c.l.b16 %v5699_v48  ;;  %v8489_v4 = vunpack.c.l.b16 %v5698_v55  ;;  %v3763_v10 = vrot.slane %v3762_v12, 4  ;;  %v2958_v19 = vadd.f32 %v8088_v30, %v8113_v50 }
 0x356   :  { %5179 = vst.msk [vmem:[%s8853_s3 + $0x20] sm:$0xf] %vm3236_vm1, %v5147_v31  ;;  %v3757_v16 = vmax.f32 %v3755_v23, %v3756_v7  ;;  %v2950_v24 = vadd.f32 %v7999_v59, %v8115_v35  ;;  %v8499_v52 = vadd.f32 %v8122_v3, %v8979_v61  ;;  %v2961_v2 = vadd.f32 %v8100_v1, %v8124_v63  ;;  %v8508_v59 = vpop.f32.mrb[188].mxu1  ;;  %v2750_v63 = vpop.f32.mrb[125].mxu0 }
 0x357   :  { %v5041_v58 = vrot.slane %v8475_v5, 7  ;;  %v3764_v18 = vmax.f32 %v3762_v12, %v3763_v10  ;;  %v3150_v38 = vcombine.high %v2958_v19, %v2958_v19  ;;  %v3825_v32 = vsel %vm3236_vm1, %v2958_v19, -inf  ;;  %v8511_v34 = vpop.f32.mrb[189].mxu1  ;;  %v8514_v48 = vpop.f32.mrb[126].mxu0 }
 0x358   :  { %v3758_v0 = vrot.slane %v3757_v16, 2  ;;  %v3826_v60 = vrot.slane %v3825_v32, 4  ;;  %v3148_v30 = vcombine.high %v2950_v24, %v2950_v24  ;;  %v3797_v50 = vsel %vm3236_vm1, %v2950_v24, -inf  ;;  %v8516_v42 = vpop.f32.mrb[190].mxu1  ;;  %v2753_v12 = vpop.f32.mrb[127].mxu0 }
 0x359   :  { %v3765_v35 = vrot.slane %v3764_v18, 2  ;;  %v3832_v3 = vsel %vm3236_vm1, %v3150_v38, -inf  ;;  %v3798_v43 = vrot.slane %v3797_v50, 4  ;;  %v3151_v1 = vcombine.high %v2961_v2, %v2961_v2  ;;  %v8519_v7 = vpop.f32.mrb[191].mxu1 }
 0x35a   :  { %v3759_v9 = vmax.f32 %v3757_v16, %v3758_v0  ;;  %v3827_v47 = vmax.f32 %v3825_v32, %v3826_v60  ;;  %v3833_v8 = vrot.slane %v3832_v3, 4  ;;  %v3804_v55 = vsel %vm3236_vm1, %v3148_v30, -inf }
 0x35b   :  { %v3766_v14 = vmax.f32 %v3764_v18, %v3765_v35  ;;  %v3799_v31 = vmax.f32 %v3797_v50, %v3798_v43  ;;  %v3805_v5 = vrot.slane %v3804_v55, 4  ;;  %v3839_v23 = vsel %vm3236_vm1, %v2961_v2, -inf }
 0x35c   :  { %v3760_v17 = vrot.slane %v3759_v9, 1  ;;  %v3828_v10 = vrot.slane %v3827_v47, 2  ;;  %v3834_v19 = vmax.f32 %v3832_v3, %v3833_v8  ;;  %v3840_v16 = vrot.slane %v3839_v23, 4 }
 0x35d   :  { %v3767_v24 = vrot.slane %v3766_v14, 1  ;;  %v3800_v61 = vrot.slane %v3799_v31, 2  ;;  %v3806_v38 = vmax.f32 %v3804_v55, %v3805_v5  ;;  %v3846_v32 = vsel %vm3236_vm1, %v3151_v1, -inf }
 0x35e   :  { %v3761_v0 = vmax.f32 %v3759_v9, %v3760_v17  ;;  %v3829_v60 = vmax.f32 %v3827_v47, %v3828_v10  ;;  %v3835_v30 = vrot.slane %v3834_v19, 2  ;;  %v3841_v18 = vmax.f32 %v3839_v23, %v3840_v16 }
 0x35f   :  { %v3768_v50 = vmax.f32 %v3766_v14, %v3767_v24  ;;  %v3801_v35 = vmax.f32 %v3799_v31, %v3800_v61  ;;  %v3807_v43 = vrot.slane %v3806_v38, 2  ;;  %v3847_v2 = vrot.slane %v3846_v32, 4 }
 0x360   :  { %v4214_v63 = vadd.f32 %v8443_v49, %v3761_v0  ;;  %v3830_v12 = vrot.slane %v3829_v60, 1  ;;  %v3836_v45 = vmax.f32 %v3834_v19, %v3835_v30  ;;  %v3842_v40 = vrot.slane %v3841_v18, 2 }
 0x361   :  { %v4215_v3 = vadd.f32 %v8443_v49, %v3768_v50  ;;  %v3802_v8 = vrot.slane %v3801_v35, 1  ;;  %v3808_v13 = vmax.f32 %v3806_v38, %v3807_v43  ;;  %v3848_v55 = vmax.f32 %v3846_v32, %v3847_v2 }
 0x362   :  { %v5700_v5 = vpack.c.bf16 %v4214_v63, %v4214_v63  ;;  %v3831_v1 = vmax.f32 %v3829_v60, %v3830_v12  ;;  %v3837_v9 = vrot.slane %v3836_v45, 1  ;;  %v3843_v47 = vmax.f32 %v3841_v18, %v3842_v40 }
 0x363   :  { %v8980_v14 = vpack.c.bf16 %v8456_v20, %v8456_v20  ;;  %v5701_v23 = vpack.c.bf16 %v4215_v3, %v4215_v3  ;;  %v3809_v17 = vrot.slane %v3808_v13, 1  ;;  %v3849_v10 = vrot.slane %v3848_v55, 2 }
 0x364   :  { %v5042_v19 = vsel %vm4909_vm2, %v5041_v58, %v8489_v4  ;;  %v4854_v16 = vunpack.c.l.b16 %v5700_v5  ;;  %v3803_v24 = vmax.f32 %v3801_v35, %v3802_v8  ;;  %v3844_v61 = vrot.slane %v3843_v47, 1 }
 0x365   :  { %v4857_v31 = vunpack.c.l.b16 %v8980_v14  ;;  %v4855_v0 = vunpack.c.l.b16 %v5701_v23  ;;  %v3838_v38 = vmax.f32 %v3836_v45, %v3837_v9  ;;  %v3810_v32 = vmax.f32 %v3808_v13, %v3809_v17  ;;  %v8983_v23 = vld [vmem:[#allocation18_spill] sm:$0xff] }
 0x366   :  { %v3850_v30 = vmax.f32 %v3848_v55, %v3849_v10  ;;  %v8981_v40 = vpack.c.bf16 %v8464_v36, %v8464_v36  ;;  %v8982_v20 = vpack.c.bf16 %v8468_v56, %v8468_v56  ;;  %v5043_v50 = vrot.slane %v4854_v16, 6 }
 0x367   :  { %v4224_v43 = vadd.f32 %v8443_v49, %v3831_v1  ;;  %v5045_v2 = vrot.slane %v4855_v0, 5  ;;  %v4221_v4 = vadd.f32 %v8443_v49, %v3810_v32  ;;  %v3845_v58 = vmax.f32 %v3843_v47, %v3844_v61 }
 0x368   :  { %v4858_v60 = vunpack.c.l.b16 %v8981_v40  ;;  %v4859_v18 = vunpack.c.l.b16 %v8982_v20  ;;  %v5047_v35 = vrot.slane %v8473_v44, 4  ;;  %v5044_v13 = vsel %vm4912_vm3, %v5043_v50, %v5042_v19  ;;  %v8985_v50 = vld [vmem:[#allocation13_spill] sm:$0xff] }
 0x369   :  { %v8540_v45 = vadd.f32 %v8443_v49, %v3803_v24  ;;  %v5049_v36 = vrot.slane %v4857_v31, 3  ;;  %v5046_v63 = vsel %vm4915_vm4, %v5045_v2, %v5044_v13  ;;  %v8544_v56 = vadd.f32 %v8443_v49, %v3838_v38 }
 0x36a   :  { %v3851_v12 = vrot.slane %v3850_v30, 1  ;;  %v5051_v3 = vrot.slane %v4858_v60, 2  ;;  %v5053_v8 = vrot.slane %v4859_v18, 1  ;;  %v5048_v55 = vsel %vm4918_vm5, %v5047_v35, %v5046_v63  ;;  %v8984_v18 = vld [vmem:[#allocation10_spill] sm:$0xff] }
 0x36b   :  { %v5710_v5 = vpack.c.bf16 %v4224_v43, %v4224_v43  ;;  %v5050_v1 = vsel %vm4921_vm6, %v5049_v36, %v5048_v55  ;;  %v5707_v44 = vpack.c.bf16 %v4221_v4, %v4221_v4  ;;  %v8549_v9 = vadd.f32 %v8443_v49, %v3845_v58  ;;  %v8986_v4 = vld [vmem:[#allocation20_spill] sm:$0xff]  ;;  %v8987_v58 = vld [vmem:[#allocation2_spill] sm:$0xff] }
 0x36c   :  { %v2953_v47 = vadd.f32 %v8033_v27, %v8128_v29  ;;  %v5052_v14 = vsel %vm4924_vm7, %v5051_v3, %v5050_v1  ;;  %v5706_v31 = vpack.c.bf16 %v8540_v45, %v8540_v45  ;;  %v8558_v17 = vadd.f32 %v8183_v11, %v8983_v23 }
 0x36d   :  { %v5054_v10 = vsel %vm4927_vm8, %v5053_v8, %v5052_v14  ;;  %v5711_v19 = vpack.c.bf16 %v8544_v56, %v8544_v56  ;;  %v3852_v16 = vmax.f32 %v3850_v30, %v3851_v12  ;;  %v8563_v0 = vunpack.c.l.b16 %v5710_v5  ;;  %v8989_v14 = vld [vmem:[#allocation3_spill] sm:$0xff] }
 0x36e   :  { %v3149_v24 = vcombine.high %v2953_v47, %v2953_v47  ;;  %v5148_v61 = vpack.c.b16 %v5054_v10, %v5054_v10  ;;  %v3811_v27 = vsel %vm3236_vm1, %v2953_v47, -inf  ;;  %v2974_v29 = vadd.f32 %v8231_v46, %v8185_v25  ;;  %v8988_v47 = vld [vmem:[#allocation19_spill] sm:$0xff] }
 0x36f   :  { %v8568_v38 = vunpack.c.l.b16 %v5707_v44  ;;  %v5712_v11 = vpack.c.bf16 %v8549_v9, %v8549_v9  ;;  %v3812_v32 = vrot.slane %v3811_v27, 4  ;;  %v2966_v25 = vadd.f32 %v8985_v50, %v8984_v18  ;;  %v8990_v10 = vld [vmem:[#allocation15_spill] sm:$0xff] }
 0x370   :  { %v3818_v40 = vsel %vm3236_vm1, %v3149_v24, -inf  ;;  %5180 = vst.msk [vmem:[%s8853_s3 + $0x24] sm:$0xf] %vm3236_vm1, %v5148_v61  ;;  %v3154_v60 = vcombine.high %v2974_v29, %v2974_v29  ;;  %v3881_v20 = vsel %vm3236_vm1, %v2974_v29, -inf  ;;  %v8581_v46 = vadd.f32 %v8443_v49, %v3852_v16  ;;  %v8991_v16 = vld [vmem:[#allocation42_spill] sm:$0xff] }
 0x371   :  { %v3819_v30 = vrot.slane %v3818_v40, 4  ;;  %v3813_v43 = vmax.f32 %v3811_v27, %v3812_v32  ;;  %v3882_v2 = vrot.slane %v3881_v20, 4  ;;  %v8585_v35 = vadd.f32 %v8987_v58, %v8986_v4 }
 0x372   :  { %v3888_v36 = vsel %vm3236_vm1, %v3154_v60, -inf  ;;  %v3152_v63 = vcombine.high %v2966_v25, %v2966_v25  ;;  %v3853_v12 = vsel %vm3236_vm1, %v2966_v25, -inf  ;;  %v2977_v23 = vadd.f32 %v8989_v14, %v8988_v47 }
 0x373   :  { %v3820_v13 = vmax.f32 %v3818_v40, %v3819_v30  ;;  %v3814_v3 = vrot.slane %v3813_v43, 2  ;;  %v3883_v8 = vmax.f32 %v3881_v20, %v3882_v2  ;;  %v3889_v55 = vrot.slane %v3888_v36, 4 }
 0x374   :  { %v3854_v5 = vrot.slane %v3853_v12, 4  ;;  %v3860_v44 = vsel %vm3236_vm1, %v3152_v63, -inf  ;;  %v8594_v24 = vadd.f32 %v8991_v16, %v8990_v10  ;;  %v3155_v60 = vcombine.high %v2977_v23, %v2977_v23 }
 0x375   :  { %v3821_v1 = vrot.slane %v3820_v13, 2  ;;  %v3815_v61 = vmax.f32 %v3813_v43, %v3814_v3  ;;  %v3884_v27 = vrot.slane %v3883_v8, 2  ;;  %v3890_v29 = vmax.f32 %v3888_v36, %v3889_v55 }
 0x376   :  { %v3855_v32 = vmax.f32 %v3853_v12, %v3854_v5  ;;  %v3861_v30 = vrot.slane %v3860_v44, 4  ;;  %v3895_v20 = vsel %vm3236_vm1, %v2977_v23, -inf  ;;  %v3902_v47 = vsel %vm3236_vm1, %v3155_v60, -inf }
 0x377   :  { %v3822_v40 = vmax.f32 %v3820_v13, %v3821_v1  ;;  %v3816_v18 = vrot.slane %v3815_v61, 1  ;;  %v3885_v50 = vmax.f32 %v3883_v8, %v3884_v27  ;;  %v3891_v25 = vrot.slane %v3890_v29, 2 }
 0x378   :  { %v3856_v2 = vrot.slane %v3855_v32, 2  ;;  %v3862_v58 = vmax.f32 %v3860_v44, %v3861_v30  ;;  %v3896_v63 = vrot.slane %v3895_v20, 4  ;;  %v5055_v14 = vrot.slane %v8568_v38, 7 }
 0x379   :  { %v3823_v4 = vrot.slane %v3822_v40, 1  ;;  %v3817_v43 = vmax.f32 %v3815_v61, %v3816_v18  ;;  %v3892_v3 = vmax.f32 %v3890_v29, %v3891_v25  ;;  %v3903_v5 = vrot.slane %v3902_v47, 4 }
 0x37a   :  { %v3857_v36 = vmax.f32 %v3855_v32, %v3856_v2  ;;  %v3863_v13 = vrot.slane %v3862_v58, 2  ;;  %v3897_v55 = vmax.f32 %v3895_v20, %v3896_v63  ;;  %v3886_v23 = vrot.slane %v3885_v50, 1 }
 0x37b   :  { %v3824_v12 = vmax.f32 %v3822_v40, %v3823_v4  ;;  %v4222_v1 = vadd.f32 %v8443_v49, %v3817_v43  ;;  %v3893_v8 = vrot.slane %v3892_v3, 1  ;;  %v3904_v30 = vmax.f32 %v3902_v47, %v3903_v5 }
 0x37c   :  { %v3858_v10 = vrot.slane %v3857_v36, 1  ;;  %v3864_v44 = vmax.f32 %v3862_v58, %v3863_v13  ;;  %v3898_v27 = vrot.slane %v3897_v55, 2  ;;  %v4860_v38 = vunpack.c.l.b16 %v5706_v31 }
 0x37d   :  { %v4223_v16 = vadd.f32 %v8443_v49, %v3824_v12  ;;  %v5713_v61 = vpack.c.bf16 %v8581_v46, %v8581_v46  ;;  %v5708_v29 = vpack.c.bf16 %v4222_v1, %v4222_v1  ;;  %v3905_v18 = vrot.slane %v3904_v30, 2 }
 0x37e   :  { %v3859_v32 = vmax.f32 %v3857_v36, %v3858_v10  ;;  %v3865_v60 = vrot.slane %v3864_v44, 1  ;;  %v3899_v20 = vmax.f32 %v3897_v55, %v3898_v27  ;;  %v4865_v25 = vunpack.c.l.b16 %v5711_v19 }
 0x37f   :  { %v5709_v40 = vpack.c.bf16 %v4223_v16, %v4223_v16  ;;  %v5056_v2 = vsel %vm4909_vm2, %v5055_v14, %v4860_v38  ;;  %v4866_v45 = vunpack.c.l.b16 %v5712_v11  ;;  %v4862_v31 = vunpack.c.l.b16 %v5708_v29  ;;  %v8992_v29 = vld [vmem:[#allocation22_spill] sm:$0xff] }
 0x380   :  { %v3887_v58 = vmax.f32 %v3885_v50, %v3886_v23  ;;  %v3894_v46 = vmax.f32 %v3892_v3, %v3893_v8  ;;  %v3866_v63 = vmax.f32 %v3864_v44, %v3865_v60  ;;  %v4867_v47 = vunpack.c.l.b16 %v5713_v61 }
 0x381   :  { %v4863_v4 = vunpack.c.l.b16 %v5709_v40  ;;  %v5057_v43 = vrot.slane %v4862_v31, 6  ;;  %v4228_v12 = vadd.f32 %v8443_v49, %v3859_v32  ;;  %v3900_v13 = vrot.slane %v3899_v20, 1  ;;  %v8993_v32 = vld [vmem:[#allocation21_spill] sm:$0xff] }
 0x382   :  { %v3906_v55 = vmax.f32 %v3904_v30, %v3905_v18  ;;  %v5061_v56 = vrot.slane %v8563_v0, 4  ;;  %v5063_v19 = vrot.slane %v4865_v25, 3  ;;  %v5065_v14 = vrot.slane %v4866_v45, 2  ;;  %v8994_v31 = vld [vmem:[#allocation17_spill] sm:$0xff] }
 0x383   :  { %v5059_v36 = vrot.slane %v4863_v4, 5  ;;  %v5058_v5 = vsel %vm4912_vm3, %v5057_v43, %v5056_v2  ;;  %v8618_v11 = vadd.f32 %v8443_v49, %v3887_v58  ;;  %v8621_v50 = vadd.f32 %v8443_v49, %v3894_v46 }
 0x384   :  { %v4229_v3 = vadd.f32 %v8443_v49, %v3866_v63  ;;  %v5067_v1 = vrot.slane %v4867_v47, 1  ;;  %v3153_v0 = vcombine.high %v8594_v24, %v8594_v24  ;;  %v3867_v8 = vsel %vm3236_vm1, %v8594_v24, -inf  ;;  %v8995_v47 = vld [vmem:[#allocation4_spill] sm:$0xff] }
 0x385   :  { %v5060_v9 = vsel %vm4915_vm4, %v5059_v36, %v5058_v5  ;;  %v5714_v16 = vpack.c.bf16 %v4228_v12, %v4228_v12  ;;  %v3901_v44 = vmax.f32 %v3899_v20, %v3900_v13  ;;  %v3907_v27 = vrot.slane %v3906_v55, 1 }
 0x386   :  { %v5062_v23 = vsel %vm4918_vm5, %v5061_v56, %v5060_v9  ;;  %v3868_v38 = vrot.slane %v3867_v8, 4  ;;  %v3874_v61 = vsel %vm3236_vm1, %v3153_v0, -inf  ;;  %v8634_v40 = vadd.f32 %v8993_v32, %v8992_v29  ;;  %v8998_v32 = vld [vmem:[#allocation44_spill] sm:$0xff] }
 0x387   :  { %v5064_v10 = vsel %vm4921_vm6, %v5063_v19, %v5062_v23  ;;  %v5718_v18 = vpack.c.bf16 %v8618_v11, %v8618_v11  ;;  %v5719_v24 = vpack.c.bf16 %v8621_v50, %v8621_v50  ;;  %v5715_v25 = vpack.c.bf16 %v4229_v3, %v4229_v3 }
 0x388   :  { %v5066_v30 = vsel %vm4924_vm7, %v5065_v14, %v5064_v10  ;;  %v3869_v2 = vmax.f32 %v3867_v8, %v3868_v38  ;;  %v3875_v45 = vrot.slane %v3874_v61, 4  ;;  %v2990_v4 = vadd.f32 %v8398_v54, %v8994_v31  ;;  %v8996_v8 = vld [vmem:[#allocation24_spill] sm:$0xff]  ;;  %v8997_v10 = vld [vmem:[#allocation45_spill] sm:$0xff] }
 0x389   :  { %v5068_v60 = vsel %vm4927_vm8, %v5067_v1, %v5066_v30  ;;  %v4868_v58 = vunpack.c.l.b16 %v5714_v16  ;;  %v3908_v46 = vmax.f32 %v3906_v55, %v3907_v27  ;;  %v8644_v63 = vadd.f32 %v8443_v49, %v3901_v44 }
 0x38a   :  { %v5149_v20 = vpack.c.b16 %v5068_v60, %v5068_v60  ;;  %v2982_v43 = vadd.f32 %v8311_v26, %v8995_v47  ;;  %v3870_v36 = vrot.slane %v3869_v2, 2  ;;  %v3876_v12 = vmax.f32 %v3874_v61, %v3875_v45 }
 0x38b   :  { %v3158_v13 = vcombine.high %v2990_v4, %v2990_v4  ;;  %v3937_v56 = vsel %vm3236_vm1, %v2990_v4, -inf  ;;  %v4869_v19 = vunpack.c.l.b16 %v5715_v25  ;;  %v8658_v16 = vadd.f32 %v8997_v10, %v8996_v8 }
 0x38c   :  { %5181 = vst.msk [vmem:[%s8853_s3 + $0x28] sm:$0xf] %vm3236_vm1, %v5149_v20  ;;  %v3938_v54 = vrot.slane %v3937_v56, 4  ;;  %v3156_v14 = vcombine.high %v2982_v43, %v2982_v43  ;;  %v3909_v55 = vsel %vm3236_vm1, %v2982_v43, -inf  ;;  %v3871_v5 = vmax.f32 %v3869_v2, %v3870_v36 }
 0x38d   :  { %v3877_v9 = vrot.slane %v3876_v12, 2  ;;  %v3944_v3 = vsel %vm3236_vm1, %v3158_v13, -inf  ;;  %v3910_v26 = vrot.slane %v3909_v55, 4  ;;  %v2993_v60 = vadd.f32 %v8414_v62, %v8998_v32 }
 0x38e   :  { %v3939_v1 = vmax.f32 %v3937_v56, %v3938_v54  ;;  %v3945_v23 = vrot.slane %v3944_v3, 4  ;;  %v3916_v0 = vsel %vm3236_vm1, %v3156_v14, -inf  ;;  %v3872_v44 = vrot.slane %v3871_v5, 1 }
 0x38f   :  { %v3878_v27 = vmax.f32 %v3876_v12, %v3877_v9  ;;  %v3911_v30 = vmax.f32 %v3909_v55, %v3910_v26  ;;  %v3917_v38 = vrot.slane %v3916_v0, 4  ;;  %v8664_v25 = vadd.f32 %v8334_v41, %v8276_v21 }
 0x390   :  { %v3940_v61 = vrot.slane %v3939_v1, 2  ;;  %v3946_v29 = vmax.f32 %v3944_v3, %v3945_v23  ;;  %v3873_v20 = vmax.f32 %v3871_v5, %v3872_v44  ;;  %v4235_v4 = vadd.f32 %v8443_v49, %v3908_v46 }
 0x391   :  { %v3879_v2 = vrot.slane %v3878_v27, 1  ;;  %v3912_v45 = vrot.slane %v3911_v30, 2  ;;  %v3918_v31 = vmax.f32 %v3916_v0, %v3917_v38  ;;  %v3159_v43 = vcombine.high %v2993_v60, %v2993_v60 }
 0x392   :  { %v3947_v47 = vrot.slane %v3946_v29, 2  ;;  %v3951_v36 = vsel %vm3236_vm1, %v2993_v60, -inf  ;;  %v4230_v13 = vadd.f32 %v8443_v49, %v3873_v20  ;;  %v3941_v56 = vmax.f32 %v3939_v1, %v3940_v61 }
 0x393   :  { %v3880_v12 = vmax.f32 %v3878_v27, %v3879_v2  ;;  %v3919_v54 = vrot.slane %v3918_v31, 2  ;;  %v5069_v62 = vrot.slane %v4869_v19, 7  ;;  %v3913_v14 = vmax.f32 %v3911_v30, %v3912_v45 }
 0x394   :  { %v3952_v55 = vrot.slane %v3951_v36, 4  ;;  %v3958_v21 = vsel %vm3236_vm1, %v3159_v43, -inf  ;;  %v5716_v5 = vpack.c.bf16 %v4230_v13, %v4230_v13  ;;  %v3948_v9 = vmax.f32 %v3946_v29, %v3947_v47 }
 0x395   :  { %v4231_v41 = vadd.f32 %v8443_v49, %v3880_v12  ;;  %v3920_v3 = vmax.f32 %v3918_v31, %v3919_v54  ;;  %v5720_v46 = vpack.c.bf16 %v8644_v63, %v8644_v63  ;;  %v5721_v26 = vpack.c.bf16 %v4235_v4, %v4235_v4 }
 0x396   :  { %v3953_v23 = vmax.f32 %v3951_v36, %v3952_v55  ;;  %v3959_v0 = vrot.slane %v3958_v21, 4  ;;  %v4870_v10 = vunpack.c.l.b16 %v5716_v5  ;;  %v3942_v1 = vrot.slane %v3941_v56, 1 }
 0x397   :  { %v5717_v8 = vpack.c.bf16 %v4231_v41, %v4231_v41  ;;  %v3921_v44 = vrot.slane %v3920_v3, 1  ;;  %v4872_v19 = vunpack.c.l.b16 %v5718_v18  ;;  %v4873_v27 = vunpack.c.l.b16 %v5719_v24 }
 0x398   :  { %v5070_v30 = vsel %vm4909_vm2, %v5069_v62, %v4868_v58  ;;  %v3960_v38 = vmax.f32 %v3958_v21, %v3959_v0  ;;  %v5071_v63 = vrot.slane %v4870_v10, 6  ;;  %v3949_v29 = vrot.slane %v3948_v9, 1 }
 0x399   :  { %v4871_v61 = vunpack.c.l.b16 %v5717_v8  ;;  %v3914_v32 = vrot.slane %v3913_v14, 1  ;;  %v4874_v60 = vunpack.c.l.b16 %v5720_v46  ;;  %v4875_v20 = vunpack.c.l.b16 %v5721_v26 }
 0x39a   :  { %v3954_v2 = vrot.slane %v3953_v23, 2  ;;  %v5072_v45 = vsel %vm4912_vm3, %v5071_v63, %v5070_v30  ;;  %v3943_v4 = vmax.f32 %v3941_v56, %v3942_v1  ;;  %v3922_v11 = vmax.f32 %v3920_v3, %v3921_v44 }
 0x39b   :  { %v5073_v31 = vrot.slane %v4871_v61, 5  ;;  %v5075_v18 = vrot.slane %v4872_v19, 4  ;;  %v5077_v47 = vrot.slane %v4873_v27, 3  ;;  %v3961_v43 = vrot.slane %v3960_v38, 2  ;;  %v8999_v19 = vld [vmem:[#allocation26_spill] sm:$0xff] }
 0x39c   :  { %v3950_v24 = vmax.f32 %v3948_v9, %v3949_v29  ;;  %v3915_v58 = vmax.f32 %v3913_v14, %v3914_v32  ;;  %v3157_v36 = vcombine.high %v8664_v25, %v8664_v25  ;;  %v5079_v12 = vrot.slane %v4874_v60, 2 }
 0x39d   :  { %v5074_v50 = vsel %vm4915_vm4, %v5073_v31, %v5072_v45  ;;  %v5081_v13 = vrot.slane %v4875_v20, 1  ;;  %v3955_v62 = vmax.f32 %v3953_v23, %v3954_v2  ;;  %v8687_v56 = vadd.f32 %v8443_v49, %v3943_v4  ;;  %v9001_v2 = vld [vmem:[#allocation27_spill] sm:$0xff] }
 0x39e   :  { %v5076_v54 = vsel %vm4918_vm5, %v5075_v18, %v5074_v50  ;;  %v4237_v21 = vadd.f32 %v8443_v49, %v3922_v11  ;;  %v3923_v41 = vsel %vm3236_vm1, %v8664_v25, -inf  ;;  %v3962_v5 = vmax.f32 %v3960_v38, %v3961_v43 }
 0x39f   :  { %v5078_v55 = vsel %vm4921_vm6, %v5077_v47, %v5076_v54  ;;  %v3924_v9 = vrot.slane %v3923_v41, 4  ;;  %v8695_v46 = vadd.f32 %v8443_v49, %v3950_v24  ;;  %v4236_v26 = vadd.f32 %v8443_v49, %v3915_v58 }
 0x3a0   :  { %v5080_v14 = vsel %vm4924_vm7, %v5079_v12, %v5078_v55  ;;  %v3930_v23 = vsel %vm3236_vm1, %v3157_v36, -inf  ;;  %v3956_v8 = vrot.slane %v3955_v62, 1  ;;  %v5726_v25 = vpack.c.bf16 %v8687_v56, %v8687_v56 }
 0x3a1   :  { %v5082_v3 = vsel %vm4927_vm8, %v5081_v13, %v5080_v14  ;;  %v3925_v10 = vmax.f32 %v3923_v41, %v3924_v9  ;;  %v3931_v1 = vrot.slane %v3930_v23, 4  ;;  %v5723_v44 = vpack.c.bf16 %v4237_v21, %v4237_v21  ;;  %v9002_v13 = vld [vmem:[#allocation46_spill] sm:$0xff] }
 0x3a2   :  { %v5150_v0 = vpack.c.b16 %v5082_v3, %v5082_v3  ;;  %v8703_v27 = vadd.f32 %v8323_v6, %v8999_v19  ;;  %v3006_v30 = vadd.f32 %v8558_v17, %v8342_v39  ;;  %v3963_v38 = vrot.slane %v3962_v5, 1  ;;  %v9000_v6 = vld [vmem:[#allocation28_spill] sm:$0xff] }
 0x3a3   :  { %v3926_v61 = vrot.slane %v3925_v10, 2  ;;  %v3932_v63 = vmax.f32 %v3930_v23, %v3931_v1  ;;  %v2998_v29 = vadd.f32 %v8483_v53, %v8345_v15  ;;  %v5722_v32 = vpack.c.bf16 %v4236_v26, %v4236_v26 }
 0x3a4   :  { %5182 = vst.msk [vmem:[%s8853_s3 + $0x2c] sm:$0xf] %vm3236_vm1, %v5150_v0  ;;  %v3162_v60 = vcombine.high %v3006_v30, %v3006_v30  ;;  %v3993_v20 = vsel %vm3236_vm1, %v3006_v30, -inf  ;;  %v8716_v45 = vadd.f32 %v9001_v2, %v9000_v6  ;;  %v3957_v39 = vmax.f32 %v3955_v62, %v3956_v8 }
 0x3a5   :  { %v3927_v17 = vmax.f32 %v3925_v10, %v3926_v61  ;;  %v3933_v31 = vrot.slane %v3932_v63, 2  ;;  %v3994_v4 = vrot.slane %v3993_v20, 4  ;;  %v5727_v11 = vpack.c.bf16 %v8695_v46, %v8695_v46 }
 0x3a6   :  { %v4000_v18 = vsel %vm3236_vm1, %v3162_v60, -inf  ;;  %v3160_v47 = vcombine.high %v2998_v29, %v2998_v29  ;;  %v3965_v15 = vsel %vm3236_vm1, %v2998_v29, -inf  ;;  %v4877_v53 = vunpack.c.l.b16 %v5723_v44 }
 0x3a7   :  { %v3964_v43 = vmax.f32 %v3962_v5, %v3963_v38  ;;  %v3928_v50 = vrot.slane %v3927_v17, 1  ;;  %v3934_v24 = vmax.f32 %v3932_v63, %v3933_v31  ;;  %v4001_v58 = vrot.slane %v4000_v18, 4 }
 0x3a8   :  { %v3966_v36 = vrot.slane %v3965_v15, 4  ;;  %v3972_v12 = vsel %vm3236_vm1, %v3160_v47, -inf  ;;  %v3009_v54 = vadd.f32 %v8585_v35, %v9002_v13  ;;  %v4242_v62 = vadd.f32 %v8443_v49, %v3957_v39 }
 0x3a9   :  { %v3929_v55 = vmax.f32 %v3927_v17, %v3928_v50  ;;  %v3935_v56 = vrot.slane %v3934_v24, 1  ;;  %v3995_v21 = vmax.f32 %v3993_v20, %v3994_v4  ;;  %v3973_v14 = vrot.slane %v3972_v12, 4 }
 0x3aa   :  { %v3967_v41 = vmax.f32 %v3965_v15, %v3966_v36  ;;  %v3163_v9 = vcombine.high %v3009_v54, %v3009_v54  ;;  %v4007_v3 = vsel %vm3236_vm1, %v3009_v54, -inf  ;;  %v5083_v5 = vrot.slane %v4877_v53, 7 }
 0x3ab   :  { %v4243_v46 = vadd.f32 %v8443_v49, %v3964_v43  ;;  %v3936_v26 = vmax.f32 %v3934_v24, %v3935_v56  ;;  %v4238_v23 = vadd.f32 %v8443_v49, %v3929_v55  ;;  %v4002_v0 = vmax.f32 %v4000_v18, %v4001_v58 }
 0x3ac   :  { %v3974_v8 = vmax.f32 %v3972_v12, %v3973_v14  ;;  %v4008_v10 = vrot.slane %v4007_v3, 4  ;;  %v4014_v35 = vsel %vm3236_vm1, %v3163_v9, -inf  ;;  %v4876_v1 = vunpack.c.l.b16 %v5722_v32  ;;  %v9003_v14 = vld [vmem:[#allocation23_spill] sm:$0xff] }
 0x3ad   :  { %v5728_v44 = vpack.c.bf16 %v4242_v62, %v4242_v62  ;;  %v4239_v19 = vadd.f32 %v8443_v49, %v3936_v26  ;;  %v5724_v30 = vpack.c.bf16 %v4238_v23, %v4238_v23  ;;  %v3996_v38 = vrot.slane %v3995_v21, 2 }
 0x3ae   :  { %v3968_v61 = vrot.slane %v3967_v41, 2  ;;  %v3975_v63 = vrot.slane %v3974_v8, 2  ;;  %v4015_v29 = vrot.slane %v4014_v35, 4  ;;  %v5729_v60 = vpack.c.bf16 %v4243_v46, %v4243_v46 }
 0x3af   :  { %v5725_v20 = vpack.c.bf16 %v4239_v19, %v4239_v19  ;;  %v4878_v6 = vunpack.c.l.b16 %v5724_v30  ;;  %v4009_v2 = vmax.f32 %v4007_v3, %v4008_v10  ;;  %v4880_v39 = vunpack.c.l.b16 %v5726_v25 }
 0x3b0   :  { %v5084_v17 = vsel %vm4909_vm2, %v5083_v5, %v4876_v1  ;;  %v4003_v31 = vrot.slane %v4002_v0, 2  ;;  %v3976_v4 = vmax.f32 %v3974_v8, %v3975_v63  ;;  %v4881_v18 = vunpack.c.l.b16 %v5727_v11 }
 0x3b1   :  { %v4879_v47 = vunpack.c.l.b16 %v5725_v20  ;;  %v5085_v32 = vrot.slane %v4878_v6, 6  ;;  %v4016_v15 = vmax.f32 %v4014_v35, %v4015_v29  ;;  %v4882_v53 = vunpack.c.l.b16 %v5728_v44  ;;  %v9004_v29 = vld [vmem:[#allocation30_spill] sm:$0xff] }
 0x3b2   :  { %v3997_v43 = vmax.f32 %v3995_v21, %v3996_v38  ;;  %v3969_v50 = vmax.f32 %v3967_v41, %v3968_v61  ;;  %v4883_v24 = vunpack.c.l.b16 %v5729_v60  ;;  %v4010_v12 = vrot.slane %v4009_v2, 2 }
 0x3b3   :  { %v5086_v58 = vsel %vm4912_vm3, %v5085_v32, %v5084_v17  ;;  %v5087_v36 = vrot.slane %v4879_v47, 5  ;;  %v5089_v13 = vrot.slane %v4880_v39, 4  ;;  %v4004_v54 = vmax.f32 %v4002_v0, %v4003_v31 }
 0x3b4   :  { %v3977_v62 = vrot.slane %v3976_v4, 1  ;;  %v5091_v25 = vrot.slane %v4881_v18, 3  ;;  %v4017_v56 = vrot.slane %v4016_v15, 2  ;;  %v3001_v11 = vadd.f32 %v8499_v52, %v9003_v14  ;;  %v9005_v18 = vld [vmem:[#allocation32_spill] sm:$0xff] }
 0x3b5   :  { %v5088_v55 = vsel %vm4915_vm4, %v5087_v36, %v5086_v58  ;;  %v5093_v9 = vrot.slane %v4882_v53, 2  ;;  %v3998_v21 = vrot.slane %v3997_v43, 1  ;;  %v3970_v41 = vrot.slane %v3969_v50, 1 }
 0x3b6   :  { %v5090_v3 = vsel %vm4918_vm5, %v5089_v13, %v5088_v55  ;;  %v5095_v5 = vrot.slane %v4883_v24, 1  ;;  %v4011_v26 = vmax.f32 %v4009_v2, %v4010_v12  ;;  %v4005_v0 = vrot.slane %v4004_v54, 1 }
 0x3b7   :  { %v5092_v46 = vsel %vm4921_vm6, %v5091_v25, %v5090_v3  ;;  %v3978_v8 = vmax.f32 %v3976_v4, %v3977_v62  ;;  %v4018_v35 = vmax.f32 %v4016_v15, %v4017_v56  ;;  %v3161_v1 = vcombine.high %v3001_v11, %v3001_v11 }
 0x3b8   :  { %v5094_v23 = vsel %vm4924_vm7, %v5093_v9, %v5092_v46  ;;  %v3999_v19 = vmax.f32 %v3997_v43, %v3998_v21  ;;  %v3971_v52 = vmax.f32 %v3969_v50, %v3970_v41  ;;  %v3979_v30 = vsel %vm3236_vm1, %v3001_v11, -inf }
 0x3b9   :  { %v5096_v10 = vsel %vm4927_vm8, %v5095_v5, %v5094_v23  ;;  %v4012_v38 = vrot.slane %v4011_v26, 1  ;;  %v3980_v61 = vrot.slane %v3979_v30, 4  ;;  %v3986_v63 = vsel %vm3236_vm1, %v3161_v1, -inf }
 0x3ba   :  { %v5151_v44 = vpack.c.b16 %v5096_v10, %v5096_v10  ;;  %v8744_v60 = vadd.f32 %v8418_v33, %v9004_v29  ;;  %v4006_v20 = vmax.f32 %v4004_v54, %v4005_v0  ;;  %v4245_v6 = vadd.f32 %v8443_v49, %v3978_v8 }
 0x3bb   :  { %v3987_v2 = vrot.slane %v3986_v63, 4  ;;  %v3022_v39 = vadd.f32 %v8703_v27, %v8420_v37  ;;  %v4019_v17 = vrot.slane %v4018_v35, 1  ;;  %v3981_v31 = vmax.f32 %v3979_v30, %v3980_v61 }
 0x3bc   :  { %5183 = vst.msk [vmem:[%s8853_s3 + $0x30] sm:$0xf] %vm3236_vm1, %v5151_v44  ;;  %v3014_v4 = vadd.f32 %v8634_v40, %v8422_v57  ;;  %v8757_v33 = vadd.f32 %v8427_v22, %v9005_v18  ;;  %v4248_v47 = vadd.f32 %v8443_v49, %v3999_v19  ;;  %v4244_v32 = vadd.f32 %v8443_v49, %v3971_v52 }
 0x3bd   :  { %v3988_v15 = vmax.f32 %v3986_v63, %v3987_v2  ;;  %v3166_v53 = vcombine.high %v3022_v39, %v3022_v39  ;;  %v4013_v43 = vmax.f32 %v4011_v26, %v4012_v38  ;;  %v3982_v50 = vrot.slane %v3981_v31, 2 }
 0x3be   :  { %v4049_v24 = vsel %vm3236_vm1, %v3022_v39, -inf  ;;  %v3164_v37 = vcombine.high %v3014_v4, %v3014_v4  ;;  %v4249_v27 = vadd.f32 %v8443_v49, %v4006_v20  ;;  %v5731_v58 = vpack.c.bf16 %v4245_v6, %v4245_v6 }
 0x3bf   :  { %v3989_v36 = vrot.slane %v3988_v15, 2  ;;  %v4021_v57 = vsel %vm3236_vm1, %v3014_v4, -inf  ;;  %v4020_v40 = vmax.f32 %v4018_v35, %v4019_v17  ;;  %v3983_v22 = vmax.f32 %v3981_v31, %v3982_v50 }
 0x3c0   :  { %v4050_v12 = vrot.slane %v4049_v24, 4  ;;  %v4056_v13 = vsel %vm3236_vm1, %v3166_v53, -inf  ;;  %v4022_v62 = vrot.slane %v4021_v57, 4  ;;  %v4028_v25 = vsel %vm3236_vm1, %v3164_v37, -inf }
 0x3c1   :  { %v3990_v54 = vmax.f32 %v3988_v15, %v3989_v36  ;;  %v3025_v55 = vadd.f32 %v8716_v45, %v8429_v51  ;;  %v5730_v56 = vpack.c.bf16 %v4244_v32, %v4244_v32  ;;  %v4250_v14 = vadd.f32 %v8443_v49, %v4013_v43 }
 0x3c2   :  { %v3984_v11 = vrot.slane %v3983_v22, 1  ;;  %v4029_v9 = vrot.slane %v4028_v25, 4  ;;  %v4885_v3 = vunpack.c.l.b16 %v5731_v58  ;;  %v4057_v41 = vrot.slane %v4056_v13, 4 }
 0x3c3   :  { %v3991_v21 = vrot.slane %v3990_v54, 1  ;;  %v3167_v5 = vcombine.high %v3025_v55, %v3025_v55  ;;  %v4251_v46 = vadd.f32 %v8443_v49, %v4020_v40  ;;  %v4063_v0 = vsel %vm3236_vm1, %v3025_v55, -inf }
 0x3c4   :  { %v3985_v26 = vmax.f32 %v3983_v22, %v3984_v11  ;;  %v4030_v23 = vmax.f32 %v4028_v25, %v4029_v9  ;;  %v4051_v10 = vmax.f32 %v4049_v24, %v4050_v12  ;;  %v4023_v35 = vmax.f32 %v4021_v57, %v4022_v62 }
 0x3c5   :  { %v3992_v8 = vmax.f32 %v3990_v54, %v3991_v21  ;;  %v4070_v51 = vsel %vm3236_vm1, %v3167_v5, -inf  ;;  %v5734_v45 = vpack.c.bf16 %v4248_v47, %v4248_v47  ;;  %v5735_v1 = vpack.c.bf16 %v4249_v27, %v4249_v27 }
 0x3c6   :  { %v4246_v44 = vadd.f32 %v8443_v49, %v3985_v26  ;;  %v4031_v19 = vrot.slane %v4030_v23, 2  ;;  %v5097_v52 = vrot.slane %v4885_v3, 7  ;;  %v4058_v38 = vmax.f32 %v4056_v13, %v4057_v41 }
 0x3c7   :  { %v4247_v30 = vadd.f32 %v8443_v49, %v3992_v8  ;;  %v4064_v61 = vrot.slane %v4063_v0, 4  ;;  %v4884_v63 = vunpack.c.l.b16 %v5730_v56  ;;  %v5736_v29 = vpack.c.bf16 %v4250_v14, %v4250_v14 }
 0x3c8   :  { %v5732_v20 = vpack.c.bf16 %v4246_v44, %v4246_v44  ;;  %v4071_v6 = vrot.slane %v4070_v51, 4  ;;  %v5737_v2 = vpack.c.bf16 %v4251_v46, %v4251_v46  ;;  %v4052_v17 = vrot.slane %v4051_v10, 2  ;;  %v9006_v46 = vld [vmem:[#allocation5_spill] sm:$0xff] }
 0x3c9   :  { %v5733_v39 = vpack.c.bf16 %v4247_v30, %v4247_v30  ;;  %v4024_v31 = vrot.slane %v4023_v35, 2  ;;  %v4888_v4 = vunpack.c.l.b16 %v5734_v45  ;;  %v4889_v18 = vunpack.c.l.b16 %v5735_v1 }
 0x3ca   :  { %v4886_v47 = vunpack.c.l.b16 %v5732_v20  ;;  %v4032_v32 = vmax.f32 %v4030_v23, %v4031_v19  ;;  %v5098_v15 = vsel %vm4909_vm2, %v5097_v52, %v4884_v63  ;;  %v4059_v43 = vrot.slane %v4058_v38, 2 }
 0x3cb   :  { %v4887_v53 = vunpack.c.l.b16 %v5733_v39  ;;  %v4065_v50 = vmax.f32 %v4063_v0, %v4064_v61  ;;  %v4890_v49 = vunpack.c.l.b16 %v5736_v29  ;;  %v4072_v37 = vmax.f32 %v4070_v51, %v4071_v6  ;;  %v9008_v29 = vld [vmem:[#allocation36_spill] sm:$0xff] }
 0x3cc   :  { %v5099_v24 = vrot.slane %v4886_v47, 6  ;;  %v4891_v27 = vunpack.c.l.b16 %v5737_v2  ;;  %v4053_v36 = vmax.f32 %v4051_v10, %v4052_v17  ;;  %v4025_v57 = vmax.f32 %v4023_v35, %v4024_v31  ;;  %v9007_v10 = vld [vmem:[#allocation34_spill] sm:$0xff] }
 0x3cd   :  { %v5101_v58 = vrot.slane %v4887_v53, 5  ;;  %v5103_v40 = vrot.slane %v4888_v4, 4  ;;  %v4033_v12 = vrot.slane %v4032_v32, 1  ;;  %v5105_v13 = vrot.slane %v4889_v18, 3 }
 0x3ce   :  { %v5100_v22 = vsel %vm4912_vm3, %v5099_v24, %v5098_v15  ;;  %v4060_v62 = vmax.f32 %v4058_v38, %v4059_v43  ;;  %v4066_v25 = vrot.slane %v4065_v50, 2  ;;  %v5107_v55 = vrot.slane %v4890_v49, 2 }
 0x3cf   :  { %v5102_v54 = vsel %vm4915_vm4, %v5101_v58, %v5100_v22  ;;  %v4073_v14 = vrot.slane %v4072_v37, 2  ;;  %v5109_v11 = vrot.slane %v4891_v27, 1  ;;  %v4054_v3 = vrot.slane %v4053_v36, 1 }
 0x3d0   :  { %v5104_v56 = vsel %vm4918_vm5, %v5103_v40, %v5102_v54  ;;  %v4026_v21 = vrot.slane %v4025_v57, 1  ;;  %v4034_v5 = vmax.f32 %v4032_v32, %v4033_v12  ;;  %v3017_v26 = vadd.f32 %v8658_v16, %v9006_v46  ;;  %v8794_v16 = vld [vmem:[%s8852_s2] ss:$0 sm:$0xff] }
 0x3d1   :  { %v5106_v9 = vsel %vm4921_vm6, %v5105_v13, %v5104_v56  ;;  %v4061_v0 = vrot.slane %v4060_v62, 1  ;;  %v4067_v8 = vmax.f32 %v4065_v50, %v4066_v25  ;;  %v5950_v35 = vadd.f32 %v8506_v28, %v9007_v10 }
 0x3d2   :  { %v5108_v41 = vsel %vm4924_vm7, %v5107_v55, %v5106_v9  ;;  %v4074_v45 = vmax.f32 %v4072_v37, %v4073_v14  ;;  %v3165_v1 = vcombine.high %v3017_v26, %v3017_v26  ;;  %v4035_v44 = vsel %vm3236_vm1, %v3017_v26, -inf }
 0x3d3   :  { %v5110_v23 = vsel %vm4927_vm8, %v5109_v11, %v5108_v41  ;;  %v4055_v19 = vmax.f32 %v4053_v36, %v4054_v3  ;;  %v4027_v52 = vmax.f32 %v4025_v57, %v4026_v21  ;;  %v4036_v30 = vrot.slane %v4035_v44, 4 }
 0x3d4   :  { %v5152_v51 = vpack.c.b16 %v5110_v23, %v5110_v23  ;;  %v3038_v38 = vadd.f32 %v5950_v35, %v8508_v59  ;;  %v4253_v28 = vadd.f32 %v8794_v16, %v4034_v5  ;;  %v4042_v61 = vsel %vm3236_vm1, %v3165_v1, -inf }
 0x3d5   :  { %v3030_v63 = vadd.f32 %v8744_v60, %v8511_v34  ;;  %v5951_v59 = vadd.f32 %v8514_v48, %v9008_v29  ;;  %v4068_v20 = vrot.slane %v4067_v8, 1  ;;  %v4037_v6 = vmax.f32 %v4035_v44, %v4036_v30 }
 0x3d6   :  { %5184 = vst.msk [vmem:[%s8853_s3 + $0x34] sm:$0xf] %vm3236_vm1, %v5152_v51  ;;  %v4043_v2 = vrot.slane %v4042_v61, 4  ;;  %v4062_v39 = vmax.f32 %v4060_v62, %v4061_v0  ;;  %v4075_v17 = vrot.slane %v4074_v45, 1  ;;  %v4256_v4 = vadd.f32 %v8794_v16, %v4055_v19 }
 0x3d7   :  { %v3168_v31 = vcombine.high %v3030_v63, %v3030_v63  ;;  %v4252_v18 = vadd.f32 %v8794_v16, %v4027_v52  ;;  %v4038_v47 = vrot.slane %v4037_v6, 2  ;;  %v5739_v15 = vpack.c.bf16 %v4253_v28, %v4253_v28 }
 0x3d8   :  { %v4044_v32 = vmax.f32 %v4042_v61, %v4043_v2  ;;  %v3170_v53 = vcombine.high %v3038_v38, %v3038_v38  ;;  %v3041_v34 = vadd.f32 %v5951_v59, %v8516_v42  ;;  %v4069_v60 = vmax.f32 %v4067_v8, %v4068_v20 }
 0x3d9   :  { %v4084_v43 = vsel %vm3236_vm1, %v3168_v31, -inf  ;;  %v4039_v48 = vmax.f32 %v4037_v6, %v4038_v47  ;;  %v4077_v49 = vsel %vm3236_vm1, %v3030_v63, -inf  ;;  %v4257_v24 = vadd.f32 %v8794_v16, %v4062_v39 }
 0x3da   :  { %v4045_v50 = vrot.slane %v4044_v32, 2  ;;  %v4076_v37 = vmax.f32 %v4074_v45, %v4075_v17  ;;  %v4085_v27 = vrot.slane %v4084_v43, 4  ;;  %v3171_v58 = vcombine.high %v3041_v34, %v3041_v34 }
 0x3db   :  { %v5738_v36 = vpack.c.bf16 %v4252_v18, %v4252_v18  ;;  %v4040_v57 = vrot.slane %v4039_v48, 1  ;;  %v4105_v22 = vsel %vm3236_vm1, %v3038_v38, -inf  ;;  %v4893_v12 = vunpack.c.l.b16 %v5739_v15 }
 0x3dc   :  { %v4046_v40 = vmax.f32 %v4044_v32, %v4045_v50  ;;  %v4112_v13 = vsel %vm3236_vm1, %v3170_v53, -inf  ;;  %v4078_v54 = vrot.slane %v4077_v49, 4  ;;  %v4086_v42 = vmax.f32 %v4084_v43, %v4085_v27 }
 0x3dd   :  { %v4258_v62 = vadd.f32 %v8794_v16, %v4069_v60  ;;  %v4041_v25 = vmax.f32 %v4039_v48, %v4040_v57  ;;  %v4119_v56 = vsel %vm3236_vm1, %v3041_v34, -inf  ;;  %v4259_v14 = vadd.f32 %v8794_v16, %v4076_v37 }
 0x3de   :  { %v4047_v55 = vrot.slane %v4046_v40, 1  ;;  %v4106_v11 = vrot.slane %v4105_v22, 4  ;;  %v4087_v9 = vrot.slane %v4086_v42, 2  ;;  %v4126_v3 = vsel %vm3236_vm1, %v3171_v58, -inf }
 0x3df   :  { %v5742_v21 = vpack.c.bf16 %v4256_v4, %v4256_v4  ;;  %v4254_v5 = vadd.f32 %v8794_v16, %v4041_v25  ;;  %v4113_v46 = vrot.slane %v4112_v13, 4  ;;  %v5743_v26 = vpack.c.bf16 %v4257_v24, %v4257_v24 }
 0x3e0   :  { %v4048_v41 = vmax.f32 %v4046_v40, %v4047_v55  ;;  %v5111_v23 = vrot.slane %v4893_v12, 7  ;;  %v4079_v0 = vmax.f32 %v4077_v49, %v4078_v54  ;;  %v4120_v8 = vrot.slane %v4119_v56, 4 }
 0x3e1   :  { %v5744_v10 = vpack.c.bf16 %v4258_v62, %v4258_v62  ;;  %v5740_v51 = vpack.c.bf16 %v4254_v5, %v4254_v5  ;;  %v4127_v45 = vrot.slane %v4126_v3, 4  ;;  %v4892_v1 = vunpack.c.l.b16 %v5738_v36 }
 0x3e2   :  { %v4255_v35 = vadd.f32 %v8794_v16, %v4048_v41  ;;  %v5745_v44 = vpack.c.bf16 %v4259_v14, %v4259_v14  ;;  %v4107_v19 = vmax.f32 %v4105_v22, %v4106_v11  ;;  %v4088_v52 = vmax.f32 %v4086_v42, %v4087_v9 }
 0x3e3   :  { %v4896_v30 = vunpack.c.l.b16 %v5742_v21  ;;  %v4894_v28 = vunpack.c.l.b16 %v5740_v51  ;;  %v4114_v61 = vmax.f32 %v4112_v13, %v4113_v46  ;;  %v4897_v63 = vunpack.c.l.b16 %v5743_v26 }
 0x3e4   :  { %v5741_v38 = vpack.c.bf16 %v4255_v35, %v4255_v35  ;;  %v5112_v29 = vsel %vm4909_vm2, %v5111_v23, %v4892_v1  ;;  %v4080_v59 = vrot.slane %v4079_v0, 2  ;;  %v4121_v20 = vmax.f32 %v4119_v56, %v4120_v8 }
 0x3e5   :  { %v4898_v6 = vunpack.c.l.b16 %v5744_v10  ;;  %v5113_v39 = vrot.slane %v4894_v28, 6  ;;  %v4128_v17 = vmax.f32 %v4126_v3, %v4127_v45  ;;  %v4899_v31 = vunpack.c.l.b16 %v5745_v44 }
 0x3e6   :  { %v4895_v2 = vunpack.c.l.b16 %v5741_v38  ;;  %v4108_v4 = vrot.slane %v4107_v19, 2  ;;  %v4089_v18 = vrot.slane %v4088_v52, 1  ;;  %v4115_v15 = vrot.slane %v4114_v61, 2 }
 0x3e7   :  { %v5114_v47 = vsel %vm4912_vm3, %v5113_v39, %v5112_v29  ;;  %v5117_v53 = vrot.slane %v4896_v30, 4  ;;  %v5119_v43 = vrot.slane %v4897_v63, 3  ;;  %v4081_v34 = vmax.f32 %v4079_v0, %v4080_v59 }
 0x3e8   :  { %v5115_v32 = vrot.slane %v4895_v2, 5  ;;  %v4122_v60 = vrot.slane %v4121_v20, 2  ;;  %v5121_v48 = vrot.slane %v4898_v6, 2  ;;  %v4129_v49 = vrot.slane %v4128_v17, 2 }
 0x3e9   :  { %v3033_v24 = vadd.f32 %v8757_v33, %v8519_v7  ;;  %v5123_v37 = vrot.slane %v4899_v31, 1  ;;  %v4109_v58 = vmax.f32 %v4107_v19, %v4108_v4  ;;  %v4090_v36 = vmax.f32 %v4088_v52, %v4089_v18 }
 0x3ea   :  { %v5116_v50 = vsel %vm4915_vm4, %v5115_v32, %v5114_v47  ;;  %v4116_v40 = vmax.f32 %v4114_v61, %v4115_v15  ;;  %v4082_v54 = vrot.slane %v4081_v34, 1  ;;  %v4123_v42 = vmax.f32 %v4121_v20, %v4122_v60 }
 0x3eb   :  { %v5118_v27 = vsel %vm4918_vm5, %v5117_v53, %v5116_v50  ;;  %v3169_v22 = vcombine.high %v3033_v24, %v3033_v24  ;;  %v4091_v12 = vsel %vm3236_vm1, %v3033_v24, -inf  ;;  %v4130_v25 = vmax.f32 %v4128_v17, %v4129_v49 }
 0x3ec   :  { %v5120_v57 = vsel %vm4921_vm6, %v5119_v43, %v5118_v27  ;;  %v4092_v55 = vrot.slane %v4091_v12, 4  ;;  %v4110_v56 = vrot.slane %v4109_v58, 1  ;;  %v4261_v14 = vadd.f32 %v8794_v16, %v4090_v36 }
 0x3ed   :  { %v5122_v13 = vsel %vm4924_vm7, %v5121_v48, %v5120_v57  ;;  %v4098_v7 = vsel %vm3236_vm1, %v3169_v22, -inf  ;;  %v4117_v11 = vrot.slane %v4116_v40, 1  ;;  %v4083_v21 = vmax.f32 %v4081_v34, %v4082_v54 }
 0x3ee   :  { %v5124_v62 = vsel %vm4927_vm8, %v5123_v37, %v5122_v13  ;;  %v4093_v9 = vmax.f32 %v4091_v12, %v4092_v55  ;;  %v4099_v3 = vrot.slane %v4098_v7, 4  ;;  %v4124_v41 = vrot.slane %v4123_v42, 1 }
 0x3ef   :  { %v5153_v33 = vpack.c.b16 %v5124_v62, %v5124_v62  ;;  %v4131_v5 = vrot.slane %v4130_v25, 1  ;;  %v4111_v23 = vmax.f32 %v4109_v58, %v4110_v56  ;;  %v5747_v0 = vpack.c.bf16 %v4261_v14, %v4261_v14 }
 0x3f0   :  { %v4094_v46 = vrot.slane %v4093_v9, 2  ;;  %v4100_v26 = vmax.f32 %v4098_v7, %v4099_v3  ;;  %v4118_v8 = vmax.f32 %v4116_v40, %v4117_v11  ;;  %v4260_v51 = vadd.f32 %v8794_v16, %v4083_v21 }
 0x3f1   :  { %5185 = vst.msk [vmem:[%s8853_s3 + $0x38] sm:$0xf] %vm3236_vm1, %v5153_v33  ;;  %v4125_v45 = vmax.f32 %v4123_v42, %v4124_v41  ;;  %v4132_v1 = vmax.f32 %v4130_v25, %v4131_v5  ;;  %v4264_v52 = vadd.f32 %v8794_v16, %v4111_v23  ;;  %v4901_v30 = vunpack.c.l.b16 %v5747_v0 }
 0x3f2   :  { %v4095_v10 = vmax.f32 %v4093_v9, %v4094_v46  ;;  %v4101_v35 = vrot.slane %v4100_v26, 2  ;;  %v4265_v38 = vadd.f32 %v8794_v16, %v4118_v8  ;;  %v5746_v63 = vpack.c.bf16 %v4260_v51, %v4260_v51 }
 0x3f3   :  { %v4266_v29 = vadd.f32 %v8794_v16, %v4125_v45  ;;  %v4267_v59 = vadd.f32 %v8794_v16, %v4132_v1  ;;  %v5750_v2 = vpack.c.bf16 %v4264_v52, %v4264_v52  ;;  %v5125_v39 = vrot.slane %v4901_v30, 7 }
 0x3f4   :  { %v4096_v44 = vrot.slane %v4095_v10, 1  ;;  %v4102_v19 = vmax.f32 %v4100_v26, %v4101_v35  ;;  %v5751_v17 = vpack.c.bf16 %v4265_v38, %v4265_v38  ;;  %v4900_v18 = vunpack.c.l.b16 %v5746_v63 }
 0x3f5   :  { %v5752_v47 = vpack.c.bf16 %v4266_v29, %v4266_v29  ;;  %v5753_v32 = vpack.c.bf16 %v4267_v59, %v4267_v59  ;;  %v4904_v43 = vunpack.c.l.b16 %v5750_v2 }
 0x3f6   :  { %v4097_v28 = vmax.f32 %v4095_v10, %v4096_v44  ;;  %v4103_v61 = vrot.slane %v4102_v19, 1  ;;  %v5126_v34 = vsel %vm4909_vm2, %v5125_v39, %v4900_v18  ;;  %v4905_v60 = vunpack.c.l.b16 %v5751_v17 }
 0x3f7   :  { %v4906_v49 = vunpack.c.l.b16 %v5752_v47  ;;  %v4907_v24 = vunpack.c.l.b16 %v5753_v32  ;;  %v5131_v58 = vrot.slane %v4904_v43, 4 }
 0x3f8   :  { %v4104_v20 = vmax.f32 %v4102_v19, %v4103_v61  ;;  %v4262_v6 = vadd.f32 %v8794_v16, %v4097_v28  ;;  %v5133_v36 = vrot.slane %v4905_v60, 3 }
 0x3f9   :  { %v5135_v57 = vrot.slane %v4906_v49, 2  ;;  %v5137_v22 = vrot.slane %v4907_v24, 1 }
 0x3fa   :  { %v4263_v31 = vadd.f32 %v8794_v16, %v4104_v20  ;;  %v5748_v4 = vpack.c.bf16 %v4262_v6, %v4262_v6 }
 0x3fc   :  { %v5749_v15 = vpack.c.bf16 %v4263_v31, %v4263_v31  ;;  %v4902_v53 = vunpack.c.l.b16 %v5748_v4 }
 0x3fe   :  { %v4903_v48 = vunpack.c.l.b16 %v5749_v15  ;;  %v5127_v50 = vrot.slane %v4902_v53, 6 }
 0x400   :  { %v5128_v37 = vsel %vm4912_vm3, %v5127_v50, %v5126_v34  ;;  %v5129_v27 = vrot.slane %v4903_v48, 5 }
 0x402   :  { %v5130_v16 = vsel %vm4915_vm4, %v5129_v27, %v5128_v37 }
 0x403   :  { %v5132_v40 = vsel %vm4918_vm5, %v5131_v58, %v5130_v16 }
 0x404   :  { %v5134_v12 = vsel %vm4921_vm6, %v5133_v36, %v5132_v40 }
 0x405   :  { %v5136_v13 = vsel %vm4924_vm7, %v5135_v57, %v5134_v12 }
 0x406   :  { %v5138_v54 = vsel %vm4927_vm8, %v5137_v22, %v5136_v13 }
 0x407   :  { %v5154_v42 = vpack.c.b16 %v5138_v54, %v5138_v54 }
 0x409   :  { %5186 = vst.msk [vmem:[%s8853_s3 + $0x3c] sm:$0xf] %vm3236_vm1, %v5154_v42 }

// kernel: cifar_net_forward.6
= control target key start
LH: loop header
LB: loop body
LE: loop exit
PB: predicated region body
PF: predicated region fallthrough
CT: control target
= control target key end

     0   :  { %vm759_vm0 = vcmask 261120   ;;  %vm1220_vm1 = vcmask 519168   ;;  %vm1645_vm2 = vcmask 1041409   ;;  %vm1648_vm3 = vcmask 1042434   ;;  %s2885_s1 = inlined_call_operand.vmem [shape: bf16[800,64], index: 1, kind: input, shape index: {}]   ;;  %s2886_s0 = inlined_call_operand.vmem [shape: bf16[128,800], index: 0, kind: input, shape index: {}]   ;;  %s2887_s2 = inlined_call_operand.vmem [shape: f32[1,64], index: 2, kind: input, shape index: {}]   ;;  %s2888_s3 = inlined_call_operand.vmem [shape: bf16[32,64], index: 3, kind: output, shape index: {}]  }
   0x1   :  { %v2140_v0 = vld [vmem:[%s2885_s1 + $0x40] sm:$0xff]   ;;  %v2144_v4 = vld [vmem:[%s2885_s1 + $0x48] sm:$0xff]   ;;  %v2148_v8 = vld [vmem:[%s2885_s1 + $0x50] sm:$0xff]   ;;  %vm1651_vm4 = vcmask 1043459   ;;  %vm1654_vm5 = vcmask 1044484   ;;  %vm1657_vm6 = vcmask 1045509  }
   0x2   :  { %v2141_v1 = vld [vmem:[%s2885_s1 + $0xc0] sm:$0xff]   ;;  %1902 = vmatprep.subr.bf16.mxu0 %v2140_v0  ;;  %v2145_v5 = vld [vmem:[%s2885_s1 + $0xc8] sm:$0xff]   ;;  %v2149_v9 = vld [vmem:[%s2885_s1 + $0xd0] sm:$0xff]   ;;  %vm1660_vm7 = vcmask 1046534   ;;  %vm1663_vm8 = vcmask 1047559  }
   0x3   :  { %v2142_v2 = vld [vmem:[%s2885_s1] sm:$0xff]   ;;  %1966 = vmatprep.subr.bf16.mxu1 %v2141_v1  ;;  %v2146_v6 = vld [vmem:[%s2885_s1 + $0x8] sm:$0xff]   ;;  %v2150_v10 = vld [vmem:[%s2885_s1 + $0x10] sm:$0xff]  }
   0x4   :  { %v2143_v3 = vld [vmem:[%s2885_s1 + $0x80] sm:$0xff]   ;;  %1903 = vmatpush3.bf16.msra.mxu0 %v2142_v2  ;;  %v2147_v7 = vld [vmem:[%s2885_s1 + $0x88] sm:$0xff]   ;;  %v2151_v11 = vld [vmem:[%s2885_s1 + $0x90] sm:$0xff]  }
   0x5   :  { %1967 = vmatpush3.bf16.msra.mxu1 %v2143_v3  ;;  %1904 = vmatprep.subr.bf16.mxu0 %v2144_v4  ;;  %v2152_v12 = vld [vmem:[%s2885_s1 + $0x58] sm:$0xff]   ;;  %v2156_v16 = vld [vmem:[%s2885_s1 + $0x60] sm:$0xff]   ;;  %v2160_v20 = vld [vmem:[%s2885_s1 + $0x68] sm:$0xff]  }
   0x6   :  { %1968 = vmatprep.subr.bf16.mxu1 %v2145_v5  ;;  %v2153_v13 = vld [vmem:[%s2885_s1 + $0xd8] sm:$0xff]   ;;  %v2157_v17 = vld [vmem:[%s2885_s1 + $0xe0] sm:$0xff]   ;;  %v2161_v21 = vld [vmem:[%s2885_s1 + $0xe8] sm:$0xff]  }
   0x7   :  { %v2154_v14 = vld [vmem:[%s2885_s1 + $0x18] sm:$0xff]   ;;  %v2158_v18 = vld [vmem:[%s2885_s1 + $0x20] sm:$0xff]   ;;  %v2162_v22 = vld [vmem:[%s2885_s1 + $0x28] sm:$0xff]  }
   0x8   :  { %1905 = vmatpush3.bf16.msra.mxu0 %v2146_v6  ;;  %v2155_v15 = vld [vmem:[%s2885_s1 + $0x98] sm:$0xff]   ;;  %v2159_v19 = vld [vmem:[%s2885_s1 + $0xa0] sm:$0xff]   ;;  %v2163_v23 = vld [vmem:[%s2885_s1 + $0xa8] sm:$0xff]  }
   0x9   :  { %1969 = vmatpush3.bf16.msra.mxu1 %v2147_v7  ;;  %1906 = vmatprep.subr.bf16.mxu0 %v2148_v8  ;;  %v2164_v24 = vld [vmem:[%s2885_s1 + $0x70] sm:$0xff]   ;;  %v2168_v28 = vld [vmem:[%s2885_s1 + $0x78] sm:$0xff]   ;;  %v2174_v33 = vld [vmem:[%s2886_s0 + $0x4] ss:$28 sps:$4 sm:$0xff]  }
   0xa   :  { %1970 = vmatprep.subr.bf16.mxu1 %v2149_v9  ;;  %v2165_v25 = vld [vmem:[%s2885_s1 + $0xf0] sm:$0xff]   ;;  %v2169_v29 = vld [vmem:[%s2885_s1 + $0xf8] sm:$0xff]   ;;  %v2175_v34 = vld [vmem:[%s2886_s0 + $0x8] ss:$28 sps:$4 sm:$0xff]   ;;  %816 = vmatprep.mubr.bf16.mxu0 %v2174_v33 }
   0xb   :  { %v2166_v26 = vld [vmem:[%s2885_s1 + $0x30] sm:$0xff]   ;;  %v2170_v30 = vld [vmem:[%s2885_s1 + $0x38] sm:$0xff]   ;;  %v2177_v35 = vld [vmem:[%s2886_s0 + $0xc] ss:$28 sps:$4 sm:$0xff]  }
   0xc   :  { %1907 = vmatpush3.bf16.msra.mxu0 %v2150_v10  ;;  %v2167_v27 = vld [vmem:[%s2885_s1 + $0xb0] sm:$0xff]   ;;  %v2171_v31 = vld [vmem:[%s2885_s1 + $0xb8] sm:$0xff]   ;;  %v2178_v36 = vld [vmem:[%s2885_s1 + $0x140] sm:$0xff]   ;;  %913 = vmatprep.mubr.bf16.mxu1 %v2177_v35 }
   0xd   :  { %1971 = vmatpush3.bf16.msra.mxu1 %v2151_v11  ;;  %1908 = vmatprep.subr.bf16.mxu0 %v2152_v12  ;;  %v2172_v32 = vld [vmem:[%s2886_s0] ss:$28 sps:$4 sm:$0xff]   ;;  %v2184_v40 = vld [vmem:[%s2886_s0 + $0x38] ss:$28 sps:$4 sm:$0xff]   ;;  %v2186_v42 = vld [vmem:[%s2885_s1 + $0x148] sm:$0xff]  }
   0xe   :  { %1972 = vmatprep.subr.bf16.mxu1 %v2153_v13  ;;  %v2179_v37 = vld [vmem:[%s2885_s1 + $0x100] sm:$0xff]   ;;  %v2180_v38 = vld [vmem:[%s2886_s0 + $0x3c] ss:$28 sps:$4 sm:$0xff]   ;;  %v2187_v43 = vld [vmem:[%s2885_s1 + $0x108] sm:$0xff]  }
   0xf   :  { %v2182_v39 = vld [vmem:[%s2886_s0 + $0x44] ss:$28 sps:$4 sm:$0xff]   ;;  %v2188_v44 = vld [vmem:[%s2886_s0 + $0x74] ss:$28 sps:$4 sm:$0xff]   ;;  %v2190_v45 = vld [vmem:[%s2886_s0 + $0x7c] ss:$28 sps:$4 sm:$0xff]  }
  0x10   :  { %1909 = vmatpush3.bf16.msra.mxu0 %v2154_v14  ;;  %v2185_v41 = vld [vmem:[%s2886_s0 + $0x40] ss:$28 sps:$4 sm:$0xff]   ;;  %v2194_v46 = vld [vmem:[%s2885_s1 + $0x150] sm:$0xff]   ;;  %v2196_v50 = vld [vmem:[%s2886_s0 + $0xac] ss:$28 sps:$4 sm:$0xff]  }
  0x11   :  { %1973 = vmatpush3.bf16.msra.mxu1 %v2155_v15  ;;  %1910 = vmatprep.subr.bf16.mxu0 %v2156_v16  ;;  %v2195_v47 = vld [vmem:[%s2885_s1 + $0x110] sm:$0xff]   ;;  %v2202_v52 = vld [vmem:[%s2885_s1 + $0x158] sm:$0xff]   ;;  %v2210_v54 = vld [vmem:[%s2885_s1 + $0x160] sm:$0xff]  }
  0x12   :  { %1974 = vmatprep.subr.bf16.mxu1 %v2157_v17  ;;  %v2192_v48 = vld [vmem:[%s2886_s0 + $0x70] ss:$28 sps:$4 sm:$0xff]   ;;  %v2193_v49 = vld [vmem:[%s2886_s0 + $0x78] ss:$28 sps:$4 sm:$0xff]   ;;  %v2211_v55 = vld [vmem:[%s2885_s1 + $0x120] sm:$0xff]  }
  0x13   :  { %v2198_v51 = vld [vmem:[%s2886_s0 + $0xb4] ss:$28 sps:$4 sm:$0xff]   ;;  %v2203_v53 = vld [vmem:[%s2885_s1 + $0x118] sm:$0xff]   ;;  %v2200_v56 = vld [vmem:[%s2886_s0 + $0xa8] ss:$28 sps:$4 sm:$0xff]  }
  0x14   :  { %1911 = vmatpush3.bf16.msra.mxu0 %v2158_v18  ;;  %v2201_v57 = vld [vmem:[%s2886_s0 + $0xb0] ss:$28 sps:$4 sm:$0xff]   ;;  %v2204_v58 = vld [vmem:[%s2886_s0 + $0xe4] ss:$28 sps:$4 sm:$0xff]   ;;  %v2212_v2 = vld [vmem:[%s2886_s0 + $0x11c] ss:$28 sps:$4 sm:$0xff]  }
  0x15   :  { %1975 = vmatpush3.bf16.msra.mxu1 %v2159_v19  ;;  %1912 = vmatprep.subr.bf16.mxu0 %v2160_v20  ;;  %v2206_v59 = vld [vmem:[%s2886_s0 + $0xec] ss:$28 sps:$4 sm:$0xff]   ;;  %v2208_v62 = vld [vmem:[%s2886_s0 + $0xe0] ss:$28 sps:$4 sm:$0xff]   ;;  %v2226_v0 = vld [vmem:[%s2885_s1 + $0x170] sm:$0xff]  }
  0x16   :  { %1976 = vmatprep.subr.bf16.mxu1 %v2161_v21  ;;  %v2218_v60 = vld [vmem:[%s2885_s1 + $0x168] sm:$0xff]   ;;  %v2227_v1 = vld [vmem:[%s2885_s1 + $0x130] sm:$0xff]   ;;  %v2214_v3 = vld [vmem:[%s2886_s0 + $0x124] ss:$28 sps:$4 sm:$0xff]  }
  0x17   :  { %v2219_v61 = vld [vmem:[%s2885_s1 + $0x128] sm:$0xff]   ;;  %v2234_v4 = vld [vmem:[%s2885_s1 + $0x178] sm:$0xff]   ;;  %v2242_v8 = vld [vmem:[%s2885_s1 + $0x180] sm:$0xff]  }
  0x18   :  { %1913 = vmatpush3.bf16.msra.mxu0 %v2162_v22  ;;  %v2209_v63 = vld [vmem:[%s2886_s0 + $0xe8] ss:$28 sps:$4 sm:$0xff]   ;;  %v2235_v5 = vld [vmem:[%s2885_s1 + $0x138] sm:$0xff]   ;;  %v2220_v9 = vld [vmem:[%s2886_s0 + $0x154] ss:$28 sps:$4 sm:$0xff]  }
  0x19   :  { %1977 = vmatpush3.bf16.msra.mxu1 %v2163_v23  ;;  %1914 = vmatprep.subr.bf16.mxu0 %v2164_v24  ;;  %v2216_v6 = vld [vmem:[%s2886_s0 + $0x118] ss:$28 sps:$4 sm:$0xff]   ;;  %v2217_v7 = vld [vmem:[%s2886_s0 + $0x120] ss:$28 sps:$4 sm:$0xff]   ;;  %v2224_v11 = vld [vmem:[%s2886_s0 + $0x150] ss:$28 sps:$4 sm:$0xff]  }
  0x1a   :  { %1978 = vmatprep.subr.bf16.mxu1 %v2165_v25  ;;  %v2222_v10 = vld [vmem:[%s2886_s0 + $0x15c] ss:$28 sps:$4 sm:$0xff]   ;;  %v2228_v13 = vld [vmem:[%s2886_s0 + $0x18c] ss:$28 sps:$4 sm:$0xff]   ;;  %v2230_v14 = vld [vmem:[%s2886_s0 + $0x194] ss:$28 sps:$4 sm:$0xff]  }
  0x1b   :  { %v2225_v12 = vld [vmem:[%s2886_s0 + $0x158] ss:$28 sps:$4 sm:$0xff]   ;;  %v2232_v15 = vld [vmem:[%s2886_s0 + $0x188] ss:$28 sps:$4 sm:$0xff]   ;;  %v2233_v16 = vld [vmem:[%s2886_s0 + $0x190] ss:$28 sps:$4 sm:$0xff]  }
  0x1c   :  { %1915 = vmatpush3.bf16.msra.mxu0 %v2166_v26  ;;  %v2238_v17 = vld [vmem:[%s2886_s0 + $0x14] ss:$28 sps:$4 sm:$0xff]   ;;  %v2241_v18 = vld [vmem:[%s2886_s0 + $0x164] ss:$28 sps:$4 sm:$0xff]   ;;  %v2243_v21 = vld [vmem:[%s2886_s0 + $0x4c] ss:$28 sps:$4 sm:$0xff]  }
  0x1d   :  { %1979 = vmatpush3.bf16.msra.mxu1 %v2167_v27  ;;  %1916 = vmatprep.subr.bf16.mxu0 %v2168_v28  ;;  %v2236_v19 = vld [vmem:[%s2886_s0 + $0x10] ss:$28 sps:$4 sm:$0xff]   ;;  %v2239_v20 = vld [vmem:[%s2886_s0 + $0x160] ss:$28 sps:$4 sm:$0xff]   ;;  %v2247_v24 = vld [vmem:[%s2886_s0 + $0x48] ss:$28 sps:$4 sm:$0xff]  }
  0x1e   :  { %1980 = vmatprep.subr.bf16.mxu1 %v2169_v29  ;;  %v2245_v22 = vld [vmem:[%s2886_s0 + $0x19c] ss:$28 sps:$4 sm:$0xff]   ;;  %v2249_v23 = vld [vmem:[%s2885_s1 + $0x188] sm:$0xff]   ;;  %v2250_v26 = vld [vmem:[%s2886_s0 + $0x84] ss:$28 sps:$4 sm:$0xff]  }
  0x1f   :  { %v2248_v25 = vld [vmem:[%s2886_s0 + $0x198] ss:$28 sps:$4 sm:$0xff]   ;;  %v2253_v28 = vld [vmem:[%s2886_s0 + $0x80] ss:$28 sps:$4 sm:$0xff]   ;;  %v2254_v29 = vld [vmem:[%s2886_s0 + $0x50] ss:$28 sps:$4 sm:$0xff]  }
  0x20   :  { %1917 = vmatpush3.bf16.msra.mxu0 %v2170_v30  ;;  %v2252_v27 = vld [vmem:[%s2886_s0 + $0x18] ss:$28 sps:$4 sm:$0xff]   ;;  %v2259_v33 = vld [vmem:[%s2886_s0 + $0xc0] ss:$28 sps:$4 sm:$0xff]  }
  0x21   :  { %1981 = vmatpush3.bf16.msra.mxu1 %v2171_v31  ;;  %2030 = vmatprep.subr.bf16.mxu0 %v2178_v36  ;;  %v2255_v30 = vld [vmem:[%s2886_s0 + $0xbc] ss:$28 sps:$4 sm:$0xff]   ;;  %v2257_v31 = vld [vmem:[%s2886_s0 + $0x88] ss:$28 sps:$4 sm:$0xff]  }
  0x22   :  { %2124 = vmatprep.subr.bf16.mxu1 %v2178_v36  ;;  %v2262_v35 = vld [vmem:[%s2886_s0 + $0xf8] ss:$28 sps:$4 sm:$0xff]   ;;  %v2263_v36 = vld [vmem:[%s2886_s0 + $0xf0] ss:$28 sps:$4 sm:$0xff]  }
  0x23   :  { %817 = vmatmul.mubr.bf16.vlgmr.msra.gmra.mrb[0].mxu0 %v2172_v32  ;;  %v2258_v32 = vld [vmem:[%s2886_s0 + $0xb8] ss:$28 sps:$4 sm:$0xff]  }
  0x24   :  { %914 = vmatmul.mubr.bf16.vlgmr.msra.gmra.mrb[0].mxu1 %v2175_v34  ;;  %2031 = vmatpush3.bf16.msra.mxu0 %v2179_v37  ;;  %v2260_v34 = vld [vmem:[%s2886_s0 + $0xf4] ss:$28 sps:$4 sm:$0xff]  }
  0x25   :  { %2132 = vmatpush3.bf16.msra.mxu1 %v2179_v37  ;;  %824 = vmatprep.mubr.bf16.mxu0 %v2180_v38  ;;  %v2264_v37 = vld [vmem:[%s2886_s0 + $0x130] ss:$28 sps:$4 sm:$0xff]  }
  0x26   :  { %921 = vmatprep.mubr.bf16.mxu1 %v2182_v39  ;;  %2032 = vmatprep.subr.bf16.mxu0 %v2186_v42  ;;  %v2265_v38 = vld [vmem:[%s2886_s0 + $0x12c] ss:$28 sps:$4 sm:$0xff]  }
  0x27   :  { %2125 = vmatprep.subr.bf16.mxu1 %v2186_v42  ;;  %v2267_v39 = vld [vmem:[%s2886_s0 + $0x168] ss:$28 sps:$4 sm:$0xff]  }
  0x28   :  { %2033 = vmatpush3.bf16.msra.mxu0 %v2187_v43 }
  0x29   :  { %2133 = vmatpush3.bf16.msra.mxu1 %v2187_v43  ;;  %2034 = vmatprep.subr.bf16.mxu0 %v2194_v46 }
  0x2a   :  { %2126 = vmatprep.subr.bf16.mxu1 %v2194_v46 }
  0x2b   :  { %825 = vmatmul.mubr.bf16.gmra.mrb[4].mxu0 %v2184_v40  ;;  %v2268_v40 = vld [vmem:[%s2886_s0 + $0x128] ss:$28 sps:$4 sm:$0xff]  }
  0x2c   :  { %922 = vmatmul.mubr.bf16.gmra.mrb[4].mxu1 %v2185_v41  ;;  %832 = vmatprep.mubr.bf16.mxu0 %v2188_v44  ;;  %v2269_v41 = vld [vmem:[%s2886_s0 + $0x1a0] ss:$28 sps:$4 sm:$0xff]  }
  0x2d   :  { %929 = vmatprep.mubr.bf16.mxu1 %v2190_v45  ;;  %2035 = vmatpush3.bf16.msra.mxu0 %v2195_v47 }
  0x2e   :  { %2134 = vmatpush3.bf16.msra.mxu1 %v2195_v47  ;;  %2036 = vmatprep.subr.bf16.mxu0 %v2202_v52 }
  0x2f   :  { %2127 = vmatprep.subr.bf16.mxu1 %v2202_v52 }
  0x31   :  { %2037 = vmatpush3.bf16.msra.mxu0 %v2203_v53 }
  0x32   :  { %2135 = vmatpush3.bf16.msra.mxu1 %v2203_v53  ;;  %2038 = vmatprep.subr.bf16.mxu0 %v2210_v54 }
  0x33   :  { %833 = vmatmul.mubr.bf16.gmra.mrb[8].mxu0 %v2192_v48  ;;  %2128 = vmatprep.subr.bf16.mxu1 %v2210_v54 }
  0x34   :  { %930 = vmatmul.mubr.bf16.gmra.mrb[8].mxu1 %v2193_v49  ;;  %840 = vmatprep.mubr.bf16.mxu0 %v2196_v50 }
  0x35   :  { %937 = vmatprep.mubr.bf16.mxu1 %v2198_v51  ;;  %2039 = vmatpush3.bf16.msra.mxu0 %v2211_v55 }
  0x36   :  { %2136 = vmatpush3.bf16.msra.mxu1 %v2211_v55  ;;  %2040 = vmatprep.subr.bf16.mxu0 %v2218_v60 }
  0x37   :  { %2129 = vmatprep.subr.bf16.mxu1 %v2218_v60 }
  0x39   :  { %2041 = vmatpush3.bf16.msra.mxu0 %v2219_v61 }
  0x3a   :  { %2137 = vmatpush3.bf16.msra.mxu1 %v2219_v61  ;;  %2042 = vmatprep.subr.bf16.mxu0 %v2226_v0 }
  0x3b   :  { %841 = vmatmul.mubr.bf16.gmra.mrb[12].mxu0 %v2200_v56  ;;  %2130 = vmatprep.subr.bf16.mxu1 %v2226_v0 }
  0x3c   :  { %938 = vmatmul.mubr.bf16.gmra.mrb[12].mxu1 %v2201_v57  ;;  %848 = vmatprep.mubr.bf16.mxu0 %v2204_v58 }
  0x3d   :  { %945 = vmatprep.mubr.bf16.mxu1 %v2206_v59  ;;  %2043 = vmatpush3.bf16.msra.mxu0 %v2227_v1 }
  0x3e   :  { %2138 = vmatpush3.bf16.msra.mxu1 %v2227_v1  ;;  %2044 = vmatprep.subr.bf16.mxu0 %v2234_v4 }
  0x3f   :  { %2131 = vmatprep.subr.bf16.mxu1 %v2234_v4 }
  0x41   :  { %2045 = vmatpush3.bf16.msra.mxu0 %v2235_v5 }
  0x42   :  { %2139 = vmatpush3.bf16.msra.mxu1 %v2235_v5 }
  0x43   :  { %849 = vmatmul.mubr.bf16.gmra.mrb[16].mxu0 %v2208_v62  ;;  %2104 = vmatprep.subr.bf16.mxu1 %v2242_v8 }
  0x44   :  { %946 = vmatmul.mubr.bf16.gmra.mrb[16].mxu1 %v2209_v63  ;;  %856 = vmatprep.mubr.bf16.mxu0 %v2212_v2 }
  0x45   :  { %953 = vmatprep.mubr.bf16.mxu1 %v2214_v3 }
  0x4b   :  { %857 = vmatmul.mubr.bf16.gmra.mrb[20].mxu0 %v2216_v6 }
  0x4c   :  { %954 = vmatmul.mubr.bf16.gmra.mrb[20].mxu1 %v2217_v7  ;;  %864 = vmatprep.mubr.bf16.mxu0 %v2220_v9 }
  0x4d   :  { %961 = vmatprep.mubr.bf16.mxu1 %v2222_v10 }
  0x53   :  { %865 = vmatmul.mubr.bf16.gmra.mrb[24].mxu0 %v2224_v11 }
  0x54   :  { %962 = vmatmul.mubr.bf16.gmra.mrb[24].mxu1 %v2225_v12  ;;  %872 = vmatprep.mubr.bf16.mxu0 %v2228_v13 }
  0x55   :  { %969 = vmatprep.mubr.bf16.mxu1 %v2230_v14 }
  0x5b   :  { %873 = vmatmul.mubr.bf16.gmra.mrb[28].mxu0 %v2232_v15 }
  0x5c   :  { %970 = vmatmul.mubr.bf16.gmra.mrb[28].mxu1 %v2233_v16  ;;  %1010 = vmatprep.mubr.bf16.mxu0 %v2238_v17 }
  0x5d   :  { %1058 = vmatprep.mubr.bf16.mxu1 %v2241_v18 }
  0x63   :  { %1011 = vmatmul.mubr.bf16.vlgmr.msra.gmra.mrb[32].mxu0 %v2236_v19 }
  0x64   :  { %1059 = vmatmul.mubr.bf16.vlgmr.msra.gmra.mrb[32].mxu1 %v2239_v20  ;;  %1018 = vmatprep.mubr.bf16.mxu0 %v2243_v21 }
  0x65   :  { %2105 = vmatpush3.bf16.msra.mxu1 %v2242_v8  ;;  %1066 = vmatprep.mubr.bf16.mxu1 %v2245_v22 }
  0x66   :  { %2106 = vmatprep.subr.bf16.mxu1 %v2249_v23 }
  0x69   :  { %2107 = vmatpush3.bf16.msra.mxu1 %v2249_v23 }
  0x6b   :  { %1019 = vmatmul.mubr.bf16.gmra.mrb[36].mxu0 %v2247_v24 }
  0x6c   :  { %1067 = vmatmul.mubr.bf16.gmra.mrb[36].mxu1 %v2248_v25  ;;  %1026 = vmatprep.mubr.bf16.mxu0 %v2250_v26 }
  0x6d   :  { %2108 = vmatprep.mubr.msk.bf16.mxu1 %vm759_vm0, %v2252_v27 }
  0x73   :  { %1027 = vmatmul.mubr.bf16.gmra.mrb[40].mxu0 %v2253_v28 }
  0x74   :  { %2109 = vmatmul.mubr.msk.bf16.vlgmr.msra.gmra.mrb[40].mxu1 %vm759_vm0, %v2254_v29  ;;  %1034 = vmatprep.mubr.bf16.mxu0 %v2255_v30 }
  0x75   :  { %2112 = vmatprep.mubr.msk.bf16.mxu1 %vm759_vm0, %v2257_v31 }
  0x7b   :  { %1035 = vmatmul.mubr.bf16.gmra.mrb[44].mxu0 %v2258_v32 }
  0x7c   :  { %2113 = vmatmul.mubr.msk.bf16.gmra.mrb[44].mxu1 %vm759_vm0, %v2259_v33  ;;  %1042 = vmatprep.mubr.bf16.mxu0 %v2260_v34 }
  0x7d   :  { %2116 = vmatprep.mubr.msk.bf16.mxu1 %vm759_vm0, %v2262_v35 }
  0x83   :  { %1043 = vmatmul.mubr.bf16.gmra.mrb[48].mxu0 %v2263_v36 }
  0x84   :  { %2117 = vmatmul.mubr.msk.bf16.gmra.mrb[48].mxu1 %vm759_vm0, %v2264_v37  ;;  %1050 = vmatprep.mubr.bf16.mxu0 %v2265_v38 }
  0x85   :  { %2120 = vmatprep.mubr.msk.bf16.mxu1 %vm759_vm0, %v2267_v39 }
  0x8b   :  { %1051 = vmatmul.mubr.bf16.gmra.mrb[52].mxu0 %v2268_v40 }
  0x8c   :  { %2121 = vmatmul.mubr.msk.bf16.gmra.mrb[52].mxu1 %vm759_vm0, %v2269_v41 }
  0xf6   :  { %v1918_v42 = vpop.f32.mrb[0].mxu0 }
  0xf7   :  { %v1982_v43 = vpop.f32.mrb[0].mxu1  ;;  %v1919_v44 = vpop.f32.mrb[1].mxu0 }
  0xf8   :  { %v1920_v45 = vadd.f32 %v1919_v44, %v1918_v42  ;;  %v1983_v46 = vpop.f32.mrb[1].mxu1  ;;  %v1921_v47 = vpop.f32.mrb[2].mxu0 }
  0xf9   :  { %v1984_v48 = vadd.f32 %v1983_v46, %v1982_v43  ;;  %v1985_v49 = vpop.f32.mrb[2].mxu1  ;;  %v1922_v50 = vpop.f32.mrb[3].mxu0 }
  0xfa   :  { %v1923_v51 = vadd.f32 %v1922_v50, %v1921_v47  ;;  %v1986_v52 = vpop.f32.mrb[3].mxu1 }
  0xfb   :  { %v2616_v53 = vadd.f32 %v1984_v48, %v1920_v45  ;;  %v1987_v54 = vadd.f32 %v1986_v52, %v1985_v49 }
  0xfd   :  { %v2618_v55 = vadd.f32 %v1987_v54, %v1923_v51 }
  0xfe   :  { %v1924_v56 = vpop.f32.mrb[4].mxu0 }
  0xff   :  { %v1988_v57 = vpop.f32.mrb[4].mxu1  ;;  %v1925_v58 = vpop.f32.mrb[5].mxu0 }
 0x100   :  { %v1926_v59 = vadd.f32 %v1925_v58, %v1924_v56  ;;  %v1989_v60 = vpop.f32.mrb[5].mxu1  ;;  %v1927_v61 = vpop.f32.mrb[6].mxu0 }
 0x101   :  { %v1990_v62 = vadd.f32 %v1989_v60, %v1988_v57  ;;  %v1991_v63 = vpop.f32.mrb[6].mxu1  ;;  %v1928_v0 = vpop.f32.mrb[7].mxu0 }
 0x102   :  { %v1929_v1 = vadd.f32 %v1928_v0, %v1927_v61  ;;  %v1992_v2 = vpop.f32.mrb[7].mxu1 }
 0x103   :  { %v2620_v3 = vadd.f32 %v1990_v62, %v1926_v59  ;;  %v1993_v4 = vadd.f32 %v1992_v2, %v1991_v63 }
 0x105   :  { %v2622_v5 = vadd.f32 %v1993_v4, %v1929_v1 }
 0x106   :  { %v1930_v6 = vpop.f32.mrb[8].mxu0 }
 0x107   :  { %v1994_v7 = vpop.f32.mrb[8].mxu1  ;;  %v1931_v8 = vpop.f32.mrb[9].mxu0 }
 0x108   :  { %v1932_v9 = vadd.f32 %v1931_v8, %v1930_v6  ;;  %v1995_v10 = vpop.f32.mrb[9].mxu1  ;;  %v1933_v11 = vpop.f32.mrb[10].mxu0 }
 0x109   :  { %v1996_v12 = vadd.f32 %v1995_v10, %v1994_v7  ;;  %v1997_v13 = vpop.f32.mrb[10].mxu1  ;;  %v1934_v14 = vpop.f32.mrb[11].mxu0 }
 0x10a   :  { %v1935_v15 = vadd.f32 %v1934_v14, %v1933_v11  ;;  %v1998_v16 = vpop.f32.mrb[11].mxu1 }
 0x10b   :  { %v2624_v17 = vadd.f32 %v1996_v12, %v1932_v9  ;;  %v1999_v18 = vadd.f32 %v1998_v16, %v1997_v13 }
 0x10d   :  { %v2626_v19 = vadd.f32 %v1999_v18, %v1935_v15 }
 0x10e   :  { %v1936_v20 = vpop.f32.mrb[12].mxu0 }
 0x10f   :  { %v2000_v21 = vpop.f32.mrb[12].mxu1  ;;  %v1937_v22 = vpop.f32.mrb[13].mxu0 }
 0x110   :  { %v1938_v23 = vadd.f32 %v1937_v22, %v1936_v20  ;;  %v2001_v24 = vpop.f32.mrb[13].mxu1  ;;  %v1939_v25 = vpop.f32.mrb[14].mxu0 }
 0x111   :  { %v2002_v26 = vadd.f32 %v2001_v24, %v2000_v21  ;;  %v2003_v27 = vpop.f32.mrb[14].mxu1  ;;  %v1940_v28 = vpop.f32.mrb[15].mxu0 }
 0x112   :  { %v1941_v29 = vadd.f32 %v1940_v28, %v1939_v25  ;;  %v2004_v30 = vpop.f32.mrb[15].mxu1 }
 0x113   :  { %v2628_v31 = vadd.f32 %v2002_v26, %v1938_v23  ;;  %v2005_v32 = vadd.f32 %v2004_v30, %v2003_v27 }
 0x115   :  { %v2630_v33 = vadd.f32 %v2005_v32, %v1941_v29 }
 0x116   :  { %v1942_v34 = vpop.f32.mrb[16].mxu0 }
 0x117   :  { %v2006_v35 = vpop.f32.mrb[16].mxu1  ;;  %v1943_v36 = vpop.f32.mrb[17].mxu0 }
 0x118   :  { %v1944_v37 = vadd.f32 %v1943_v36, %v1942_v34  ;;  %v2007_v38 = vpop.f32.mrb[17].mxu1  ;;  %v1945_v39 = vpop.f32.mrb[18].mxu0 }
 0x119   :  { %v2008_v40 = vadd.f32 %v2007_v38, %v2006_v35  ;;  %v2009_v41 = vpop.f32.mrb[18].mxu1  ;;  %v1946_v42 = vpop.f32.mrb[19].mxu0 }
 0x11a   :  { %v1947_v43 = vadd.f32 %v1946_v42, %v1945_v39  ;;  %v2010_v44 = vpop.f32.mrb[19].mxu1 }
 0x11b   :  { %v2632_v45 = vadd.f32 %v2008_v40, %v1944_v37  ;;  %v2011_v46 = vadd.f32 %v2010_v44, %v2009_v41 }
 0x11d   :  { %v2634_v47 = vadd.f32 %v2011_v46, %v1947_v43 }
 0x11e   :  { %v1948_v48 = vpop.f32.mrb[20].mxu0 }
 0x11f   :  { %v2012_v49 = vpop.f32.mrb[20].mxu1  ;;  %v1949_v50 = vpop.f32.mrb[21].mxu0 }
 0x120   :  { %v1950_v51 = vadd.f32 %v1949_v50, %v1948_v48  ;;  %v2013_v52 = vpop.f32.mrb[21].mxu1  ;;  %v1951_v54 = vpop.f32.mrb[22].mxu0 }
 0x121   :  { %v2014_v56 = vadd.f32 %v2013_v52, %v2012_v49  ;;  %v2015_v57 = vpop.f32.mrb[22].mxu1  ;;  %v1952_v58 = vpop.f32.mrb[23].mxu0 }
 0x122   :  { %v1953_v59 = vadd.f32 %v1952_v58, %v1951_v54  ;;  %v2016_v60 = vpop.f32.mrb[23].mxu1 }
 0x123   :  { %v2636_v61 = vadd.f32 %v2014_v56, %v1950_v51  ;;  %v2017_v62 = vadd.f32 %v2016_v60, %v2015_v57 }
 0x125   :  { %v2638_v63 = vadd.f32 %v2017_v62, %v1953_v59 }
 0x126   :  { %v1954_v0 = vpop.f32.mrb[24].mxu0 }
 0x127   :  { %v2018_v1 = vpop.f32.mrb[24].mxu1  ;;  %v1955_v2 = vpop.f32.mrb[25].mxu0 }
 0x128   :  { %v1956_v4 = vadd.f32 %v1955_v2, %v1954_v0  ;;  %v2019_v6 = vpop.f32.mrb[25].mxu1  ;;  %v1957_v7 = vpop.f32.mrb[26].mxu0 }
 0x129   :  { %v2020_v8 = vadd.f32 %v2019_v6, %v2018_v1  ;;  %v2021_v9 = vpop.f32.mrb[26].mxu1  ;;  %v1958_v10 = vpop.f32.mrb[27].mxu0 }
 0x12a   :  { %v1959_v11 = vadd.f32 %v1958_v10, %v1957_v7  ;;  %v2022_v12 = vpop.f32.mrb[27].mxu1 }
 0x12b   :  { %v964_v13 = vadd.f32 %v2020_v8, %v1956_v4  ;;  %v2023_v14 = vadd.f32 %v2022_v12, %v2021_v9 }
 0x12d   :  { %v967_v15 = vadd.f32 %v2023_v14, %v1959_v11 }
 0x12e   :  { %v1960_v16 = vpop.f32.mrb[28].mxu0 }
 0x12f   :  { %v2024_v18 = vpop.f32.mrb[28].mxu1  ;;  %v1961_v20 = vpop.f32.mrb[29].mxu0 }
 0x130   :  { %v1962_v21 = vadd.f32 %v1961_v20, %v1960_v16  ;;  %v2025_v22 = vpop.f32.mrb[29].mxu1  ;;  %v1963_v23 = vpop.f32.mrb[30].mxu0 }
 0x131   :  { %v2026_v24 = vadd.f32 %v2025_v22, %v2024_v18  ;;  %v2027_v25 = vpop.f32.mrb[30].mxu1  ;;  %v1964_v26 = vpop.f32.mrb[31].mxu0 }
 0x132   :  { %v1965_v27 = vadd.f32 %v1964_v26, %v1963_v23  ;;  %v2028_v28 = vpop.f32.mrb[31].mxu1 }
 0x133   :  { %v972_v29 = vadd.f32 %v2026_v24, %v1962_v21  ;;  %v2029_v30 = vadd.f32 %v2028_v28, %v2027_v25 }
 0x135   :  { %v975_v32 = vadd.f32 %v2029_v30, %v1965_v27 }
 0x136   :  { %v2046_v34 = vpop.f32.mrb[32].mxu0 }
 0x137   :  { %v2082_v35 = vpop.f32.mrb[32].mxu1  ;;  %v2047_v36 = vpop.f32.mrb[33].mxu0 }
 0x138   :  { %v2048_v37 = vadd.f32 %v2047_v36, %v2046_v34  ;;  %v2083_v38 = vpop.f32.mrb[33].mxu1  ;;  %v2049_v39 = vpop.f32.mrb[34].mxu0 }
 0x139   :  { %v2084_v40 = vadd.f32 %v2083_v38, %v2082_v35  ;;  %v2085_v41 = vpop.f32.mrb[34].mxu1  ;;  %v2050_v42 = vpop.f32.mrb[35].mxu0 }
 0x13a   :  { %v2051_v43 = vadd.f32 %v2050_v42, %v2049_v39  ;;  %v2086_v44 = vpop.f32.mrb[35].mxu1  ;;  %v1013_v46 = vadd.f32 %v2048_v37, %v2616_v53 }
 0x13b   :  { %v2087_v48 = vadd.f32 %v2086_v44, %v2085_v41  ;;  %v2641_v49 = vadd.f32 %v2084_v40, %v964_v13 }
 0x13c   :  { %v1016_v50 = vadd.f32 %v2051_v43, %v2618_v55 }
 0x13d   :  { %v2644_v51 = vadd.f32 %v2087_v48, %v967_v15 }
 0x13e   :  { %v2052_v52 = vpop.f32.mrb[36].mxu0 }
 0x13f   :  { %v2088_v54 = vpop.f32.mrb[36].mxu1  ;;  %v2053_v56 = vpop.f32.mrb[37].mxu0 }
 0x140   :  { %v2054_v57 = vadd.f32 %v2053_v56, %v2052_v52  ;;  %v2089_v58 = vpop.f32.mrb[37].mxu1  ;;  %v2055_v59 = vpop.f32.mrb[38].mxu0 }
 0x141   :  { %v2090_v60 = vadd.f32 %v2089_v58, %v2088_v54  ;;  %v2091_v62 = vpop.f32.mrb[38].mxu1  ;;  %v2056_v0 = vpop.f32.mrb[39].mxu0 }
 0x142   :  { %v2057_v1 = vadd.f32 %v2056_v0, %v2055_v59  ;;  %v2092_v2 = vpop.f32.mrb[39].mxu1  ;;  %v1021_v53 = vadd.f32 %v2054_v57, %v2620_v3 }
 0x143   :  { %v2093_v4 = vadd.f32 %v2092_v2, %v2091_v62  ;;  %v2647_v6 = vadd.f32 %v2090_v60, %v972_v29 }
 0x144   :  { %v1024_v55 = vadd.f32 %v2057_v1, %v2622_v5 }
 0x145   :  { %v2650_v7 = vadd.f32 %v2093_v4, %v975_v32 }
 0x146   :  { %v2058_v8 = vpop.f32.mrb[40].mxu0 }
 0x147   :  { %v2110_v9 = vpop.f32.mrb[40].mxu1  ;;  %v2059_v10 = vpop.f32.mrb[41].mxu0 }
 0x148   :  { %v1118_v11 = vadd.f32 %v2110_v9, %v1021_v53  ;;  %v2652_v12 = vadd.f32 %v2059_v10, %v2058_v8  ;;  %v1109_v13 = vpop.f32.mrb[41].mxu1  ;;  %v2061_v14 = vpop.f32.mrb[42].mxu0 }
 0x149   :  { %v1110_v15 = vadd.f32 %v1109_v13, %v1013_v46  ;;  %v2111_v16 = vpop.f32.mrb[42].mxu1  ;;  %v2062_v18 = vpop.f32.mrb[43].mxu0 }
 0x14a   :  { %v1190_v3 = vcombine.high %v1118_v11, %v1118_v11  ;;  %v1249_v20 = vsel %vm1220_vm1, %v1118_v11, -inf  ;;  %v1121_v21 = vadd.f32 %v2111_v16, %v1024_v55  ;;  %v2655_v22 = vadd.f32 %v2062_v18, %v2061_v14  ;;  %v1112_v5 = vpop.f32.mrb[43].mxu1  ;;  %v2682_v55 = vld [vmem:[%s2887_s2] ss:$0 sm:$0xff] }
 0x14b   :  { %v1250_v23 = vrot.slane %v1249_v20, 4  ;;  %v1188_v24 = vcombine.high %v1110_v15, %v1110_v15  ;;  %v1221_v25 = vsel %vm1220_vm1, %v1110_v15, -inf  ;;  %v1113_v26 = vadd.f32 %v1112_v5, %v1016_v50 }
 0x14c   :  { %v1256_v27 = vsel %vm1220_vm1, %v1190_v3, -inf  ;;  %v1222_v28 = vrot.slane %v1221_v25, 4  ;;  %v1263_v56 = vsel %vm1220_vm1, %v1121_v21, -inf  ;;  %v1191_v4 = vcombine.high %v1121_v21, %v1121_v21 }
 0x14d   :  { %v1251_v29 = vmax.f32 %v1249_v20, %v1250_v23  ;;  %v1257_v30 = vrot.slane %v1256_v27, 4  ;;  %v1228_v32 = vsel %vm1220_vm1, %v1188_v24, -inf  ;;  %v1189_v36 = vcombine.high %v1113_v26, %v1113_v26 }
 0x14e   :  { %v1223_v34 = vmax.f32 %v1221_v25, %v1222_v28  ;;  %v1229_v35 = vrot.slane %v1228_v32, 4  ;;  %v2660_v37 = vpop.f32.mrb[44].mxu0  ;;  %v1235_v44 = vsel %vm1220_vm1, %v1113_v26, -inf  ;;  %v1264_v15 = vrot.slane %v1263_v56, 4 }
 0x14f   :  { %v1252_v38 = vrot.slane %v1251_v29, 2  ;;  %v1258_v39 = vmax.f32 %v1256_v27, %v1257_v30  ;;  %v2662_v40 = vpop.f32.mrb[44].mxu1  ;;  %v2664_v41 = vpop.f32.mrb[45].mxu0  ;;  %v1242_v46 = vsel %vm1220_vm1, %v1189_v36, -inf  ;;  %v1236_v62 = vrot.slane %v1235_v44, 4 }
 0x150   :  { %v1224_v42 = vrot.slane %v1223_v34, 2  ;;  %v1230_v43 = vmax.f32 %v1228_v32, %v1229_v35  ;;  %v2668_v48 = vpop.f32.mrb[45].mxu1  ;;  %v2670_v50 = vpop.f32.mrb[46].mxu0  ;;  %v1243_v0 = vrot.slane %v1242_v46, 4  ;;  %v1270_v24 = vsel %vm1220_vm1, %v1191_v4, -inf }
 0x151   :  { %v1253_v52 = vmax.f32 %v1251_v29, %v1252_v38  ;;  %v1259_v54 = vrot.slane %v1258_v39, 2  ;;  %v2673_v57 = vpop.f32.mrb[46].mxu1  ;;  %v2675_v58 = vpop.f32.mrb[47].mxu0  ;;  %v1237_v10 = vmax.f32 %v1235_v44, %v1236_v62  ;;  %v2698_v38 = vmax.f32 %v1263_v56, %v1264_v15 }
 0x152   :  { %v1225_v59 = vmax.f32 %v1223_v34, %v1224_v42  ;;  %v1231_v60 = vrot.slane %v1230_v43, 2  ;;  %v2677_v1 = vpop.f32.mrb[47].mxu1  ;;  %v1244_v11 = vmax.f32 %v1242_v46, %v1243_v0  ;;  %v1271_v62 = vrot.slane %v1270_v24, 4 }
 0x153   :  { %v1254_v2 = vrot.slane %v1253_v52, 1  ;;  %v1260_v53 = vmax.f32 %v1258_v39, %v1259_v54  ;;  %v1238_v3 = vrot.slane %v1237_v10, 2  ;;  %v1266_v4 = vrot.slane %v2698_v38, 2 }
 0x154   :  { %v1226_v8 = vrot.slane %v1225_v59, 1  ;;  %v1232_v9 = vmax.f32 %v1230_v43, %v1231_v60  ;;  %v1245_v20 = vrot.slane %v1244_v11, 2 }
 0x155   :  { %v1255_v13 = vmax.f32 %v1253_v52, %v1254_v2  ;;  %v1261_v14 = vrot.slane %v1260_v53, 1  ;;  %v1239_v29 = vmax.f32 %v1237_v10, %v1238_v3 }
 0x156   :  { %v1227_v16 = vmax.f32 %v1225_v59, %v1226_v8  ;;  %v1233_v18 = vrot.slane %v1232_v9, 1  ;;  %v2684_v5 = vpop.f32.mrb[48].mxu0  ;;  %v1246_v30 = vmax.f32 %v1244_v11, %v1245_v20  ;;  %v2066_v11 = vadd.f32 %v2664_v41, %v2660_v37 }
 0x157   :  { %v1262_v23 = vmax.f32 %v1260_v53, %v1261_v14  ;;  %v1456_v21 = vadd.f32 %v2682_v55, %v1255_v13  ;;  %v2688_v25 = vpop.f32.mrb[48].mxu1  ;;  %v2690_v26 = vpop.f32.mrb[49].mxu0  ;;  %v1240_v44 = vrot.slane %v1239_v29, 1 }
 0x158   :  { %v1234_v27 = vmax.f32 %v1232_v9, %v1233_v18  ;;  %v1452_v28 = vadd.f32 %v2682_v55, %v1227_v16  ;;  %v2693_v32 = vpop.f32.mrb[49].mxu1  ;;  %v2695_v34 = vpop.f32.mrb[50].mxu0  ;;  %v1247_v46 = vrot.slane %v1246_v30, 1  ;;  %v2714_v16 = vmax.f32 %v1270_v24, %v1271_v62 }
 0x159   :  { %v1457_v35 = vadd.f32 %v2682_v55, %v1262_v23  ;;  %v1874_v36 = vpack.c.bf16 %v1456_v21, %v1456_v21  ;;  %v2700_v39 = vpop.f32.mrb[50].mxu1  ;;  %v2702_v42 = vpop.f32.mrb[51].mxu0  ;;  %v1241_v2 = vmax.f32 %v1239_v29, %v1240_v44  ;;  %v1029_v18 = vadd.f32 %v2652_v12, %v2624_v17 }
 0x15a   :  { %v1453_v43 = vadd.f32 %v2682_v55, %v1234_v27  ;;  %v2705_v52 = vpop.f32.mrb[51].mxu1  ;;  %v1870_v60 = vpack.c.bf16 %v1452_v28, %v1452_v28  ;;  %v1248_v53 = vmax.f32 %v1246_v30, %v1247_v46  ;;  %v1037_v28 = vadd.f32 %v2066_v11, %v2628_v31 }
 0x15b   :  { %v1875_v54 = vpack.c.bf16 %v1457_v35, %v1457_v35  ;;  %v1616_v59 = vunpack.c.l.b16 %v1874_v36  ;;  %v1454_v9 = vadd.f32 %v2682_v55, %v1241_v2  ;;  %v1126_v24 = vadd.f32 %v2668_v48, %v1029_v18 }
 0x15c   :  { %v1871_v0 = vpack.c.bf16 %v1453_v43, %v1453_v43  ;;  %v1455_v10 = vadd.f32 %v2682_v55, %v1248_v53  ;;  %v1612_v15 = vunpack.c.l.b16 %v1870_v60  ;;  %v2069_v30 = vadd.f32 %v2675_v58, %v2670_v50 }
 0x15d   :  { %v1617_v56 = vunpack.c.l.b16 %v1875_v54  ;;  %v1653_v14 = vrot.slane %v1616_v59, 4  ;;  %v1872_v21 = vpack.c.bf16 %v1454_v9, %v1454_v9  ;;  %v1032_v17 = vadd.f32 %v2655_v22, %v2626_v19 }
 0x15e   :  { %v1613_v8 = vunpack.c.l.b16 %v1871_v0  ;;  %v2712_v13 = vpop.f32.mrb[52].mxu0  ;;  %v1873_v27 = vpack.c.bf16 %v1455_v10, %v1455_v10  ;;  %v1134_v44 = vadd.f32 %v2662_v40, %v1037_v28  ;;  %v1192_v54 = vcombine.high %v1126_v24, %v1126_v24 }
 0x15f   :  { %v2718_v3 = vpop.f32.mrb[52].mxu1  ;;  %v2720_v20 = vpop.f32.mrb[53].mxu0  ;;  %v1656_v41 = vrot.slane %v1617_v56, 3  ;;  %v1614_v31 = vunpack.c.l.b16 %v1872_v21  ;;  %v1277_v48 = vsel %vm1220_vm1, %v1126_v24, -inf  ;;  %v1040_v50 = vadd.f32 %v2069_v30, %v2630_v33 }
 0x160   :  { %v1644_v23 = vrot.slane %v1613_v8, 7  ;;  %v2723_v29 = vpop.f32.mrb[53].mxu1  ;;  %v2725_v37 = vpop.f32.mrb[54].mxu0  ;;  %v1615_v43 = vunpack.c.l.b16 %v1873_v27  ;;  %v1129_v58 = vadd.f32 %v2677_v1, %v1032_v17  ;;  %v1194_v59 = vcombine.high %v1134_v44, %v1134_v44 }
 0x161   :  { %v2732_v12 = vpop.f32.mrb[54].mxu1  ;;  %v2734_v35 = vpop.f32.mrb[55].mxu0  ;;  %v1647_v19 = vrot.slane %v1614_v31, 6  ;;  %v1305_v60 = vsel %vm1220_vm1, %v1134_v44, -inf  ;;  %v1278_v0 = vrot.slane %v1277_v48, 4  ;;  %v1284_v2 = vsel %vm1220_vm1, %v1192_v54, -inf }
 0x162   :  { %v1646_v36 = vsel %vm1645_vm2, %v1644_v23, %v1612_v15  ;;  %v2738_v46 = vpop.f32.mrb[55].mxu1  ;;  %v1650_v22 = vrot.slane %v1615_v43, 5  ;;  %v1306_v62 = vrot.slane %v1305_v60, 4  ;;  %v1137_v40 = vadd.f32 %v2673_v57, %v1040_v50 }
 0x163   :  { %v1649_v53 = vsel %vm1648_vm3, %v1647_v19, %v1646_v36  ;;  %v1312_v56 = vsel %vm1220_vm1, %v1194_v59, -inf  ;;  %v1285_v8 = vrot.slane %v1284_v2, 4  ;;  %v1193_v9 = vcombine.high %v1129_v58, %v1129_v58 }
 0x164   :  { %v1652_v33 = vsel %vm1651_vm4, %v1650_v22, %v1649_v53  ;;  %v1307_v1 = vmax.f32 %v1305_v60, %v1306_v62  ;;  %v1313_v10 = vrot.slane %v1312_v56, 4  ;;  %v1279_v11 = vmax.f32 %v1277_v48, %v1278_v0 }
 0x165   :  { %v1655_v15 = vsel %vm1654_vm5, %v1653_v14, %v1652_v33  ;;  %v1286_v18 = vmax.f32 %v1284_v2, %v1285_v8  ;;  %v1195_v23 = vcombine.high %v1137_v40, %v1137_v40  ;;  %v1319_v21 = vsel %vm1220_vm1, %v1137_v40, -inf }
 0x166   :  { %v2752_v27 = vsel %vm1657_vm6, %v1656_v41, %v1655_v15  ;;  %v1308_v57 = vrot.slane %v1307_v1, 2  ;;  %v1314_v28 = vmax.f32 %v1312_v56, %v1313_v10  ;;  %v1280_v24 = vrot.slane %v1279_v11, 2 }
 0x167   :  { %v1287_v30 = vrot.slane %v1286_v18, 2  ;;  %v1320_v17 = vrot.slane %v1319_v21, 4  ;;  %v1326_v36 = vsel %vm1220_vm1, %v1195_v23, -inf  ;;  %v1291_v31 = vsel %vm1220_vm1, %v1129_v58, -inf }
 0x168   :  { %v1273_v43 = vrot.slane %v2714_v16, 2  ;;  %v1309_v44 = vmax.f32 %v1307_v1, %v1308_v57  ;;  %v1315_v14 = vrot.slane %v1314_v28, 2  ;;  %v1281_v54 = vmax.f32 %v1279_v11, %v1280_v24 }
 0x169   :  { %v1288_v48 = vmax.f32 %v1286_v18, %v1287_v30  ;;  %v1327_v50 = vrot.slane %v1326_v36, 4  ;;  %v1292_v19 = vrot.slane %v1291_v31, 4  ;;  %v1298_v41 = vsel %vm1220_vm1, %v1193_v9, -inf }
 0x16a   :  { %v1310_v22 = vrot.slane %v1309_v44, 1  ;;  %v1316_v59 = vmax.f32 %v1314_v28, %v1315_v14  ;;  %v1282_v60 = vrot.slane %v1281_v54, 1  ;;  %v1321_v62 = vmax.f32 %v1319_v21, %v1320_v17 }
 0x16b   :  { %v1267_v0 = vmax.f32 %v2698_v38, %v1266_v4  ;;  %v1289_v2 = vrot.slane %v1288_v48, 1  ;;  %v1293_v58 = vmax.f32 %v1291_v31, %v1292_v19  ;;  %v1299_v40 = vrot.slane %v1298_v41, 4 }
 0x16c   :  { %v1274_v53 = vmax.f32 %v2714_v16, %v1273_v43  ;;  %v1311_v56 = vmax.f32 %v1309_v44, %v1310_v22  ;;  %v1317_v8 = vrot.slane %v1316_v59, 1  ;;  %v1283_v33 = vmax.f32 %v1281_v54, %v1282_v60 }
 0x16d   :  { %v1290_v1 = vmax.f32 %v1288_v48, %v1289_v2  ;;  %v1328_v10 = vmax.f32 %v1326_v36, %v1327_v50  ;;  %v1294_v11 = vrot.slane %v1293_v58, 2  ;;  %v1300_v9 = vmax.f32 %v1298_v41, %v1299_v40 }
 0x16e   :  { %v1318_v15 = vmax.f32 %v1316_v59, %v1317_v8  ;;  %v1464_v18 = vadd.f32 %v2682_v55, %v1311_v56  ;;  %v1322_v23 = vrot.slane %v1321_v62, 2  ;;  %v1460_v21 = vadd.f32 %v2682_v55, %v1283_v33 }
 0x16f   :  { %v1461_v38 = vadd.f32 %v2682_v55, %v1290_v1  ;;  %v1295_v4 = vmax.f32 %v1293_v58, %v1294_v11  ;;  %v1301_v57 = vrot.slane %v1300_v9, 2  ;;  %v1268_v28 = vrot.slane %v1267_v0, 1 }
 0x170   :  { %v1275_v24 = vrot.slane %v1274_v53, 1  ;;  %v1465_v16 = vadd.f32 %v2682_v55, %v1318_v15  ;;  %v1329_v17 = vrot.slane %v1328_v10, 2  ;;  %v1882_v43 = vpack.c.bf16 %v1464_v18, %v1464_v18 }
 0x171   :  { %v1879_v30 = vpack.c.bf16 %v1461_v38, %v1461_v38  ;;  %v1296_v31 = vrot.slane %v1295_v4, 1  ;;  %v1302_v36 = vmax.f32 %v1300_v9, %v1301_v57  ;;  %v1323_v44 = vmax.f32 %v1321_v62, %v1322_v23 }
 0x172   :  { %v1878_v14 = vpack.c.bf16 %v1460_v21, %v1460_v21  ;;  %v1269_v19 = vmax.f32 %v1267_v0, %v1268_v28  ;;  %v1883_v41 = vpack.c.bf16 %v1465_v16, %v1465_v16  ;;  %v2072_v22 = vadd.f32 %v2690_v26, %v2684_v5 }
 0x173   :  { %v1621_v54 = vunpack.c.l.b16 %v1879_v30  ;;  %v1297_v48 = vmax.f32 %v1295_v4, %v1296_v31  ;;  %v1303_v50 = vrot.slane %v1302_v36, 1  ;;  %v1276_v59 = vmax.f32 %v1274_v53, %v1275_v24 }
 0x174   :  { %v1330_v60 = vmax.f32 %v1328_v10, %v1329_v17  ;;  %v1324_v56 = vrot.slane %v1323_v44, 1  ;;  %v1045_v8 = vadd.f32 %v2072_v22, %v2632_v45  ;;  %v2075_v62 = vadd.f32 %v2702_v42, %v2695_v34 }
 0x175   :  { %v1304_v2 = vmax.f32 %v1302_v36, %v1303_v50  ;;  %v1462_v58 = vadd.f32 %v2682_v55, %v1297_v48  ;;  %v1665_v40 = vrot.slane %v1621_v54, 7  ;;  %v1624_v33 = vunpack.c.l.b16 %v1882_v43 }
 0x176   :  { %v1620_v1 = vunpack.c.l.b16 %v1878_v14  ;;  %v1625_v9 = vunpack.c.l.b16 %v1883_v41  ;;  %v1142_v5 = vadd.f32 %v2693_v32, %v1045_v8  ;;  %v1048_v26 = vadd.f32 %v2075_v62, %v2634_v47 }
 0x177   :  { %v1463_v0 = vadd.f32 %v2682_v55, %v1304_v2  ;;  %v1880_v11 = vpack.c.bf16 %v1462_v58, %v1462_v58  ;;  %v2777_v53 = vadd.f32 %v2718_v3, %v2647_v6  ;;  %v1331_v10 = vrot.slane %v1330_v60, 1 }
 0x178   :  { %v2078_v34 = vadd.f32 %v2720_v20, %v2712_v13  ;;  %v1666_v42 = vsel %vm1645_vm2, %v1665_v40, %v1620_v1  ;;  %v1196_v18 = vcombine.high %v1142_v5, %v1142_v5  ;;  %v1333_v23 = vsel %vm1220_vm1, %v1142_v5, -inf }
 0x179   :  { %v1881_v15 = vpack.c.bf16 %v1463_v0, %v1463_v0  ;;  %v1622_v45 = vunpack.c.l.b16 %v1880_v11  ;;  %v1145_v21 = vadd.f32 %v2705_v52, %v1048_v26  ;;  %v1671_v32 = vrot.slane %v1624_v33, 4 }
 0x17a   :  { %v1334_v4 = vrot.slane %v1333_v23, 4  ;;  %v1673_v57 = vrot.slane %v1625_v9, 3  ;;  %v1340_v6 = vsel %vm1220_vm1, %v1196_v18, -inf  ;;  %v1458_v30 = vadd.f32 %v2682_v55, %v1269_v19 }
 0x17b   :  { %v1623_v38 = vunpack.c.l.b16 %v1881_v15  ;;  %v1667_v47 = vrot.slane %v1622_v45, 6  ;;  %v1197_v3 = vcombine.high %v1145_v21, %v1145_v21  ;;  %v1347_v28 = vsel %vm1220_vm1, %v1145_v21, -inf }
 0x17c   :  { %v1335_v20 = vmax.f32 %v1333_v23, %v1334_v4  ;;  %v1341_v16 = vrot.slane %v1340_v6, 4  ;;  %v1459_v17 = vadd.f32 %v2682_v55, %v1276_v59  ;;  %v1348_v52 = vrot.slane %v1347_v28, 4 }
 0x17d   :  { %v1668_v24 = vsel %vm1648_vm3, %v1667_v47, %v1666_v42  ;;  %v1669_v13 = vrot.slane %v1623_v38, 5  ;;  %v1354_v31 = vsel %vm1220_vm1, %v1197_v3, -inf  ;;  %v1325_v48 = vmax.f32 %v1323_v44, %v1324_v56 }
 0x17e   :  { %v1336_v43 = vrot.slane %v1335_v20, 2  ;;  %v1342_v14 = vmax.f32 %v1340_v6, %v1341_v16  ;;  %v1355_v54 = vrot.slane %v1354_v31, 4  ;;  %v1332_v50 = vmax.f32 %v1330_v60, %v1331_v10 }
 0x17f   :  { %v1670_v36 = vsel %vm1651_vm4, %v1669_v13, %v1668_v24  ;;  %v1349_v22 = vmax.f32 %v1347_v28, %v1348_v52  ;;  %v1876_v59 = vpack.c.bf16 %v1458_v30, %v1458_v30  ;;  %v1877_v8 = vpack.c.bf16 %v1459_v17, %v1459_v17 }
 0x180   :  { %v1672_v41 = vsel %vm1654_vm5, %v1671_v32, %v1670_v36  ;;  %v1337_v58 = vmax.f32 %v1335_v20, %v1336_v43  ;;  %v1343_v19 = vrot.slane %v1342_v14, 2  ;;  %v1356_v40 = vmax.f32 %v1354_v31, %v1355_v54 }
 0x181   :  { %v2793_v2 = vsel %vm1657_vm6, %v1673_v57, %v1672_v41  ;;  %v1350_v62 = vrot.slane %v1349_v22, 2  ;;  %v1053_v33 = vadd.f32 %v2078_v34, %v2636_v61  ;;  %v1158_v44 = vadd.f32 %v2723_v29, %v2641_v49 }
 0x182   :  { %v1338_v1 = vrot.slane %v1337_v58, 1  ;;  %v1344_v0 = vmax.f32 %v1342_v14, %v1343_v19  ;;  %v1357_v11 = vrot.slane %v1356_v40, 2  ;;  %v1466_v60 = vadd.f32 %v2682_v55, %v1325_v48 }
 0x183   :  { %v1467_v56 = vadd.f32 %v2682_v55, %v1332_v50  ;;  %v1351_v9 = vmax.f32 %v1349_v22, %v1350_v62  ;;  %v1150_v5 = vadd.f32 %v2688_v25, %v1053_v33  ;;  %v1618_v45 = vunpack.c.l.b16 %v1876_v59 }
 0x184   :  { %v1339_v26 = vmax.f32 %v1337_v58, %v1338_v1  ;;  %v1345_v10 = vrot.slane %v1344_v0, 1  ;;  %v1358_v15 = vmax.f32 %v1356_v40, %v1357_v11  ;;  %v2801_v42 = vunpack.c.l.b16 %v1877_v8 }
 0x185   :  { %v1352_v61 = vrot.slane %v1351_v9, 1  ;;  %v1198_v34 = vcombine.high %v1150_v5, %v1150_v5  ;;  %v1361_v49 = vsel %vm1220_vm1, %v1150_v5, -inf  ;;  %v1884_v29 = vpack.c.bf16 %v1466_v60, %v1466_v60 }
 0x186   :  { %v1346_v18 = vmax.f32 %v1344_v0, %v1345_v10  ;;  %v1468_v23 = vadd.f32 %v2682_v55, %v1339_v26  ;;  %v1359_v21 = vrot.slane %v1358_v15, 1  ;;  %v1885_v32 = vpack.c.bf16 %v1467_v56, %v1467_v56 }
 0x187   :  { %v1353_v38 = vmax.f32 %v1351_v9, %v1352_v61  ;;  %v1362_v47 = vrot.slane %v1361_v49, 4  ;;  %v1368_v57 = vsel %vm1220_vm1, %v1198_v34, -inf  ;;  %v1659_v6 = vrot.slane %v1618_v45, 2 }
 0x188   :  { %v1469_v25 = vadd.f32 %v2682_v55, %v1346_v18  ;;  %v1360_v4 = vmax.f32 %v1358_v15, %v1359_v21  ;;  %v1662_v3 = vrot.slane %v2801_v42, 1  ;;  %v1886_v13 = vpack.c.bf16 %v1468_v23, %v1468_v23 }
 0x189   :  { %v1470_v28 = vadd.f32 %v2682_v55, %v1353_v38  ;;  %v1363_v24 = vmax.f32 %v1361_v49, %v1362_v47  ;;  %v1369_v30 = vrot.slane %v1368_v57, 4  ;;  %v1626_v17 = vunpack.c.l.b16 %v1884_v29 }
 0x18a   :  { %v1887_v20 = vpack.c.bf16 %v1469_v25, %v1469_v25  ;;  %v1471_v16 = vadd.f32 %v2682_v55, %v1360_v4  ;;  %v2810_v52 = vunpack.c.l.b16 %v1885_v32  ;;  %v1202_v54 = vcombine.high %v2777_v53, %v2777_v53 }
 0x18b   :  { %v1888_v31 = vpack.c.bf16 %v1470_v28, %v1470_v28  ;;  %v1364_v36 = vrot.slane %v1363_v24, 2  ;;  %v1370_v48 = vmax.f32 %v1368_v57, %v1369_v30  ;;  %v1417_v41 = vsel %vm1220_vm1, %v2777_v53, -inf }
 0x18c   :  { %v1629_v43 = vunpack.c.l.b16 %v1887_v20  ;;  %v1889_v14 = vpack.c.bf16 %v1471_v16, %v1471_v16  ;;  %v1200_v58 = vcombine.high %v1158_v44, %v1158_v44  ;;  %v1628_v19 = vunpack.c.l.b16 %v1886_v13 }
 0x18d   :  { %v1630_v50 = vunpack.c.l.b16 %v1888_v31  ;;  %v1365_v22 = vmax.f32 %v1363_v24, %v1364_v36  ;;  %v1371_v8 = vrot.slane %v1370_v48, 2  ;;  %v1675_v62 = vrot.slane %v1626_v17, 2 }
 0x18e   :  { %v1679_v40 = vrot.slane %v1629_v43, 7  ;;  %v1631_v59 = vunpack.c.l.b16 %v1889_v14  ;;  %v1389_v0 = vsel %vm1220_vm1, %v1158_v44, -inf  ;;  %v1418_v56 = vrot.slane %v1417_v41, 4 }
 0x18f   :  { %v1681_v33 = vrot.slane %v1630_v50, 6  ;;  %v1366_v1 = vrot.slane %v1365_v22, 1  ;;  %v1372_v9 = vmax.f32 %v1370_v48, %v1371_v8  ;;  %v1424_v53 = vsel %vm1220_vm1, %v1202_v54, -inf }
 0x190   :  { %v1680_v11 = vsel %vm1645_vm2, %v1679_v40, %v1628_v19  ;;  %v1683_v60 = vrot.slane %v1631_v59, 5  ;;  %v1396_v10 = vsel %vm1220_vm1, %v1200_v58, -inf  ;;  %v1390_v42 = vrot.slane %v1389_v0, 4 }
 0x191   :  { %v1682_v5 = vsel %vm1648_vm3, %v1681_v33, %v1680_v11  ;;  %v1367_v26 = vmax.f32 %v1365_v22, %v1366_v1  ;;  %v1373_v45 = vrot.slane %v1372_v9, 1  ;;  %v1397_v61 = vrot.slane %v1396_v10, 4 }
 0x192   :  { %v1684_v15 = vsel %vm1651_vm4, %v1683_v60, %v1682_v5  ;;  %v1169_v44 = vadd.f32 %v2732_v12, %v2650_v7  ;;  %v2081_v18 = vadd.f32 %v2734_v35, %v2725_v37  ;;  %v1661_v23 = vsel %vm1660_vm7, %v1659_v6, %v2752_v27 }
 0x193   :  { %v1472_v34 = vadd.f32 %v2682_v55, %v1367_v26  ;;  %v1425_v21 = vrot.slane %v1424_v53, 4  ;;  %v1374_v49 = vmax.f32 %v1372_v9, %v1373_v45  ;;  %v1398_v29 = vmax.f32 %v1396_v10, %v1397_v61 }
 0x194   :  { %v1664_v32 = vsel %vm1663_vm8, %v1662_v3, %v1661_v23  ;;  %v1203_v47 = vcombine.high %v1169_v44, %v1169_v44  ;;  %v1431_v25 = vsel %vm1220_vm1, %v1169_v44, -inf  ;;  %v1056_v4 = vadd.f32 %v2081_v18, %v2638_v63 }
 0x195   :  { %v1890_v38 = vpack.c.bf16 %v1472_v34, %v1472_v34  ;;  %v1473_v57 = vadd.f32 %v2682_v55, %v1374_v49  ;;  %v1391_v7 = vmax.f32 %v1389_v0, %v1390_v42  ;;  %v1399_v12 = vrot.slane %v1398_v29, 2 }
 0x196   :  { %v1432_v28 = vrot.slane %v1431_v25, 4  ;;  %v1438_v35 = vsel %vm1220_vm1, %v1203_v47, -inf  ;;  %v1153_v27 = vadd.f32 %v2700_v39, %v1056_v4  ;;  %v1676_v6 = vsel %vm1660_vm7, %v1675_v62, %v2793_v2 }
 0x197   :  { %v1632_v37 = vunpack.c.l.b16 %v1890_v38  ;;  %v1677_v3 = vrot.slane %v2810_v52, 1  ;;  %v1419_v24 = vmax.f32 %v1417_v41, %v1418_v56  ;;  %v1891_v13 = vpack.c.bf16 %v1473_v57, %v1473_v57 }
 0x198   :  { %v1400_v20 = vmax.f32 %v1398_v29, %v1399_v12  ;;  %v1439_v63 = vrot.slane %v1438_v35, 4  ;;  %v1199_v30 = vcombine.high %v1153_v27, %v1153_v27  ;;  %v1375_v17 = vsel %vm1220_vm1, %v1153_v27, -inf }
 0x199   :  { %v1685_v16 = vrot.slane %v1632_v37, 4  ;;  %v1426_v31 = vmax.f32 %v1424_v53, %v1425_v21  ;;  %v1633_v36 = vunpack.c.l.b16 %v1891_v13  ;;  %v1392_v43 = vrot.slane %v1391_v7, 2 }
 0x19a   :  { %v1433_v54 = vmax.f32 %v1431_v25, %v1432_v28  ;;  %v1376_v39 = vrot.slane %v1375_v17, 4  ;;  %v1382_v48 = vsel %vm1220_vm1, %v1199_v30, -inf  ;;  %v1401_v50 = vrot.slane %v1400_v20, 1 }
 0x19b   :  { %v1686_v14 = vsel %vm1654_vm5, %v1685_v16, %v1684_v15  ;;  %v1687_v2 = vrot.slane %v1633_v36, 3  ;;  %v1440_v52 = vmax.f32 %v1438_v35, %v1439_v63  ;;  %v1420_v41 = vrot.slane %v1419_v24, 2 }
 0x19c   :  { %v1377_v22 = vmax.f32 %v1375_v17, %v1376_v39  ;;  %v1383_v58 = vrot.slane %v1382_v48, 4  ;;  %v1678_v19 = vsel %vm1663_vm8, %v1677_v3, %v1676_v6  ;;  %v1427_v40 = vrot.slane %v1426_v31, 2 }
 0x19d   :  { %v2843_v59 = vsel %vm1657_vm6, %v1687_v2, %v1686_v14  ;;  %v1393_v8 = vmax.f32 %v1391_v7, %v1392_v43  ;;  %v1434_v62 = vrot.slane %v1433_v54, 2  ;;  %v1707_v0 = vpack.c.b16 %v1664_v32, %v1664_v32 }
 0x19e   :  { %v1378_v33 = vrot.slane %v1377_v22, 2  ;;  %v1384_v1 = vmax.f32 %v1382_v48, %v1383_v58  ;;  %v1402_v11 = vmax.f32 %v1400_v20, %v1401_v50  ;;  %v1441_v60 = vrot.slane %v1440_v52, 2 }
 0x19f   :  { %v1708_v56 = vpack.c.b16 %v1678_v19, %v1678_v19  ;;  %v1161_v9 = vadd.f32 %v2738_v46, %v2644_v51  ;;  %v1421_v5 = vmax.f32 %v1419_v24, %v1420_v41  ;;  %1715 = vst.msk [vmem:[%s2888_s3] sm:$0xf] %vm1220_vm1, %v1707_v0  ;;  %v1428_v10 = vmax.f32 %v1426_v31, %v1427_v40 }
 0x1a0   :  { %v1379_v53 = vmax.f32 %v1377_v22, %v1378_v33  ;;  %v1385_v26 = vrot.slane %v1384_v1, 2  ;;  %v1394_v15 = vrot.slane %v1393_v8, 1  ;;  %v1435_v61 = vmax.f32 %v1433_v54, %v1434_v62 }
 0x1a1   :  { %1716 = vst.msk [vmem:[%s2888_s3 + $0x4] sm:$0xf] %vm1220_vm1, %v1708_v56  ;;  %v1201_v45 = vcombine.high %v1161_v9, %v1161_v9  ;;  %v1403_v42 = vsel %vm1220_vm1, %v1161_v9, -inf  ;;  %v1477_v44 = vadd.f32 %v2682_v55, %v1402_v11  ;;  %v1442_v18 = vmax.f32 %v1440_v52, %v1441_v60 }
 0x1a2   :  { %v1380_v51 = vrot.slane %v1379_v53, 1  ;;  %v1386_v46 = vmax.f32 %v1384_v1, %v1385_v26  ;;  %v1404_v34 = vrot.slane %v1403_v42, 4  ;;  %v1422_v21 = vrot.slane %v1421_v5, 1 }
 0x1a3   :  { %v1410_v23 = vsel %vm1220_vm1, %v1201_v45, -inf  ;;  %v1429_v38 = vrot.slane %v1428_v10, 1  ;;  %v1395_v47 = vmax.f32 %v1393_v8, %v1394_v15  ;;  %v1436_v4 = vrot.slane %v1435_v61, 1 }
 0x1a4   :  { %v1381_v49 = vmax.f32 %v1379_v53, %v1380_v51  ;;  %v1387_v29 = vrot.slane %v1386_v46, 1  ;;  %v1405_v32 = vmax.f32 %v1403_v42, %v1404_v34  ;;  %v1411_v25 = vrot.slane %v1410_v23, 4 }
 0x1a5   :  { %v1895_v28 = vpack.c.bf16 %v1477_v44, %v1477_v44  ;;  %v1443_v37 = vrot.slane %v1442_v18, 1  ;;  %v1423_v27 = vmax.f32 %v1421_v5, %v1422_v21  ;;  %v1430_v13 = vmax.f32 %v1428_v10, %v1429_v38 }
 0x1a6   :  { %v1388_v57 = vmax.f32 %v1386_v46, %v1387_v29  ;;  %v1474_v7 = vadd.f32 %v2682_v55, %v1381_v49  ;;  %v1406_v12 = vrot.slane %v1405_v32, 2  ;;  %v1412_v35 = vmax.f32 %v1410_v23, %v1411_v25 }
 0x1a7   :  { %v1476_v20 = vadd.f32 %v2682_v55, %v1395_v47  ;;  %v1437_v63 = vmax.f32 %v1435_v61, %v1436_v4  ;;  %v1637_v36 = vunpack.c.l.b16 %v1895_v28  ;;  %v1444_v43 = vmax.f32 %v1442_v18, %v1443_v37 }
 0x1a8   :  { %v1475_v6 = vadd.f32 %v2682_v55, %v1388_v57  ;;  %v1892_v3 = vpack.c.bf16 %v1474_v7, %v1474_v7  ;;  %v1407_v24 = vmax.f32 %v1405_v32, %v1406_v12  ;;  %v1413_v16 = vrot.slane %v1412_v35, 2 }
 0x1a9   :  { %v1480_v54 = vadd.f32 %v2682_v55, %v1423_v27  ;;  %v1481_v50 = vadd.f32 %v2682_v55, %v1430_v13  ;;  %v1894_v52 = vpack.c.bf16 %v1476_v20, %v1476_v20  ;;  %v1482_v22 = vadd.f32 %v2682_v55, %v1437_v63 }
 0x1aa   :  { %v1893_v30 = vpack.c.bf16 %v1475_v6, %v1475_v6  ;;  %v1634_v17 = vunpack.c.l.b16 %v1892_v3  ;;  %v1408_v31 = vrot.slane %v1407_v24, 1  ;;  %v1414_v14 = vmax.f32 %v1412_v35, %v1413_v16 }
 0x1ab   :  { %v1693_v8 = vrot.slane %v1637_v36, 7  ;;  %v1483_v62 = vadd.f32 %v2682_v55, %v1444_v43  ;;  %v1898_v1 = vpack.c.bf16 %v1480_v54, %v1480_v54  ;;  %v1899_v60 = vpack.c.bf16 %v1481_v50, %v1481_v50 }
 0x1ac   :  { %v1635_v39 = vunpack.c.l.b16 %v1893_v30  ;;  %v1689_v48 = vrot.slane %v1634_v17, 2  ;;  %v1409_v2 = vmax.f32 %v1407_v24, %v1408_v31  ;;  %v1415_v41 = vrot.slane %v1414_v14, 1 }
 0x1ad   :  { %v1636_v56 = vunpack.c.l.b16 %v1894_v52  ;;  %v1900_v53 = vpack.c.bf16 %v1482_v22, %v1482_v22  ;;  %v1901_v10 = vpack.c.bf16 %v1483_v62, %v1483_v62  ;;  %v1640_v45 = vunpack.c.l.b16 %v1898_v1 }
 0x1ae   :  { %v1690_v58 = vsel %vm1660_vm7, %v1689_v48, %v2843_v59  ;;  %v1691_v19 = vrot.slane %v1635_v39, 1  ;;  %v1478_v40 = vadd.f32 %v2682_v55, %v1409_v2  ;;  %v1416_v33 = vmax.f32 %v1414_v14, %v1415_v41 }
 0x1af   :  { %v1694_v59 = vsel %vm1645_vm2, %v1693_v8, %v1636_v56  ;;  %v1641_v61 = vunpack.c.l.b16 %v1899_v60  ;;  %v1642_v46 = vunpack.c.l.b16 %v1900_v53  ;;  %v1643_v44 = vunpack.c.l.b16 %v1901_v10 }
 0x1b0   :  { %v1692_v0 = vsel %vm1663_vm8, %v1691_v19, %v1690_v58  ;;  %v1896_v11 = vpack.c.bf16 %v1478_v40, %v1478_v40  ;;  %v1479_v5 = vadd.f32 %v2682_v55, %v1416_v33  ;;  %v1699_v18 = vrot.slane %v1640_v45, 4 }
 0x1b1   :  { %v1709_v9 = vpack.c.b16 %v1692_v0, %v1692_v0  ;;  %v1701_v23 = vrot.slane %v1641_v61, 3  ;;  %v1703_v49 = vrot.slane %v1642_v46, 2  ;;  %v1705_v32 = vrot.slane %v1643_v44, 1 }
 0x1b2   :  { %v1638_v26 = vunpack.c.l.b16 %v1896_v11  ;;  %v1897_v15 = vpack.c.bf16 %v1479_v5, %v1479_v5 }
 0x1b3   :  { %1717 = vst.msk [vmem:[%s2888_s3 + $0x8] sm:$0xf] %vm1220_vm1, %v1709_v9 }
 0x1b4   :  { %v1695_v42 = vrot.slane %v1638_v26, 6  ;;  %v1639_v51 = vunpack.c.l.b16 %v1897_v15 }
 0x1b6   :  { %v1696_v34 = vsel %vm1648_vm3, %v1695_v42, %v1694_v59  ;;  %v1697_v55 = vrot.slane %v1639_v51, 5 }
 0x1b8   :  { %v1698_v21 = vsel %vm1651_vm4, %v1697_v55, %v1696_v34 }
 0x1b9   :  { %v1700_v29 = vsel %vm1654_vm5, %v1699_v18, %v1698_v21 }
 0x1ba   :  { %v1702_v38 = vsel %vm1657_vm6, %v1701_v23, %v1700_v29 }
 0x1bb   :  { %v1704_v47 = vsel %vm1660_vm7, %v1703_v49, %v1702_v38 }
 0x1bc   :  { %v1706_v25 = vsel %vm1663_vm8, %v1705_v32, %v1704_v47 }
 0x1bd   :  { %v1710_v4 = vpack.c.b16 %v1706_v25, %v1706_v25 }
 0x1bf   :  { %1718 = vst.msk [vmem:[%s2888_s3 + $0xc] sm:$0xf] %vm1220_vm1, %v1710_v4 }

// kernel: cifar_net_forward.7
= control target key start
LH: loop header
LB: loop body
LE: loop exit
PB: predicated region body
PF: predicated region fallthrough
CT: control target
= control target key end

     0   :  { %v163_v28 = vlaneseq  ;;  %v1133_v36 = vmov 1966171168   ;;  %s1405_s0 = inlined_call_operand.vmem [shape: bf16[2,1024], index: 0, kind: input, shape index: {}]   ;;  %s1406_s1 = inlined_call_operand.vmem [shape: bf16[1024,64], index: 1, kind: input, shape index: {}]   ;;  %s1407_s2 = inlined_call_operand.vmem [shape: f32[1,64], index: 2, kind: input, shape index: {}]   ;;  %s1408_s3 = inlined_call_operand.vmem [shape: bf16[64,10], index: 3, kind: input, shape index: {}]   ;;  %s1409_s4 = inlined_call_operand.vmem [shape: f32[1,10], index: 4, kind: input, shape index: {}]   ;;  %s1410_s5 = inlined_call_operand.hbm [shape: f32[2,10], index: 5, kind: output, shape index: {}]  }
   0x1   :  { %v1040_v0 = vld [vmem:[%s1406_s1 + $0x40] sm:$0xff]   ;;  %v1044_v4 = vld [vmem:[%s1406_s1 + $0x48] sm:$0xff]   ;;  %v1048_v8 = vld [vmem:[%s1406_s1 + $0x50] sm:$0xff]   ;;  %v161_v37 = vunpack.c.l.s4 %v1133_v36 }
   0x2   :  { %v1041_v1 = vld [vmem:[%s1406_s1 + $0xc0] sm:$0xff]   ;;  %931 = vmatprep.subr.bf16.mxu0 %v1040_v0  ;;  %v1045_v5 = vld [vmem:[%s1406_s1 + $0xc8] sm:$0xff]   ;;  %v1049_v9 = vld [vmem:[%s1406_s1 + $0xd0] sm:$0xff]   ;;  %v164_v33 = vshrl.u32 %v163_v28, 7 }
   0x3   :  { %v1042_v2 = vld [vmem:[%s1406_s1] sm:$0xff]   ;;  %953 = vmatprep.subr.bf16.mxu1 %v1041_v1  ;;  %v1046_v6 = vld [vmem:[%s1406_s1 + $0x8] sm:$0xff]   ;;  %v1050_v10 = vld [vmem:[%s1406_s1 + $0x10] sm:$0xff]   ;;  %v162_v40 = vunpack.c.0.s8 %v161_v37 }
   0x4   :  { %v1043_v3 = vld [vmem:[%s1406_s1 + $0x80] sm:$0xff]   ;;  %932 = vmatpush3.bf16.msra.mxu0 %v1042_v2  ;;  %v1047_v7 = vld [vmem:[%s1406_s1 + $0x88] sm:$0xff]   ;;  %v1051_v11 = vld [vmem:[%s1406_s1 + $0x90] sm:$0xff]  }
   0x5   :  { %954 = vmatpush3.bf16.msra.mxu1 %v1043_v3  ;;  %933 = vmatprep.subr.bf16.mxu0 %v1044_v4  ;;  %v1052_v12 = vld [vmem:[%s1406_s1 + $0x58] sm:$0xff]   ;;  %v1056_v16 = vld [vmem:[%s1406_s1 + $0x60] sm:$0xff]   ;;  %v1060_v20 = vld [vmem:[%s1406_s1 + $0x68] sm:$0xff]   ;;  %v1272_v41 = vsub.s32 %v162_v40, %v164_v33 }
   0x6   :  { %955 = vmatprep.subr.bf16.mxu1 %v1045_v5  ;;  %v1053_v13 = vld [vmem:[%s1406_s1 + $0xd8] sm:$0xff]   ;;  %v1057_v17 = vld [vmem:[%s1406_s1 + $0xe0] sm:$0xff]   ;;  %v1061_v21 = vld [vmem:[%s1406_s1 + $0xe8] sm:$0xff]  }
   0x7   :  { %v1054_v14 = vld [vmem:[%s1406_s1 + $0x18] sm:$0xff]   ;;  %v1058_v18 = vld [vmem:[%s1406_s1 + $0x20] sm:$0xff]   ;;  %v1062_v22 = vld [vmem:[%s1406_s1 + $0x28] sm:$0xff]  }
   0x8   :  { %934 = vmatpush3.bf16.msra.mxu0 %v1046_v6  ;;  %v1055_v15 = vld [vmem:[%s1406_s1 + $0x98] sm:$0xff]   ;;  %v1059_v19 = vld [vmem:[%s1406_s1 + $0xa0] sm:$0xff]   ;;  %v1063_v23 = vld [vmem:[%s1406_s1 + $0xa8] sm:$0xff]  }
   0x9   :  { %956 = vmatpush3.bf16.msra.mxu1 %v1047_v7  ;;  %935 = vmatprep.subr.bf16.mxu0 %v1048_v8  ;;  %v1064_v24 = vld [vmem:[%s1406_s1 + $0x70] sm:$0xff]   ;;  %v1068_v29 = vld [vmem:[%s1406_s1 + $0x78] sm:$0xff]   ;;  %v22_v34 = vld [vmem:[%s1405_s0] sm:$0xff] }
   0xa   :  { %957 = vmatprep.subr.bf16.mxu1 %v1049_v9  ;;  %v1065_v25 = vld [vmem:[%s1406_s1 + $0xf0] sm:$0xff]   ;;  %v1069_v30 = vld [vmem:[%s1406_s1 + $0xf8] sm:$0xff]   ;;  %v1073_v35 = vld [vmem:[%s1406_s1 + $0x140] sm:$0xff]   ;;  %v159_v39 = vcombine.high %v22_v34, %v22_v34  ;;  %v166_v42 = vrot.slane %v22_v34, %v1272_v41 }
   0xb   :  { %v1066_v26 = vld [vmem:[%s1406_s1 + $0x30] sm:$0xff]   ;;  %v1070_v31 = vld [vmem:[%s1406_s1 + $0x38] sm:$0xff]   ;;  %v1074_v38 = vld [vmem:[%s1406_s1 + $0x1c0] sm:$0xff]  }
   0xc   :  { %936 = vmatpush3.bf16.msra.mxu0 %v1050_v10  ;;  %v1067_v27 = vld [vmem:[%s1406_s1 + $0xb0] sm:$0xff]   ;;  %v1071_v32 = vld [vmem:[%s1406_s1 + $0xb8] sm:$0xff]   ;;  %v1276_v43 = vrot.slane %v159_v39, %v1272_v41  ;;  %v174_v44 = vcombine.high %v166_v42, %v166_v42  ;;  %v182_v45 = vrot.slane %v166_v42, %v1272_v41  ;;  %v1075_v47 = vld [vmem:[%s1406_s1 + $0x100] sm:$0xff]  }
   0xd   :  { %958 = vmatpush3.bf16.msra.mxu1 %v1051_v11  ;;  %937 = vmatprep.subr.bf16.mxu0 %v1052_v12  ;;  %v1076_v49 = vld [vmem:[%s1406_s1 + $0x180] sm:$0xff]   ;;  %v1077_v52 = vld [vmem:[%s1406_s1 + $0x148] sm:$0xff]   ;;  %v1081_v58 = vld [vmem:[%s1406_s1 + $0x150] sm:$0xff]  }
   0xe   :  { %959 = vmatprep.subr.bf16.mxu1 %v1053_v13  ;;  %v175_v46 = vcombine.high %v1276_v43, %v1276_v43  ;;  %v196_v48 = vrot.slane %v174_v44, %v1272_v41  ;;  %v204_v51 = vcombine.high %v182_v45, %v182_v45  ;;  %v1078_v54 = vld [vmem:[%s1406_s1 + $0x1c8] sm:$0xff]   ;;  %v1082_v59 = vld [vmem:[%s1406_s1 + $0x1d0] sm:$0xff]   ;;  %v1085_v62 = vld [vmem:[%s1406_s1 + $0x158] sm:$0xff]  }
   0xf   :  { %v1079_v55 = vld [vmem:[%s1406_s1 + $0x108] sm:$0xff]   ;;  %v1083_v60 = vld [vmem:[%s1406_s1 + $0x110] sm:$0xff]   ;;  %v1086_v63 = vld [vmem:[%s1406_s1 + $0x1d8] sm:$0xff]  }
  0x10   :  { %938 = vmatpush3.bf16.msra.mxu0 %v1054_v14  ;;  %v203_v50 = vrot.slane %v175_v46, %v1272_v41  ;;  %632 = vmatprep.mubr.bf16.mxu0 %v196_v48  ;;  %v206_v53 = vcombine.high %v196_v48, %v196_v48  ;;  %v1080_v57 = vld [vmem:[%s1406_s1 + $0x188] sm:$0xff]   ;;  %v1084_v61 = vld [vmem:[%s1406_s1 + $0x190] sm:$0xff]   ;;  %v1087_v0 = vld [vmem:[%s1406_s1 + $0x118] sm:$0xff]  }
  0x11   :  { %960 = vmatpush3.bf16.msra.mxu1 %v1055_v15  ;;  %939 = vmatprep.subr.bf16.mxu0 %v1056_v16  ;;  %v1088_v1 = vld [vmem:[%s1406_s1 + $0x198] sm:$0xff]   ;;  %v1089_v2 = vld [vmem:[%s1406_s1 + $0x160] sm:$0xff]   ;;  %v1093_v6 = vld [vmem:[%s1406_s1 + $0x168] sm:$0xff]  }
  0x12   :  { %961 = vmatprep.subr.bf16.mxu1 %v1057_v17  ;;  %v207_v56 = vcombine.high %v203_v50, %v203_v50  ;;  %672 = vmatprep.mubr.bf16.mxu1 %v206_v53  ;;  %v1090_v3 = vld [vmem:[%s1406_s1 + $0x1e0] sm:$0xff]   ;;  %v1094_v7 = vld [vmem:[%s1406_s1 + $0x1e8] sm:$0xff]   ;;  %v1097_v10 = vld [vmem:[%s1406_s1 + $0x170] sm:$0xff]  }
  0x13   :  { %v1091_v4 = vld [vmem:[%s1406_s1 + $0x120] sm:$0xff]   ;;  %v1095_v8 = vld [vmem:[%s1406_s1 + $0x128] sm:$0xff]   ;;  %v1098_v11 = vld [vmem:[%s1406_s1 + $0x1f0] sm:$0xff]  }
  0x14   :  { %940 = vmatpush3.bf16.msra.mxu0 %v1058_v18  ;;  %v1092_v5 = vld [vmem:[%s1406_s1 + $0x1a0] sm:$0xff]   ;;  %v1096_v9 = vld [vmem:[%s1406_s1 + $0x1a8] sm:$0xff]   ;;  %v1099_v12 = vld [vmem:[%s1406_s1 + $0x130] sm:$0xff]  }
  0x15   :  { %962 = vmatpush3.bf16.msra.mxu1 %v1059_v19  ;;  %941 = vmatprep.subr.bf16.mxu0 %v1060_v20 }
  0x16   :  { %963 = vmatprep.subr.bf16.mxu1 %v1061_v21 }
  0x18   :  { %942 = vmatpush3.bf16.msra.mxu0 %v1062_v22 }
  0x19   :  { %964 = vmatpush3.bf16.msra.mxu1 %v1063_v23  ;;  %943 = vmatprep.subr.bf16.mxu0 %v1064_v24 }
  0x1a   :  { %965 = vmatprep.subr.bf16.mxu1 %v1065_v25 }
  0x1c   :  { %944 = vmatpush3.bf16.msra.mxu0 %v1066_v26 }
  0x1d   :  { %966 = vmatpush3.bf16.msra.mxu1 %v1067_v27  ;;  %945 = vmatprep.subr.bf16.mxu0 %v1068_v29 }
  0x1e   :  { %967 = vmatprep.subr.bf16.mxu1 %v1069_v30 }
  0x20   :  { %946 = vmatpush3.bf16.msra.mxu0 %v1070_v31 }
  0x21   :  { %968 = vmatpush3.bf16.msra.mxu1 %v1071_v32  ;;  %975 = vmatprep.subr.bf16.mxu0 %v1073_v35 }
  0x22   :  { %997 = vmatprep.subr.bf16.mxu1 %v1074_v38 }
  0x23   :  { %633 = vmatmul.mubr.bf16.vlgmr.msra.gmra.mrb[0].mxu0 %v182_v45 }
  0x24   :  { %976 = vmatpush3.bf16.msra.mxu0 %v1075_v47  ;;  %673 = vmatmul.mubr.bf16.vlgmr.msra.gmra.mrb[0].mxu1 %v204_v51 }
  0x25   :  { %977 = vmatprep.subr.bf16.mxu0 %v1077_v52  ;;  %998 = vmatpush3.bf16.msra.mxu1 %v1076_v49 }
  0x26   :  { %712 = vmatprep.mubr.bf16.mxu0 %v203_v50  ;;  %999 = vmatprep.subr.bf16.mxu1 %v1078_v54 }
  0x27   :  { %752 = vmatprep.mubr.bf16.mxu1 %v207_v56 }
  0x28   :  { %978 = vmatpush3.bf16.msra.mxu0 %v1079_v55 }
  0x29   :  { %979 = vmatprep.subr.bf16.mxu0 %v1081_v58  ;;  %1000 = vmatpush3.bf16.msra.mxu1 %v1080_v57 }
  0x2a   :  { %1001 = vmatprep.subr.bf16.mxu1 %v1082_v59 }
  0x2c   :  { %980 = vmatpush3.bf16.msra.mxu0 %v1083_v60 }
  0x2d   :  { %981 = vmatprep.subr.bf16.mxu0 %v1085_v62  ;;  %1002 = vmatpush3.bf16.msra.mxu1 %v1084_v61 }
  0x2e   :  { %1003 = vmatprep.subr.bf16.mxu1 %v1086_v63 }
  0x30   :  { %982 = vmatpush3.bf16.msra.mxu0 %v1087_v0 }
  0x31   :  { %983 = vmatprep.subr.bf16.mxu0 %v1089_v2  ;;  %1004 = vmatpush3.bf16.msra.mxu1 %v1088_v1 }
  0x32   :  { %1005 = vmatprep.subr.bf16.mxu1 %v1090_v3 }
  0x34   :  { %984 = vmatpush3.bf16.msra.mxu0 %v1091_v4 }
  0x35   :  { %985 = vmatprep.subr.bf16.mxu0 %v1093_v6  ;;  %1006 = vmatpush3.bf16.msra.mxu1 %v1092_v5 }
  0x36   :  { %1007 = vmatprep.subr.bf16.mxu1 %v1094_v7 }
  0x38   :  { %986 = vmatpush3.bf16.msra.mxu0 %v1095_v8 }
  0x39   :  { %10 = vsyncpa [#allocation3], 0  ;;  %987 = vmatprep.subr.bf16.mxu0 %v1097_v10  ;;  %v1101_v13 = vld [vmem:[%s1406_s1 + $0x178] sm:$0xff]   ;;  %1008 = vmatpush3.bf16.msra.mxu1 %v1096_v9  ;;  %v1100_v14 = vld [vmem:[%s1406_s1 + $0x1b0] sm:$0xff]   ;;  %v189_v17 = vrot.slane %v1276_v43, %v1272_v41  ;;  %v1134_v21 = vmov 0.0   ;;  %vm1135_vm0 = vmmov 0  }
  0x3a   :  { %1009 = vmatprep.subr.bf16.mxu1 %v1098_v11  ;;  %v1102_v15 = vld [vmem:[%s1406_s1 + $0x1f8] sm:$0xff]   ;;  %v1105_v20 = vld [vmem:[%s1408_s3] sm:$0xff]   ;;  %v1106_v22 = vld [vmem:[%s1408_s3 + $0x8] sm:$0xff]   ;;  %vm800_vm1 = vcmask 523264   ;;  %s1136_s29 = smov [#allocation2]   ;;  %vm844_vm2 = vcmask 74752  }
  0x3b   :  { %v1103_v16 = vld [vmem:[%s1406_s1 + $0x138] sm:$0xff]   ;;  %v205_v19 = vcombine.high %v189_v17, %v189_v17  ;;  %v1107_v23 = vld [vmem:[%s1408_s3 + $0x10] sm:$0xff]   ;;  %v860_v26 = vld [vmem:[%s1407_s2] ss:$0 sm:$0xff]  ;;  %s852_s30 = sshll.u32 %s1136_s29, 4  ;;  %s853_s30 = int_to_ptr.vmem [resolvable:$true] %s852_s30 }
  0x3c   :  { %988 = vmatpush3.bf16.msra.mxu0 %v1099_v12  ;;  %v1104_v18 = vld [vmem:[%s1406_s1 + $0x1b8] sm:$0xff]   ;;  %v925_v51 = vld [vmem:[%s1409_s4] ss:$0 sm:$0xff]  ;;  %s1109_s6 = scalar_lea.vmem %s853_s30, 32  ;;  %p1114_p1 = scmp.lt.s32.totalorder %s853_s30, %s853_s30 }
  0x3d   :  { %989 = vmatprep.subr.bf16.mxu0 %v1101_v13  ;;  %1010 = vmatpush3.bf16.msra.mxu1 %v1100_v14  ;;  %v1108_v24 = vld [vmem:[%s1408_s3 + $0x18] sm:$0xff]   ;;  %p1110_p0 = scmp.ne.s32.totalorder %s853_s30, %s1109_s6  ;;  %p1115_p2 = scmp.lt.s32.totalorder %s1109_s6, %s1109_s6 }
  0x3e   :  { %1011 = vmatprep.subr.bf16.mxu1 %v1102_v15 }
  0x3f   :  { %p1116_p3 = por %p1115_p2, %p1114_p1 }
  0x40   :  { %990 = vmatpush3.bf16.msra.mxu0 %v1103_v16 }
  0x41   :  { %1012 = vmatpush3.bf16.msra.mxu1 %v1104_v18  ;;  %1024 = vmatprep.subr.bf16.mxu0 %v1134_v21  ;;  %p1117_p4 = pnand %p1116_p3, %p1110_p0 }
  0x43   :  { %713 = vmatmul.mubr.bf16.vlgmr.msra.gmra.mrb[4].mxu0 %v189_v17 }
  0x44   :  { %753 = vmatmul.mubr.bf16.vlgmr.msra.gmra.mrb[4].mxu1 %v205_v19  ;;  %1025 = vmatpush3.bf16.msra.mxu0 %v1105_v20 }
  0x45   :  { %1026 = vmatprep.subr.bf16.mxu0 %v1134_v21  ;;  %1032 = vmatprep.mubr.msk.bf16.mxu0 %vm1135_vm0, %v1134_v21 }
  0x48   :  { %1027 = vmatpush3.bf16.msra.mxu0 %v1106_v22 }
  0x49   :  { %1028 = vmatprep.subr.bf16.mxu0 %v1134_v21 }
  0x4c   :  { %1029 = vmatpush3.bf16.msra.mxu0 %v1107_v23 }
  0x4d   :  { %1030 = vmatprep.subr.bf16.mxu0 %v1134_v21 }
  0x50   :  { %1031 = vmatpush3.bf16.msra.mxu0 %v1108_v24 }
  0xf6   :  { %v947_v25 = vpop.f32.mrb[0].mxu0 }
  0xf7   :  { %v948_v27 = vpop.f32.mrb[1].mxu0  ;;  %v969_v28 = vpop.f32.mrb[0].mxu1 }
  0xf8   :  { %v949_v29 = vadd.f32 %v948_v27, %v947_v25  ;;  %v950_v30 = vpop.f32.mrb[2].mxu0  ;;  %v970_v31 = vpop.f32.mrb[1].mxu1 }
  0xf9   :  { %v951_v32 = vpop.f32.mrb[3].mxu0  ;;  %v971_v34 = vadd.f32 %v970_v31, %v969_v28  ;;  %v972_v35 = vpop.f32.mrb[2].mxu1 }
  0xfa   :  { %v635_v33 = vadd.f32 %v949_v29, %v860_v26  ;;  %v973_v36 = vpop.f32.mrb[3].mxu1 }
  0xfc   :  { %v675_v37 = vadd.f32 %v971_v34, %v635_v33 }
 0x116   :  { %v991_v38 = vpop.f32.mrb[4].mxu0 }
 0x117   :  { %v992_v39 = vpop.f32.mrb[5].mxu0  ;;  %v1013_v40 = vpop.f32.mrb[4].mxu1 }
 0x118   :  { %v993_v41 = vadd.f32 %v992_v39, %v991_v38  ;;  %v994_v42 = vpop.f32.mrb[6].mxu0  ;;  %v1014_v43 = vpop.f32.mrb[5].mxu1 }
 0x119   :  { %v995_v44 = vpop.f32.mrb[7].mxu0  ;;  %v1015_v46 = vadd.f32 %v1014_v43, %v1013_v40  ;;  %v1016_v47 = vpop.f32.mrb[6].mxu1 }
 0x11a   :  { %v715_v45 = vadd.f32 %v993_v41, %v675_v37  ;;  %v1017_v48 = vpop.f32.mrb[7].mxu1 }
 0x11c   :  { %v755_v49 = vadd.f32 %v1015_v46, %v715_v45 }
 0x11e   :  { %v760_v50 = vpack.c.bf16 %v755_v49, %v755_v49 }
 0x120   :  { %1033 = vmatmul.mubr.msk.bf16.vlgmr.msra.gmra.mrb[8].mxu0 %vm800_vm1, %v760_v50 }
 0x1f3   :  { %v838_v52 = vpop.f32.mrb[8].mxu0 }
 0x1f4   :  { %v839_v53 = vadd.f32 %v925_v51, %v838_v52  ;;  %v1034_v54 = vpop.f32.mrb[9].mxu0 }
 0x1f5   :  { %v841_v55 = vpop.f32.mrb[10].mxu0 }
 0x1f6   :  { %v1035_v56 = vpop.f32.mrb[11].mxu0  ;;  %845 = vst.msk [vmem:[#allocation2] sm:$0x3] %vm844_vm2, %v839_v53 }
 0x1f7   :  { %1120 = shalt.err (!%p1117_p4)
}
 0x1f8   :  { %s1121_s4 = scalar_lea.hbm %s1410_s5, 32 }
 0x1f9   :  { %p1122_p5 = scmp.ne.s32.totalorder %s1410_s5, %s1121_s4  ;;  %p1125_p6 = scmp.lt.u32.totalorder %s1121_s4, %s1410_s5 }
 0x1fb   :  { %p1127_p7 = pnand %p1125_p6, %p1122_p5 }
 0x1fd   :  { %1130 = shalt.err (!%p1127_p7)
}
 0x1fe   :  { %855 = dma.vmem_to_hbm [thread:$0]  %s853_s30, 32, %s1410_s5, [#allocation3]  }
 0x1ff   :  { %1131 = dma.done.wait [#allocation3], 32  }
 0x200   :  { %1132 = vsyncadd [#allocation3], 4294967264 }
 0x201   :  { %859 = vsyncpa [#allocation3], 1 }

</bundles_post_ra>
